<compile_context>
chip_gen: v7x
topology: tpu7x:2x2x1
jax: 0.10.0
libtpu: 0.0.40
codegen_flags: <defaults>
</compile_context>

<pallas_src>
import jax
import jax.numpy as jnp
from jax.experimental import pallas as pl
from jax.experimental.pallas import tpu as pltpu

N_CLASSES = 3
DEPTH = 4                     # rqcnn output channels ("depth")
KSIZE = 2                     # rqcnn kernel size
POOL = 2                      # MaxPool2d(2)
H_IN = W_IN = 28
H_CONV = W_CONV = H_IN - KSIZE + 1          # 27
H_POOL = W_POOL = H_CONV // POOL            # 13
S = H_POOL * W_POOL                         # 169
S_PAD = 176                                 # 169 rounded up to a multiple of 8
NPLANE = POOL + KSIZE - 1                   # 3 shifts per axis -> 9 planes
HIDDEN = 64


def _round_up(x, m):
    return (x + m - 1) // m * m


def _hybrid_rqcnn_kernel(wc_ref, x9_ref, w1_ref, b1_ref, w2_ref, b2_ref,
                         out_ref, pooled_ref):
    """Quanvolution(2x2, depth 4) + MaxPool(2) + fc1 + ReLU + fc2 + Sigmoid.

    Batch-on-lanes layout (NT = batch tile, multiple of 128):
      wc_ref    : (4 out-ch, 4 patch elems)   SMEM f32
      x9_ref    : (9 planes, 169, NT)         VMEM  (9 unique 2-strided shifts)
      w1_ref    : (64, 4*176)                 VMEM f32 (permuted + padded fc1 w)
      b1_ref    : (64, 1)                     VMEM f32 (fc1 bias + folded conv bias)
      w2_ref    : (3, 64)                     VMEM f32
      b2_ref    : (3, 1)                      VMEM f32
      out_ref   : (3, NT)                     VMEM f32 (lane-dense store)
      pooled_ref: (4*176, NT)                 VMEM f32 scratch
    """
    # Zero the scratch so the 7 pad rows per channel are 0 (they multiply zero
    # fc1 columns, but must not be stale NaN/Inf VMEM garbage).
    pooled_ref[...] = jnp.zeros_like(pooled_ref)

    for c in range(DEPTH):
        pooled_c = None
        for a in range(POOL):                      # pooling-window corner (a, b)
            for b in range(POOL):
                conv = None
                for dh in range(KSIZE):            # conv patch element (dh, dw)
                    for dw in range(KSIZE):
                        plane = (a + dh) * NPLANE + (b + dw)
                        p = dh * KSIZE + dw
                        term = wc_ref[c, p] * x9_ref[plane].astype(jnp.float32)
                        conv = term if conv is None else conv + term
                pooled_c = conv if pooled_c is None else jnp.maximum(pooled_c, conv)
        pooled_ref[pl.ds(c * S_PAD, S), :] = pooled_c       # sublane-aligned offset

    # fc1 as a single fused K=704 MXU pass, then ReLU.
    h = jnp.dot(w1_ref[...], pooled_ref[...], preferred_element_type=jnp.float32)
    h = jnp.maximum(h + b1_ref[...], 0.0)
    # fc2 + Sigmoid (exp overflow for very negative logits yields 0.0, the
    # correct sigmoid limit).
    logits = jnp.dot(w2_ref[...], h, preferred_element_type=jnp.float32) + b2_ref[...]
    out_ref[...] = 1.0 / (1.0 + jnp.exp(-logits))


def hybrid_rqcnn_forward(x, params, *, x_dtype=jnp.float32):
    """x: (N, 1, 28, 28) float32, NCHW. Returns (N, 3) sigmoid outputs.

    x_dtype=jnp.bfloat16 halves the dominant HBM stream on v6e/v7x (values are
    upcast to f32 in-kernel before any arithmetic); default f32 for exactness.
    """
    n = x.shape[0]
    nt = min(256, _round_up(max(n, 1), 128))          # batch tile (lane axis)
    n_pad = _round_up(max(n, 1), nt)

    xs = x[:, 0].astype(jnp.float32)                  # (N, 28, 28)
    if n_pad != n:
        xs = jnp.pad(xs, ((0, n_pad - n), (0, 0), (0, 0)))

    # Glue (pure indexing): the 9 unique shifted planes.  For pooled output
    # position (p, q), pooling corner (a, b) and conv element (dh, dw):
    #   x[n, 0, 2p + a + dh, 2q + b + dw] == x9[(a+dh)*3 + (b+dw), p*13 + q, n]
    planes = []
    for u in range(NPLANE):
        for v in range(NPLANE):
            sl = xs[:, u: u + 2 * H_POOL: 2, v: v + 2 * W_POOL: 2]   # (Np,13,13)
            planes.append(sl.reshape(n_pad, S).T)                    # (169, Np)
    x9 = jnp.stack(planes, axis=0).astype(x_dtype)                   # (9,169,Np)

    # Parameter re-layout (glue only).
    wc = params["wc"].reshape(DEPTH, KSIZE * KSIZE).astype(jnp.float32)   # (4,4)
    w1r = params["w1"].reshape(HIDDEN, DEPTH, S).astype(jnp.float32)      # (64,4,169)
    # Conv bias folded into fc1 bias: max-pool is monotone and the bias is
    # identical over the 4 pooling corners, so
    #   fc1(pool(conv) + bc) == fc1(pool(conv_nobias)) + w1 . broadcast(bc).
    b1f = params["b1"].astype(jnp.float32) + jnp.einsum(
        "c,hcs->h", params["bc"].astype(jnp.float32), w1r)
    b1f = b1f.reshape(HIDDEN, 1)
    # fc1 weight in flatten order c*169+s, each channel block padded 169->176.
    w1p = jnp.pad(w1r, ((0, 0), (0, 0), (0, S_PAD - S))).reshape(
        HIDDEN, DEPTH * S_PAD)
    w2 = params["w2"].astype(jnp.float32)                                 # (3,64)
    b2 = params["b2"].reshape(N_CLASSES, 1).astype(jnp.float32)

    out = pl.pallas_call(
        _hybrid_rqcnn_kernel,
        out_shape=jax.ShapeDtypeStruct((N_CLASSES, n_pad), jnp.float32),
        grid=(n_pad // nt,),
        in_specs=[
            # small scalar conv weights: whole array, SMEM resident
            pl.BlockSpec(memory_space=pltpu.MemorySpace.SMEM),            # wc
            # batch-tiled input planes (double-buffered HBM->VMEM pipeline)
            pl.BlockSpec((NPLANE * NPLANE, S, nt), lambda i: (0, 0, i)),  # x9
            # VMEM-resident weights: constant index maps -> no re-DMA per step
            pl.BlockSpec((HIDDEN, DEPTH * S_PAD), lambda i: (0, 0)),      # w1p
            pl.BlockSpec((HIDDEN, 1), lambda i: (0, 0)),                  # b1f
            pl.BlockSpec((N_CLASSES, HIDDEN), lambda i: (0, 0)),          # w2
            pl.BlockSpec((N_CLASSES, 1), lambda i: (0, 0)),               # b2
        ],
        out_specs=pl.BlockSpec((N_CLASSES, nt), lambda i: (0, i)),
        scratch_shapes=[pltpu.VMEM((DEPTH * S_PAD, nt), jnp.float32)],
        compiler_params=pltpu.CompilerParams(
            dimension_semantics=("parallel",)),
    )(wc, x9, w1p, b1f, w2, b2)

    return out[:, :n].T                                                   # (N, 3)


def reference_forward(x, params):
    """Pure-JAX reference matching the PyTorch forward (with the conv substitute)."""
    conv = jax.lax.conv_general_dilated(
        x, params["wc"], window_strides=(1, 1), padding="VALID",
        dimension_numbers=("NCHW", "OIHW", "NCHW"))
    conv = conv + params["bc"].reshape(1, DEPTH, 1, 1)               # (N,4,27,27)
    pooled = jax.lax.reduce_window(
        conv, -jnp.inf, jax.lax.max,
        window_dimensions=(1, 1, POOL, POOL),
        window_strides=(1, 1, POOL, POOL), padding="VALID")          # (N,4,13,13)
    flat = pooled.reshape(x.shape[0], DEPTH * S)                     # view(-1, 676)
    h = jnp.maximum(flat @ params["w1"].T + params["b1"], 0.0)
    logits = h @ params["w2"].T + params["b2"]
    return jax.nn.sigmoid(logits)


if __name__ == "__main__":
    key = jax.random.PRNGKey(0)
    kx, kwc, kbc, kw1, kb1, kw2, kb2 = jax.random.split(key, 7)

    def uinit(k, shape, fan_in):
        bound = 1.0 / (fan_in ** 0.5)
        return jax.random.uniform(k, shape, jnp.float32, -bound, bound)

    # Deterministic synthetic parameters (shapes dictated by the module).
    params = {
        "wc": uinit(kwc, (DEPTH, 1, KSIZE, KSIZE), KSIZE * KSIZE),   # rqcnn substitute
        "bc": uinit(kbc, (DEPTH,), KSIZE * KSIZE),
        "w1": uinit(kw1, (HIDDEN, DEPTH * S), DEPTH * S),            # fc1: 676 -> 64
        "b1": uinit(kb1, (HIDDEN,), DEPTH * S),
        "w2": uinit(kw2, (N_CLASSES, HIDDEN), HIDDEN),               # fc2: 64 -> 3
        "b2": uinit(kb2, (N_CLASSES,), HIDDEN),
    }

    x = jax.random.normal(kx, (2, 1, 28, 28), dtype=jnp.float32)     # NCHW

    out = jax.jit(hybrid_rqcnn_forward)(x, params)
    out = jax.block_until_ready(out)

    ref = reference_forward(x, params)
    assert out.shape == (2, N_CLASSES), out.shape
    assert jnp.allclose(out, ref, atol=2e-3, rtol=2e-3), (out, ref)
    print("KERNEL_OK")
</pallas_src>

<mosaic_0001>
module attributes {stable_mosaic.version = 11 : i64} {
  func.func @_hybrid_rqcnn_kernel(%arg0: i32, %arg1: memref<4x4xf32, #tpu.memory_space<smem>>, %arg2: memref<9x169x128xf32, #tpu.memory_space<vmem>>, %arg3: memref<64x704xf32, #tpu.memory_space<vmem>>, %arg4: memref<64x1xf32, #tpu.memory_space<vmem>>, %arg5: memref<3x64xf32, #tpu.memory_space<vmem>>, %arg6: memref<3x1xf32, #tpu.memory_space<vmem>>, %arg7: memref<3x128xf32, #tpu.memory_space<vmem>>, %arg8: memref<704x128xf32, #tpu.memory_space<vmem>>) attributes {dimension_semantics = [#tpu.dimension_semantics<parallel>], iteration_bounds = array<i64: 1>, scalar_prefetch = 0 : i64, scratch_operands = 1 : i64, tpu.core_type = #tpu.core_type<tc>, window_params = [{transform_indices = @transform_0, window_bounds = array<i64: 4, 4>}, {transform_indices = @transform_1, window_bounds = array<i64: 9, 169, 128>}, {pipeline_mode = #tpu.pipeline_mode<synchronous>, transform_indices = @transform_2, window_bounds = array<i64: 64, 704>}, {pipeline_mode = #tpu.pipeline_mode<synchronous>, transform_indices = @transform_3, window_bounds = array<i64: 64, 1>}, {pipeline_mode = #tpu.pipeline_mode<synchronous>, transform_indices = @transform_4, window_bounds = array<i64: 3, 64>}, {pipeline_mode = #tpu.pipeline_mode<synchronous>, transform_indices = @transform_5, window_bounds = array<i64: 3, 1>}, {transform_indices = @transform_6, window_bounds = array<i64: 3, 128>}]} {
    %cst = arith.constant 0.000000e+00 : f32
    %0 = vector.broadcast %cst : f32 to vector<704x128xf32>
    %c0 = arith.constant 0 : index
    %c0_0 = arith.constant 0 : index
    %1 = vector.load %arg8[%c0, %c0_0] : memref<704x128xf32, #tpu.memory_space<vmem>>, vector<704x128xf32>
    tpu.vector_store %arg8[%c0, %c0_0], %0 {strides = array<i32>} : memref<704x128xf32, #tpu.memory_space<vmem>>, vector<704x128xf32>,
    %c0_1 = arith.constant 0 : index
    %c0_2 = arith.constant 0 : index
    %2 = memref.load %arg1[%c0_1, %c0_2] : memref<4x4xf32, #tpu.memory_space<smem>>
    %c0_3 = arith.constant 0 : index
    %c0_4 = arith.constant 0 : index
    %c0_5 = arith.constant 0 : index
    %3 = vector.load %arg2[%c0_3, %c0_4, %c0_5] : memref<9x169x128xf32, #tpu.memory_space<vmem>>, vector<1x169x128xf32>
    %4 = vector.shape_cast %3 : vector<1x169x128xf32> to vector<169x128xf32>
    %5 = vector.broadcast %2 : f32 to vector<169x128xf32>
    %6 = arith.mulf %5, %4 : vector<169x128xf32>
    %c0_6 = arith.constant 0 : index
    %c1 = arith.constant 1 : index
    %7 = memref.load %arg1[%c0_6, %c1] : memref<4x4xf32, #tpu.memory_space<smem>>
    %c1_7 = arith.constant 1 : index
    %c0_8 = arith.constant 0 : index
    %c0_9 = arith.constant 0 : index
    %8 = vector.load %arg2[%c1_7, %c0_8, %c0_9] : memref<9x169x128xf32, #tpu.memory_space<vmem>>, vector<1x169x128xf32>
    %9 = vector.shape_cast %8 : vector<1x169x128xf32> to vector<169x128xf32>
    %10 = vector.broadcast %7 : f32 to vector<169x128xf32>
    %11 = arith.mulf %10, %9 : vector<169x128xf32>
    %12 = arith.addf %6, %11 : vector<169x128xf32>
    %c0_10 = arith.constant 0 : index
    %c2 = arith.constant 2 : index
    %13 = memref.load %arg1[%c0_10, %c2] : memref<4x4xf32, #tpu.memory_space<smem>>
    %c3 = arith.constant 3 : index
    %c0_11 = arith.constant 0 : index
    %c0_12 = arith.constant 0 : index
    %14 = vector.load %arg2[%c3, %c0_11, %c0_12] : memref<9x169x128xf32, #tpu.memory_space<vmem>>, vector<1x169x128xf32>
    %15 = vector.shape_cast %14 : vector<1x169x128xf32> to vector<169x128xf32>
    %16 = vector.broadcast %13 : f32 to vector<169x128xf32>
    %17 = arith.mulf %16, %15 : vector<169x128xf32>
    %18 = arith.addf %12, %17 : vector<169x128xf32>
    %c0_13 = arith.constant 0 : index
    %c3_14 = arith.constant 3 : index
    %19 = memref.load %arg1[%c0_13, %c3_14] : memref<4x4xf32, #tpu.memory_space<smem>>
    %c4 = arith.constant 4 : index
    %c0_15 = arith.constant 0 : index
    %c0_16 = arith.constant 0 : index
    %20 = vector.load %arg2[%c4, %c0_15, %c0_16] : memref<9x169x128xf32, #tpu.memory_space<vmem>>, vector<1x169x128xf32>
    %21 = vector.shape_cast %20 : vector<1x169x128xf32> to vector<169x128xf32>
    %22 = vector.broadcast %19 : f32 to vector<169x128xf32>
    %23 = arith.mulf %22, %21 : vector<169x128xf32>
    %24 = arith.addf %18, %23 : vector<169x128xf32>
    %c0_17 = arith.constant 0 : index
    %c0_18 = arith.constant 0 : index
    %25 = memref.load %arg1[%c0_17, %c0_18] : memref<4x4xf32, #tpu.memory_space<smem>>
    %c1_19 = arith.constant 1 : index
    %c0_20 = arith.constant 0 : index
    %c0_21 = arith.constant 0 : index
    %26 = vector.load %arg2[%c1_19, %c0_20, %c0_21] : memref<9x169x128xf32, #tpu.memory_space<vmem>>, vector<1x169x128xf32>
    %27 = vector.shape_cast %26 : vector<1x169x128xf32> to vector<169x128xf32>
    %28 = vector.broadcast %25 : f32 to vector<169x128xf32>
    %29 = arith.mulf %28, %27 : vector<169x128xf32>
    %c0_22 = arith.constant 0 : index
    %c1_23 = arith.constant 1 : index
    %30 = memref.load %arg1[%c0_22, %c1_23] : memref<4x4xf32, #tpu.memory_space<smem>>
    %c2_24 = arith.constant 2 : index
    %c0_25 = arith.constant 0 : index
    %c0_26 = arith.constant 0 : index
    %31 = vector.load %arg2[%c2_24, %c0_25, %c0_26] : memref<9x169x128xf32, #tpu.memory_space<vmem>>, vector<1x169x128xf32>
    %32 = vector.shape_cast %31 : vector<1x169x128xf32> to vector<169x128xf32>
    %33 = vector.broadcast %30 : f32 to vector<169x128xf32>
    %34 = arith.mulf %33, %32 : vector<169x128xf32>
    %35 = arith.addf %29, %34 : vector<169x128xf32>
    %c0_27 = arith.constant 0 : index
    %c2_28 = arith.constant 2 : index
    %36 = memref.load %arg1[%c0_27, %c2_28] : memref<4x4xf32, #tpu.memory_space<smem>>
    %c4_29 = arith.constant 4 : index
    %c0_30 = arith.constant 0 : index
    %c0_31 = arith.constant 0 : index
    %37 = vector.load %arg2[%c4_29, %c0_30, %c0_31] : memref<9x169x128xf32, #tpu.memory_space<vmem>>, vector<1x169x128xf32>
    %38 = vector.shape_cast %37 : vector<1x169x128xf32> to vector<169x128xf32>
    %39 = vector.broadcast %36 : f32 to vector<169x128xf32>
    %40 = arith.mulf %39, %38 : vector<169x128xf32>
    %41 = arith.addf %35, %40 : vector<169x128xf32>
    %c0_32 = arith.constant 0 : index
    %c3_33 = arith.constant 3 : index
    %42 = memref.load %arg1[%c0_32, %c3_33] : memref<4x4xf32, #tpu.memory_space<smem>>
    %c5 = arith.constant 5 : index
    %c0_34 = arith.constant 0 : index
    %c0_35 = arith.constant 0 : index
    %43 = vector.load %arg2[%c5, %c0_34, %c0_35] : memref<9x169x128xf32, #tpu.memory_space<vmem>>, vector<1x169x128xf32>
    %44 = vector.shape_cast %43 : vector<1x169x128xf32> to vector<169x128xf32>
    %45 = vector.broadcast %42 : f32 to vector<169x128xf32>
    %46 = arith.mulf %45, %44 : vector<169x128xf32>
    %47 = arith.addf %41, %46 : vector<169x128xf32>
    %48 = arith.maximumf %24, %47 : vector<169x128xf32>
    %c0_36 = arith.constant 0 : index
    %c0_37 = arith.constant 0 : index
    %49 = memref.load %arg1[%c0_36, %c0_37] : memref<4x4xf32, #tpu.memory_space<smem>>
    %c3_38 = arith.constant 3 : index
    %c0_39 = arith.constant 0 : index
    %c0_40 = arith.constant 0 : index
    %50 = vector.load %arg2[%c3_38, %c0_39, %c0_40] : memref<9x169x128xf32, #tpu.memory_space<vmem>>, vector<1x169x128xf32>
    %51 = vector.shape_cast %50 : vector<1x169x128xf32> to vector<169x128xf32>
    %52 = vector.broadcast %49 : f32 to vector<169x128xf32>
    %53 = arith.mulf %52, %51 : vector<169x128xf32>
    %c0_41 = arith.constant 0 : index
    %c1_42 = arith.constant 1 : index
    %54 = memref.load %arg1[%c0_41, %c1_42] : memref<4x4xf32, #tpu.memory_space<smem>>
    %c4_43 = arith.constant 4 : index
    %c0_44 = arith.constant 0 : index
    %c0_45 = arith.constant 0 : index
    %55 = vector.load %arg2[%c4_43, %c0_44, %c0_45] : memref<9x169x128xf32, #tpu.memory_space<vmem>>, vector<1x169x128xf32>
    %56 = vector.shape_cast %55 : vector<1x169x128xf32> to vector<169x128xf32>
    %57 = vector.broadcast %54 : f32 to vector<169x128xf32>
    %58 = arith.mulf %57, %56 : vector<169x128xf32>
    %59 = arith.addf %53, %58 : vector<169x128xf32>
    %c0_46 = arith.constant 0 : index
    %c2_47 = arith.constant 2 : index
    %60 = memref.load %arg1[%c0_46, %c2_47] : memref<4x4xf32, #tpu.memory_space<smem>>
    %c6 = arith.constant 6 : index
    %c0_48 = arith.constant 0 : index
    %c0_49 = arith.constant 0 : index
    %61 = vector.load %arg2[%c6, %c0_48, %c0_49] : memref<9x169x128xf32, #tpu.memory_space<vmem>>, vector<1x169x128xf32>
    %62 = vector.shape_cast %61 : vector<1x169x128xf32> to vector<169x128xf32>
    %63 = vector.broadcast %60 : f32 to vector<169x128xf32>
    %64 = arith.mulf %63, %62 : vector<169x128xf32>
    %65 = arith.addf %59, %64 : vector<169x128xf32>
    %c0_50 = arith.constant 0 : index
    %c3_51 = arith.constant 3 : index
    %66 = memref.load %arg1[%c0_50, %c3_51] : memref<4x4xf32, #tpu.memory_space<smem>>
    %c7 = arith.constant 7 : index
    %c0_52 = arith.constant 0 : index
    %c0_53 = arith.constant 0 : index
    %67 = vector.load %arg2[%c7, %c0_52, %c0_53] : memref<9x169x128xf32, #tpu.memory_space<vmem>>, vector<1x169x128xf32>
    %68 = vector.shape_cast %67 : vector<1x169x128xf32> to vector<169x128xf32>
    %69 = vector.broadcast %66 : f32 to vector<169x128xf32>
    %70 = arith.mulf %69, %68 : vector<169x128xf32>
    %71 = arith.addf %65, %70 : vector<169x128xf32>
    %72 = arith.maximumf %48, %71 : vector<169x128xf32>
    %c0_54 = arith.constant 0 : index
    %c0_55 = arith.constant 0 : index
    %73 = memref.load %arg1[%c0_54, %c0_55] : memref<4x4xf32, #tpu.memory_space<smem>>
    %c4_56 = arith.constant 4 : index
    %c0_57 = arith.constant 0 : index
    %c0_58 = arith.constant 0 : index
    %74 = vector.load %arg2[%c4_56, %c0_57, %c0_58] : memref<9x169x128xf32, #tpu.memory_space<vmem>>, vector<1x169x128xf32>
    %75 = vector.shape_cast %74 : vector<1x169x128xf32> to vector<169x128xf32>
    %76 = vector.broadcast %73 : f32 to vector<169x128xf32>
    %77 = arith.mulf %76, %75 : vector<169x128xf32>
    %c0_59 = arith.constant 0 : index
    %c1_60 = arith.constant 1 : index
    %78 = memref.load %arg1[%c0_59, %c1_60] : memref<4x4xf32, #tpu.memory_space<smem>>
    %c5_61 = arith.constant 5 : index
    %c0_62 = arith.constant 0 : index
    %c0_63 = arith.constant 0 : index
    %79 = vector.load %arg2[%c5_61, %c0_62, %c0_63] : memref<9x169x128xf32, #tpu.memory_space<vmem>>, vector<1x169x128xf32>
    %80 = vector.shape_cast %79 : vector<1x169x128xf32> to vector<169x128xf32>
    %81 = vector.broadcast %78 : f32 to vector<169x128xf32>
    %82 = arith.mulf %81, %80 : vector<169x128xf32>
    %83 = arith.addf %77, %82 : vector<169x128xf32>
    %c0_64 = arith.constant 0 : index
    %c2_65 = arith.constant 2 : index
    %84 = memref.load %arg1[%c0_64, %c2_65] : memref<4x4xf32, #tpu.memory_space<smem>>
    %c7_66 = arith.constant 7 : index
    %c0_67 = arith.constant 0 : index
    %c0_68 = arith.constant 0 : index
    %85 = vector.load %arg2[%c7_66, %c0_67, %c0_68] : memref<9x169x128xf32, #tpu.memory_space<vmem>>, vector<1x169x128xf32>
    %86 = vector.shape_cast %85 : vector<1x169x128xf32> to vector<169x128xf32>
    %87 = vector.broadcast %84 : f32 to vector<169x128xf32>
    %88 = arith.mulf %87, %86 : vector<169x128xf32>
    %89 = arith.addf %83, %88 : vector<169x128xf32>
    %c0_69 = arith.constant 0 : index
    %c3_70 = arith.constant 3 : index
    %90 = memref.load %arg1[%c0_69, %c3_70] : memref<4x4xf32, #tpu.memory_space<smem>>
    %c8 = arith.constant 8 : index
    %c0_71 = arith.constant 0 : index
    %c0_72 = arith.constant 0 : index
    %91 = vector.load %arg2[%c8, %c0_71, %c0_72] : memref<9x169x128xf32, #tpu.memory_space<vmem>>, vector<1x169x128xf32>
    %92 = vector.shape_cast %91 : vector<1x169x128xf32> to vector<169x128xf32>
    %93 = vector.broadcast %90 : f32 to vector<169x128xf32>
    %94 = arith.mulf %93, %92 : vector<169x128xf32>
    %95 = arith.addf %89, %94 : vector<169x128xf32>
    %96 = arith.maximumf %72, %95 : vector<169x128xf32>
    %c0_73 = arith.constant 0 : index
    %c0_74 = arith.constant 0 : index
    %97 = vector.load %arg8[%c0_73, %c0_74] : memref<704x128xf32, #tpu.memory_space<vmem>>, vector<169x128xf32>
    tpu.vector_store %arg8[%c0_73, %c0_74], %96 {strides = array<i32>} : memref<704x128xf32, #tpu.memory_space<vmem>>, vector<169x128xf32>,
    %c1_75 = arith.constant 1 : index
    %c0_76 = arith.constant 0 : index
    %98 = memref.load %arg1[%c1_75, %c0_76] : memref<4x4xf32, #tpu.memory_space<smem>>
    %c0_77 = arith.constant 0 : index
    %c0_78 = arith.constant 0 : index
    %c0_79 = arith.constant 0 : index
    %99 = vector.load %arg2[%c0_77, %c0_78, %c0_79] : memref<9x169x128xf32, #tpu.memory_space<vmem>>, vector<1x169x128xf32>
    %100 = vector.shape_cast %99 : vector<1x169x128xf32> to vector<169x128xf32>
    %101 = vector.broadcast %98 : f32 to vector<169x128xf32>
    %102 = arith.mulf %101, %100 : vector<169x128xf32>
    %c1_80 = arith.constant 1 : index
    %c1_81 = arith.constant 1 : index
    %103 = memref.load %arg1[%c1_80, %c1_81] : memref<4x4xf32, #tpu.memory_space<smem>>
    %c1_82 = arith.constant 1 : index
    %c0_83 = arith.constant 0 : index
    %c0_84 = arith.constant 0 : index
    %104 = vector.load %arg2[%c1_82, %c0_83, %c0_84] : memref<9x169x128xf32, #tpu.memory_space<vmem>>, vector<1x169x128xf32>
    %105 = vector.shape_cast %104 : vector<1x169x128xf32> to vector<169x128xf32>
    %106 = vector.broadcast %103 : f32 to vector<169x128xf32>
    %107 = arith.mulf %106, %105 : vector<169x128xf32>
    %108 = arith.addf %102, %107 : vector<169x128xf32>
    %c1_85 = arith.constant 1 : index
    %c2_86 = arith.constant 2 : index
    %109 = memref.load %arg1[%c1_85, %c2_86] : memref<4x4xf32, #tpu.memory_space<smem>>
    %c3_87 = arith.constant 3 : index
    %c0_88 = arith.constant 0 : index
    %c0_89 = arith.constant 0 : index
    %110 = vector.load %arg2[%c3_87, %c0_88, %c0_89] : memref<9x169x128xf32, #tpu.memory_space<vmem>>, vector<1x169x128xf32>
    %111 = vector.shape_cast %110 : vector<1x169x128xf32> to vector<169x128xf32>
    %112 = vector.broadcast %109 : f32 to vector<169x128xf32>
    %113 = arith.mulf %112, %111 : vector<169x128xf32>
    %114 = arith.addf %108, %113 : vector<169x128xf32>
    %c1_90 = arith.constant 1 : index
    %c3_91 = arith.constant 3 : index
    %115 = memref.load %arg1[%c1_90, %c3_91] : memref<4x4xf32, #tpu.memory_space<smem>>
    %c4_92 = arith.constant 4 : index
    %c0_93 = arith.constant 0 : index
    %c0_94 = arith.constant 0 : index
    %116 = vector.load %arg2[%c4_92, %c0_93, %c0_94] : memref<9x169x128xf32, #tpu.memory_space<vmem>>, vector<1x169x128xf32>
    %117 = vector.shape_cast %116 : vector<1x169x128xf32> to vector<169x128xf32>
    %118 = vector.broadcast %115 : f32 to vector<169x128xf32>
    %119 = arith.mulf %118, %117 : vector<169x128xf32>
    %120 = arith.addf %114, %119 : vector<169x128xf32>
    %c1_95 = arith.constant 1 : index
    %c0_96 = arith.constant 0 : index
    %121 = memref.load %arg1[%c1_95, %c0_96] : memref<4x4xf32, #tpu.memory_space<smem>>
    %c1_97 = arith.constant 1 : index
    %c0_98 = arith.constant 0 : index
    %c0_99 = arith.constant 0 : index
    %122 = vector.load %arg2[%c1_97, %c0_98, %c0_99] : memref<9x169x128xf32, #tpu.memory_space<vmem>>, vector<1x169x128xf32>
    %123 = vector.shape_cast %122 : vector<1x169x128xf32> to vector<169x128xf32>
    %124 = vector.broadcast %121 : f32 to vector<169x128xf32>
    %125 = arith.mulf %124, %123 : vector<169x128xf32>
    %c1_100 = arith.constant 1 : index
    %c1_101 = arith.constant 1 : index
    %126 = memref.load %arg1[%c1_100, %c1_101] : memref<4x4xf32, #tpu.memory_space<smem>>
    %c2_102 = arith.constant 2 : index
    %c0_103 = arith.constant 0 : index
    %c0_104 = arith.constant 0 : index
    %127 = vector.load %arg2[%c2_102, %c0_103, %c0_104] : memref<9x169x128xf32, #tpu.memory_space<vmem>>, vector<1x169x128xf32>
    %128 = vector.shape_cast %127 : vector<1x169x128xf32> to vector<169x128xf32>
    %129 = vector.broadcast %126 : f32 to vector<169x128xf32>
    %130 = arith.mulf %129, %128 : vector<169x128xf32>
    %131 = arith.addf %125, %130 : vector<169x128xf32>
    %c1_105 = arith.constant 1 : index
    %c2_106 = arith.constant 2 : index
    %132 = memref.load %arg1[%c1_105, %c2_106] : memref<4x4xf32, #tpu.memory_space<smem>>
    %c4_107 = arith.constant 4 : index
    %c0_108 = arith.constant 0 : index
    %c0_109 = arith.constant 0 : index
    %133 = vector.load %arg2[%c4_107, %c0_108, %c0_109] : memref<9x169x128xf32, #tpu.memory_space<vmem>>, vector<1x169x128xf32>
    %134 = vector.shape_cast %133 : vector<1x169x128xf32> to vector<169x128xf32>
    %135 = vector.broadcast %132 : f32 to vector<169x128xf32>
    %136 = arith.mulf %135, %134 : vector<169x128xf32>
    %137 = arith.addf %131, %136 : vector<169x128xf32>
    %c1_110 = arith.constant 1 : index
    %c3_111 = arith.constant 3 : index
    %138 = memref.load %arg1[%c1_110, %c3_111] : memref<4x4xf32, #tpu.memory_space<smem>>
    %c5_112 = arith.constant 5 : index
    %c0_113 = arith.constant 0 : index
    %c0_114 = arith.constant 0 : index
    %139 = vector.load %arg2[%c5_112, %c0_113, %c0_114] : memref<9x169x128xf32, #tpu.memory_space<vmem>>, vector<1x169x128xf32>
    %140 = vector.shape_cast %139 : vector<1x169x128xf32> to vector<169x128xf32>
    %141 = vector.broadcast %138 : f32 to vector<169x128xf32>
    %142 = arith.mulf %141, %140 : vector<169x128xf32>
    %143 = arith.addf %137, %142 : vector<169x128xf32>
    %144 = arith.maximumf %120, %143 : vector<169x128xf32>
    %c1_115 = arith.constant 1 : index
    %c0_116 = arith.constant 0 : index
    %145 = memref.load %arg1[%c1_115, %c0_116] : memref<4x4xf32, #tpu.memory_space<smem>>
    %c3_117 = arith.constant 3 : index
    %c0_118 = arith.constant 0 : index
    %c0_119 = arith.constant 0 : index
    %146 = vector.load %arg2[%c3_117, %c0_118, %c0_119] : memref<9x169x128xf32, #tpu.memory_space<vmem>>, vector<1x169x128xf32>
    %147 = vector.shape_cast %146 : vector<1x169x128xf32> to vector<169x128xf32>
    %148 = vector.broadcast %145 : f32 to vector<169x128xf32>
    %149 = arith.mulf %148, %147 : vector<169x128xf32>
    %c1_120 = arith.constant 1 : index
    %c1_121 = arith.constant 1 : index
    %150 = memref.load %arg1[%c1_120, %c1_121] : memref<4x4xf32, #tpu.memory_space<smem>>
    %c4_122 = arith.constant 4 : index
    %c0_123 = arith.constant 0 : index
    %c0_124 = arith.constant 0 : index
    %151 = vector.load %arg2[%c4_122, %c0_123, %c0_124] : memref<9x169x128xf32, #tpu.memory_space<vmem>>, vector<1x169x128xf32>
    %152 = vector.shape_cast %151 : vector<1x169x128xf32> to vector<169x128xf32>
    %153 = vector.broadcast %150 : f32 to vector<169x128xf32>
    %154 = arith.mulf %153, %152 : vector<169x128xf32>
    %155 = arith.addf %149, %154 : vector<169x128xf32>
    %c1_125 = arith.constant 1 : index
    %c2_126 = arith.constant 2 : index
    %156 = memref.load %arg1[%c1_125, %c2_126] : memref<4x4xf32, #tpu.memory_space<smem>>
    %c6_127 = arith.constant 6 : index
    %c0_128 = arith.constant 0 : index
    %c0_129 = arith.constant 0 : index
    %157 = vector.load %arg2[%c6_127, %c0_128, %c0_129] : memref<9x169x128xf32, #tpu.memory_space<vmem>>, vector<1x169x128xf32>
    %158 = vector.shape_cast %157 : vector<1x169x128xf32> to vector<169x128xf32>
    %159 = vector.broadcast %156 : f32 to vector<169x128xf32>
    %160 = arith.mulf %159, %158 : vector<169x128xf32>
    %161 = arith.addf %155, %160 : vector<169x128xf32>
    %c1_130 = arith.constant 1 : index
    %c3_131 = arith.constant 3 : index
    %162 = memref.load %arg1[%c1_130, %c3_131] : memref<4x4xf32, #tpu.memory_space<smem>>
    %c7_132 = arith.constant 7 : index
    %c0_133 = arith.constant 0 : index
    %c0_134 = arith.constant 0 : index
    %163 = vector.load %arg2[%c7_132, %c0_133, %c0_134] : memref<9x169x128xf32, #tpu.memory_space<vmem>>, vector<1x169x128xf32>
    %164 = vector.shape_cast %163 : vector<1x169x128xf32> to vector<169x128xf32>
    %165 = vector.broadcast %162 : f32 to vector<169x128xf32>
    %166 = arith.mulf %165, %164 : vector<169x128xf32>
    %167 = arith.addf %161, %166 : vector<169x128xf32>
    %168 = arith.maximumf %144, %167 : vector<169x128xf32>
    %c1_135 = arith.constant 1 : index
    %c0_136 = arith.constant 0 : index
    %169 = memref.load %arg1[%c1_135, %c0_136] : memref<4x4xf32, #tpu.memory_space<smem>>
    %c4_137 = arith.constant 4 : index
    %c0_138 = arith.constant 0 : index
    %c0_139 = arith.constant 0 : index
    %170 = vector.load %arg2[%c4_137, %c0_138, %c0_139] : memref<9x169x128xf32, #tpu.memory_space<vmem>>, vector<1x169x128xf32>
    %171 = vector.shape_cast %170 : vector<1x169x128xf32> to vector<169x128xf32>
    %172 = vector.broadcast %169 : f32 to vector<169x128xf32>
    %173 = arith.mulf %172, %171 : vector<169x128xf32>
    %c1_140 = arith.constant 1 : index
    %c1_141 = arith.constant 1 : index
    %174 = memref.load %arg1[%c1_140, %c1_141] : memref<4x4xf32, #tpu.memory_space<smem>>
    %c5_142 = arith.constant 5 : index
    %c0_143 = arith.constant 0 : index
    %c0_144 = arith.constant 0 : index
    %175 = vector.load %arg2[%c5_142, %c0_143, %c0_144] : memref<9x169x128xf32, #tpu.memory_space<vmem>>, vector<1x169x128xf32>
    %176 = vector.shape_cast %175 : vector<1x169x128xf32> to vector<169x128xf32>
    %177 = vector.broadcast %174 : f32 to vector<169x128xf32>
    %178 = arith.mulf %177, %176 : vector<169x128xf32>
    %179 = arith.addf %173, %178 : vector<169x128xf32>
    %c1_145 = arith.constant 1 : index
    %c2_146 = arith.constant 2 : index
    %180 = memref.load %arg1[%c1_145, %c2_146] : memref<4x4xf32, #tpu.memory_space<smem>>
    %c7_147 = arith.constant 7 : index
    %c0_148 = arith.constant 0 : index
    %c0_149 = arith.constant 0 : index
    %181 = vector.load %arg2[%c7_147, %c0_148, %c0_149] : memref<9x169x128xf32, #tpu.memory_space<vmem>>, vector<1x169x128xf32>
    %182 = vector.shape_cast %181 : vector<1x169x128xf32> to vector<169x128xf32>
    %183 = vector.broadcast %180 : f32 to vector<169x128xf32>
    %184 = arith.mulf %183, %182 : vector<169x128xf32>
    %185 = arith.addf %179, %184 : vector<169x128xf32>
    %c1_150 = arith.constant 1 : index
    %c3_151 = arith.constant 3 : index
    %186 = memref.load %arg1[%c1_150, %c3_151] : memref<4x4xf32, #tpu.memory_space<smem>>
    %c8_152 = arith.constant 8 : index
    %c0_153 = arith.constant 0 : index
    %c0_154 = arith.constant 0 : index
    %187 = vector.load %arg2[%c8_152, %c0_153, %c0_154] : memref<9x169x128xf32, #tpu.memory_space<vmem>>, vector<1x169x128xf32>
    %188 = vector.shape_cast %187 : vector<1x169x128xf32> to vector<169x128xf32>
    %189 = vector.broadcast %186 : f32 to vector<169x128xf32>
    %190 = arith.mulf %189, %188 : vector<169x128xf32>
    %191 = arith.addf %185, %190 : vector<169x128xf32>
    %192 = arith.maximumf %168, %191 : vector<169x128xf32>
    %c176 = arith.constant 176 : index
    %c0_155 = arith.constant 0 : index
    %193 = vector.load %arg8[%c176, %c0_155] : memref<704x128xf32, #tpu.memory_space<vmem>>, vector<169x128xf32>
    tpu.vector_store %arg8[%c176, %c0_155], %192 {strides = array<i32>} : memref<704x128xf32, #tpu.memory_space<vmem>>, vector<169x128xf32>,
    %c2_156 = arith.constant 2 : index
    %c0_157 = arith.constant 0 : index
    %194 = memref.load %arg1[%c2_156, %c0_157] : memref<4x4xf32, #tpu.memory_space<smem>>
    %c0_158 = arith.constant 0 : index
    %c0_159 = arith.constant 0 : index
    %c0_160 = arith.constant 0 : index
    %195 = vector.load %arg2[%c0_158, %c0_159, %c0_160] : memref<9x169x128xf32, #tpu.memory_space<vmem>>, vector<1x169x128xf32>
    %196 = vector.shape_cast %195 : vector<1x169x128xf32> to vector<169x128xf32>
    %197 = vector.broadcast %194 : f32 to vector<169x128xf32>
    %198 = arith.mulf %197, %196 : vector<169x128xf32>
    %c2_161 = arith.constant 2 : index
    %c1_162 = arith.constant 1 : index
    %199 = memref.load %arg1[%c2_161, %c1_162] : memref<4x4xf32, #tpu.memory_space<smem>>
    %c1_163 = arith.constant 1 : index
    %c0_164 = arith.constant 0 : index
    %c0_165 = arith.constant 0 : index
    %200 = vector.load %arg2[%c1_163, %c0_164, %c0_165] : memref<9x169x128xf32, #tpu.memory_space<vmem>>, vector<1x169x128xf32>
    %201 = vector.shape_cast %200 : vector<1x169x128xf32> to vector<169x128xf32>
    %202 = vector.broadcast %199 : f32 to vector<169x128xf32>
    %203 = arith.mulf %202, %201 : vector<169x128xf32>
    %204 = arith.addf %198, %203 : vector<169x128xf32>
    %c2_166 = arith.constant 2 : index
    %c2_167 = arith.constant 2 : index
    %205 = memref.load %arg1[%c2_166, %c2_167] : memref<4x4xf32, #tpu.memory_space<smem>>
    %c3_168 = arith.constant 3 : index
    %c0_169 = arith.constant 0 : index
    %c0_170 = arith.constant 0 : index
    %206 = vector.load %arg2[%c3_168, %c0_169, %c0_170] : memref<9x169x128xf32, #tpu.memory_space<vmem>>, vector<1x169x128xf32>
    %207 = vector.shape_cast %206 : vector<1x169x128xf32> to vector<169x128xf32>
    %208 = vector.broadcast %205 : f32 to vector<169x128xf32>
    %209 = arith.mulf %208, %207 : vector<169x128xf32>
    %210 = arith.addf %204, %209 : vector<169x128xf32>
    %c2_171 = arith.constant 2 : index
    %c3_172 = arith.constant 3 : index
    %211 = memref.load %arg1[%c2_171, %c3_172] : memref<4x4xf32, #tpu.memory_space<smem>>
    %c4_173 = arith.constant 4 : index
    %c0_174 = arith.constant 0 : index
    %c0_175 = arith.constant 0 : index
    %212 = vector.load %arg2[%c4_173, %c0_174, %c0_175] : memref<9x169x128xf32, #tpu.memory_space<vmem>>, vector<1x169x128xf32>
    %213 = vector.shape_cast %212 : vector<1x169x128xf32> to vector<169x128xf32>
    %214 = vector.broadcast %211 : f32 to vector<169x128xf32>
    %215 = arith.mulf %214, %213 : vector<169x128xf32>
    %216 = arith.addf %210, %215 : vector<169x128xf32>
    %c2_176 = arith.constant 2 : index
    %c0_177 = arith.constant 0 : index
    %217 = memref.load %arg1[%c2_176, %c0_177] : memref<4x4xf32, #tpu.memory_space<smem>>
    %c1_178 = arith.constant 1 : index
    %c0_179 = arith.constant 0 : index
    %c0_180 = arith.constant 0 : index
    %218 = vector.load %arg2[%c1_178, %c0_179, %c0_180] : memref<9x169x128xf32, #tpu.memory_space<vmem>>, vector<1x169x128xf32>
    %219 = vector.shape_cast %218 : vector<1x169x128xf32> to vector<169x128xf32>
    %220 = vector.broadcast %217 : f32 to vector<169x128xf32>
    %221 = arith.mulf %220, %219 : vector<169x128xf32>
    %c2_181 = arith.constant 2 : index
    %c1_182 = arith.constant 1 : index
    %222 = memref.load %arg1[%c2_181, %c1_182] : memref<4x4xf32, #tpu.memory_space<smem>>
    %c2_183 = arith.constant 2 : index
    %c0_184 = arith.constant 0 : index
    %c0_185 = arith.constant 0 : index
    %223 = vector.load %arg2[%c2_183, %c0_184, %c0_185] : memref<9x169x128xf32, #tpu.memory_space<vmem>>, vector<1x169x128xf32>
    %224 = vector.shape_cast %223 : vector<1x169x128xf32> to vector<169x128xf32>
    %225 = vector.broadcast %222 : f32 to vector<169x128xf32>
    %226 = arith.mulf %225, %224 : vector<169x128xf32>
    %227 = arith.addf %221, %226 : vector<169x128xf32>
    %c2_186 = arith.constant 2 : index
    %c2_187 = arith.constant 2 : index
    %228 = memref.load %arg1[%c2_186, %c2_187] : memref<4x4xf32, #tpu.memory_space<smem>>
    %c4_188 = arith.constant 4 : index
    %c0_189 = arith.constant 0 : index
    %c0_190 = arith.constant 0 : index
    %229 = vector.load %arg2[%c4_188, %c0_189, %c0_190] : memref<9x169x128xf32, #tpu.memory_space<vmem>>, vector<1x169x128xf32>
    %230 = vector.shape_cast %229 : vector<1x169x128xf32> to vector<169x128xf32>
    %231 = vector.broadcast %228 : f32 to vector<169x128xf32>
    %232 = arith.mulf %231, %230 : vector<169x128xf32>
    %233 = arith.addf %227, %232 : vector<169x128xf32>
    %c2_191 = arith.constant 2 : index
    %c3_192 = arith.constant 3 : index
    %234 = memref.load %arg1[%c2_191, %c3_192] : memref<4x4xf32, #tpu.memory_space<smem>>
    %c5_193 = arith.constant 5 : index
    %c0_194 = arith.constant 0 : index
    %c0_195 = arith.constant 0 : index
    %235 = vector.load %arg2[%c5_193, %c0_194, %c0_195] : memref<9x169x128xf32, #tpu.memory_space<vmem>>, vector<1x169x128xf32>
    %236 = vector.shape_cast %235 : vector<1x169x128xf32> to vector<169x128xf32>
    %237 = vector.broadcast %234 : f32 to vector<169x128xf32>
    %238 = arith.mulf %237, %236 : vector<169x128xf32>
    %239 = arith.addf %233, %238 : vector<169x128xf32>
    %240 = arith.maximumf %216, %239 : vector<169x128xf32>
    %c2_196 = arith.constant 2 : index
    %c0_197 = arith.constant 0 : index
    %241 = memref.load %arg1[%c2_196, %c0_197] : memref<4x4xf32, #tpu.memory_space<smem>>
    %c3_198 = arith.constant 3 : index
    %c0_199 = arith.constant 0 : index
    %c0_200 = arith.constant 0 : index
    %242 = vector.load %arg2[%c3_198, %c0_199, %c0_200] : memref<9x169x128xf32, #tpu.memory_space<vmem>>, vector<1x169x128xf32>
    %243 = vector.shape_cast %242 : vector<1x169x128xf32> to vector<169x128xf32>
    %244 = vector.broadcast %241 : f32 to vector<169x128xf32>
    %245 = arith.mulf %244, %243 : vector<169x128xf32>
    %c2_201 = arith.constant 2 : index
    %c1_202 = arith.constant 1 : index
    %246 = memref.load %arg1[%c2_201, %c1_202] : memref<4x4xf32, #tpu.memory_space<smem>>
    %c4_203 = arith.constant 4 : index
    %c0_204 = arith.constant 0 : index
    %c0_205 = arith.constant 0 : index
    %247 = vector.load %arg2[%c4_203, %c0_204, %c0_205] : memref<9x169x128xf32, #tpu.memory_space<vmem>>, vector<1x169x128xf32>
    %248 = vector.shape_cast %247 : vector<1x169x128xf32> to vector<169x128xf32>
    %249 = vector.broadcast %246 : f32 to vector<169x128xf32>
    %250 = arith.mulf %249, %248 : vector<169x128xf32>
    %251 = arith.addf %245, %250 : vector<169x128xf32>
    %c2_206 = arith.constant 2 : index
    %c2_207 = arith.constant 2 : index
    %252 = memref.load %arg1[%c2_206, %c2_207] : memref<4x4xf32, #tpu.memory_space<smem>>
    %c6_208 = arith.constant 6 : index
    %c0_209 = arith.constant 0 : index
    %c0_210 = arith.constant 0 : index
    %253 = vector.load %arg2[%c6_208, %c0_209, %c0_210] : memref<9x169x128xf32, #tpu.memory_space<vmem>>, vector<1x169x128xf32>
    %254 = vector.shape_cast %253 : vector<1x169x128xf32> to vector<169x128xf32>
    %255 = vector.broadcast %252 : f32 to vector<169x128xf32>
    %256 = arith.mulf %255, %254 : vector<169x128xf32>
    %257 = arith.addf %251, %256 : vector<169x128xf32>
    %c2_211 = arith.constant 2 : index
    %c3_212 = arith.constant 3 : index
    %258 = memref.load %arg1[%c2_211, %c3_212] : memref<4x4xf32, #tpu.memory_space<smem>>
    %c7_213 = arith.constant 7 : index
    %c0_214 = arith.constant 0 : index
    %c0_215 = arith.constant 0 : index
    %259 = vector.load %arg2[%c7_213, %c0_214, %c0_215] : memref<9x169x128xf32, #tpu.memory_space<vmem>>, vector<1x169x128xf32>
    %260 = vector.shape_cast %259 : vector<1x169x128xf32> to vector<169x128xf32>
    %261 = vector.broadcast %258 : f32 to vector<169x128xf32>
    %262 = arith.mulf %261, %260 : vector<169x128xf32>
    %263 = arith.addf %257, %262 : vector<169x128xf32>
    %264 = arith.maximumf %240, %263 : vector<169x128xf32>
    %c2_216 = arith.constant 2 : index
    %c0_217 = arith.constant 0 : index
    %265 = memref.load %arg1[%c2_216, %c0_217] : memref<4x4xf32, #tpu.memory_space<smem>>
    %c4_218 = arith.constant 4 : index
    %c0_219 = arith.constant 0 : index
    %c0_220 = arith.constant 0 : index
    %266 = vector.load %arg2[%c4_218, %c0_219, %c0_220] : memref<9x169x128xf32, #tpu.memory_space<vmem>>, vector<1x169x128xf32>
    %267 = vector.shape_cast %266 : vector<1x169x128xf32> to vector<169x128xf32>
    %268 = vector.broadcast %265 : f32 to vector<169x128xf32>
    %269 = arith.mulf %268, %267 : vector<169x128xf32>
    %c2_221 = arith.constant 2 : index
    %c1_222 = arith.constant 1 : index
    %270 = memref.load %arg1[%c2_221, %c1_222] : memref<4x4xf32, #tpu.memory_space<smem>>
    %c5_223 = arith.constant 5 : index
    %c0_224 = arith.constant 0 : index
    %c0_225 = arith.constant 0 : index
    %271 = vector.load %arg2[%c5_223, %c0_224, %c0_225] : memref<9x169x128xf32, #tpu.memory_space<vmem>>, vector<1x169x128xf32>
    %272 = vector.shape_cast %271 : vector<1x169x128xf32> to vector<169x128xf32>
    %273 = vector.broadcast %270 : f32 to vector<169x128xf32>
    %274 = arith.mulf %273, %272 : vector<169x128xf32>
    %275 = arith.addf %269, %274 : vector<169x128xf32>
    %c2_226 = arith.constant 2 : index
    %c2_227 = arith.constant 2 : index
    %276 = memref.load %arg1[%c2_226, %c2_227] : memref<4x4xf32, #tpu.memory_space<smem>>
    %c7_228 = arith.constant 7 : index
    %c0_229 = arith.constant 0 : index
    %c0_230 = arith.constant 0 : index
    %277 = vector.load %arg2[%c7_228, %c0_229, %c0_230] : memref<9x169x128xf32, #tpu.memory_space<vmem>>, vector<1x169x128xf32>
    %278 = vector.shape_cast %277 : vector<1x169x128xf32> to vector<169x128xf32>
    %279 = vector.broadcast %276 : f32 to vector<169x128xf32>
    %280 = arith.mulf %279, %278 : vector<169x128xf32>
    %281 = arith.addf %275, %280 : vector<169x128xf32>
    %c2_231 = arith.constant 2 : index
    %c3_232 = arith.constant 3 : index
    %282 = memref.load %arg1[%c2_231, %c3_232] : memref<4x4xf32, #tpu.memory_space<smem>>
    %c8_233 = arith.constant 8 : index
    %c0_234 = arith.constant 0 : index
    %c0_235 = arith.constant 0 : index
    %283 = vector.load %arg2[%c8_233, %c0_234, %c0_235] : memref<9x169x128xf32, #tpu.memory_space<vmem>>, vector<1x169x128xf32>
    %284 = vector.shape_cast %283 : vector<1x169x128xf32> to vector<169x128xf32>
    %285 = vector.broadcast %282 : f32 to vector<169x128xf32>
    %286 = arith.mulf %285, %284 : vector<169x128xf32>
    %287 = arith.addf %281, %286 : vector<169x128xf32>
    %288 = arith.maximumf %264, %287 : vector<169x128xf32>
    %c352 = arith.constant 352 : index
    %c0_236 = arith.constant 0 : index
    %289 = vector.load %arg8[%c352, %c0_236] : memref<704x128xf32, #tpu.memory_space<vmem>>, vector<169x128xf32>
    tpu.vector_store %arg8[%c352, %c0_236], %288 {strides = array<i32>} : memref<704x128xf32, #tpu.memory_space<vmem>>, vector<169x128xf32>,
    %c3_237 = arith.constant 3 : index
    %c0_238 = arith.constant 0 : index
    %290 = memref.load %arg1[%c3_237, %c0_238] : memref<4x4xf32, #tpu.memory_space<smem>>
    %c0_239 = arith.constant 0 : index
    %c0_240 = arith.constant 0 : index
    %c0_241 = arith.constant 0 : index
    %291 = vector.load %arg2[%c0_239, %c0_240, %c0_241] : memref<9x169x128xf32, #tpu.memory_space<vmem>>, vector<1x169x128xf32>
    %292 = vector.shape_cast %291 : vector<1x169x128xf32> to vector<169x128xf32>
    %293 = vector.broadcast %290 : f32 to vector<169x128xf32>
    %294 = arith.mulf %293, %292 : vector<169x128xf32>
    %c3_242 = arith.constant 3 : index
    %c1_243 = arith.constant 1 : index
    %295 = memref.load %arg1[%c3_242, %c1_243] : memref<4x4xf32, #tpu.memory_space<smem>>
    %c1_244 = arith.constant 1 : index
    %c0_245 = arith.constant 0 : index
    %c0_246 = arith.constant 0 : index
    %296 = vector.load %arg2[%c1_244, %c0_245, %c0_246] : memref<9x169x128xf32, #tpu.memory_space<vmem>>, vector<1x169x128xf32>
    %297 = vector.shape_cast %296 : vector<1x169x128xf32> to vector<169x128xf32>
    %298 = vector.broadcast %295 : f32 to vector<169x128xf32>
    %299 = arith.mulf %298, %297 : vector<169x128xf32>
    %300 = arith.addf %294, %299 : vector<169x128xf32>
    %c3_247 = arith.constant 3 : index
    %c2_248 = arith.constant 2 : index
    %301 = memref.load %arg1[%c3_247, %c2_248] : memref<4x4xf32, #tpu.memory_space<smem>>
    %c3_249 = arith.constant 3 : index
    %c0_250 = arith.constant 0 : index
    %c0_251 = arith.constant 0 : index
    %302 = vector.load %arg2[%c3_249, %c0_250, %c0_251] : memref<9x169x128xf32, #tpu.memory_space<vmem>>, vector<1x169x128xf32>
    %303 = vector.shape_cast %302 : vector<1x169x128xf32> to vector<169x128xf32>
    %304 = vector.broadcast %301 : f32 to vector<169x128xf32>
    %305 = arith.mulf %304, %303 : vector<169x128xf32>
    %306 = arith.addf %300, %305 : vector<169x128xf32>
    %c3_252 = arith.constant 3 : index
    %c3_253 = arith.constant 3 : index
    %307 = memref.load %arg1[%c3_252, %c3_253] : memref<4x4xf32, #tpu.memory_space<smem>>
    %c4_254 = arith.constant 4 : index
    %c0_255 = arith.constant 0 : index
    %c0_256 = arith.constant 0 : index
    %308 = vector.load %arg2[%c4_254, %c0_255, %c0_256] : memref<9x169x128xf32, #tpu.memory_space<vmem>>, vector<1x169x128xf32>
    %309 = vector.shape_cast %308 : vector<1x169x128xf32> to vector<169x128xf32>
    %310 = vector.broadcast %307 : f32 to vector<169x128xf32>
    %311 = arith.mulf %310, %309 : vector<169x128xf32>
    %312 = arith.addf %306, %311 : vector<169x128xf32>
    %c3_257 = arith.constant 3 : index
    %c0_258 = arith.constant 0 : index
    %313 = memref.load %arg1[%c3_257, %c0_258] : memref<4x4xf32, #tpu.memory_space<smem>>
    %c1_259 = arith.constant 1 : index
    %c0_260 = arith.constant 0 : index
    %c0_261 = arith.constant 0 : index
    %314 = vector.load %arg2[%c1_259, %c0_260, %c0_261] : memref<9x169x128xf32, #tpu.memory_space<vmem>>, vector<1x169x128xf32>
    %315 = vector.shape_cast %314 : vector<1x169x128xf32> to vector<169x128xf32>
    %316 = vector.broadcast %313 : f32 to vector<169x128xf32>
    %317 = arith.mulf %316, %315 : vector<169x128xf32>
    %c3_262 = arith.constant 3 : index
    %c1_263 = arith.constant 1 : index
    %318 = memref.load %arg1[%c3_262, %c1_263] : memref<4x4xf32, #tpu.memory_space<smem>>
    %c2_264 = arith.constant 2 : index
    %c0_265 = arith.constant 0 : index
    %c0_266 = arith.constant 0 : index
    %319 = vector.load %arg2[%c2_264, %c0_265, %c0_266] : memref<9x169x128xf32, #tpu.memory_space<vmem>>, vector<1x169x128xf32>
    %320 = vector.shape_cast %319 : vector<1x169x128xf32> to vector<169x128xf32>
    %321 = vector.broadcast %318 : f32 to vector<169x128xf32>
    %322 = arith.mulf %321, %320 : vector<169x128xf32>
    %323 = arith.addf %317, %322 : vector<169x128xf32>
    %c3_267 = arith.constant 3 : index
    %c2_268 = arith.constant 2 : index
    %324 = memref.load %arg1[%c3_267, %c2_268] : memref<4x4xf32, #tpu.memory_space<smem>>
    %c4_269 = arith.constant 4 : index
    %c0_270 = arith.constant 0 : index
    %c0_271 = arith.constant 0 : index
    %325 = vector.load %arg2[%c4_269, %c0_270, %c0_271] : memref<9x169x128xf32, #tpu.memory_space<vmem>>, vector<1x169x128xf32>
    %326 = vector.shape_cast %325 : vector<1x169x128xf32> to vector<169x128xf32>
    %327 = vector.broadcast %324 : f32 to vector<169x128xf32>
    %328 = arith.mulf %327, %326 : vector<169x128xf32>
    %329 = arith.addf %323, %328 : vector<169x128xf32>
    %c3_272 = arith.constant 3 : index
    %c3_273 = arith.constant 3 : index
    %330 = memref.load %arg1[%c3_272, %c3_273] : memref<4x4xf32, #tpu.memory_space<smem>>
    %c5_274 = arith.constant 5 : index
    %c0_275 = arith.constant 0 : index
    %c0_276 = arith.constant 0 : index
    %331 = vector.load %arg2[%c5_274, %c0_275, %c0_276] : memref<9x169x128xf32, #tpu.memory_space<vmem>>, vector<1x169x128xf32>
    %332 = vector.shape_cast %331 : vector<1x169x128xf32> to vector<169x128xf32>
    %333 = vector.broadcast %330 : f32 to vector<169x128xf32>
    %334 = arith.mulf %333, %332 : vector<169x128xf32>
    %335 = arith.addf %329, %334 : vector<169x128xf32>
    %336 = arith.maximumf %312, %335 : vector<169x128xf32>
    %c3_277 = arith.constant 3 : index
    %c0_278 = arith.constant 0 : index
    %337 = memref.load %arg1[%c3_277, %c0_278] : memref<4x4xf32, #tpu.memory_space<smem>>
    %c3_279 = arith.constant 3 : index
    %c0_280 = arith.constant 0 : index
    %c0_281 = arith.constant 0 : index
    %338 = vector.load %arg2[%c3_279, %c0_280, %c0_281] : memref<9x169x128xf32, #tpu.memory_space<vmem>>, vector<1x169x128xf32>
    %339 = vector.shape_cast %338 : vector<1x169x128xf32> to vector<169x128xf32>
    %340 = vector.broadcast %337 : f32 to vector<169x128xf32>
    %341 = arith.mulf %340, %339 : vector<169x128xf32>
    %c3_282 = arith.constant 3 : index
    %c1_283 = arith.constant 1 : index
    %342 = memref.load %arg1[%c3_282, %c1_283] : memref<4x4xf32, #tpu.memory_space<smem>>
    %c4_284 = arith.constant 4 : index
    %c0_285 = arith.constant 0 : index
    %c0_286 = arith.constant 0 : index
    %343 = vector.load %arg2[%c4_284, %c0_285, %c0_286] : memref<9x169x128xf32, #tpu.memory_space<vmem>>, vector<1x169x128xf32>
    %344 = vector.shape_cast %343 : vector<1x169x128xf32> to vector<169x128xf32>
    %345 = vector.broadcast %342 : f32 to vector<169x128xf32>
    %346 = arith.mulf %345, %344 : vector<169x128xf32>
    %347 = arith.addf %341, %346 : vector<169x128xf32>
    %c3_287 = arith.constant 3 : index
    %c2_288 = arith.constant 2 : index
    %348 = memref.load %arg1[%c3_287, %c2_288] : memref<4x4xf32, #tpu.memory_space<smem>>
    %c6_289 = arith.constant 6 : index
    %c0_290 = arith.constant 0 : index
    %c0_291 = arith.constant 0 : index
    %349 = vector.load %arg2[%c6_289, %c0_290, %c0_291] : memref<9x169x128xf32, #tpu.memory_space<vmem>>, vector<1x169x128xf32>
    %350 = vector.shape_cast %349 : vector<1x169x128xf32> to vector<169x128xf32>
    %351 = vector.broadcast %348 : f32 to vector<169x128xf32>
    %352 = arith.mulf %351, %350 : vector<169x128xf32>
    %353 = arith.addf %347, %352 : vector<169x128xf32>
    %c3_292 = arith.constant 3 : index
    %c3_293 = arith.constant 3 : index
    %354 = memref.load %arg1[%c3_292, %c3_293] : memref<4x4xf32, #tpu.memory_space<smem>>
    %c7_294 = arith.constant 7 : index
    %c0_295 = arith.constant 0 : index
    %c0_296 = arith.constant 0 : index
    %355 = vector.load %arg2[%c7_294, %c0_295, %c0_296] : memref<9x169x128xf32, #tpu.memory_space<vmem>>, vector<1x169x128xf32>
    %356 = vector.shape_cast %355 : vector<1x169x128xf32> to vector<169x128xf32>
    %357 = vector.broadcast %354 : f32 to vector<169x128xf32>
    %358 = arith.mulf %357, %356 : vector<169x128xf32>
    %359 = arith.addf %353, %358 : vector<169x128xf32>
    %360 = arith.maximumf %336, %359 : vector<169x128xf32>
    %c3_297 = arith.constant 3 : index
    %c0_298 = arith.constant 0 : index
    %361 = memref.load %arg1[%c3_297, %c0_298] : memref<4x4xf32, #tpu.memory_space<smem>>
    %c4_299 = arith.constant 4 : index
    %c0_300 = arith.constant 0 : index
    %c0_301 = arith.constant 0 : index
    %362 = vector.load %arg2[%c4_299, %c0_300, %c0_301] : memref<9x169x128xf32, #tpu.memory_space<vmem>>, vector<1x169x128xf32>
    %363 = vector.shape_cast %362 : vector<1x169x128xf32> to vector<169x128xf32>
    %364 = vector.broadcast %361 : f32 to vector<169x128xf32>
    %365 = arith.mulf %364, %363 : vector<169x128xf32>
    %c3_302 = arith.constant 3 : index
    %c1_303 = arith.constant 1 : index
    %366 = memref.load %arg1[%c3_302, %c1_303] : memref<4x4xf32, #tpu.memory_space<smem>>
    %c5_304 = arith.constant 5 : index
    %c0_305 = arith.constant 0 : index
    %c0_306 = arith.constant 0 : index
    %367 = vector.load %arg2[%c5_304, %c0_305, %c0_306] : memref<9x169x128xf32, #tpu.memory_space<vmem>>, vector<1x169x128xf32>
    %368 = vector.shape_cast %367 : vector<1x169x128xf32> to vector<169x128xf32>
    %369 = vector.broadcast %366 : f32 to vector<169x128xf32>
    %370 = arith.mulf %369, %368 : vector<169x128xf32>
    %371 = arith.addf %365, %370 : vector<169x128xf32>
    %c3_307 = arith.constant 3 : index
    %c2_308 = arith.constant 2 : index
    %372 = memref.load %arg1[%c3_307, %c2_308] : memref<4x4xf32, #tpu.memory_space<smem>>
    %c7_309 = arith.constant 7 : index
    %c0_310 = arith.constant 0 : index
    %c0_311 = arith.constant 0 : index
    %373 = vector.load %arg2[%c7_309, %c0_310, %c0_311] : memref<9x169x128xf32, #tpu.memory_space<vmem>>, vector<1x169x128xf32>
    %374 = vector.shape_cast %373 : vector<1x169x128xf32> to vector<169x128xf32>
    %375 = vector.broadcast %372 : f32 to vector<169x128xf32>
    %376 = arith.mulf %375, %374 : vector<169x128xf32>
    %377 = arith.addf %371, %376 : vector<169x128xf32>
    %c3_312 = arith.constant 3 : index
    %c3_313 = arith.constant 3 : index
    %378 = memref.load %arg1[%c3_312, %c3_313] : memref<4x4xf32, #tpu.memory_space<smem>>
    %c8_314 = arith.constant 8 : index
    %c0_315 = arith.constant 0 : index
    %c0_316 = arith.constant 0 : index
    %379 = vector.load %arg2[%c8_314, %c0_315, %c0_316] : memref<9x169x128xf32, #tpu.memory_space<vmem>>, vector<1x169x128xf32>
    %380 = vector.shape_cast %379 : vector<1x169x128xf32> to vector<169x128xf32>
    %381 = vector.broadcast %378 : f32 to vector<169x128xf32>
    %382 = arith.mulf %381, %380 : vector<169x128xf32>
    %383 = arith.addf %377, %382 : vector<169x128xf32>
    %384 = arith.maximumf %360, %383 : vector<169x128xf32>
    %c528 = arith.constant 528 : index
    %c0_317 = arith.constant 0 : index
    %385 = vector.load %arg8[%c528, %c0_317] : memref<704x128xf32, #tpu.memory_space<vmem>>, vector<169x128xf32>
    tpu.vector_store %arg8[%c528, %c0_317], %384 {strides = array<i32>} : memref<704x128xf32, #tpu.memory_space<vmem>>, vector<169x128xf32>,
    %c0_318 = arith.constant 0 : index
    %c0_319 = arith.constant 0 : index
    %386 = vector.load %arg3[%c0_318, %c0_319] : memref<64x704xf32, #tpu.memory_space<vmem>>, vector<64x704xf32>
    %c0_320 = arith.constant 0 : index
    %c0_321 = arith.constant 0 : index
    %387 = vector.load %arg8[%c0_320, %c0_321] : memref<704x128xf32, #tpu.memory_space<vmem>>, vector<704x128xf32>
    %cst_322 = arith.constant dense<0.000000e+00> : vector<64x128xf32>
    %388 = tpu.matmul %386, %387, %cst_322 {dimension_numbers = #tpu.dot_dimension_numbers<[1], [0], [0], [1], [0, 0, 1, 1], [], []>} : vector<64x704xf32>, vector<704x128xf32>, vector<64x128xf32> -> vector<64x128xf32>
    %c0_323 = arith.constant 0 : index
    %c0_324 = arith.constant 0 : index
    %389 = vector.load %arg4[%c0_323, %c0_324] : memref<64x1xf32, #tpu.memory_space<vmem>>, vector<64x1xf32>
    %390 = vector.broadcast %389 : vector<64x1xf32> to vector<64x128xf32>
    %391 = arith.addf %388, %390 : vector<64x128xf32>
    %cst_325 = arith.constant 0.000000e+00 : f32
    %392 = vector.broadcast %cst_325 : f32 to vector<64x128xf32>
    %393 = arith.maximumf %391, %392 : vector<64x128xf32>
    %c0_326 = arith.constant 0 : index
    %c0_327 = arith.constant 0 : index
    %394 = vector.load %arg5[%c0_326, %c0_327] : memref<3x64xf32, #tpu.memory_space<vmem>>, vector<3x64xf32>
    %cst_328 = arith.constant dense<0.000000e+00> : vector<3x128xf32>
    %395 = tpu.matmul %394, %393, %cst_328 {dimension_numbers = #tpu.dot_dimension_numbers<[1], [0], [0], [1], [0, 0, 1, 1], [], []>} : vector<3x64xf32>, vector<64x128xf32>, vector<3x128xf32> -> vector<3x128xf32>
    %c0_329 = arith.constant 0 : index
    %c0_330 = arith.constant 0 : index
    %396 = vector.load %arg6[%c0_329, %c0_330] : memref<3x1xf32, #tpu.memory_space<vmem>>, vector<3x1xf32>
    %397 = vector.broadcast %396 : vector<3x1xf32> to vector<3x128xf32>
    %398 = arith.addf %395, %397 : vector<3x128xf32>
    %cst_331 = arith.constant 0.000000e+00 : f32
    %399 = vector.broadcast %cst_331 : f32 to vector<3x128xf32>
    %400 = arith.subf %399, %398 : vector<3x128xf32>
    %401 = math.exp %400 : vector<3x128xf32>
    %cst_332 = arith.constant 1.000000e+00 : f32
    %402 = vector.broadcast %cst_332 : f32 to vector<3x128xf32>
    %403 = arith.addf %402, %401 : vector<3x128xf32>
    %cst_333 = arith.constant 1.000000e+00 : f32
    %404 = vector.broadcast %cst_333 : f32 to vector<3x128xf32>
    %405 = arith.divf %404, %403 : vector<3x128xf32>
    %c0_334 = arith.constant 0 : index
    %c0_335 = arith.constant 0 : index
    %406 = vector.load %arg7[%c0_334, %c0_335] : memref<3x128xf32, #tpu.memory_space<vmem>>, vector<3x128xf32>
    tpu.vector_store %arg7[%c0_334, %c0_335], %405 {strides = array<i32>} : memref<3x128xf32, #tpu.memory_space<vmem>>, vector<3x128xf32>,
    return
  }
  func.func @transform_0(%arg0: i32) -> (i32, i32) {
    %c0_i32 = arith.constant 0 : i32
    %c0_i32_0 = arith.constant 0 : i32
    %c0_i32_1 = arith.constant 0 : i32
    return %c0_i32, %c0_i32_0 : i32, i32
  }
  func.func @transform_1(%arg0: i32) -> (i32, i32, i32) {
    %c0_i32 = arith.constant 0 : i32
    %c0_i32_0 = arith.constant 0 : i32
    %c0_i32_1 = arith.constant 0 : i32
    return %c0_i32, %c0_i32_0, %arg0 : i32, i32, i32
  }
  func.func @transform_2(%arg0: i32) -> (i32, i32) {
    %c0_i32 = arith.constant 0 : i32
    %c0_i32_0 = arith.constant 0 : i32
    %c0_i32_1 = arith.constant 0 : i32
    return %c0_i32, %c0_i32_0 : i32, i32
  }
  func.func @transform_3(%arg0: i32) -> (i32, i32) {
    %c0_i32 = arith.constant 0 : i32
    %c0_i32_0 = arith.constant 0 : i32
    %c0_i32_1 = arith.constant 0 : i32
    return %c0_i32, %c0_i32_0 : i32, i32
  }
  func.func @transform_4(%arg0: i32) -> (i32, i32) {
    %c0_i32 = arith.constant 0 : i32
    %c0_i32_0 = arith.constant 0 : i32
    %c0_i32_1 = arith.constant 0 : i32
    return %c0_i32, %c0_i32_0 : i32, i32
  }
  func.func @transform_5(%arg0: i32) -> (i32, i32) {
    %c0_i32 = arith.constant 0 : i32
    %c0_i32_0 = arith.constant 0 : i32
    %c0_i32_1 = arith.constant 0 : i32
    return %c0_i32, %c0_i32_0 : i32, i32
  }
  func.func @transform_6(%arg0: i32) -> (i32, i32) {
    %c0_i32 = arith.constant 0 : i32
    %c0_i32_0 = arith.constant 0 : i32
    return %c0_i32, %arg0 : i32, i32
  }
}

</mosaic_0001>

<bundles_post_ra>
// kernel: hybrid_rqcnn_forward.1
= control target key start
LH: loop header
LB: loop body
LE: loop exit
PB: predicated region body
PF: predicated region fallthrough
CT: control target
= control target key end

     0   :  { %11 = vsyncpa [#allocation4], 0  ;;  %s10054_s0 = inlined_call_operand.vmem [shape: f32[4,4], index: 0, kind: input, shape index: {}]   ;;  %s10055_s1 = inlined_call_operand.vmem [shape: f32[9,169,128], index: 1, kind: input, shape index: {}]   ;;  %s10056_s2 = inlined_call_operand.vmem [shape: f32[64,704], index: 2, kind: input, shape index: {}]   ;;  %s10057_s3 = inlined_call_operand.vmem [shape: f32[64,1], index: 3, kind: input, shape index: {}]   ;;  %s10058_s4 = inlined_call_operand.vmem [shape: f32[3,64], index: 4, kind: input, shape index: {}]   ;;  %s10059_s5 = inlined_call_operand.vmem [shape: f32[3,1], index: 5, kind: input, shape index: {}]   ;;  %s10060_s6 = inlined_call_operand.vmem [shape: f32[3,128], index: 6, kind: output, shape index: {}]  }
   0x1   :  { %s18_s23 = sshll.u32 %s10054_s0, 4  ;;  %s19_s23 = int_to_ptr.vmem [resolvable:$true] %s18_s23 }
   0x2   :  { %s5387_s24 = scalar_lea.vmem %s19_s23, 64  ;;  %p5392_p1 = scmp.lt.s32.totalorder %s19_s23, %s19_s23 }
   0x3   :  { %p5388_p0 = scmp.ne.s32.totalorder %s19_s23, %s5387_s24  ;;  %p5393_p2 = scmp.lt.s32.totalorder %s5387_s24, %s5387_s24 }
   0x5   :  { %p5394_p3 = por %p5393_p2, %p5392_p1 }
   0x7   :  { %p5395_p4 = pnand %p5394_p3, %p5388_p0 }
   0x9   :  { %5398 = shalt.err (!%p5395_p4)
}
   0xa   :  { %s5401_s25 = smov [#allocation3]  }
   0xb   :  { %21 = dma.vmem_to_smem %s19_s23, 64, %s5401_s25, [#allocation4]  }
   0xc   :  { %5399 = dma.done.wait [#allocation4], 64  }
   0xd   :  { %5400 = vsyncadd [#allocation4], 4294967232 }
   0xe   :  { %35 = sfence }
   0xf   :  { %s124_s26 = sld [smem:[#allocation3]]  ;;  %s4396_s27 = sld [smem:[#allocation3 + $0x1]]  ;;  %v10061_v0 = vmov 0.0   ;;  %v141_v1 = vld [vmem:[%s10055_s1 + $0x80] sm:$0xff]  ;;  %v142_v2 = vld [vmem:[%s10055_s1 + $0x88] sm:$0xff]  ;;  %v4413_v3 = vld [vmem:[%s10055_s1 + $0x130] sm:$0xff] }
  0x10   :  { %s4419_s28 = sld [smem:[#allocation3 + $0x2]]  ;;  %57 = vst [vmem:[#allocation2 + $0xa8] sm:$0xff] %v10061_v0  ;;  %79 = vst [vmem:[#allocation2 + $0x158] sm:$0xff] %v10061_v0  ;;  %s4442_s0 = sld [smem:[#allocation3 + $0x3]]  ;;  %v4414_v4 = vld [vmem:[%s10055_s1 + $0x138] sm:$0xff]  ;;  %v4436_v5 = vld [vmem:[%s10055_s1 + $0x290] sm:$0xff] }
  0x11   :  { %101 = vst [vmem:[#allocation2 + $0x208] sm:$0xff] %v10061_v0  ;;  %123 = vst [vmem:[#allocation2 + $0x2b8] sm:$0xff] %v10061_v0  ;;  %v4437_v6 = vld [vmem:[%s10055_s1 + $0x298] sm:$0xff]  ;;  %v4481_v8 = vld [vmem:[%s10055_s1 + $0x1e0] sm:$0xff]  ;;  %s6146_s17 = sld [smem:[#allocation3 + $0x80]]  ;;  %s6152_s18 = sld [smem:[#allocation3 + $0x81]] }
  0x12   :  { %v4459_v17 = vld [vmem:[%s10055_s1 + $0x340] sm:$0xff]  ;;  %v4460_v18 = vld [vmem:[%s10055_s1 + $0x348] sm:$0xff]  ;;  %v4503_v24 = vld [vmem:[%s10055_s1 + $0x3f0] sm:$0xff]  ;;  %s6162_s19 = sld [smem:[#allocation3 + $0x82]]  ;;  %s6164_s20 = sld [smem:[#allocation3 + $0x83]]  ;;  %vm3956_vm0 = vcmask 523264  }
  0x13   :  { %v4482_v19 = vld [vmem:[%s10055_s1 + $0x1e8] sm:$0xff]  ;;  %v4504_v25 = vld [vmem:[%s10055_s1 + $0x3f8] sm:$0xff]  ;;  %v4525_v38 = vld [vmem:[%s10055_s1 + $0x4a0] sm:$0xff]  ;;  %s6641_s7 = sld [smem:[#allocation3 + $0x101]]  ;;  %s6643_s8 = sld [smem:[#allocation3 + $0x102]]  ;;  %vm5405_vm1 = vmmov 0  }
  0x14   :  { %v4526_v39 = vld [vmem:[%s10055_s1 + $0x4a8] sm:$0xff]  ;;  %v4547_v44 = vld [vmem:[%s10055_s1 + $0x550] sm:$0xff]  ;;  %v4548_v45 = vld [vmem:[%s10055_s1 + $0x558] sm:$0xff]  ;;  %s6649_s9 = sld [smem:[#allocation3 + $0x103]] }
  0x15   :  { %v5466_v7 = vstv %s124_s26  ;;  %v5473_v11 = vstv %s4396_s27  ;;  %v4569_v58 = vld [vmem:[%s10055_s1 + $0x600] sm:$0xff]  ;;  %v4570_v63 = vld [vmem:[%s10055_s1 + $0x608] sm:$0xff]  ;;  %s6933_s21 = sld [smem:[#allocation3 + $0x183]] }
  0x16   :  { %v164_v9 = vmul.f32 %v5466_v7, %v141_v1  ;;  %v165_v10 = vmul.f32 %v5466_v7, %v142_v2  ;;  %v5475_v12 = vstv %s4419_s28  ;;  %v211_v13 = vmul.f32 %v4413_v3, %v5473_v11 }
  0x17   :  { %v212_v14 = vmul.f32 %v4414_v4, %v5473_v11  ;;  %v280_v15 = vmul.f32 %v4436_v5, %v5475_v12  ;;  %v281_v16 = vmul.f32 %v4437_v6, %v5475_v12  ;;  %v5490_v20 = vstv %s4442_s0  ;;  %s6630_s0 = sld [smem:[#allocation3 + $0x100]] }
  0x18   :  { %v393_v21 = vmul.f32 %v4413_v3, %v5466_v7  ;;  %v394_v22 = vmul.f32 %v4414_v4, %v5466_v7  ;;  %v438_v23 = vmul.f32 %v4481_v8, %v5473_v11  ;;  %v233_v26 = vadd.f32 %v211_v13, %v164_v9  ;;  %v5551_v8 = vld [vmem:[%s10055_s1 + $0xb0] sm:$0xff] }
  0x19   :  { %v234_v27 = vadd.f32 %v212_v14, %v165_v10  ;;  %v349_v28 = vmul.f32 %v4459_v17, %v5490_v20  ;;  %v350_v29 = vmul.f32 %v4460_v18, %v5490_v20  ;;  %v439_v30 = vmul.f32 %v4482_v19, %v5473_v11  ;;  %v5559_v19 = vld [vmem:[%s10055_s1 + $0xb8] sm:$0xff] }
  0x1a   :  { %v460_v31 = vadd.f32 %v438_v23, %v393_v21  ;;  %v482_v32 = vmul.f32 %v4459_v17, %v5475_v12  ;;  %v483_v33 = vmul.f32 %v4460_v18, %v5475_v12  ;;  %v302_v34 = vadd.f32 %v280_v15, %v233_v26  ;;  %v5564_v21 = vld [vmem:[%s10055_s1 + $0x210] sm:$0xff] }
  0x1b   :  { %v303_v35 = vadd.f32 %v281_v16, %v234_v27  ;;  %v549_v36 = vmul.f32 %v4503_v24, %v5490_v20  ;;  %v550_v37 = vmul.f32 %v4504_v25, %v5490_v20  ;;  %v461_v40 = vadd.f32 %v439_v30, %v394_v22  ;;  %v5569_v22 = vld [vmem:[%s10055_s1 + $0x218] sm:$0xff] }
  0x1c   :  { %v504_v41 = vadd.f32 %v482_v32, %v460_v31  ;;  %v615_v42 = vmul.f32 %v4436_v5, %v5466_v7  ;;  %v616_v43 = vmul.f32 %v4437_v6, %v5466_v7  ;;  %v371_v46 = vadd.f32 %v349_v28, %v302_v34  ;;  %v5541_v5 = vld [vmem:[%s10055_s1] sm:$0xff]  ;;  %v5546_v6 = vld [vmem:[%s10055_s1 + $0x8] sm:$0xff] }
  0x1d   :  { %v372_v47 = vadd.f32 %v350_v29, %v303_v35  ;;  %v637_v48 = vmul.f32 %v4459_v17, %v5473_v11  ;;  %v638_v49 = vmul.f32 %v4460_v18, %v5473_v11  ;;  %v505_v50 = vadd.f32 %v483_v33, %v461_v40  ;;  %v5581_v31 = vld [vmem:[%s10055_s1 + $0x2c0] sm:$0xff] }
  0x1e   :  { %v571_v51 = vadd.f32 %v549_v36, %v504_v41  ;;  %v704_v52 = vmul.f32 %v4525_v38, %v5475_v12  ;;  %v705_v53 = vmul.f32 %v4526_v39, %v5475_v12  ;;  %v771_v56 = vmul.f32 %v4547_v44, %v5490_v20  ;;  %v5592_v36 = vld [vmem:[%s10055_s1 + $0x2c8] sm:$0xff] }
  0x1f   :  { %v659_v54 = vadd.f32 %v637_v48, %v615_v42  ;;  %v660_v55 = vadd.f32 %v638_v49, %v616_v43  ;;  %v772_v57 = vmul.f32 %v4548_v45, %v5490_v20  ;;  %v572_v59 = vadd.f32 %v550_v37, %v505_v50  ;;  %v5597_v37 = vld [vmem:[%s10055_s1 + $0x160] sm:$0xff]  ;;  %v5602_v38 = vld [vmem:[%s10055_s1 + $0x168] sm:$0xff] }
  0x20   :  { %v593_v60 = vmax.f32 %v371_v46, %v571_v51  ;;  %v837_v61 = vmul.f32 %v4459_v17, %v5466_v7  ;;  %v838_v62 = vmul.f32 %v4460_v18, %v5466_v7  ;;  %v859_v3 = vmul.f32 %v4503_v24, %v5473_v11 }
  0x21   :  { %v726_v1 = vadd.f32 %v704_v52, %v659_v54  ;;  %v727_v2 = vadd.f32 %v705_v53, %v660_v55  ;;  %v860_v4 = vmul.f32 %v4504_v25, %v5473_v11  ;;  %v594_v9 = vmax.f32 %v372_v47, %v572_v59  ;;  %v5615_v47 = vld [vmem:[%s10055_s1 + $0x370] sm:$0xff]  ;;  %v5624_v52 = vld [vmem:[%s10055_s1 + $0x378] sm:$0xff] }
  0x22   :  { %v903_v10 = vmul.f32 %v4547_v44, %v5475_v12  ;;  %v904_v13 = vmul.f32 %v4548_v45, %v5475_v12  ;;  %v970_v14 = vmul.f32 %v4569_v58, %v5490_v20  ;;  %v881_v17 = vadd.f32 %v859_v3, %v837_v61 }
  0x23   :  { %v793_v15 = vadd.f32 %v771_v56, %v726_v1  ;;  %v794_v16 = vadd.f32 %v772_v57, %v727_v2  ;;  %v882_v18 = vadd.f32 %v860_v4, %v838_v62  ;;  %v971_v23 = vmul.f32 %v4570_v63, %v5490_v20  ;;  %v5633_v57 = vld [vmem:[%s10055_s1 + $0x420] sm:$0xff]  ;;  %v5640_v62 = vld [vmem:[%s10055_s1 + $0x428] sm:$0xff]  ;;  %v5645_v63 = vld [vmem:[%s10055_s1 + $0x4d0] sm:$0xff] }
  0x24   :  { %v148_v24 = vmul.f32 %v5466_v7, %v5541_v5  ;;  %v149_v25 = vmul.f32 %v5466_v7, %v5546_v6  ;;  %v195_v26 = vmul.f32 %v5551_v8, %v5473_v11  ;;  %v925_v29 = vadd.f32 %v903_v10, %v881_v17  ;;  %v5650_v1 = vld [vmem:[%s10055_s1 + $0x4d8] sm:$0xff] }
  0x25   :  { %v815_v27 = vmax.f32 %v593_v60, %v793_v15  ;;  %v816_v28 = vmax.f32 %v594_v9, %v794_v16  ;;  %v926_v30 = vadd.f32 %v904_v13, %v882_v18  ;;  %v196_v32 = vmul.f32 %v5559_v19, %v5473_v11 }
  0x26   :  { %v217_v33 = vadd.f32 %v195_v26, %v148_v24  ;;  %v264_v34 = vmul.f32 %v5564_v21, %v5475_v12  ;;  %v265_v35 = vmul.f32 %v5569_v22, %v5475_v12  ;;  %v992_v39 = vadd.f32 %v970_v14, %v925_v29 }
  0x27   :  { %v993_v40 = vadd.f32 %v971_v23, %v926_v30  ;;  %v333_v41 = vmul.f32 %v5581_v31, %v5490_v20  ;;  %v334_v42 = vmul.f32 %v5592_v36, %v5490_v20  ;;  %v218_v43 = vadd.f32 %v196_v32, %v149_v25 }
  0x28   :  { %v286_v44 = vadd.f32 %v264_v34, %v217_v33  ;;  %v377_v45 = vmul.f32 %v5551_v8, %v5466_v7  ;;  %v378_v46 = vmul.f32 %v5559_v19, %v5466_v7  ;;  %v1014_v48 = vmax.f32 %v815_v27, %v992_v39  ;;  %v5681_v33 = vld [vmem:[%s10055_s1 + $0x580] sm:$0xff]  ;;  %v5686_v34 = vld [vmem:[%s10055_s1 + $0x588] sm:$0xff] }
  0x29   :  { %v1015_v49 = vmax.f32 %v816_v28, %v993_v40  ;;  %v422_v50 = vmul.f32 %v5597_v37, %v5473_v11  ;;  %v423_v51 = vmul.f32 %v5602_v38, %v5473_v11  ;;  %v287_v53 = vadd.f32 %v265_v35, %v218_v43  ;;  %v144_v43 = vld [vmem:[%s10055_s1 + $0x98] sm:$0xff] }
  0x2a   :  { %v355_v54 = vadd.f32 %v333_v41, %v286_v44  ;;  %v466_v55 = vmul.f32 %v5581_v31, %v5475_v12  ;;  %v467_v56 = vmul.f32 %v5592_v36, %v5475_v12  ;;  %v533_v61 = vmul.f32 %v5615_v47, %v5490_v20 }
  0x2b   :  { %v5264_v58 = vpack.c.bf16 %v1015_v49, %v1014_v48  ;;  %v444_v59 = vadd.f32 %v422_v50, %v377_v45  ;;  %v445_v60 = vadd.f32 %v423_v51, %v378_v46  ;;  %v356_v2 = vadd.f32 %v334_v42, %v287_v53  ;;  %v143_v42 = vld [vmem:[%s10055_s1 + $0x90] sm:$0xff]  ;;  %v4415_v49 = vld [vmem:[%s10055_s1 + $0x140] sm:$0xff]  ;;  %v4416_v50 = vld [vmem:[%s10055_s1 + $0x148] sm:$0xff] }
  0x2c   :  { %v534_v3 = vmul.f32 %v5624_v52, %v5490_v20  ;;  %v599_v4 = vmul.f32 %v5564_v21, %v5466_v7  ;;  %v600_v9 = vmul.f32 %v5569_v22, %v5466_v7  ;;  %v621_v14 = vmul.f32 %v5581_v31, %v5473_v11 }
  0x2d   :  { %5265 = vmatprep.subr.bf16.mxu1 %v5264_v58  ;;  %v488_v10 = vadd.f32 %v466_v55, %v444_v59  ;;  %v489_v13 = vadd.f32 %v467_v56, %v445_v60  ;;  %v622_v15 = vmul.f32 %v5592_v36, %v5473_v11  ;;  %v688_v16 = vmul.f32 %v5633_v57, %v5475_v12  ;;  %v4438_v56 = vld [vmem:[%s10055_s1 + $0x2a0] sm:$0xff]  ;;  %v4439_v58 = vld [vmem:[%s10055_s1 + $0x2a8] sm:$0xff] }
  0x2e   :  { %v689_v17 = vmul.f32 %v5640_v62, %v5475_v12  ;;  %v755_v18 = vmul.f32 %v5645_v63, %v5490_v20  ;;  %v756_v23 = vmul.f32 %v5650_v1, %v5490_v20  ;;  %v643_v26 = vadd.f32 %v621_v14, %v599_v4 }
  0x2f   :  { %v555_v24 = vadd.f32 %v533_v61, %v488_v10  ;;  %v556_v25 = vadd.f32 %v534_v3, %v489_v13  ;;  %v644_v27 = vadd.f32 %v622_v15, %v600_v9  ;;  %v821_v28 = vmul.f32 %v5581_v31, %v5466_v7  ;;  %v4461_v13 = vld [vmem:[%s10055_s1 + $0x350] sm:$0xff] }
  0x30   :  { %v822_v29 = vmul.f32 %v5592_v36, %v5466_v7  ;;  %v843_v30 = vmul.f32 %v5615_v47, %v5473_v11  ;;  %v844_v32 = vmul.f32 %v5624_v52, %v5473_v11  ;;  %v710_v40 = vadd.f32 %v688_v16, %v643_v26 }
  0x31   :  { %v577_v35 = vmax.f32 %v355_v54, %v555_v24  ;;  %v578_v39 = vmax.f32 %v356_v2, %v556_v25  ;;  %v711_v41 = vadd.f32 %v689_v17, %v644_v27  ;;  %v887_v46 = vmul.f32 %v5645_v63, %v5475_v12  ;;  %v4484_v24 = vld [vmem:[%s10055_s1 + $0x1f8] sm:$0xff] }
  0x32   :  { %v865_v44 = vadd.f32 %v843_v30, %v821_v28  ;;  %v866_v45 = vadd.f32 %v844_v32, %v822_v29  ;;  %v888_v48 = vmul.f32 %v5650_v1, %v5475_v12  ;;  %v777_v51 = vadd.f32 %v755_v18, %v710_v40  ;;  %v4462_v18 = vld [vmem:[%s10055_s1 + $0x358] sm:$0xff]  ;;  %v4505_v29 = vld [vmem:[%s10055_s1 + $0x400] sm:$0xff] }
  0x33   :  { %v778_v53 = vadd.f32 %v756_v23, %v711_v41  ;;  %v954_v54 = vmul.f32 %v5681_v33, %v5490_v20  ;;  %v955_v55 = vmul.f32 %v5686_v34, %v5490_v20  ;;  %v166_v61 = vmul.f32 %v5466_v7, %v143_v42  ;;  %v4483_v23 = vld [vmem:[%s10055_s1 + $0x1f0] sm:$0xff] }
  0x34   :  { %v909_v59 = vadd.f32 %v887_v46, %v865_v44  ;;  %v910_v60 = vadd.f32 %v888_v48, %v866_v45  ;;  %v167_v2 = vmul.f32 %v5466_v7, %v144_v43  ;;  %v799_v3 = vmax.f32 %v577_v35, %v777_v51  ;;  %v4506_v44 = vld [vmem:[%s10055_s1 + $0x408] sm:$0xff] }
  0x35   :  { %v800_v4 = vmax.f32 %v578_v39, %v778_v53  ;;  %v213_v9 = vmul.f32 %v4415_v49, %v5473_v11  ;;  %v214_v10 = vmul.f32 %v4416_v50, %v5473_v11  ;;  %v282_v16 = vmul.f32 %v4438_v56, %v5475_v12 }
  0x36   :  { %v976_v14 = vadd.f32 %v954_v54, %v909_v59  ;;  %v977_v15 = vadd.f32 %v955_v55, %v910_v60  ;;  %v283_v17 = vmul.f32 %v4439_v58, %v5475_v12  ;;  %v351_v27 = vmul.f32 %v4461_v13, %v5490_v20  ;;  %v4528_v59 = vld [vmem:[%s10055_s1 + $0x4b8] sm:$0xff]  ;;  %v4549_v60 = vld [vmem:[%s10055_s1 + $0x560] sm:$0xff] }
  0x37   :  { %v235_v25 = vadd.f32 %v213_v9, %v166_v61  ;;  %v236_v26 = vadd.f32 %v214_v10, %v167_v2  ;;  %v352_v28 = vmul.f32 %v4462_v18, %v5490_v20  ;;  %v395_v35 = vmul.f32 %v4415_v49, %v5466_v7  ;;  %v4527_v49 = vld [vmem:[%s10055_s1 + $0x4b0] sm:$0xff]  ;;  %v4550_v61 = vld [vmem:[%s10055_s1 + $0x568] sm:$0xff] }
  0x38   :  { %v998_v30 = vmax.f32 %v799_v3, %v976_v14  ;;  %v999_v32 = vmax.f32 %v800_v4, %v977_v15  ;;  %v396_v39 = vmul.f32 %v4416_v50, %v5466_v7  ;;  %v440_v42 = vmul.f32 %v4483_v23, %v5473_v11 }
  0x39   :  { %v304_v40 = vadd.f32 %v282_v16, %v235_v25  ;;  %v305_v41 = vadd.f32 %v283_v17, %v236_v26  ;;  %v441_v43 = vmul.f32 %v4484_v24, %v5473_v11  ;;  %v484_v46 = vmul.f32 %v4461_v13, %v5475_v12 }
  0x3a   :  { %v5266_v45 = vpack.c.bf16 %v999_v32, %v998_v30  ;;  %v485_v48 = vmul.f32 %v4462_v18, %v5475_v12  ;;  %v551_v51 = vmul.f32 %v4505_v29, %v5490_v20  ;;  %v462_v54 = vadd.f32 %v440_v42, %v395_v35 }
  0x3b   :  { %v373_v50 = vadd.f32 %v351_v27, %v304_v40  ;;  %v374_v53 = vadd.f32 %v352_v28, %v305_v41  ;;  %v463_v55 = vadd.f32 %v441_v43, %v396_v39  ;;  %v552_v2 = vmul.f32 %v4506_v44, %v5490_v20  ;;  %v4571_v39 = vld [vmem:[%s10055_s1 + $0x610] sm:$0xff]  ;;  %v4572_v40 = vld [vmem:[%s10055_s1 + $0x618] sm:$0xff] }
  0x3c   :  { %5267 = vmatpush3.bf16.msra.mxu1 %v5266_v45  ;;  %v617_v3 = vmul.f32 %v4438_v56, %v5466_v7  ;;  %v618_v4 = vmul.f32 %v4439_v58, %v5466_v7  ;;  %v639_v9 = vmul.f32 %v4461_v13, %v5473_v11  ;;  %v506_v10 = vadd.f32 %v484_v46, %v462_v54  ;;  %v5781_v41 = vld [vmem:[%s10055_s1 + $0x10] sm:$0xff]  ;;  %v5787_v43 = vld [vmem:[%s10055_s1 + $0x18] sm:$0xff] }
  0x3d   :  { %v507_v14 = vadd.f32 %v485_v48, %v463_v55  ;;  %v640_v15 = vmul.f32 %v4462_v18, %v5473_v11  ;;  %v706_v16 = vmul.f32 %v4527_v49, %v5475_v12  ;;  %v707_v23 = vmul.f32 %v4528_v59, %v5475_v12  ;;  %v5798_v49 = vld [vmem:[%s10055_s1 + $0xc8] sm:$0xff] }
  0x3e   :  { %v661_v17 = vadd.f32 %v639_v9, %v617_v3  ;;  %v773_v24 = vmul.f32 %v4549_v60, %v5490_v20  ;;  %v774_v25 = vmul.f32 %v4550_v61, %v5490_v20  ;;  %v573_v26 = vadd.f32 %v551_v51, %v506_v10  ;;  %v5793_v51 = vld [vmem:[%s10055_s1 + $0xc0] sm:$0xff] }
  0x3f   :  { %v574_v27 = vadd.f32 %v552_v2, %v507_v14  ;;  %v662_v56 = vadd.f32 %v640_v15, %v618_v4  ;;  %v839_v58 = vmul.f32 %v4461_v13, %v5466_v7  ;;  %v840_v30 = vmul.f32 %v4462_v18, %v5466_v7 }
  0x40   :  { %v728_v28 = vadd.f32 %v706_v16, %v661_v17  ;;  %v861_v32 = vmul.f32 %v4505_v29, %v5473_v11  ;;  %v862_v35 = vmul.f32 %v4506_v44, %v5473_v11  ;;  %v595_v13 = vmax.f32 %v373_v50, %v573_v26  ;;  %v5803_v50 = vld [vmem:[%s10055_s1 + $0x220] sm:$0xff]  ;;  %v5825_v16 = vld [vmem:[%s10055_s1 + $0x2d0] sm:$0xff]  ;;  %v5837_v26 = vld [vmem:[%s10055_s1 + $0x2d8] sm:$0xff] }
  0x41   :  { %v596_v42 = vmax.f32 %v374_v53, %v574_v27  ;;  %v729_v18 = vadd.f32 %v707_v23, %v662_v56  ;;  %v905_v29 = vmul.f32 %v4549_v60, %v5475_v12  ;;  %v906_v48 = vmul.f32 %v4550_v61, %v5475_v12  ;;  %v5812_v60 = vld [vmem:[%s10055_s1 + $0x228] sm:$0xff]  ;;  %v5830_v17 = vld [vmem:[%s10055_s1 + $0x170] sm:$0xff]  ;;  %v5844_v56 = vld [vmem:[%s10055_s1 + $0x178] sm:$0xff] }
  0x42   :  { %v795_v44 = vadd.f32 %v773_v24, %v728_v28  ;;  %v883_v45 = vadd.f32 %v861_v32, %v839_v58  ;;  %v884_v46 = vadd.f32 %v862_v35, %v840_v30  ;;  %v972_v54 = vmul.f32 %v4571_v39, %v5490_v20  ;;  %v5853_v35 = vld [vmem:[%s10055_s1 + $0x380] sm:$0xff] }
  0x43   :  { %v796_v53 = vadd.f32 %v774_v25, %v729_v18  ;;  %v973_v55 = vmul.f32 %v4572_v40, %v5490_v20  ;;  %v150_v59 = vmul.f32 %v5466_v7, %v5781_v41  ;;  %v151_v4 = vmul.f32 %v5466_v7, %v5787_v43  ;;  %v5862_v18 = vld [vmem:[%s10055_s1 + $0x388] sm:$0xff] }
  0x44   :  { %v817_v61 = vmax.f32 %v595_v13, %v795_v44  ;;  %v927_v2 = vadd.f32 %v905_v29, %v883_v45  ;;  %v928_v3 = vadd.f32 %v906_v48, %v884_v46  ;;  %v197_v10 = vmul.f32 %v5793_v51, %v5473_v11  ;;  %10092 = vst [vmem:[#allocation6_spill] sm:$0xff] %v5862_v18 }
  0x45   :  { %v818_v9 = vmax.f32 %v596_v42, %v796_v53  ;;  %v198_v14 = vmul.f32 %v5798_v49, %v5473_v11  ;;  %v266_v15 = vmul.f32 %v5803_v50, %v5475_v12  ;;  %v267_v25 = vmul.f32 %v5812_v60, %v5475_v12 }
  0x46   :  { %v994_v23 = vadd.f32 %v972_v54, %v927_v2  ;;  %v995_v24 = vadd.f32 %v973_v55, %v928_v3  ;;  %v335_v27 = vmul.f32 %v5825_v16, %v5490_v20  ;;  %v219_v58 = vadd.f32 %v197_v10, %v150_v59  ;;  %v5875_v59 = vld [vmem:[%s10055_s1 + $0x430] sm:$0xff]  ;;  %v5887_v10 = vld [vmem:[%s10055_s1 + $0x4e0] sm:$0xff] }
  0x47   :  { %v220_v28 = vadd.f32 %v198_v14, %v151_v4  ;;  %v336_v30 = vmul.f32 %v5837_v26, %v5490_v20  ;;  %v379_v32 = vmul.f32 %v5793_v51, %v5466_v7  ;;  %v380_v13 = vmul.f32 %v5798_v49, %v5466_v7  ;;  %10093 = vst [vmem:[#allocation7_spill] sm:$0xff] %v5875_v59  ;;  %v5892_v14 = vld [vmem:[%s10055_s1 + $0x4e8] sm:$0xff] }
  0x48   :  { %v1016_v39 = vmax.f32 %v817_v61, %v994_v23  ;;  %v1017_v40 = vmax.f32 %v818_v9, %v995_v24  ;;  %v424_v42 = vmul.f32 %v5830_v17, %v5473_v11  ;;  %v288_v29 = vadd.f32 %v266_v15, %v219_v58  ;;  %v5880_v61 = vld [vmem:[%s10055_s1 + $0x438] sm:$0xff]  ;;  %10095 = vst [vmem:[#allocation9_spill] sm:$0xff] %v5887_v10 }
  0x49   :  { %v289_v44 = vadd.f32 %v267_v25, %v220_v28  ;;  %v425_v45 = vmul.f32 %v5844_v56, %v5473_v11  ;;  %v468_v46 = vmul.f32 %v5825_v16, %v5475_v12  ;;  %v469_v54 = vmul.f32 %v5837_v26, %v5475_v12  ;;  %10094 = vst [vmem:[#allocation8_spill] sm:$0xff] %v5880_v61 }
  0x4a   :  { %v5268_v48 = vpack.c.bf16 %v1017_v40, %v1016_v39  ;;  %v446_v53 = vadd.f32 %v424_v42, %v379_v32  ;;  %v535_v55 = vmul.f32 %v5853_v35, %v5490_v20  ;;  %v357_v2 = vadd.f32 %v335_v27, %v288_v29  ;;  %10096 = vst [vmem:[#allocation10_spill] sm:$0xff] %v5892_v14 }
  0x4b   :  { %v358_v3 = vadd.f32 %v336_v30, %v289_v44  ;;  %v447_v4 = vadd.f32 %v425_v45, %v380_v13  ;;  %v536_v9 = vmul.f32 %v5862_v18, %v5490_v20  ;;  %v601_v23 = vmul.f32 %v5803_v50, %v5466_v7 }
  0x4c   :  { %5269 = vmatprep.subr.bf16.mxu1 %v5268_v48  ;;  %v490_v15 = vadd.f32 %v468_v46, %v446_v53  ;;  %v602_v24 = vmul.f32 %v5812_v60, %v5466_v7  ;;  %v623_v25 = vmul.f32 %v5825_v16, %v5473_v11  ;;  %v624_v58 = vmul.f32 %v5837_v26, %v5473_v11  ;;  %v5917_v46 = vld [vmem:[%s10055_s1 + $0x590] sm:$0xff] }
  0x4d   :  { %v491_v27 = vadd.f32 %v469_v54, %v447_v4  ;;  %v690_v28 = vmul.f32 %v5875_v59, %v5475_v12  ;;  %v691_v30 = vmul.f32 %v5880_v61, %v5475_v12  ;;  %v757_v40 = vmul.f32 %v5887_v10, %v5490_v20  ;;  %10097 = vst [vmem:[#allocation11_spill] sm:$0xff] %v5917_v46  ;;  %v5926_v4 = vld [vmem:[%s10055_s1 + $0x598] sm:$0xff] }
  0x4e   :  { %v557_v32 = vadd.f32 %v535_v55, %v490_v15  ;;  %v645_v39 = vadd.f32 %v623_v25, %v601_v23  ;;  %v758_v13 = vmul.f32 %v5892_v14, %v5490_v20  ;;  %v646_v29 = vadd.f32 %v624_v58, %v602_v24  ;;  %10098 = vst [vmem:[#allocation12_spill] sm:$0xff] %v5926_v4 }
  0x4f   :  { %v558_v42 = vadd.f32 %v536_v9, %v491_v27  ;;  %v823_v44 = vmul.f32 %v5825_v16, %v5466_v7  ;;  %v824_v45 = vmul.f32 %v5837_v26, %v5466_v7  ;;  %v845_v54 = vmul.f32 %v5853_v35, %v5473_v11  ;;  %v145_v9 = vld [vmem:[%s10055_s1 + $0xa0] sm:$0xff]  ;;  %v4417_v27 = vld [vmem:[%s10055_s1 + $0x150] sm:$0xff] }
  0x50   :  { %v579_v48 = vmax.f32 %v357_v2, %v557_v32  ;;  %v712_v53 = vadd.f32 %v690_v28, %v645_v39  ;;  %v846_v55 = vmul.f32 %v5862_v18, %v5473_v11  ;;  %v146_v2 = vld [vmem:[%s10055_s1 + $0xa8] sm:$0x1]  ;;  %v713_v23 = vadd.f32 %v691_v30, %v646_v29  ;;  %v4440_v30 = vld [vmem:[%s10055_s1 + $0x2b0] sm:$0xff] }
  0x51   :  { %v580_v15 = vmax.f32 %v358_v3, %v558_v42  ;;  %v889_v24 = vmul.f32 %v5887_v10, %v5475_v12  ;;  %v890_v25 = vmul.f32 %v5892_v14, %v5475_v12  ;;  %v867_v28 = vadd.f32 %v845_v54, %v823_v44  ;;  %v4418_v3 = vld [vmem:[%s10055_s1 + $0x158] sm:$0x1] }
  0x52   :  { %v779_v58 = vadd.f32 %v757_v40, %v712_v53  ;;  %v868_v32 = vadd.f32 %v846_v55, %v824_v45  ;;  %v956_v39 = vmul.f32 %v5917_v46, %v5490_v20  ;;  %v4441_v42 = vld [vmem:[%s10055_s1 + $0x2b8] sm:$0x1]  ;;  %v780_v29 = vadd.f32 %v758_v13, %v713_v23  ;;  %v4463_v13 = vld [vmem:[%s10055_s1 + $0x360] sm:$0xff] }
  0x53   :  { %v957_v40 = vmul.f32 %v5926_v4, %v5490_v20  ;;  %v168_v44 = vmul.f32 %v5466_v7, %v145_v9  ;;  %v169_v45 = vmul.f32 %v5466_v7, %v146_v2  ;;  %v911_v54 = vadd.f32 %v889_v24, %v867_v28  ;;  %v4485_v9 = vld [vmem:[%s10055_s1 + $0x200] sm:$0xff] }
  0x54   :  { %v801_v53 = vmax.f32 %v579_v48, %v779_v58  ;;  %v912_v55 = vadd.f32 %v890_v25, %v868_v32  ;;  %v215_v0 = vmul.f32 %v4417_v27, %v5473_v11  ;;  %v802_v46 = vmax.f32 %v580_v15, %v780_v29  ;;  %v4464_v15 = vld [vmem:[%s10055_s1 + $0x368] sm:$0x1] }
  0x55   :  { %v216_v14 = vmul.f32 %v4418_v3, %v5473_v11  ;;  %v284_v10 = vmul.f32 %v4440_v30, %v5475_v12  ;;  %v285_v61 = vmul.f32 %v4441_v42, %v5475_v12  ;;  %v978_v48 = vadd.f32 %v956_v39, %v911_v54  ;;  %v4486_v25 = vld [vmem:[%s10055_s1 + $0x208] sm:$0x1] }
  0x56   :  { %v979_v2 = vadd.f32 %v957_v40, %v912_v55  ;;  %v237_v23 = vadd.f32 %v215_v0, %v168_v44  ;;  %v353_v24 = vmul.f32 %v4463_v13, %v5490_v20  ;;  %v354_v28 = vmul.f32 %v4464_v15, %v5490_v20  ;;  %v4507_v0 = vld [vmem:[%s10055_s1 + $0x410] sm:$0xff]  ;;  %v4508_v55 = vld [vmem:[%s10055_s1 + $0x418] sm:$0x1] }
  0x57   :  { %v238_v58 = vadd.f32 %v216_v14, %v169_v45  ;;  %v397_v32 = vmul.f32 %v4417_v27, %v5466_v7  ;;  %v398_v29 = vmul.f32 %v4418_v3, %v5466_v7  ;;  %v1000_v39 = vmax.f32 %v801_v53, %v978_v48 }
  0x58   :  { %v1001_v40 = vmax.f32 %v802_v46, %v979_v2  ;;  %v306_v44 = vadd.f32 %v284_v10, %v237_v23  ;;  %v442_v54 = vmul.f32 %v4485_v9, %v5473_v11  ;;  %v443_v45 = vmul.f32 %v4486_v25, %v5473_v11  ;;  %v4529_v10 = vld [vmem:[%s10055_s1 + $0x4c0] sm:$0xff]  ;;  %v4530_v46 = vld [vmem:[%s10055_s1 + $0x4c8] sm:$0x1] }
  0x59   :  { %v307_v14 = vadd.f32 %v285_v61, %v238_v58  ;;  %v486_v27 = vmul.f32 %v4463_v13, %v5475_v12  ;;  %v487_v3 = vmul.f32 %v4464_v15, %v5475_v12  ;;  %v553_v53 = vmul.f32 %v4507_v0, %v5490_v20  ;;  %v4551_v61 = vld [vmem:[%s10055_s1 + $0x570] sm:$0xff] }
  0x5a   :  { %v5270_v4 = vpack.c.bf16 %v1001_v40, %v1000_v39  ;;  %v375_v59 = vadd.f32 %v353_v24, %v306_v44  ;;  %v464_v18 = vadd.f32 %v442_v54, %v397_v32  ;;  %v465_v48 = vadd.f32 %v443_v45, %v398_v29  ;;  %v4552_v24 = vld [vmem:[%s10055_s1 + $0x578] sm:$0x1] }
  0x5b   :  { %v376_v9 = vadd.f32 %v354_v28, %v307_v14  ;;  %v554_v2 = vmul.f32 %v4508_v55, %v5490_v20  ;;  %v619_v23 = vmul.f32 %v4440_v30, %v5466_v7  ;;  %v620_v58 = vmul.f32 %v4441_v42, %v5466_v7 }
  0x5c   :  { %5271 = vmatpush3.bf16.msra.mxu1 %v5270_v4  ;;  %v508_v25 = vadd.f32 %v486_v27, %v464_v18  ;;  %v641_v32 = vmul.f32 %v4463_v13, %v5473_v11  ;;  %v642_v39 = vmul.f32 %v4464_v15, %v5473_v11  ;;  %v509_v40 = vadd.f32 %v487_v3, %v465_v48  ;;  %v4573_v3 = vld [vmem:[%s10055_s1 + $0x620] sm:$0xff] }
  0x5d   :  { %v708_v28 = vmul.f32 %v4529_v10, %v5475_v12  ;;  %v709_v29 = vmul.f32 %v4530_v46, %v5475_v12  ;;  %v775_v44 = vmul.f32 %v4551_v61, %v5490_v20  ;;  %v776_v45 = vmul.f32 %v4552_v24, %v5490_v20 }
  0x5e   :  { %v575_v30 = vadd.f32 %v553_v53, %v508_v25  ;;  %v663_v54 = vadd.f32 %v641_v32, %v619_v23  ;;  %v664_v14 = vadd.f32 %v642_v39, %v620_v58  ;;  %v576_v4 = vadd.f32 %v554_v2, %v509_v40  ;;  %v4574_v23 = vld [vmem:[%s10055_s1 + $0x628] sm:$0x1]  ;;  %v6033_v25 = vld [vmem:[%s10055_s1 + $0xd0] sm:$0xff] }
  0x5f   :  { %v841_v18 = vmul.f32 %v4463_v13, %v5466_v7  ;;  %v842_v42 = vmul.f32 %v4464_v15, %v5466_v7  ;;  %v863_v27 = vmul.f32 %v4507_v0, %v5473_v11  ;;  %v864_v53 = vmul.f32 %v4508_v55, %v5473_v11  ;;  %v6021_v13 = vld [vmem:[%s10055_s1 + $0x20] sm:$0xff]  ;;  %v6026_v15 = vld [vmem:[%s10055_s1 + $0x28] sm:$0xff]  ;;  %10099 = vst [vmem:[#allocation13_spill] sm:$0xff] %v6033_v25 }
  0x60   :  { %v597_v10 = vmax.f32 %v375_v59, %v575_v30  ;;  %v730_v46 = vadd.f32 %v708_v28, %v663_v54  ;;  %v731_v48 = vadd.f32 %v709_v29, %v664_v14  ;;  %v598_v0 = vmax.f32 %v376_v9, %v576_v4  ;;  %v6039_v28 = vld [vmem:[%s10055_s1 + $0xd8] sm:$0xff] }
  0x61   :  { %v885_v59 = vadd.f32 %v863_v27, %v841_v18  ;;  %v907_v2 = vmul.f32 %v4551_v61, %v5475_v12  ;;  %v908_v55 = vmul.f32 %v4552_v24, %v5475_v12  ;;  %v886_v39 = vadd.f32 %v864_v53, %v842_v42  ;;  %10100 = vst [vmem:[#allocation14_spill] sm:$0xff] %v6039_v28  ;;  %v6044_v61 = vld [vmem:[%s10055_s1 + $0x230] sm:$0xff]  ;;  %v6049_v9 = vld [vmem:[%s10055_s1 + $0x238] sm:$0xff]  ;;  %v6063_v18 = vld [vmem:[%s10055_s1 + $0x2e0] sm:$0xff] }
  0x62   :  { %v797_v58 = vadd.f32 %v775_v44, %v730_v46  ;;  %v798_v32 = vadd.f32 %v776_v45, %v731_v48  ;;  %v974_v40 = vmul.f32 %v4573_v3, %v5490_v20  ;;  %10101 = vst [vmem:[#allocation15_spill] sm:$0xff] %v6044_v61  ;;  %10102 = vst [vmem:[#allocation16_spill] sm:$0xff] %v6049_v9  ;;  %v6076_v46 = vld [vmem:[%s10055_s1 + $0x2e8] sm:$0xff]  ;;  %v6081_v48 = vld [vmem:[%s10055_s1 + $0x180] sm:$0xff] }
  0x63   :  { %v929_v24 = vadd.f32 %v907_v2, %v885_v59  ;;  %v975_v29 = vmul.f32 %v4574_v23, %v5490_v20  ;;  %v152_v44 = vmul.f32 %v5466_v7, %v6021_v13  ;;  %v153_v30 = vmul.f32 %v5466_v7, %v6026_v15  ;;  %10103 = vst [vmem:[#allocation17_spill] sm:$0xff] %v6063_v18  ;;  %v6086_v53 = vld [vmem:[%s10055_s1 + $0x188] sm:$0xff] }
  0x64   :  { %v6056_v54 = vmax.f32 %v597_v10, %v797_v58  ;;  %v820_v14 = vmax.f32 %v598_v0, %v798_v32  ;;  %v930_v45 = vadd.f32 %v908_v55, %v886_v39  ;;  %v199_v4 = vmul.f32 %v6033_v25, %v5473_v11  ;;  %10104 = vst [vmem:[#allocation18_spill] sm:$0xff] %v6076_v46  ;;  %v6095_v55 = vld [vmem:[%s10055_s1 + $0x390] sm:$0xff] }
  0x65   :  { %v6065_v42 = vadd.f32 %v974_v40, %v929_v24  ;;  %v200_v27 = vmul.f32 %v6039_v28, %v5473_v11  ;;  %v268_v3 = vmul.f32 %v6044_v61, %v5475_v12  ;;  %v269_v10 = vmul.f32 %v6049_v9, %v5475_v12  ;;  %10105 = vst [vmem:[#allocation19_spill] sm:$0xff] %v6081_v48  ;;  %v6106_v24 = vld [vmem:[%s10055_s1 + $0x398] sm:$0xff] }
  0x66   :  { %10106 = vst [vmem:[#allocation20_spill] sm:$0xff] %v6086_v53  ;;  %v997_v23 = vadd.f32 %v975_v29, %v930_v45  ;;  %v221_v0 = vadd.f32 %v199_v4, %v152_v44  ;;  %v337_v59 = vmul.f32 %v6063_v18, %v5490_v20  ;;  %v338_v2 = vmul.f32 %v6076_v46, %v5490_v20 }
  0x67   :  { %10107 = vst [vmem:[#allocation21_spill] sm:$0xff] %v6095_v55  ;;  %v1018_v58 = vmax.f32 %v6056_v54, %v6065_v42  ;;  %v222_v32 = vadd.f32 %v200_v27, %v153_v30  ;;  %v381_v39 = vmul.f32 %v6033_v25, %v5466_v7  ;;  %v382_v40 = vmul.f32 %v6039_v28, %v5466_v7 }
  0x68   :  { %10108 = vst [vmem:[#allocation22_spill] sm:$0xff] %v6106_v24  ;;  %v1019_v29 = vmax.f32 %v820_v14, %v997_v23  ;;  %v290_v44 = vadd.f32 %v268_v3, %v221_v0  ;;  %v426_v45 = vmul.f32 %v6081_v48, %v5473_v11  ;;  %v427_v54 = vmul.f32 %v6086_v53, %v5473_v11  ;;  %v6121_v14 = vld [vmem:[%s10055_s1 + $0x440] sm:$0xff]  ;;  %v6133_v53 = vld [vmem:[%s10055_s1 + $0x4f0] sm:$0xff] }
  0x69   :  { %v291_v30 = vadd.f32 %v269_v10, %v222_v32  ;;  %v470_v4 = vmul.f32 %v6063_v18, %v5475_v12  ;;  %v471_v42 = vmul.f32 %v6076_v46, %v5475_v12  ;;  %v537_v27 = vmul.f32 %v6095_v55, %v5490_v20  ;;  %10109 = vst [vmem:[#allocation23_spill] sm:$0xff] %v6121_v14  ;;  %v6128_v32 = vld [vmem:[%s10055_s1 + $0x448] sm:$0xff] }
  0x6a   :  { %1041 = vst [vmem:[#allocation2 + $0xa8] sm:$0x1] %v1019_v29  ;;  %v359_v3 = vadd.f32 %v337_v59, %v290_v44  ;;  %v448_v23 = vadd.f32 %v426_v45, %v381_v39  ;;  %v449_v0 = vadd.f32 %v427_v54, %v382_v40  ;;  %v538_v10 = vmul.f32 %v6106_v24, %v5490_v20  ;;  %v6138_v29 = vld [vmem:[%s10055_s1 + $0x4f8] sm:$0xff] }
  0x6b   :  { %10110 = vst [vmem:[#allocation24_spill] sm:$0xff] %v6128_v32  ;;  %v360_v59 = vadd.f32 %v338_v2, %v291_v30  ;;  %v603_v39 = vmul.f32 %v6044_v61, %v5466_v7  ;;  %v604_v40 = vmul.f32 %v6049_v9, %v5466_v7  ;;  %v625_v44 = vmul.f32 %v6063_v18, %v5473_v11 }
  0x6c   :  { %v492_v45 = vadd.f32 %v470_v4, %v448_v23  ;;  %v493_v54 = vadd.f32 %v471_v42, %v449_v0  ;;  %v626_v48 = vmul.f32 %v6076_v46, %v5473_v11  ;;  %v692_v28 = vmul.f32 %v6121_v14, %v5475_v12 }
  0x6d   :  { %v647_v2 = vadd.f32 %v625_v44, %v603_v39  ;;  %v693_v30 = vmul.f32 %v6128_v32, %v5475_v12  ;;  %v759_v9 = vmul.f32 %v6133_v53, %v5490_v20  ;;  %v760_v61 = vmul.f32 %v6138_v29, %v5490_v20 }
  0x6e   :  { %v559_v4 = vadd.f32 %v537_v27, %v492_v45  ;;  %v560_v42 = vadd.f32 %v538_v10, %v493_v54  ;;  %v648_v23 = vadd.f32 %v626_v48, %v604_v40  ;;  %v825_v0 = vmul.f32 %v6063_v18, %v5466_v7  ;;  %v6175_v48 = vld [vmem:[%s10055_s1 + $0x5a0] sm:$0xff]  ;;  %v6180_v27 = vld [vmem:[%s10055_s1 + $0x5a8] sm:$0xff] }
  0x6f   :  { %v714_v39 = vadd.f32 %v692_v28, %v647_v2  ;;  %v826_v44 = vmul.f32 %v6076_v46, %v5466_v7  ;;  %v847_v32 = vmul.f32 %v6095_v55, %v5473_v11  ;;  %v848_v14 = vmul.f32 %v6106_v24, %v5473_v11 }
  0x70   :  { %v581_v28 = vmax.f32 %v359_v3, %v559_v4  ;;  %v582_v10 = vmax.f32 %v360_v59, %v560_v42  ;;  %v715_v40 = vadd.f32 %v693_v30, %v648_v23  ;;  %v891_v45 = vmul.f32 %v6133_v53, %v5475_v12 }
  0x71   :  { %v3841_v54 = vld [vmem:[#allocation2 + $0xa8] sm:$0xff]  ;;  %v781_v2 = vadd.f32 %v759_v9, %v714_v39  ;;  %v869_v24 = vadd.f32 %v847_v32, %v825_v0  ;;  %v870_v55 = vadd.f32 %v848_v14, %v826_v44  ;;  %v892_v46 = vmul.f32 %v6138_v29, %v5475_v12 }
  0x72   :  { %v5272_v18 = vpack.c.bf16 %v3841_v54, %v1018_v58  ;;  %v782_v25 = vadd.f32 %v760_v61, %v715_v40  ;;  %v958_v3 = vmul.f32 %v6175_v48, %v5490_v20  ;;  %v959_v59 = vmul.f32 %v6180_v27, %v5490_v20 }
  0x73   :  { %v803_v30 = vmax.f32 %v581_v28, %v781_v2  ;;  %v913_v4 = vadd.f32 %v891_v45, %v869_v24  ;;  %v914_v42 = vadd.f32 %v892_v46, %v870_v55  ;;  %v6191_v9 = vstv %s6146_s17 }
  0x74   :  { %5273 = vmatprep.subr.bf16.mxu1 %v5272_v18  ;;  %v804_v14 = vmax.f32 %v582_v10, %v782_v25  ;;  %v1066_v32 = vmul.f32 %v6191_v9, %v5541_v5  ;;  %v1067_v61 = vmul.f32 %v6191_v9, %v5546_v6  ;;  %v6198_v58 = vstv %s6152_s18  ;;  %s6921_s18 = sld [smem:[#allocation3 + $0x180]] }
  0x75   :  { %v980_v23 = vadd.f32 %v958_v3, %v913_v4  ;;  %v981_v0 = vadd.f32 %v959_v59, %v914_v42  ;;  %v1112_v39 = vmul.f32 %v5551_v8, %v6198_v58  ;;  %v1113_v46 = vmul.f32 %v5559_v19, %v6198_v58 }
  0x76   :  { %v6205_v55 = vstv %s6162_s19  ;;  %v6208_v18 = vstv %s6164_s20  ;;  %v1292_v5 = vmul.f32 %v5551_v8, %v6191_v9  ;;  %v1293_v6 = vmul.f32 %v5559_v19, %v6191_v9  ;;  %s6923_s19 = sld [smem:[#allocation3 + $0x181]]  ;;  %s6931_s20 = sld [smem:[#allocation3 + $0x182]] }
  0x77   :  { %v1002_v25 = vmax.f32 %v803_v30, %v980_v23  ;;  %v1003_v24 = vmax.f32 %v804_v14, %v981_v0  ;;  %v1134_v44 = vadd.f32 %v1112_v39, %v1066_v32  ;;  %v1135_v28 = vadd.f32 %v1113_v46, %v1067_v61 }
  0x78   :  { %v1180_v10 = vmul.f32 %v5564_v21, %v6205_v55  ;;  %v1181_v40 = vmul.f32 %v5569_v22, %v6205_v55  ;;  %v1248_v45 = vmul.f32 %v5581_v31, %v6208_v18  ;;  %v1249_v54 = vmul.f32 %v5592_v36, %v6208_v18 }
  0x79   :  { %v5274_v8 = vpack.c.bf16 %v1003_v24, %v1002_v25  ;;  %v1336_v19 = vmul.f32 %v5597_v37, %v6198_v58  ;;  %v1337_v2 = vmul.f32 %v5602_v38, %v6198_v58  ;;  %v1380_v3 = vmul.f32 %v5581_v31, %v6205_v55 }
  0x7a   :  { %v1202_v59 = vadd.f32 %v1180_v10, %v1134_v44  ;;  %v1203_v30 = vadd.f32 %v1181_v40, %v1135_v28  ;;  %v1381_v4 = vmul.f32 %v5592_v36, %v6205_v55  ;;  %v1446_v42 = vmul.f32 %v5615_v47, %v6208_v18 }
  0x7b   :  { %5275 = vmatpush3.bf16.msra.mxu1 %v5274_v8  ;;  %v1358_v14 = vadd.f32 %v1336_v19, %v1292_v5  ;;  %v1359_v32 = vadd.f32 %v1337_v2, %v1293_v6  ;;  %v1447_v37 = vmul.f32 %v5624_v52, %v6208_v18  ;;  %v1512_v38 = vmul.f32 %v5564_v21, %v6191_v9  ;;  %v131_v19 = vld [vmem:[%s10055_s1 + $0x30] sm:$0xff] }
  0x7c   :  { %v1270_v61 = vadd.f32 %v1248_v45, %v1202_v59  ;;  %v1271_v23 = vadd.f32 %v1249_v54, %v1203_v30  ;;  %v1513_v0 = vmul.f32 %v5569_v22, %v6191_v9  ;;  %v1534_v39 = vmul.f32 %v5581_v31, %v6198_v58 }
  0x7d   :  { %v1402_v46 = vadd.f32 %v1380_v3, %v1358_v14  ;;  %v1403_v25 = vadd.f32 %v1381_v4, %v1359_v32  ;;  %v1535_v5 = vmul.f32 %v5592_v36, %v6198_v58  ;;  %v1600_v6 = vmul.f32 %v5633_v57, %v6205_v55  ;;  %v4404_v14 = vld [vmem:[%s10055_s1 + $0xe8] sm:$0xff] }
  0x7e   :  { %v1556_v24 = vadd.f32 %v1534_v39, %v1512_v38  ;;  %v1601_v21 = vmul.f32 %v5640_v62, %v6205_v55  ;;  %v1666_v44 = vmul.f32 %v5645_v63, %v6208_v18  ;;  %v1667_v22 = vmul.f32 %v5650_v1, %v6208_v18 }
  0x7f   :  { %v1468_v28 = vadd.f32 %v1446_v42, %v1402_v46  ;;  %v1469_v10 = vadd.f32 %v1447_v37, %v1403_v25  ;;  %v1557_v40 = vadd.f32 %v1535_v5, %v1513_v0  ;;  %v1732_v45 = vmul.f32 %v5581_v31, %v6191_v9  ;;  %v4403_v42 = vld [vmem:[%s10055_s1 + $0xe0] sm:$0xff] }
  0x80   :  { %v1622_v54 = vadd.f32 %v1600_v6, %v1556_v24  ;;  %v1733_v57 = vmul.f32 %v5592_v36, %v6191_v9  ;;  %v1754_v8 = vmul.f32 %v5615_v47, %v6198_v58  ;;  %v1755_v62 = vmul.f32 %v5624_v52, %v6198_v58  ;;  %v132_v36 = vld [vmem:[%s10055_s1 + $0x38] sm:$0xff]  ;;  %v4471_v24 = vld [vmem:[%s10055_s1 + $0x190] sm:$0xff] }
  0x81   :  { %v1490_v2 = vmax.f32 %v1270_v61, %v1468_v28  ;;  %v1491_v3 = vmax.f32 %v1271_v23, %v1469_v10  ;;  %v1623_v59 = vadd.f32 %v1601_v21, %v1557_v40  ;;  %v1798_v31 = vmul.f32 %v5645_v63, %v6205_v55  ;;  %v4426_v63 = vld [vmem:[%s10055_s1 + $0x240] sm:$0xff]  ;;  %v4427_v61 = vld [vmem:[%s10055_s1 + $0x248] sm:$0xff]  ;;  %v4450_v28 = vld [vmem:[%s10055_s1 + $0x2f8] sm:$0xff] }
  0x82   :  { %v1688_v30 = vadd.f32 %v1666_v44, %v1622_v54  ;;  %v1776_v4 = vadd.f32 %v1754_v8, %v1732_v45  ;;  %v1777_v47 = vadd.f32 %v1755_v62, %v1733_v57  ;;  %v1799_v52 = vmul.f32 %v5650_v1, %v6205_v55  ;;  %v4472_v40 = vld [vmem:[%s10055_s1 + $0x198] sm:$0xff]  ;;  %v4493_v62 = vld [vmem:[%s10055_s1 + $0x3a0] sm:$0xff] }
  0x83   :  { %v1689_v32 = vadd.f32 %v1667_v22, %v1623_v59  ;;  %v1864_v37 = vmul.f32 %v5681_v33, %v6208_v18  ;;  %v1865_v38 = vmul.f32 %v5686_v34, %v6208_v18  ;;  %v154_v1 = vmul.f32 %v5466_v7, %v131_v19  ;;  %v4449_v34 = vld [vmem:[%s10055_s1 + $0x2f0] sm:$0xff] }
  0x84   :  { %v1710_v23 = vmax.f32 %v1490_v2, %v1688_v30  ;;  %v1820_v0 = vadd.f32 %v1798_v31, %v1776_v4  ;;  %v1821_v39 = vadd.f32 %v1799_v52, %v1777_v47  ;;  %v155_v46 = vmul.f32 %v5466_v7, %v132_v36  ;;  %v4494_v31 = vld [vmem:[%s10055_s1 + $0x3a8] sm:$0xff] }
  0x85   :  { %v1711_v25 = vmax.f32 %v1491_v3, %v1689_v32  ;;  %v201_v5 = vmul.f32 %v4403_v42, %v5473_v11  ;;  %v202_v6 = vmul.f32 %v4404_v14, %v5473_v11  ;;  %v270_v33 = vmul.f32 %v4426_v63, %v5475_v12 }
  0x86   :  { %v1886_v21 = vadd.f32 %v1864_v37, %v1820_v0  ;;  %v1887_v44 = vadd.f32 %v1865_v38, %v1821_v39  ;;  %v271_v22 = vmul.f32 %v4427_v61, %v5475_v12  ;;  %v339_v10 = vmul.f32 %v4449_v34, %v5490_v20  ;;  %v4516_v38 = vld [vmem:[%s10055_s1 + $0x458] sm:$0xff] }
  0x87   :  { %v223_v45 = vadd.f32 %v201_v5, %v154_v1  ;;  %v224_v54 = vadd.f32 %v202_v6, %v155_v46  ;;  %v340_v57 = vmul.f32 %v4450_v28, %v5490_v20  ;;  %v383_v8 = vmul.f32 %v4403_v42, %v5466_v7  ;;  %v4537_v46 = vld [vmem:[%s10055_s1 + $0x500] sm:$0xff] }
  0x88   :  { %v1908_v19 = vmax.f32 %v1710_v23, %v1886_v21  ;;  %v1909_v2 = vmax.f32 %v1711_v25, %v1887_v44  ;;  %v384_v3 = vmul.f32 %v4404_v14, %v5466_v7  ;;  %v428_v59 = vmul.f32 %v4471_v24, %v5473_v11  ;;  %v4515_v14 = vld [vmem:[%s10055_s1 + $0x450] sm:$0xff]  ;;  %v4538_v25 = vld [vmem:[%s10055_s1 + $0x508] sm:$0xff] }
  0x89   :  { %v292_v36 = vadd.f32 %v270_v33, %v223_v45  ;;  %v293_v30 = vadd.f32 %v271_v22, %v224_v54  ;;  %v429_v4 = vmul.f32 %v4472_v40, %v5473_v11  ;;  %v472_v47 = vmul.f32 %v4449_v34, %v5475_v12 }
  0x8a   :  { %v5276_v52 = vpack.c.bf16 %v1909_v2, %v1908_v19  ;;  %v450_v42 = vadd.f32 %v428_v59, %v383_v8  ;;  %v473_v32 = vmul.f32 %v4450_v28, %v5475_v12  ;;  %v539_v37 = vmul.f32 %v4493_v62, %v5490_v20  ;;  %v4559_v2 = vld [vmem:[%s10055_s1 + $0x5b0] sm:$0xff] }
  0x8b   :  { %v361_v1 = vadd.f32 %v339_v10, %v292_v36  ;;  %v362_v23 = vadd.f32 %v340_v57, %v293_v30  ;;  %v451_v0 = vadd.f32 %v429_v4, %v384_v3  ;;  %v540_v39 = vmul.f32 %v4494_v31, %v5490_v20  ;;  %v4560_v4 = vld [vmem:[%s10055_s1 + $0x5b8] sm:$0xff] }
  0x8c   :  { %5277 = vmatprep.subr.bf16.mxu1 %v5276_v52  ;;  %v494_v5 = vadd.f32 %v472_v47, %v450_v42  ;;  %v605_v6 = vmul.f32 %v4426_v63, %v5466_v7  ;;  %v606_v33 = vmul.f32 %v4427_v61, %v5466_v7  ;;  %v627_v24 = vmul.f32 %v4449_v34, %v5473_v11 }
  0x8d   :  { %v495_v21 = vadd.f32 %v473_v32, %v451_v0  ;;  %v628_v44 = vmul.f32 %v4450_v28, %v5473_v11  ;;  %v694_v22 = vmul.f32 %v4515_v14, %v5475_v12  ;;  %v695_v10 = vmul.f32 %v4516_v38, %v5475_v12 }
  0x8e   :  { %v561_v40 = vadd.f32 %v539_v37, %v494_v5  ;;  %v649_v45 = vadd.f32 %v627_v24, %v605_v6  ;;  %v761_v54 = vmul.f32 %v4537_v46, %v5490_v20  ;;  %v762_v57 = vmul.f32 %v4538_v25, %v5490_v20 }
  0x8f   :  { %v562_v8 = vadd.f32 %v540_v39, %v495_v21  ;;  %v650_v19 = vadd.f32 %v628_v44, %v606_v33  ;;  %v827_v63 = vmul.f32 %v4449_v34, %v5466_v7  ;;  %v828_v61 = vmul.f32 %v4450_v28, %v5466_v7 }
  0x90   :  { %v583_v3 = vmax.f32 %v361_v1, %v561_v40  ;;  %v716_v59 = vadd.f32 %v694_v22, %v649_v45  ;;  %v849_v36 = vmul.f32 %v4493_v62, %v5473_v11  ;;  %v850_v30 = vmul.f32 %v4494_v31, %v5473_v11 }
  0x91   :  { %v584_v47 = vmax.f32 %v362_v23, %v562_v8  ;;  %v717_v52 = vadd.f32 %v695_v10, %v650_v19  ;;  %v893_v34 = vmul.f32 %v4537_v46, %v5475_v12  ;;  %v894_v28 = vmul.f32 %v4538_v25, %v5475_v12 }
  0x92   :  { %v783_v42 = vadd.f32 %v761_v54, %v716_v59  ;;  %v871_v32 = vadd.f32 %v849_v36, %v827_v63  ;;  %v872_v37 = vadd.f32 %v850_v30, %v828_v61  ;;  %v960_v14 = vmul.f32 %v4559_v2, %v5490_v20 }
  0x93   :  { %v784_v38 = vadd.f32 %v762_v57, %v717_v52  ;;  %v961_v62 = vmul.f32 %v4560_v4, %v5490_v20  ;;  %v1068_v31 = vmul.f32 %v6191_v9, %v5781_v41  ;;  %v1069_v1 = vmul.f32 %v6191_v9, %v5787_v43 }
  0x94   :  { %v805_v23 = vmax.f32 %v583_v3, %v783_v42  ;;  %v915_v0 = vadd.f32 %v893_v34, %v871_v32  ;;  %v916_v39 = vadd.f32 %v894_v28, %v872_v37  ;;  %v1114_v46 = vmul.f32 %v5793_v51, %v6198_v58  ;;  %v10112_v32 = vld [vmem:[#allocation7_spill] sm:$0xff] }
  0x95   :  { %v806_v25 = vmax.f32 %v584_v47, %v784_v38  ;;  %v1115_v5 = vmul.f32 %v5798_v49, %v6198_v58  ;;  %v1182_v6 = vmul.f32 %v5803_v50, %v6205_v55  ;;  %v1183_v33 = vmul.f32 %v5812_v60, %v6205_v55 }
  0x96   :  { %v982_v41 = vadd.f32 %v960_v14, %v915_v0  ;;  %v983_v24 = vadd.f32 %v961_v62, %v916_v39  ;;  %v1136_v21 = vadd.f32 %v1114_v46, %v1068_v31  ;;  %v1250_v43 = vmul.f32 %v5825_v16, %v6208_v18  ;;  %v10113_v14 = vld [vmem:[#allocation8_spill] sm:$0xff] }
  0x97   :  { %v1137_v44 = vadd.f32 %v1115_v5, %v1069_v1  ;;  %v1251_v22 = vmul.f32 %v5837_v26, %v6208_v18  ;;  %v1294_v10 = vmul.f32 %v5793_v51, %v6191_v9  ;;  %v1295_v40 = vmul.f32 %v5798_v49, %v6191_v9 }
  0x98   :  { %v1004_v45 = vmax.f32 %v805_v23, %v982_v41  ;;  %v1005_v54 = vmax.f32 %v806_v25, %v983_v24  ;;  %v1204_v57 = vadd.f32 %v1182_v6, %v1136_v21  ;;  %v1338_v8 = vmul.f32 %v5830_v17, %v6198_v58  ;;  %v10111_v17 = vld [vmem:[#allocation6_spill] sm:$0xff] }
  0x99   :  { %v1205_v19 = vadd.f32 %v1183_v33, %v1137_v44  ;;  %v1339_v63 = vmul.f32 %v5844_v56, %v6198_v58  ;;  %v1382_v61 = vmul.f32 %v5825_v16, %v6205_v55  ;;  %v1383_v2 = vmul.f32 %v5837_v26, %v6205_v55  ;;  %v133_v21 = vld [vmem:[%s10055_s1 + $0x40] sm:$0xff] }
  0x9a   :  { %v5278_v51 = vpack.c.bf16 %v1005_v54, %v1004_v45  ;;  %v1272_v3 = vadd.f32 %v1250_v43, %v1204_v57  ;;  %v1360_v59 = vadd.f32 %v1338_v8, %v1294_v10  ;;  %v1448_v49 = vmul.f32 %v5853_v35, %v6208_v18  ;;  %v10116_v54 = vld [vmem:[#allocation11_spill] sm:$0xff]  ;;  %v4406_v8 = vld [vmem:[%s10055_s1 + $0xf8] sm:$0xff] }
  0x9b   :  { %v1273_v36 = vadd.f32 %v1251_v22, %v1205_v19  ;;  %v1361_v30 = vadd.f32 %v1339_v63, %v1295_v40  ;;  %v1449_v4 = vmul.f32 %v10111_v17, %v6208_v18  ;;  %v1514_v56 = vmul.f32 %v5803_v50, %v6191_v9  ;;  %v10114_v50 = vld [vmem:[#allocation9_spill] sm:$0xff]  ;;  %v4405_v22 = vld [vmem:[%s10055_s1 + $0xf0] sm:$0xff] }
  0x9c   :  { %5279 = vmatpush3.bf16.msra.mxu1 %v5278_v51  ;;  %v1404_v47 = vadd.f32 %v1382_v61, %v1360_v59  ;;  %v1515_v52 = vmul.f32 %v5812_v60, %v6191_v9  ;;  %v1536_v34 = vmul.f32 %v5825_v16, %v6198_v58  ;;  %v1537_v28 = vmul.f32 %v5837_v26, %v6198_v58  ;;  %v10115_v60 = vld [vmem:[#allocation10_spill] sm:$0xff]  ;;  %v4428_v19 = vld [vmem:[%s10055_s1 + $0x250] sm:$0xff]  ;;  %v4429_v63 = vld [vmem:[%s10055_s1 + $0x258] sm:$0xff] }
  0x9d   :  { %v1405_v42 = vadd.f32 %v1383_v2, %v1361_v30  ;;  %v1602_v37 = vmul.f32 %v10112_v32, %v6205_v55  ;;  %v1603_v38 = vmul.f32 %v10113_v14, %v6205_v55  ;;  %v1668_v62 = vmul.f32 %v10114_v50, %v6208_v18  ;;  %v10117_v2 = vld [vmem:[#allocation12_spill] sm:$0xff]  ;;  %v4474_v32 = vld [vmem:[%s10055_s1 + $0x1a8] sm:$0xff] }
  0x9e   :  { %v1470_v31 = vadd.f32 %v1448_v49, %v1404_v47  ;;  %v1558_v1 = vadd.f32 %v1536_v34, %v1514_v56  ;;  %v1559_v23 = vadd.f32 %v1537_v28, %v1515_v52  ;;  %v1669_v0 = vmul.f32 %v10115_v60, %v6208_v18  ;;  %v4452_v28 = vld [vmem:[%s10055_s1 + $0x308] sm:$0xff] }
  0x9f   :  { %v1471_v39 = vadd.f32 %v1449_v4, %v1405_v42  ;;  %v1734_v46 = vmul.f32 %v5825_v16, %v6191_v9  ;;  %v1735_v25 = vmul.f32 %v5837_v26, %v6191_v9  ;;  %v1756_v5 = vmul.f32 %v5853_v35, %v6198_v58  ;;  %v134_v16 = vld [vmem:[%s10055_s1 + $0x48] sm:$0xff]  ;;  %v4451_v4 = vld [vmem:[%s10055_s1 + $0x300] sm:$0xff] }
  0xa0   :  { %v1492_v6 = vmax.f32 %v1272_v3, %v1470_v31  ;;  %v1624_v33 = vadd.f32 %v1602_v37, %v1558_v1  ;;  %v1625_v41 = vadd.f32 %v1603_v38, %v1559_v23  ;;  %v1757_v24 = vmul.f32 %v10111_v17, %v6198_v58  ;;  %v4473_v42 = vld [vmem:[%s10055_s1 + $0x1a0] sm:$0xff] }
  0xa1   :  { %v1493_v43 = vmax.f32 %v1273_v36, %v1471_v39  ;;  %v1778_v44 = vadd.f32 %v1756_v5, %v1734_v46  ;;  %v1800_v26 = vmul.f32 %v10114_v50, %v6205_v55  ;;  %v1801_v35 = vmul.f32 %v10115_v60, %v6205_v55  ;;  %v4496_v5 = vld [vmem:[%s10055_s1 + $0x3b8] sm:$0xff] }
  0xa2   :  { %v1690_v10 = vadd.f32 %v1668_v62, %v1624_v33  ;;  %v1691_v40 = vadd.f32 %v1669_v0, %v1625_v41  ;;  %v1779_v45 = vadd.f32 %v1757_v24, %v1735_v25  ;;  %v1866_v57 = vmul.f32 %v10116_v54, %v6208_v18  ;;  %v4495_v62 = vld [vmem:[%s10055_s1 + $0x3b0] sm:$0xff] }
  0xa3   :  { %v1822_v61 = vadd.f32 %v1800_v26, %v1778_v44  ;;  %v1867_v51 = vmul.f32 %v10117_v2, %v6208_v18  ;;  %v156_v3 = vmul.f32 %v5466_v7, %v133_v21  ;;  %v157_v59 = vmul.f32 %v5466_v7, %v134_v16  ;;  %v4517_v21 = vld [vmem:[%s10055_s1 + $0x460] sm:$0xff] }
  0xa4   :  { %v1712_v49 = vmax.f32 %v1492_v6, %v1690_v10  ;;  %v1713_v36 = vmax.f32 %v1493_v43, %v1691_v40  ;;  %v1823_v30 = vadd.f32 %v1801_v35, %v1779_v45  ;;  %v203_v17 = vmul.f32 %v4405_v22, %v5473_v11  ;;  %v4518_v35 = vld [vmem:[%s10055_s1 + $0x468] sm:$0xff]  ;;  %v4540_v10 = vld [vmem:[%s10055_s1 + $0x518] sm:$0xff] }
  0xa5   :  { %v1888_v56 = vadd.f32 %v1866_v57, %v1822_v61  ;;  %v204_v47 = vmul.f32 %v4406_v8, %v5473_v11  ;;  %v272_v52 = vmul.f32 %v4428_v19, %v5475_v12  ;;  %v273_v34 = vmul.f32 %v4429_v63, %v5475_v12 }
  0xa6   :  { %v1889_v37 = vadd.f32 %v1867_v51, %v1823_v30  ;;  %v225_v14 = vadd.f32 %v203_v17, %v156_v3  ;;  %v341_v38 = vmul.f32 %v4451_v4, %v5490_v20  ;;  %v342_v50 = vmul.f32 %v4452_v28, %v5490_v20 }
  0xa7   :  { %v1910_v31 = vmax.f32 %v1712_v49, %v1888_v56  ;;  %v226_v1 = vadd.f32 %v204_v47, %v157_v59  ;;  %v385_v23 = vmul.f32 %v4405_v22, %v5466_v7  ;;  %v386_v60 = vmul.f32 %v4406_v8, %v5466_v7  ;;  %v4539_v22 = vld [vmem:[%s10055_s1 + $0x510] sm:$0xff] }
  0xa8   :  { %v1911_v0 = vmax.f32 %v1713_v36, %v1889_v37  ;;  %v294_v39 = vadd.f32 %v272_v52, %v225_v14  ;;  %v430_v46 = vmul.f32 %v4473_v42, %v5473_v11  ;;  %v431_v25 = vmul.f32 %v4474_v32, %v5473_v11  ;;  %v4561_v42 = vld [vmem:[%s10055_s1 + $0x5c0] sm:$0xff]  ;;  %v4562_v32 = vld [vmem:[%s10055_s1 + $0x5c8] sm:$0xff] }
  0xa9   :  { %v295_v6 = vadd.f32 %v273_v34, %v226_v1  ;;  %v474_v33 = vmul.f32 %v4451_v4, %v5475_v12  ;;  %v475_v41 = vmul.f32 %v4452_v28, %v5475_v12  ;;  %v541_v24 = vmul.f32 %v4495_v62, %v5490_v20 }
  0xaa   :  { %v5280_v16 = vpack.c.bf16 %v1911_v0, %v1910_v31  ;;  %v363_v43 = vadd.f32 %v341_v38, %v294_v39  ;;  %v452_v44 = vadd.f32 %v430_v46, %v385_v23  ;;  %v453_v26 = vadd.f32 %v431_v25, %v386_v60 }
  0xab   :  { %v364_v40 = vadd.f32 %v342_v50, %v295_v6  ;;  %v542_v45 = vmul.f32 %v4496_v5, %v5490_v20  ;;  %v607_v54 = vmul.f32 %v4428_v19, %v5466_v7  ;;  %v608_v57 = vmul.f32 %v4429_v63, %v5466_v7 }
  0xac   :  { %5281 = vmatprep.subr.bf16.mxu1 %v5280_v16  ;;  %v496_v8 = vadd.f32 %v474_v33, %v452_v44  ;;  %v497_v61 = vadd.f32 %v475_v41, %v453_v26  ;;  %v629_v2 = vmul.f32 %v4451_v4, %v5473_v11  ;;  %v630_v51 = vmul.f32 %v4452_v28, %v5473_v11  ;;  %v10118_v41 = vld [vmem:[#allocation13_spill] sm:$0xff]  ;;  %v10120_v26 = vld [vmem:[#allocation15_spill] sm:$0xff] }
  0xad   :  { %v696_v3 = vmul.f32 %v4517_v21, %v5475_v12  ;;  %v697_v59 = vmul.f32 %v4518_v35, %v5475_v12  ;;  %v763_v49 = vmul.f32 %v4539_v22, %v5490_v20  ;;  %v764_v36 = vmul.f32 %v4540_v10, %v5490_v20  ;;  %v10119_v21 = vld [vmem:[#allocation14_spill] sm:$0xff] }
  0xae   :  { %v563_v30 = vadd.f32 %v541_v24, %v496_v8  ;;  %v564_v17 = vadd.f32 %v542_v45, %v497_v61  ;;  %v651_v19 = vadd.f32 %v629_v2, %v607_v54  ;;  %v652_v56 = vadd.f32 %v630_v51, %v608_v57  ;;  %v10123_v54 = vld [vmem:[#allocation18_spill] sm:$0xff] }
  0xaf   :  { %v829_v63 = vmul.f32 %v4451_v4, %v5466_v7  ;;  %v830_v47 = vmul.f32 %v4452_v28, %v5466_v7  ;;  %v851_v52 = vmul.f32 %v4495_v62, %v5473_v11  ;;  %v852_v34 = vmul.f32 %v4496_v5, %v5473_v11 }
  0xb0   :  { %v585_v37 = vmax.f32 %v363_v43, %v563_v30  ;;  %v586_v14 = vmax.f32 %v364_v40, %v564_v17  ;;  %v718_v38 = vadd.f32 %v696_v3, %v651_v19  ;;  %v719_v50 = vadd.f32 %v697_v59, %v652_v56  ;;  %v10125_v30 = vld [vmem:[#allocation20_spill] sm:$0xff] }
  0xb1   :  { %v873_v31 = vadd.f32 %v851_v52, %v829_v63  ;;  %v874_v4 = vadd.f32 %v852_v34, %v830_v47  ;;  %v895_v28 = vmul.f32 %v4539_v22, %v5475_v12  ;;  %v896_v62 = vmul.f32 %v4540_v10, %v5475_v12  ;;  %v10121_v22 = vld [vmem:[#allocation16_spill] sm:$0xff]  ;;  %v10126_v47 = vld [vmem:[#allocation21_spill] sm:$0xff] }
  0xb2   :  { %v785_v1 = vadd.f32 %v763_v49, %v718_v38  ;;  %v786_v23 = vadd.f32 %v764_v36, %v719_v50  ;;  %v962_v60 = vmul.f32 %v4561_v42, %v5490_v20  ;;  %v963_v0 = vmul.f32 %v4562_v32, %v5490_v20  ;;  %v10124_v49 = vld [vmem:[#allocation19_spill] sm:$0xff] }
  0xb3   :  { %v917_v39 = vadd.f32 %v895_v28, %v873_v31  ;;  %v918_v46 = vadd.f32 %v896_v62, %v874_v4  ;;  %v1070_v25 = vmul.f32 %v6191_v9, %v6021_v13  ;;  %v1071_v5 = vmul.f32 %v6191_v9, %v6026_v15  ;;  %v10122_v15 = vld [vmem:[#allocation17_spill] sm:$0xff] }
  0xb4   :  { %v807_v6 = vmax.f32 %v585_v37, %v785_v1  ;;  %v808_v33 = vmax.f32 %v586_v14, %v786_v23  ;;  %v1116_v24 = vmul.f32 %v10118_v41, %v6198_v58  ;;  %v1117_v16 = vmul.f32 %v10119_v21, %v6198_v58  ;;  %v10127_v14 = vld [vmem:[#allocation22_spill] sm:$0xff]  ;;  %v10128_v23 = vld [vmem:[#allocation23_spill] sm:$0xff] }
  0xb5   :  { %v984_v43 = vadd.f32 %v962_v60, %v917_v39  ;;  %v985_v44 = vadd.f32 %v963_v0, %v918_v46  ;;  %v1184_v35 = vmul.f32 %v10120_v26, %v6205_v55  ;;  %v1185_v10 = vmul.f32 %v10121_v22, %v6205_v55  ;;  %v10129_v39 = vld [vmem:[#allocation24_spill] sm:$0xff] }
  0xb6   :  { %v1138_v13 = vadd.f32 %v1116_v24, %v1070_v25  ;;  %v1139_v40 = vadd.f32 %v1117_v16, %v1071_v5  ;;  %v1252_v45 = vmul.f32 %v10122_v15, %v6208_v18  ;;  %v1253_v57 = vmul.f32 %v10123_v54, %v6208_v18 }
  0xb7   :  { %v1006_v8 = vmax.f32 %v807_v6, %v984_v43  ;;  %v1007_v61 = vmax.f32 %v808_v33, %v985_v44  ;;  %v1296_v2 = vmul.f32 %v10118_v41, %v6191_v9  ;;  %v1297_v51 = vmul.f32 %v10119_v21, %v6191_v9 }
  0xb8   :  { %v1206_v3 = vadd.f32 %v1184_v35, %v1138_v13  ;;  %v1207_v59 = vadd.f32 %v1185_v10, %v1139_v40  ;;  %v1340_v36 = vmul.f32 %v10124_v49, %v6198_v58  ;;  %v1341_v17 = vmul.f32 %v10125_v30, %v6198_v58  ;;  %v135_v13 = vld [vmem:[%s10055_s1 + $0x50] sm:$0xff] }
  0xb9   :  { %v5282_v19 = vpack.c.bf16 %v1007_v61, %v1006_v8  ;;  %v1384_v56 = vmul.f32 %v10122_v15, %v6205_v55  ;;  %v1385_v63 = vmul.f32 %v10123_v54, %v6205_v55  ;;  %v1450_v52 = vmul.f32 %v10126_v47, %v6208_v18  ;;  %v4407_v8 = vld [vmem:[%s10055_s1 + $0x100] sm:$0xff] }
  0xba   :  { %v1274_v34 = vadd.f32 %v1252_v45, %v1206_v3  ;;  %v1275_v42 = vadd.f32 %v1253_v57, %v1207_v59  ;;  %v1362_v32 = vadd.f32 %v1340_v36, %v1296_v2  ;;  %v1363_v37 = vadd.f32 %v1341_v17, %v1297_v51  ;;  %v136_v57 = vld [vmem:[%s10055_s1 + $0x58] sm:$0xff]  ;;  %v4431_v3 = vld [vmem:[%s10055_s1 + $0x268] sm:$0xff] }
  0xbb   :  { %5283 = vmatpush3.bf16.msra.mxu1 %v5282_v19  ;;  %v1451_v38 = vmul.f32 %v10127_v14, %v6208_v18  ;;  %v1516_v50 = vmul.f32 %v10120_v26, %v6191_v9  ;;  %v1517_v31 = vmul.f32 %v10121_v22, %v6191_v9  ;;  %v1538_v4 = vmul.f32 %v10122_v15, %v6198_v58 }
  0xbc   :  { %v1406_v28 = vadd.f32 %v1384_v56, %v1362_v32  ;;  %v1407_v62 = vadd.f32 %v1385_v63, %v1363_v37  ;;  %v1539_v1 = vmul.f32 %v10123_v54, %v6198_v58  ;;  %v1604_v60 = vmul.f32 %v10128_v23, %v6205_v55  ;;  %v4453_v63 = vld [vmem:[%s10055_s1 + $0x310] sm:$0xff]  ;;  %v4454_v32 = vld [vmem:[%s10055_s1 + $0x318] sm:$0xff] }
  0xbd   :  { %v1560_v0 = vadd.f32 %v1538_v4, %v1516_v50  ;;  %v1605_v46 = vmul.f32 %v10129_v39, %v6205_v55  ;;  %v1670_v25 = vmul.f32 %v6133_v53, %v6208_v18  ;;  %v1671_v5 = vmul.f32 %v6138_v29, %v6208_v18  ;;  %v4475_v37 = vld [vmem:[%s10055_s1 + $0x1b0] sm:$0xff] }
  0xbe   :  { %v1472_v6 = vadd.f32 %v1450_v52, %v1406_v28  ;;  %v1473_v33 = vadd.f32 %v1451_v38, %v1407_v62  ;;  %v1561_v41 = vadd.f32 %v1539_v1, %v1517_v31  ;;  %v1736_v24 = vmul.f32 %v10122_v15, %v6191_v9  ;;  %v4497_v28 = vld [vmem:[%s10055_s1 + $0x3c0] sm:$0xff] }
  0xbf   :  { %v1626_v21 = vadd.f32 %v1604_v60, %v1560_v0  ;;  %v1737_v16 = vmul.f32 %v10123_v54, %v6191_v9  ;;  %v1758_v43 = vmul.f32 %v10126_v47, %v6198_v58  ;;  %v1759_v44 = vmul.f32 %v10127_v14, %v6198_v58  ;;  %v4476_v14 = vld [vmem:[%s10055_s1 + $0x1b8] sm:$0xff] }
  0xc0   :  { %v1494_v26 = vmax.f32 %v1274_v34, %v1472_v6  ;;  %v1495_v35 = vmax.f32 %v1275_v42, %v1473_v33  ;;  %v1627_v22 = vadd.f32 %v1605_v46, %v1561_v41  ;;  %v1802_v10 = vmul.f32 %v6133_v53, %v6205_v55  ;;  %v4408_v53 = vld [vmem:[%s10055_s1 + $0x108] sm:$0xff] }
  0xc1   :  { %v1692_v40 = vadd.f32 %v1670_v25, %v1626_v21  ;;  %v1780_v15 = vadd.f32 %v1758_v43, %v1736_v24  ;;  %v1781_v45 = vadd.f32 %v1759_v44, %v1737_v16  ;;  %v1803_v54 = vmul.f32 %v6138_v29, %v6205_v55  ;;  %v4430_v29 = vld [vmem:[%s10055_s1 + $0x260] sm:$0xff]  ;;  %v4519_v21 = vld [vmem:[%s10055_s1 + $0x470] sm:$0xff] }
  0xc2   :  { %v1693_v61 = vadd.f32 %v1671_v5, %v1627_v22  ;;  %v1868_v2 = vmul.f32 %v6175_v48, %v6208_v18  ;;  %v1869_v51 = vmul.f32 %v6180_v27, %v6208_v18  ;;  %v5403_v30 = vmov 0.0|0.0   ;;  %v4498_v5 = vld [vmem:[%s10055_s1 + $0x3c8] sm:$0xff]  ;;  %v4541_v22 = vld [vmem:[%s10055_s1 + $0x520] sm:$0xff] }
  0xc3   :  { %v1714_v59 = vmax.f32 %v1494_v26, %v1692_v40  ;;  %v1824_v49 = vadd.f32 %v1802_v10, %v1780_v15  ;;  %v1825_v36 = vadd.f32 %v1803_v54, %v1781_v45  ;;  %5328 = vmatprep.subr.bf16.mxu0 %v5403_v30  ;;  %v158_v17 = vmul.f32 %v5466_v7, %v135_v13  ;;  %v4542_v10 = vld [vmem:[%s10055_s1 + $0x528] sm:$0xff] }
  0xc4   :  { %v1715_v48 = vmax.f32 %v1495_v35, %v1693_v61  ;;  %v159_v19 = vmul.f32 %v5466_v7, %v136_v57  ;;  %v205_v27 = vmul.f32 %v4407_v8, %v5473_v11  ;;  %v206_v56 = vmul.f32 %v4408_v53, %v5473_v11  ;;  %v4520_v35 = vld [vmem:[%s10055_s1 + $0x478] sm:$0xff]  ;;  %v3773_v54 = vld [vmem:[%s10056_s2 + $0x8] sm:$0xff] }
  0xc5   :  { %v1890_v47 = vadd.f32 %v1868_v2, %v1824_v49  ;;  %v1891_v52 = vadd.f32 %v1869_v51, %v1825_v36  ;;  %v274_v34 = vmul.f32 %v4430_v29, %v5475_v12  ;;  %v275_v42 = vmul.f32 %v4431_v3, %v5475_v12  ;;  %4045 = vmatprep.mubr.f32.mxu1 %v3773_v54 }
  0xc6   :  { %v227_v38 = vadd.f32 %v205_v27, %v158_v17  ;;  %v228_v50 = vadd.f32 %v206_v56, %v159_v19  ;;  %v343_v31 = vmul.f32 %v4453_v63, %v5490_v20  ;;  %v344_v4 = vmul.f32 %v4454_v32, %v5490_v20 }
  0xc7   :  { %v1912_v62 = vmax.f32 %v1714_v59, %v1890_v47  ;;  %v1913_v1 = vmax.f32 %v1715_v48, %v1891_v52  ;;  %v387_v23 = vmul.f32 %v4407_v8, %v5466_v7  ;;  %v388_v60 = vmul.f32 %v4408_v53, %v5466_v7  ;;  %v4563_v47 = vld [vmem:[%s10055_s1 + $0x5d0] sm:$0xff]  ;;  %v4564_v52 = vld [vmem:[%s10055_s1 + $0x5d8] sm:$0xff] }
  0xc8   :  { %v296_v0 = vadd.f32 %v274_v34, %v227_v38  ;;  %v297_v39 = vadd.f32 %v275_v42, %v228_v50  ;;  %v432_v46 = vmul.f32 %v4475_v37, %v5473_v11  ;;  %v433_v25 = vmul.f32 %v4476_v14, %v5473_v11 }
  0xc9   :  { %v5284_v6 = vpack.c.bf16 %v1913_v1, %v1912_v62  ;;  %v476_v33 = vmul.f32 %v4453_v63, %v5475_v12  ;;  %v477_v41 = vmul.f32 %v4454_v32, %v5475_v12  ;;  %v543_v24 = vmul.f32 %v4497_v28, %v5490_v20 }
  0xca   :  { %v365_v16 = vadd.f32 %v343_v31, %v296_v0  ;;  %v366_v43 = vadd.f32 %v344_v4, %v297_v39  ;;  %v454_v44 = vadd.f32 %v432_v46, %v387_v23  ;;  %v455_v26 = vadd.f32 %v433_v25, %v388_v60  ;;  %v1974_v4 = vld [vmem:[%s10055_s1 + $0xa8] sm:$0x1]  ;;  %v4777_v60 = vld [vmem:[%s10055_s1 + $0x150] sm:$0xff]  ;;  %v4778_v0 = vld [vmem:[%s10055_s1 + $0x158] sm:$0x1] }
  0xcb   :  { %5285 = vmatprep.subr.bf16.mxu1 %v5284_v6  ;;  %v544_v13 = vmul.f32 %v4498_v5, %v5490_v20  ;;  %v609_v40 = vmul.f32 %v4430_v29, %v5466_v7  ;;  %v610_v15 = vmul.f32 %v4431_v3, %v5466_v7  ;;  %v631_v45 = vmul.f32 %v4453_v63, %v5473_v11  ;;  %v4800_v6 = vld [vmem:[%s10055_s1 + $0x2b0] sm:$0xff] }
  0xcc   :  { %v498_v57 = vadd.f32 %v476_v33, %v454_v44  ;;  %v499_v8 = vadd.f32 %v477_v41, %v455_v26  ;;  %v632_v53 = vmul.f32 %v4454_v32, %v5473_v11  ;;  %v698_v61 = vmul.f32 %v4519_v21, %v5475_v12  ;;  %v4801_v33 = vld [vmem:[%s10055_s1 + $0x2b8] sm:$0x1] }
  0xcd   :  { %v653_v2 = vadd.f32 %v631_v45, %v609_v40  ;;  %v699_v51 = vmul.f32 %v4520_v35, %v5475_v12  ;;  %v765_v29 = vmul.f32 %v4541_v22, %v5490_v20  ;;  %v766_v3 = vmul.f32 %v4542_v10, %v5490_v20  ;;  %v4846_v45 = vld [vmem:[%s10055_s1 + $0x208] sm:$0x1] }
  0xce   :  { %v565_v59 = vadd.f32 %v543_v24, %v498_v57  ;;  %v566_v49 = vadd.f32 %v544_v13, %v499_v8  ;;  %v654_v36 = vadd.f32 %v632_v53, %v610_v15  ;;  %v831_v17 = vmul.f32 %v4453_v63, %v5466_v7 }
  0xcf   :  { %v720_v48 = vadd.f32 %v698_v61, %v653_v2  ;;  %v832_v19 = vmul.f32 %v4454_v32, %v5466_v7  ;;  %v853_v27 = vmul.f32 %v4497_v28, %v5473_v11  ;;  %v854_v56 = vmul.f32 %v4498_v5, %v5473_v11  ;;  %v1973_v32 = vld [vmem:[%s10055_s1 + $0xa0] sm:$0xff]  ;;  %v4824_v2 = vld [vmem:[%s10055_s1 + $0x368] sm:$0x1] }
  0xd0   :  { %v587_v34 = vmax.f32 %v365_v16, %v565_v59  ;;  %v588_v63 = vmax.f32 %v366_v43, %v566_v49  ;;  %v721_v42 = vadd.f32 %v699_v51, %v654_v36  ;;  %v897_v37 = vmul.f32 %v4541_v22, %v5475_v12  ;;  %v4845_v22 = vld [vmem:[%s10055_s1 + $0x200] sm:$0xff]  ;;  %v4867_v51 = vld [vmem:[%s10055_s1 + $0x410] sm:$0xff]  ;;  %v4868_v36 = vld [vmem:[%s10055_s1 + $0x418] sm:$0x1] }
  0xd1   :  { %v787_v14 = vadd.f32 %v765_v29, %v720_v48  ;;  %v875_v38 = vadd.f32 %v853_v27, %v831_v17  ;;  %v876_v50 = vadd.f32 %v854_v56, %v832_v19  ;;  %v898_v31 = vmul.f32 %v4542_v10, %v5475_v12  ;;  %v4823_v61 = vld [vmem:[%s10055_s1 + $0x360] sm:$0xff] }
  0xd2   :  { %v788_v28 = vadd.f32 %v766_v3, %v721_v42  ;;  %v964_v62 = vmul.f32 %v4563_v47, %v5490_v20  ;;  %v965_v1 = vmul.f32 %v4564_v52, %v5490_v20  ;;  %v6671_v23 = vstv %s6630_s0  ;;  %v4890_v42 = vld [vmem:[%s10055_s1 + $0x4c8] sm:$0x1] }
  0xd3   :  { %v809_v39 = vmax.f32 %v587_v34, %v787_v14  ;;  %v919_v46 = vadd.f32 %v897_v37, %v875_v38  ;;  %v920_v25 = vadd.f32 %v898_v31, %v876_v50  ;;  %v1996_v5 = vmul.f32 %v6671_v23, %v1973_v32  ;;  %v4911_v50 = vld [vmem:[%s10055_s1 + $0x570] sm:$0xff]  ;;  %v4912_v31 = vld [vmem:[%s10055_s1 + $0x578] sm:$0x1] }
  0xd4   :  { %v810_v41 = vmax.f32 %v588_v63, %v788_v28  ;;  %v1997_v24 = vmul.f32 %v6671_v23, %v1974_v4  ;;  %v6688_v21 = vstv %s6641_s7  ;;  %v6691_v16 = vstv %s6643_s8  ;;  %v4889_v63 = vld [vmem:[%s10055_s1 + $0x4c0] sm:$0xff] }
  0xd5   :  { %v986_v43 = vadd.f32 %v964_v62, %v919_v46  ;;  %v987_v44 = vadd.f32 %v965_v1, %v920_v25  ;;  %v2042_v26 = vmul.f32 %v4777_v60, %v6688_v21  ;;  %v2043_v35 = vmul.f32 %v4778_v0, %v6688_v21 }
  0xd6   :  { %v2110_v10 = vmul.f32 %v4800_v6, %v6691_v16  ;;  %v2111_v13 = vmul.f32 %v4801_v33, %v6691_v16  ;;  %v6701_v40 = vstv %s6649_s9  ;;  %v2222_v15 = vmul.f32 %v4777_v60, %v6671_v23 }
  0xd7   :  { %v1008_v54 = vmax.f32 %v809_v39, %v986_v43  ;;  %v1009_v57 = vmax.f32 %v810_v41, %v987_v44  ;;  %v2064_v8 = vadd.f32 %v2042_v26, %v1996_v5  ;;  %v2065_v53 = vadd.f32 %v2043_v35, %v1997_v24  ;;  %v4933_v26 = vld [vmem:[%s10055_s1 + $0x620] sm:$0xff] }
  0xd8   :  { %v2178_v29 = vmul.f32 %v4823_v61, %v6701_v40  ;;  %v2179_v3 = vmul.f32 %v4824_v2, %v6701_v40  ;;  %v2223_v59 = vmul.f32 %v4778_v0, %v6671_v23  ;;  %v2266_v49 = vmul.f32 %v4845_v22, %v6688_v21 }
  0xd9   :  { %v5286_v17 = vpack.c.bf16 %v1009_v57, %v1008_v54  ;;  %v2132_v48 = vadd.f32 %v2110_v10, %v2064_v8  ;;  %v2133_v19 = vadd.f32 %v2111_v13, %v2065_v53  ;;  %v2267_v27 = vmul.f32 %v4846_v45, %v6688_v21  ;;  %v1049_v45 = vld [vmem:[%s10055_s1 + $0x30] sm:$0xff]  ;;  %v1050_v54 = vld [vmem:[%s10055_s1 + $0x38] sm:$0xff] }
  0xda   :  { %v2288_v56 = vadd.f32 %v2266_v49, %v2222_v15  ;;  %v2310_v47 = vmul.f32 %v4823_v61, %v6691_v16  ;;  %v2311_v52 = vmul.f32 %v4824_v2, %v6691_v16  ;;  %v2376_v34 = vmul.f32 %v4867_v51, %v6701_v40  ;;  %v4934_v15 = vld [vmem:[%s10055_s1 + $0x628] sm:$0x1] }
  0xdb   :  { %5287 = vmatpush3.bf16.msra.mxu1 %v5286_v17  ;;  %v2200_v37 = vadd.f32 %v2178_v29, %v2132_v48  ;;  %v2201_v32 = vadd.f32 %v2179_v3, %v2133_v19  ;;  %v2289_v14 = vadd.f32 %v2267_v27, %v2223_v59  ;;  %v2377_v38 = vmul.f32 %v4868_v36, %v6701_v40  ;;  %v4584_v49 = vld [vmem:[%s10055_s1 + $0xe8] sm:$0xff] }
  0xdc   :  { %v2332_v4 = vadd.f32 %v2310_v47, %v2288_v56  ;;  %v2442_v28 = vmul.f32 %v4800_v6, %v6671_v23  ;;  %v2443_v62 = vmul.f32 %v4801_v33, %v6671_v23  ;;  %v2464_v1 = vmul.f32 %v4823_v61, %v6688_v21  ;;  %v4607_v17 = vld [vmem:[%s10055_s1 + $0x248] sm:$0xff] }
  0xdd   :  { %v2333_v60 = vadd.f32 %v2311_v52, %v2289_v14  ;;  %v2465_v0 = vmul.f32 %v4824_v2, %v6688_v21  ;;  %v2530_v39 = vmul.f32 %v4889_v63, %v6691_v16  ;;  %v2531_v46 = vmul.f32 %v4890_v42, %v6691_v16 }
  0xde   :  { %v2398_v25 = vadd.f32 %v2376_v34, %v2332_v4  ;;  %v2486_v5 = vadd.f32 %v2464_v1, %v2442_v28  ;;  %v2596_v41 = vmul.f32 %v4911_v50, %v6701_v40  ;;  %v2597_v24 = vmul.f32 %v4912_v31, %v6701_v40 }
  0xdf   :  { %v2399_v43 = vadd.f32 %v2377_v38, %v2333_v60  ;;  %v2487_v44 = vadd.f32 %v2465_v0, %v2443_v62  ;;  %v2662_v6 = vmul.f32 %v4823_v61, %v6671_v23  ;;  %v2663_v33 = vmul.f32 %v4824_v2, %v6671_v23  ;;  %v4583_v2 = vld [vmem:[%s10055_s1 + $0xe0] sm:$0xff]  ;;  %v4629_v38 = vld [vmem:[%s10055_s1 + $0x2f0] sm:$0xff]  ;;  %v4630_v62 = vld [vmem:[%s10055_s1 + $0x2f8] sm:$0xff] }
  0xe0   :  { %v2420_v35 = vmax.f32 %v2200_v37, %v2398_v25  ;;  %v2552_v22 = vadd.f32 %v2530_v39, %v2486_v5  ;;  %v2684_v10 = vmul.f32 %v4867_v51, %v6688_v21  ;;  %v2685_v13 = vmul.f32 %v4868_v36, %v6688_v21  ;;  %v4606_v36 = vld [vmem:[%s10055_s1 + $0x240] sm:$0xff]  ;;  %v4652_v60 = vld [vmem:[%s10055_s1 + $0x198] sm:$0xff] }
  0xe1   :  { %v2421_v57 = vmax.f32 %v2201_v32, %v2399_v43  ;;  %v2553_v8 = vadd.f32 %v2531_v46, %v2487_v44  ;;  %v2728_v53 = vmul.f32 %v4911_v50, %v6691_v16  ;;  %v2729_v61 = vmul.f32 %v4912_v31, %v6691_v16  ;;  %v4651_v50 = vld [vmem:[%s10055_s1 + $0x190] sm:$0xff]  ;;  %v4673_v5 = vld [vmem:[%s10055_s1 + $0x3a0] sm:$0xff] }
  0xe2   :  { %v2618_v51 = vadd.f32 %v2596_v41, %v2552_v22  ;;  %v2706_v29 = vadd.f32 %v2684_v10, %v2662_v6  ;;  %v2707_v3 = vadd.f32 %v2685_v13, %v2663_v33  ;;  %v2794_v59 = vmul.f32 %v4933_v26, %v6701_v40  ;;  %v4674_v41 = vld [vmem:[%s10055_s1 + $0x3a8] sm:$0xff]  ;;  %v4695_v10 = vld [vmem:[%s10055_s1 + $0x450] sm:$0xff] }
  0xe3   :  { %v2619_v48 = vadd.f32 %v2597_v24, %v2553_v8  ;;  %v2795_v19 = vmul.f32 %v4934_v15, %v6701_v40  ;;  %v1072_v27 = vmul.f32 %v6191_v9, %v1049_v45  ;;  %v1073_v56 = vmul.f32 %v6191_v9, %v1050_v54  ;;  %v4717_v8 = vld [vmem:[%s10055_s1 + $0x500] sm:$0xff] }
  0xe4   :  { %v6782_v47 = vmax.f32 %v2420_v35, %v2618_v51  ;;  %v2750_v52 = vadd.f32 %v2728_v53, %v2706_v29  ;;  %v2751_v34 = vadd.f32 %v2729_v61, %v2707_v3  ;;  %v1118_v63 = vmul.f32 %v4583_v2, %v6198_v58  ;;  %v4718_v53 = vld [vmem:[%s10055_s1 + $0x508] sm:$0xff] }
  0xe5   :  { %v2641_v42 = vmax.f32 %v2421_v57, %v2619_v48  ;;  %v1119_v37 = vmul.f32 %v4584_v49, %v6198_v58  ;;  %v1186_v32 = vmul.f32 %v4606_v36, %v6205_v55  ;;  %v1187_v14 = vmul.f32 %v4607_v17, %v6205_v55  ;;  %v4696_v57 = vld [vmem:[%s10055_s1 + $0x458] sm:$0xff] }
  0xe6   :  { %v6794_v31 = vadd.f32 %v2794_v59, %v2750_v52  ;;  %v2817_v4 = vadd.f32 %v2795_v19, %v2751_v34  ;;  %v1140_v28 = vadd.f32 %v1118_v63, %v1072_v27  ;;  %v1254_v1 = vmul.f32 %v4629_v38, %v6208_v18 }
  0xe7   :  { %v1141_v0 = vadd.f32 %v1119_v37, %v1073_v56  ;;  %v1255_v39 = vmul.f32 %v4630_v62, %v6208_v18  ;;  %v1298_v46 = vmul.f32 %v4583_v2, %v6191_v9  ;;  %v1299_v25 = vmul.f32 %v4584_v49, %v6191_v9 }
  0xe8   :  { %v2838_v24 = vmax.f32 %v6782_v47, %v6794_v31  ;;  %v2839_v43 = vmax.f32 %v2641_v42, %v2817_v4  ;;  %v1208_v44 = vadd.f32 %v1186_v32, %v1140_v28  ;;  %v1342_v6 = vmul.f32 %v4651_v50, %v6198_v58 }
  0xe9   :  { %v1209_v33 = vadd.f32 %v1187_v14, %v1141_v0  ;;  %v1343_v26 = vmul.f32 %v4652_v60, %v6198_v58  ;;  %v1386_v35 = vmul.f32 %v4629_v38, %v6205_v55  ;;  %v1387_v22 = vmul.f32 %v4630_v62, %v6205_v55  ;;  %v4739_v14 = vld [vmem:[%s10055_s1 + $0x5b0] sm:$0xff] }
  0xea   :  { %2861 = vst [vmem:[#allocation2 + $0x208] sm:$0x1] %v2839_v43  ;;  %v1276_v13 = vadd.f32 %v1254_v1, %v1208_v44  ;;  %v1364_v15 = vadd.f32 %v1342_v6, %v1298_v46  ;;  %v1452_v45 = vmul.f32 %v4673_v5, %v6208_v18  ;;  %v1453_v54 = vmul.f32 %v4674_v41, %v6208_v18 }
  0xeb   :  { %v1277_v61 = vadd.f32 %v1255_v39, %v1209_v33  ;;  %v1365_v2 = vadd.f32 %v1343_v26, %v1299_v25  ;;  %v1518_v51 = vmul.f32 %v4606_v36, %v6191_v9  ;;  %v1519_v29 = vmul.f32 %v4607_v17, %v6191_v9  ;;  %v138_v25 = vld [vmem:[%s10055_s1 + $0x68] sm:$0xff]  ;;  %v4410_v33 = vld [vmem:[%s10055_s1 + $0x118] sm:$0xff]  ;;  %v4432_v26 = vld [vmem:[%s10055_s1 + $0x270] sm:$0xff] }
  0xec   :  { %v1408_v3 = vadd.f32 %v1386_v35, %v1364_v15  ;;  %v1540_v59 = vmul.f32 %v4629_v38, %v6198_v58  ;;  %v1541_v49 = vmul.f32 %v4630_v62, %v6198_v58  ;;  %v1606_v48 = vmul.f32 %v4695_v10, %v6205_v55 }
  0xed   :  { %v1409_v19 = vadd.f32 %v1387_v22, %v1365_v2  ;;  %v1607_v27 = vmul.f32 %v4696_v57, %v6205_v55  ;;  %v1672_v56 = vmul.f32 %v4717_v8, %v6208_v18  ;;  %v1673_v47 = vmul.f32 %v4718_v53, %v6208_v18 }
  0xee   :  { %v1474_v52 = vadd.f32 %v1452_v45, %v1408_v3  ;;  %v1562_v34 = vadd.f32 %v1540_v59, %v1518_v51  ;;  %v1563_v63 = vadd.f32 %v1541_v49, %v1519_v29  ;;  %v1738_v36 = vmul.f32 %v4629_v38, %v6191_v9  ;;  %v4740_v38 = vld [vmem:[%s10055_s1 + $0x5b8] sm:$0xff]  ;;  %v4456_v29 = vld [vmem:[%s10055_s1 + $0x328] sm:$0xff]  ;;  %v4477_v3 = vld [vmem:[%s10055_s1 + $0x1c0] sm:$0xff] }
  0xef   :  { %v1475_v17 = vadd.f32 %v1453_v54, %v1409_v19  ;;  %v1739_v42 = vmul.f32 %v4630_v62, %v6191_v9  ;;  %v1760_v37 = vmul.f32 %v4673_v5, %v6198_v58  ;;  %v1761_v32 = vmul.f32 %v4674_v41, %v6198_v58  ;;  %v137_v62 = vld [vmem:[%s10055_s1 + $0x60] sm:$0xff]  ;;  %v4409_v5 = vld [vmem:[%s10055_s1 + $0x110] sm:$0xff]  ;;  %v4478_v59 = vld [vmem:[%s10055_s1 + $0x1c8] sm:$0xff] }
  0xf0   :  { %v1496_v50 = vmax.f32 %v1276_v13, %v1474_v52  ;;  %v1628_v31 = vadd.f32 %v1606_v48, %v1562_v34  ;;  %v1629_v4 = vadd.f32 %v1607_v27, %v1563_v63  ;;  %v1804_v28 = vmul.f32 %v4717_v8, %v6205_v55  ;;  %v4455_v8 = vld [vmem:[%s10055_s1 + $0x320] sm:$0xff]  ;;  %v4499_v63 = vld [vmem:[%s10055_s1 + $0x3d0] sm:$0xff] }
  0xf1   :  { %v3885_v1 = vld [vmem:[#allocation2 + $0x208] sm:$0xff]  ;;  %v1497_v60 = vmax.f32 %v1277_v61, %v1475_v17  ;;  %v1782_v0 = vadd.f32 %v1760_v37, %v1738_v36  ;;  %v1783_v39 = vadd.f32 %v1761_v32, %v1739_v42  ;;  %v1805_v46 = vmul.f32 %v4718_v53, %v6205_v55  ;;  %v4500_v32 = vld [vmem:[%s10055_s1 + $0x3d8] sm:$0xff] }
  0xf2   :  { %v5329_v41 = vpack.c.bf16 %v3885_v1, %v2838_v24  ;;  %v1694_v43 = vadd.f32 %v1672_v56, %v1628_v31  ;;  %v1695_v44 = vadd.f32 %v1673_v47, %v1629_v4  ;;  %v1870_v6 = vmul.f32 %v4739_v14, %v6208_v18  ;;  %v4433_v24 = vld [vmem:[%s10055_s1 + $0x278] sm:$0xff] }
  0xf3   :  { %v1826_v35 = vadd.f32 %v1804_v28, %v1782_v0  ;;  %v1827_v22 = vadd.f32 %v1805_v46, %v1783_v39  ;;  %v1871_v10 = vmul.f32 %v4740_v38, %v6208_v18  ;;  %v160_v13 = vmul.f32 %v5466_v7, %v137_v62  ;;  %v4521_v28 = vld [vmem:[%s10055_s1 + $0x480] sm:$0xff]  ;;  %v4522_v0 = vld [vmem:[%s10055_s1 + $0x488] sm:$0xff]  ;;  %v4543_v39 = vld [vmem:[%s10055_s1 + $0x530] sm:$0xff] }
  0xf4   :  { %5330 = vmatpush1.bf16.msra.mxu0 %v5329_v41  ;;  %v1716_v15 = vmax.f32 %v1496_v50, %v1694_v43  ;;  %v1717_v45 = vmax.f32 %v1497_v60, %v1695_v44  ;;  %v161_v54 = vmul.f32 %v5466_v7, %v138_v25  ;;  %v207_v57 = vmul.f32 %v4409_v5, %v5473_v11  ;;  %v4544_v46 = vld [vmem:[%s10055_s1 + $0x538] sm:$0xff] }
  0xf5   :  { %v1892_v53 = vadd.f32 %v1870_v6, %v1826_v35  ;;  %v1893_v61 = vadd.f32 %v1871_v10, %v1827_v22  ;;  %5331 = vmatprep.subr.bf16.mxu0 %v5403_v30  ;;  %v208_v2 = vmul.f32 %v4410_v33, %v5473_v11  ;;  %v276_v51 = vmul.f32 %v4432_v26, %v5475_v12 }
  0xf6   :  { %v229_v49 = vadd.f32 %v207_v57, %v160_v13  ;;  %v277_v48 = vmul.f32 %v4433_v24, %v5475_v12  ;;  %v345_v19 = vmul.f32 %v4455_v8, %v5490_v20  ;;  %v346_v27 = vmul.f32 %v4456_v29, %v5490_v20 }
  0xf7   :  { %v1914_v56 = vmax.f32 %v1716_v15, %v1892_v53  ;;  %v1915_v47 = vmax.f32 %v1717_v45, %v1893_v61  ;;  %v230_v52 = vadd.f32 %v208_v2, %v161_v54  ;;  %v389_v34 = vmul.f32 %v4409_v5, %v5466_v7 }
  0xf8   :  { %v298_v36 = vadd.f32 %v276_v51, %v229_v49  ;;  %v390_v17 = vmul.f32 %v4410_v33, %v5466_v7  ;;  %v434_v42 = vmul.f32 %v4477_v3, %v5473_v11  ;;  %v435_v37 = vmul.f32 %v4478_v59, %v5473_v11  ;;  %v4565_v51 = vld [vmem:[%s10055_s1 + $0x5e0] sm:$0xff]  ;;  %v4566_v3 = vld [vmem:[%s10055_s1 + $0x5e8] sm:$0xff] }
  0xf9   :  { %v5288_v14 = vpack.c.bf16 %v1915_v47, %v1914_v56  ;;  %v299_v50 = vadd.f32 %v277_v48, %v230_v52  ;;  %v478_v31 = vmul.f32 %v4455_v8, %v5475_v12  ;;  %v479_v4 = vmul.f32 %v4456_v29, %v5475_v12  ;;  %v2863_v47 = vld [vmem:[%s10055_s1] sm:$0xff]  ;;  %v2864_v52 = vld [vmem:[%s10055_s1 + $0x8] sm:$0xff] }
  0xfa   :  { %v367_v38 = vadd.f32 %v345_v19, %v298_v36  ;;  %v456_v62 = vadd.f32 %v434_v42, %v389_v34  ;;  %v457_v1 = vadd.f32 %v435_v37, %v390_v17  ;;  %v545_v60 = vmul.f32 %v4499_v63, %v5490_v20  ;;  %v4937_v42 = vld [vmem:[%s10055_s1 + $0xb0] sm:$0xff]  ;;  %v4938_v37 = vld [vmem:[%s10055_s1 + $0xb8] sm:$0xff] }
  0xfb   :  { %5289 = vmatprep.subr.bf16.mxu1 %v5288_v14  ;;  %v368_v25 = vadd.f32 %v346_v27, %v299_v50  ;;  %v546_v5 = vmul.f32 %v4500_v32, %v5490_v20  ;;  %v611_v41 = vmul.f32 %v4432_v26, %v5466_v7  ;;  %v612_v43 = vmul.f32 %v4433_v24, %v5466_v7 }
  0xfc   :  { %v500_v44 = vadd.f32 %v478_v31, %v456_v62  ;;  %v501_v6 = vadd.f32 %v479_v4, %v457_v1  ;;  %v633_v33 = vmul.f32 %v4455_v8, %v5473_v11  ;;  %v634_v35 = vmul.f32 %v4456_v29, %v5473_v11 }
  0xfd   :  { %v700_v22 = vmul.f32 %v4521_v28, %v5475_v12  ;;  %v701_v10 = vmul.f32 %v4522_v0, %v5475_v12  ;;  %v767_v13 = vmul.f32 %v4543_v39, %v5490_v20  ;;  %v768_v26 = vmul.f32 %v4544_v46, %v5490_v20 }
  0xfe   :  { %v567_v15 = vadd.f32 %v545_v60, %v500_v44  ;;  %v568_v24 = vadd.f32 %v546_v5, %v501_v6  ;;  %v655_v45 = vadd.f32 %v633_v33, %v611_v41  ;;  %v656_v54 = vadd.f32 %v634_v35, %v612_v43  ;;  %v5005_v5 = vld [vmem:[%s10055_s1 + $0x160] sm:$0xff]  ;;  %v5006_v35 = vld [vmem:[%s10055_s1 + $0x168] sm:$0xff] }
  0xff   :  { %v833_v57 = vmul.f32 %v4455_v8, %v5466_v7  ;;  %v834_v53 = vmul.f32 %v4456_v29, %v5466_v7  ;;  %v855_v61 = vmul.f32 %v4499_v63, %v5473_v11  ;;  %v856_v2 = vmul.f32 %v4500_v32, %v5473_v11  ;;  %v4983_v43 = vld [vmem:[%s10055_s1 + $0x2c0] sm:$0xff] }
 0x100   :  { %v589_v59 = vmax.f32 %v367_v38, %v567_v15  ;;  %v590_v49 = vmax.f32 %v368_v25, %v568_v24  ;;  %v722_v48 = vadd.f32 %v700_v22, %v655_v45  ;;  %v723_v19 = vadd.f32 %v701_v10, %v656_v54  ;;  %v4961_v25 = vld [vmem:[%s10055_s1 + $0x218] sm:$0xff]  ;;  %v4984_v15 = vld [vmem:[%s10055_s1 + $0x2c8] sm:$0xff]  ;;  %v5027_v24 = vld [vmem:[%s10055_s1 + $0x370] sm:$0xff] }
 0x101   :  { %v877_v8 = vadd.f32 %v855_v61, %v833_v57  ;;  %v878_v29 = vadd.f32 %v856_v2, %v834_v53  ;;  %v899_v27 = vmul.f32 %v4543_v39, %v5475_v12  ;;  %v900_v56 = vmul.f32 %v4544_v46, %v5475_v12  ;;  %v4960_v46 = vld [vmem:[%s10055_s1 + $0x210] sm:$0xff]  ;;  %v5028_v61 = vld [vmem:[%s10055_s1 + $0x378] sm:$0xff] }
 0x102   :  { %v789_v34 = vadd.f32 %v767_v13, %v722_v48  ;;  %v790_v63 = vadd.f32 %v768_v26, %v723_v19  ;;  %v966_v36 = vmul.f32 %v4565_v51, %v5490_v20  ;;  %v967_v17 = vmul.f32 %v4566_v3, %v5490_v20 }
 0x103   :  { %v921_v32 = vadd.f32 %v899_v27, %v877_v8  ;;  %v922_v14 = vadd.f32 %v900_v56, %v878_v29  ;;  %v6962_v50 = vstv %s6921_s18  ;;  %v6965_v31 = vstv %s6923_s19  ;;  %v5049_v29 = vld [vmem:[%s10055_s1 + $0x420] sm:$0xff] }
 0x104   :  { %v811_v4 = vmax.f32 %v589_v59, %v789_v34  ;;  %v812_v28 = vmax.f32 %v590_v49, %v790_v63  ;;  %v2886_v38 = vmul.f32 %v6962_v50, %v2863_v47  ;;  %v2887_v62 = vmul.f32 %v6962_v50, %v2864_v52  ;;  %v5050_v34 = vld [vmem:[%s10055_s1 + $0x428] sm:$0xff]  ;;  %v5071_v63 = vld [vmem:[%s10055_s1 + $0x4d0] sm:$0xff] }
 0x105   :  { %v988_v1 = vadd.f32 %v966_v36, %v921_v32  ;;  %v989_v60 = vadd.f32 %v967_v17, %v922_v14  ;;  %v2932_v0 = vmul.f32 %v4937_v42, %v6965_v31  ;;  %v2933_v39 = vmul.f32 %v4938_v37, %v6965_v31  ;;  %v5072_v36 = vld [vmem:[%s10055_s1 + $0x4d8] sm:$0xff] }
 0x106   :  { %v6981_v41 = vstv %s6931_s20  ;;  %v6987_v44 = vstv %s6933_s21  ;;  %v3112_v6 = vmul.f32 %v4937_v42, %v6962_v50  ;;  %v3113_v33 = vmul.f32 %v4938_v37, %v6962_v50 }
 0x107   :  { %v1010_v22 = vmax.f32 %v811_v4, %v988_v1  ;;  %v1011_v10 = vmax.f32 %v812_v28, %v989_v60  ;;  %v2954_v13 = vadd.f32 %v2932_v0, %v2886_v38  ;;  %v2955_v26 = vadd.f32 %v2933_v39, %v2887_v62 }
 0x108   :  { %v3000_v45 = vmul.f32 %v4960_v46, %v6981_v41  ;;  %v3001_v54 = vmul.f32 %v4961_v25, %v6981_v41  ;;  %v3068_v57 = vmul.f32 %v4983_v43, %v6987_v44  ;;  %v3069_v53 = vmul.f32 %v4984_v15, %v6987_v44 }
 0x109   :  { %v5290_v2 = vpack.c.bf16 %v1011_v10, %v1010_v22  ;;  %v3156_v51 = vmul.f32 %v5005_v5, %v6965_v31  ;;  %v3157_v3 = vmul.f32 %v5006_v35, %v6965_v31  ;;  %v3200_v59 = vmul.f32 %v4983_v43, %v6981_v41  ;;  %v5093_v10 = vld [vmem:[%s10055_s1 + $0x580] sm:$0xff] }
 0x10a   :  { %v3022_v49 = vadd.f32 %v3000_v45, %v2954_v13  ;;  %v3023_v48 = vadd.f32 %v3001_v54, %v2955_v26  ;;  %v3201_v19 = vmul.f32 %v4984_v15, %v6981_v41  ;;  %v3266_v8 = vmul.f32 %v5027_v24, %v6987_v44  ;;  %v5094_v13 = vld [vmem:[%s10055_s1 + $0x588] sm:$0xff]  ;;  %v1051_v26 = vld [vmem:[%s10055_s1 + $0x40] sm:$0xff] }
 0x10b   :  { %5291 = vmatpush3.bf16.msra.mxu1 %v5290_v2  ;;  %v3178_v27 = vadd.f32 %v3156_v51, %v3112_v6  ;;  %v3179_v56 = vadd.f32 %v3157_v3, %v3113_v33  ;;  %v3267_v47 = vmul.f32 %v5028_v61, %v6987_v44  ;;  %v3332_v52 = vmul.f32 %v4960_v46, %v6962_v50  ;;  %v4585_v51 = vld [vmem:[%s10055_s1 + $0xf0] sm:$0xff]  ;;  %v4586_v3 = vld [vmem:[%s10055_s1 + $0xf8] sm:$0xff] }
 0x10c   :  { %v3090_v17 = vadd.f32 %v3068_v57, %v3022_v49  ;;  %v3091_v42 = vadd.f32 %v3069_v53, %v3023_v48  ;;  %v3333_v37 = vmul.f32 %v4961_v25, %v6962_v50  ;;  %v3354_v32 = vmul.f32 %v4983_v43, %v6965_v31 }
 0x10d   :  { %v3222_v14 = vadd.f32 %v3200_v59, %v3178_v27  ;;  %v3223_v4 = vadd.f32 %v3201_v19, %v3179_v56  ;;  %v3355_v28 = vmul.f32 %v4984_v15, %v6965_v31  ;;  %v3420_v38 = vmul.f32 %v5049_v29, %v6981_v41  ;;  %v4608_v59 = vld [vmem:[%s10055_s1 + $0x250] sm:$0xff]  ;;  %v4609_v29 = vld [vmem:[%s10055_s1 + $0x258] sm:$0xff] }
 0x10e   :  { %v3376_v62 = vadd.f32 %v3354_v32, %v3332_v52  ;;  %v3421_v1 = vmul.f32 %v5050_v34, %v6981_v41  ;;  %v3486_v60 = vmul.f32 %v5071_v63, %v6987_v44  ;;  %v3487_v0 = vmul.f32 %v5072_v36, %v6987_v44 }
 0x10f   :  { %v3288_v39 = vadd.f32 %v3266_v8, %v3222_v14  ;;  %v3289_v46 = vadd.f32 %v3267_v47, %v3223_v4  ;;  %v3377_v5 = vadd.f32 %v3355_v28, %v3333_v37  ;;  %v3552_v25 = vmul.f32 %v4983_v43, %v6962_v50  ;;  %v4653_v37 = vld [vmem:[%s10055_s1 + $0x1a0] sm:$0xff]  ;;  %v4632_v28 = vld [vmem:[%s10055_s1 + $0x308] sm:$0xff] }
 0x110   :  { %v3442_v6 = vadd.f32 %v3420_v38, %v3376_v62  ;;  %v3553_v33 = vmul.f32 %v4984_v15, %v6962_v50  ;;  %v3574_v35 = vmul.f32 %v5027_v24, %v6965_v31  ;;  %v3575_v22 = vmul.f32 %v5028_v61, %v6965_v31  ;;  %v1052_v24 = vld [vmem:[%s10055_s1 + $0x48] sm:$0xff] }
 0x111   :  { %v3310_v43 = vmax.f32 %v3090_v17, %v3288_v39  ;;  %v3311_v45 = vmax.f32 %v3091_v42, %v3289_v46  ;;  %v3443_v54 = vadd.f32 %v3421_v1, %v3377_v5  ;;  %v3618_v15 = vmul.f32 %v5071_v63, %v6981_v41  ;;  %v4631_v42 = vld [vmem:[%s10055_s1 + $0x300] sm:$0xff]  ;;  %v4654_v62 = vld [vmem:[%s10055_s1 + $0x1a8] sm:$0xff]  ;;  %v4675_v46 = vld [vmem:[%s10055_s1 + $0x3b0] sm:$0xff] }
 0x112   :  { %v3508_v57 = vadd.f32 %v3486_v60, %v3442_v6  ;;  %v3596_v53 = vadd.f32 %v3574_v35, %v3552_v25  ;;  %v3597_v61 = vadd.f32 %v3575_v22, %v3553_v33  ;;  %v3619_v2 = vmul.f32 %v5072_v36, %v6981_v41  ;;  %v4676_v35 = vld [vmem:[%s10055_s1 + $0x3b8] sm:$0xff] }
 0x113   :  { %v3509_v49 = vadd.f32 %v3487_v0, %v3443_v54  ;;  %v3684_v48 = vmul.f32 %v5093_v10, %v6987_v44  ;;  %v3685_v19 = vmul.f32 %v5094_v13, %v6987_v44  ;;  %v1074_v8 = vmul.f32 %v6191_v9, %v1051_v26 }
 0x114   :  { %v3530_v27 = vmax.f32 %v3310_v43, %v3508_v57  ;;  %v3640_v56 = vadd.f32 %v3618_v15, %v3596_v53  ;;  %v3641_v47 = vadd.f32 %v3619_v2, %v3597_v61  ;;  %v1075_v52 = vmul.f32 %v6191_v9, %v1052_v24  ;;  %v4697_v24 = vld [vmem:[%s10055_s1 + $0x460] sm:$0xff]  ;;  %v4698_v57 = vld [vmem:[%s10055_s1 + $0x468] sm:$0xff] }
 0x115   :  { %v3531_v34 = vmax.f32 %v3311_v45, %v3509_v49  ;;  %v1120_v63 = vmul.f32 %v4585_v51, %v6198_v58  ;;  %v1121_v36 = vmul.f32 %v4586_v3, %v6198_v58  ;;  %v1188_v17 = vmul.f32 %v4608_v59, %v6205_v55  ;;  %v4720_v49 = vld [vmem:[%s10055_s1 + $0x518] sm:$0xff] }
 0x116   :  { %v3706_v32 = vadd.f32 %v3684_v48, %v3640_v56  ;;  %v3707_v14 = vadd.f32 %v3685_v19, %v3641_v47  ;;  %v1189_v4 = vmul.f32 %v4609_v29, %v6205_v55  ;;  %v1256_v38 = vmul.f32 %v4631_v42, %v6208_v18 }
 0x117   :  { %v1142_v1 = vadd.f32 %v1120_v63, %v1074_v8  ;;  %v1143_v60 = vadd.f32 %v1121_v36, %v1075_v52  ;;  %v1257_v0 = vmul.f32 %v4632_v28, %v6208_v18  ;;  %v1300_v39 = vmul.f32 %v4585_v51, %v6191_v9 }
 0x118   :  { %v3728_v5 = vmax.f32 %v3530_v27, %v3706_v32  ;;  %v3729_v25 = vmax.f32 %v3531_v34, %v3707_v14  ;;  %v1301_v6 = vmul.f32 %v4586_v3, %v6191_v9  ;;  %v1344_v33 = vmul.f32 %v4653_v37, %v6198_v58  ;;  %v4719_v3 = vld [vmem:[%s10055_s1 + $0x510] sm:$0xff] }
 0x119   :  { %v1210_v22 = vadd.f32 %v1188_v17, %v1142_v1  ;;  %v1211_v10 = vadd.f32 %v1189_v4, %v1143_v60  ;;  %v1345_v13 = vmul.f32 %v4654_v62, %v6198_v58  ;;  %v1388_v26 = vmul.f32 %v4631_v42, %v6205_v55  ;;  %v4741_v4 = vld [vmem:[%s10055_s1 + $0x5c0] sm:$0xff] }
 0x11a   :  { %v5332_v43 = vpack.c.bf16 %v3729_v25, %v3728_v5  ;;  %v1366_v45 = vadd.f32 %v1344_v33, %v1300_v39  ;;  %v1389_v54 = vmul.f32 %v4632_v28, %v6205_v55  ;;  %v1454_v15 = vmul.f32 %v4675_v46, %v6208_v18 }
 0x11b   :  { %v1278_v53 = vadd.f32 %v1256_v38, %v1210_v22  ;;  %v1279_v61 = vadd.f32 %v1257_v0, %v1211_v10  ;;  %v1367_v2 = vadd.f32 %v1345_v13, %v1301_v6  ;;  %v1455_v51 = vmul.f32 %v4676_v35, %v6208_v18  ;;  %v4742_v0 = vld [vmem:[%s10055_s1 + $0x5c8] sm:$0xff]  ;;  %v4411_v6 = vld [vmem:[%s10055_s1 + $0x120] sm:$0xff] }
 0x11c   :  { %5333 = vmatpush1.bf16.msra.mxu0 %v5332_v43  ;;  %v1410_v48 = vadd.f32 %v1388_v26, %v1366_v45  ;;  %v1520_v19 = vmul.f32 %v4608_v59, %v6191_v9  ;;  %v1521_v8 = vmul.f32 %v4609_v29, %v6191_v9  ;;  %v1542_v27 = vmul.f32 %v4631_v42, %v6198_v58  ;;  %v4412_v13 = vld [vmem:[%s10055_s1 + $0x128] sm:$0xff]  ;;  %v4434_v26 = vld [vmem:[%s10055_s1 + $0x280] sm:$0xff] }
 0x11d   :  { %v1411_v56 = vadd.f32 %v1389_v54, %v1367_v2  ;;  %v1543_v47 = vmul.f32 %v4632_v28, %v6198_v58  ;;  %v1608_v52 = vmul.f32 %v4697_v24, %v6205_v55  ;;  %v1609_v34 = vmul.f32 %v4698_v57, %v6205_v55  ;;  %5334 = vmatprep.subr.bf16.mxu0 %v5403_v30  ;;  %v4435_v43 = vld [vmem:[%s10055_s1 + $0x288] sm:$0xff] }
 0x11e   :  { %v1476_v63 = vadd.f32 %v1454_v15, %v1410_v48  ;;  %v1564_v36 = vadd.f32 %v1542_v27, %v1520_v19  ;;  %v1674_v17 = vmul.f32 %v4719_v3, %v6208_v18  ;;  %v1675_v37 = vmul.f32 %v4720_v49, %v6208_v18  ;;  %v4457_v19 = vld [vmem:[%s10055_s1 + $0x330] sm:$0xff] }
 0x11f   :  { %v1477_v59 = vadd.f32 %v1455_v51, %v1411_v56  ;;  %v1565_v32 = vadd.f32 %v1543_v47, %v1521_v8  ;;  %v1740_v29 = vmul.f32 %v4631_v42, %v6191_v9  ;;  %v1741_v14 = vmul.f32 %v4632_v28, %v6191_v9  ;;  %v139_v42 = vld [vmem:[%s10055_s1 + $0x70] sm:$0xff]  ;;  %v140_v28 = vld [vmem:[%s10055_s1 + $0x78] sm:$0xff] }
 0x120   :  { %v1498_v38 = vmax.f32 %v1278_v53, %v1476_v63  ;;  %v1630_v62 = vadd.f32 %v1608_v52, %v1564_v36  ;;  %v1762_v1 = vmul.f32 %v4675_v46, %v6198_v58  ;;  %v1763_v60 = vmul.f32 %v4676_v35, %v6198_v58  ;;  %v4479_v8 = vld [vmem:[%s10055_s1 + $0x1d0] sm:$0xff]  ;;  %v4458_v52 = vld [vmem:[%s10055_s1 + $0x338] sm:$0xff] }
 0x121   :  { %v1499_v39 = vmax.f32 %v1279_v61, %v1477_v59  ;;  %v1631_v5 = vadd.f32 %v1609_v34, %v1565_v32  ;;  %v1806_v25 = vmul.f32 %v4719_v3, %v6205_v55  ;;  %v1807_v46 = vmul.f32 %v4720_v49, %v6205_v55  ;;  %v4480_v63 = vld [vmem:[%s10055_s1 + $0x1d8] sm:$0xff]  ;;  %v4501_v32 = vld [vmem:[%s10055_s1 + $0x3e0] sm:$0xff] }
 0x122   :  { %v1696_v33 = vadd.f32 %v1674_v17, %v1630_v62  ;;  %v1784_v35 = vadd.f32 %v1762_v1, %v1740_v29  ;;  %v1785_v22 = vadd.f32 %v1763_v60, %v1741_v14  ;;  %v1872_v10 = vmul.f32 %v4741_v4, %v6208_v18  ;;  %v4502_v62 = vld [vmem:[%s10055_s1 + $0x3e8] sm:$0xff] }
 0x123   :  { %v1697_v45 = vadd.f32 %v1675_v37, %v1631_v5  ;;  %v1873_v54 = vmul.f32 %v4742_v0, %v6208_v18  ;;  %v162_v15 = vmul.f32 %v5466_v7, %v139_v42  ;;  %v163_v24 = vmul.f32 %v5466_v7, %v140_v28 }
 0x124   :  { %v1718_v57 = vmax.f32 %v1498_v38, %v1696_v33  ;;  %v1828_v53 = vadd.f32 %v1806_v25, %v1784_v35  ;;  %v1829_v61 = vadd.f32 %v1807_v46, %v1785_v22  ;;  %v209_v2 = vmul.f32 %v4411_v6, %v5473_v11  ;;  %v4523_v46 = vld [vmem:[%s10055_s1 + $0x490] sm:$0xff]  ;;  %v4545_v33 = vld [vmem:[%s10055_s1 + $0x540] sm:$0xff] }
 0x125   :  { %v1719_v51 = vmax.f32 %v1499_v39, %v1697_v45  ;;  %v210_v3 = vmul.f32 %v4412_v13, %v5473_v11  ;;  %v278_v49 = vmul.f32 %v4434_v26, %v5475_v12  ;;  %v279_v48 = vmul.f32 %v4435_v43, %v5475_v12  ;;  %v4546_v45 = vld [vmem:[%s10055_s1 + $0x548] sm:$0xff] }
 0x126   :  { %v1894_v27 = vadd.f32 %v1872_v10, %v1828_v53  ;;  %v1895_v56 = vadd.f32 %v1873_v54, %v1829_v61  ;;  %v231_v47 = vadd.f32 %v209_v2, %v162_v15  ;;  %v347_v34 = vmul.f32 %v4457_v19, %v5490_v20 }
 0x127   :  { %v232_v36 = vadd.f32 %v210_v3, %v163_v24  ;;  %v348_v17 = vmul.f32 %v4458_v52, %v5490_v20  ;;  %v391_v37 = vmul.f32 %v4411_v6, %v5466_v7  ;;  %v392_v59 = vmul.f32 %v4412_v13, %v5466_v7  ;;  %v4524_v6 = vld [vmem:[%s10055_s1 + $0x498] sm:$0xff] }
 0x128   :  { %v1916_v29 = vmax.f32 %v1718_v57, %v1894_v27  ;;  %v1917_v14 = vmax.f32 %v1719_v51, %v1895_v56  ;;  %v300_v4 = vadd.f32 %v278_v49, %v231_v47  ;;  %v436_v38 = vmul.f32 %v4479_v8, %v5473_v11  ;;  %v4567_v47 = vld [vmem:[%s10055_s1 + $0x5f0] sm:$0xff] }
 0x129   :  { %v301_v1 = vadd.f32 %v279_v48, %v232_v36  ;;  %v437_v60 = vmul.f32 %v4480_v63, %v5473_v11  ;;  %v480_v0 = vmul.f32 %v4457_v19, %v5475_v12  ;;  %v481_v42 = vmul.f32 %v4458_v52, %v5475_v12 }
 0x12a   :  { %v5292_v28 = vpack.c.bf16 %v1917_v14, %v1916_v29  ;;  %v369_v39 = vadd.f32 %v347_v34, %v300_v4  ;;  %v458_v5 = vadd.f32 %v436_v38, %v391_v37  ;;  %v547_v25 = vmul.f32 %v4501_v32, %v5490_v20  ;;  %v4568_v37 = vld [vmem:[%s10055_s1 + $0x5f8] sm:$0xff] }
 0x12b   :  { %v370_v35 = vadd.f32 %v348_v17, %v301_v1  ;;  %v459_v22 = vadd.f32 %v437_v60, %v392_v59  ;;  %v548_v10 = vmul.f32 %v4502_v62, %v5490_v20  ;;  %v613_v13 = vmul.f32 %v4434_v26, %v5466_v7  ;;  %v4940_v1 = vld [vmem:[%s10055_s1 + $0xc8] sm:$0xff]  ;;  %v4962_v60 = vld [vmem:[%s10055_s1 + $0x220] sm:$0xff] }
 0x12c   :  { %5293 = vmatprep.subr.bf16.mxu1 %v5292_v28  ;;  %v502_v54 = vadd.f32 %v480_v0, %v458_v5  ;;  %v614_v15 = vmul.f32 %v4435_v43, %v5466_v7  ;;  %v635_v24 = vmul.f32 %v4457_v19, %v5473_v11  ;;  %v636_v57 = vmul.f32 %v4458_v52, %v5473_v11 }
 0x12d   :  { %v503_v53 = vadd.f32 %v481_v42, %v459_v22  ;;  %v702_v61 = vmul.f32 %v4523_v46, %v5475_v12  ;;  %v703_v2 = vmul.f32 %v4524_v6, %v5475_v12  ;;  %v769_v51 = vmul.f32 %v4545_v33, %v5490_v20 }
 0x12e   :  { %v569_v26 = vadd.f32 %v547_v25, %v502_v54  ;;  %v657_v3 = vadd.f32 %v635_v24, %v613_v13  ;;  %v658_v49 = vadd.f32 %v636_v57, %v614_v15  ;;  %v770_v48 = vmul.f32 %v4546_v45, %v5490_v20  ;;  %v4986_v13 = vld [vmem:[%s10055_s1 + $0x2d8] sm:$0xff] }
 0x12f   :  { %v570_v8 = vadd.f32 %v548_v10, %v503_v53  ;;  %v835_v27 = vmul.f32 %v4457_v19, %v5466_v7  ;;  %v836_v43 = vmul.f32 %v4458_v52, %v5466_v7  ;;  %v857_v56 = vmul.f32 %v4501_v32, %v5473_v11  ;;  %v2865_v19 = vld [vmem:[%s10055_s1 + $0x10] sm:$0xff]  ;;  %v2866_v7 = vld [vmem:[%s10055_s1 + $0x18] sm:$0xff] }
 0x130   :  { %v591_v34 = vmax.f32 %v369_v39, %v569_v26  ;;  %v724_v63 = vadd.f32 %v702_v61, %v657_v3  ;;  %v725_v36 = vadd.f32 %v703_v2, %v658_v49  ;;  %v858_v17 = vmul.f32 %v4502_v62, %v5473_v11  ;;  %v4939_v11 = vld [vmem:[%s10055_s1 + $0xc0] sm:$0xff]  ;;  %v5008_v54 = vld [vmem:[%s10055_s1 + $0x178] sm:$0xff] }
 0x131   :  { %v592_v52 = vmax.f32 %v370_v35, %v570_v8  ;;  %v879_v59 = vadd.f32 %v857_v56, %v835_v27  ;;  %v901_v32 = vmul.f32 %v4545_v33, %v5475_v12  ;;  %v902_v29 = vmul.f32 %v4546_v45, %v5475_v12  ;;  %v4963_v12 = vld [vmem:[%s10055_s1 + $0x228] sm:$0xff]  ;;  %v4985_v33 = vld [vmem:[%s10055_s1 + $0x2d0] sm:$0xff]  ;;  %v5029_v61 = vld [vmem:[%s10055_s1 + $0x380] sm:$0xff] }
 0x132   :  { %v791_v14 = vadd.f32 %v769_v51, %v724_v63  ;;  %v792_v4 = vadd.f32 %v770_v48, %v725_v36  ;;  %v880_v38 = vadd.f32 %v858_v17, %v836_v43  ;;  %v968_v62 = vmul.f32 %v4567_v47, %v5490_v20  ;;  %v5007_v45 = vld [vmem:[%s10055_s1 + $0x170] sm:$0xff]  ;;  %v5030_v43 = vld [vmem:[%s10055_s1 + $0x388] sm:$0xff] }
 0x133   :  { %v923_v0 = vadd.f32 %v901_v32, %v879_v59  ;;  %v969_v42 = vmul.f32 %v4568_v37, %v5490_v20  ;;  %v2888_v28 = vmul.f32 %v6962_v50, %v2865_v19  ;;  %v2889_v39 = vmul.f32 %v6962_v50, %v2866_v7  ;;  %v5051_v36 = vld [vmem:[%s10055_s1 + $0x430] sm:$0xff]  ;;  %v5073_v59 = vld [vmem:[%s10055_s1 + $0x4e0] sm:$0xff]  ;;  %v5074_v32 = vld [vmem:[%s10055_s1 + $0x4e8] sm:$0xff] }
 0x134   :  { %v813_v5 = vmax.f32 %v591_v34, %v791_v14  ;;  %v814_v25 = vmax.f32 %v592_v52, %v792_v4  ;;  %v924_v46 = vadd.f32 %v902_v29, %v880_v38  ;;  %v2934_v6 = vmul.f32 %v4939_v11, %v6965_v31  ;;  %v5052_v52 = vld [vmem:[%s10055_s1 + $0x438] sm:$0xff] }
 0x135   :  { %v990_v35 = vadd.f32 %v968_v62, %v923_v0  ;;  %v2935_v22 = vmul.f32 %v4940_v1, %v6965_v31  ;;  %v3002_v10 = vmul.f32 %v4962_v60, %v6981_v41  ;;  %v3003_v20 = vmul.f32 %v4963_v12, %v6981_v41 }
 0x136   :  { %v991_v15 = vadd.f32 %v969_v42, %v924_v46  ;;  %v2956_v24 = vadd.f32 %v2934_v6, %v2888_v28  ;;  %v3070_v57 = vmul.f32 %v4985_v33, %v6987_v44  ;;  %v3071_v53 = vmul.f32 %v4986_v13, %v6987_v44  ;;  %v3772_v42 = vld [vmem:[%s10056_s2] sm:$0xff] }
 0x137   :  { %v1012_v2 = vmax.f32 %v813_v5, %v990_v35  ;;  %v2957_v51 = vadd.f32 %v2935_v22, %v2889_v39  ;;  %v3114_v26 = vmul.f32 %v4939_v11, %v6962_v50  ;;  %v3115_v3 = vmul.f32 %v4940_v1, %v6962_v50 }
 0x138   :  { %v1013_v49 = vmax.f32 %v814_v25, %v991_v15  ;;  %v3024_v48 = vadd.f32 %v3002_v10, %v2956_v24  ;;  %v3158_v8 = vmul.f32 %v5007_v45, %v6965_v31  ;;  %v3159_v27 = vmul.f32 %v5008_v54, %v6965_v31  ;;  %v5095_v54 = vld [vmem:[%s10055_s1 + $0x590] sm:$0xff]  ;;  %v5096_v15 = vld [vmem:[%s10055_s1 + $0x598] sm:$0xff] }
 0x139   :  { %v3025_v56 = vadd.f32 %v3003_v20, %v2957_v51  ;;  %v3202_v47 = vmul.f32 %v4985_v33, %v6981_v41  ;;  %v3203_v34 = vmul.f32 %v4986_v13, %v6981_v41  ;;  %v3268_v63 = vmul.f32 %v5029_v61, %v6987_v44 }
 0x13a   :  { %v5294_v17 = vpack.c.bf16 %v1013_v49, %v1012_v2  ;;  %v3092_v37 = vadd.f32 %v3070_v57, %v3024_v48  ;;  %v3180_v19 = vadd.f32 %v3158_v8, %v3114_v26  ;;  %v3181_v7 = vadd.f32 %v3159_v27, %v3115_v3  ;;  %v7326_v48 = vld [vmem:[%s10055_s1 + $0xd0] sm:$0xff]  ;;  %v7331_v8 = vld [vmem:[%s10055_s1 + $0xd8] sm:$0xff]  ;;  %v3785_v27 = vld [vmem:[%s10056_s2 + $0x68] sm:$0xff] }
 0x13b   :  { %v3093_v29 = vadd.f32 %v3071_v53, %v3025_v56  ;;  %v3269_v11 = vmul.f32 %v5030_v43, %v6987_v44  ;;  %v3334_v14 = vmul.f32 %v4962_v60, %v6962_v50  ;;  %v3335_v4 = vmul.f32 %v4963_v12, %v6962_v50  ;;  %v3779_v12 = vld [vmem:[%s10056_s2 + $0x38] sm:$0xff] }
 0x13c   :  { %5295 = vmatpush3.bf16.msra.mxu1 %v5294_v17  ;;  %v3224_v38 = vadd.f32 %v3202_v47, %v3180_v19  ;;  %v3225_v62 = vadd.f32 %v3203_v34, %v3181_v7  ;;  %v3356_v1 = vmul.f32 %v4985_v33, %v6965_v31  ;;  %v3357_v0 = vmul.f32 %v4986_v13, %v6965_v31 }
 0x13d   :  { %v3422_v28 = vmul.f32 %v5051_v36, %v6981_v41  ;;  %v3423_v39 = vmul.f32 %v5052_v52, %v6981_v41  ;;  %v3488_v5 = vmul.f32 %v5073_v59, %v6987_v44  ;;  %v3489_v60 = vmul.f32 %v5074_v32, %v6987_v44  ;;  %v7346_v36 = vld [vmem:[%s10055_s1 + $0x238] sm:$0xff] }
 0x13e   :  { %v3290_v25 = vadd.f32 %v3268_v63, %v3224_v38  ;;  %v3291_v46 = vadd.f32 %v3269_v11, %v3225_v62  ;;  %v3378_v6 = vadd.f32 %v3356_v1, %v3334_v14  ;;  %v3379_v35 = vadd.f32 %v3357_v0, %v3335_v4  ;;  %v7341_v63 = vld [vmem:[%s10055_s1 + $0x230] sm:$0xff]  ;;  %v7359_v11 = vld [vmem:[%s10055_s1 + $0x2e0] sm:$0xff]  ;;  %v7371_v0 = vld [vmem:[%s10055_s1 + $0x2e8] sm:$0xff] }
 0x13f   :  { %v3554_v22 = vmul.f32 %v4985_v33, %v6962_v50  ;;  %v3555_v10 = vmul.f32 %v4986_v13, %v6962_v50  ;;  %v3576_v20 = vmul.f32 %v5029_v61, %v6965_v31  ;;  %v3577_v45 = vmul.f32 %v5030_v43, %v6965_v31  ;;  %4046 = vmatmul.mubr.f32.vlgmr.msra.gmra.mrb[0].mxu1 %v3772_v42  ;;  %v7311_v33 = vld [vmem:[%s10055_s1 + $0x20] sm:$0xff]  ;;  %v7316_v13 = vld [vmem:[%s10055_s1 + $0x28] sm:$0xff]  ;;  %v3778_v61 = vld [vmem:[%s10056_s2 + $0x30] sm:$0xff] }
 0x140   :  { %v3312_v24 = vmax.f32 %v3092_v37, %v3290_v25  ;;  %v3313_v57 = vmax.f32 %v3093_v29, %v3291_v46  ;;  %v3444_v53 = vadd.f32 %v3422_v28, %v3378_v6  ;;  %v3445_v2 = vadd.f32 %v3423_v39, %v3379_v35  ;;  %4050 = vmatprep.mubr.f32.mxu1 %v3779_v12  ;;  %v3784_v14 = vld [vmem:[%s10056_s2 + $0x60] sm:$0xff]  ;;  %v7381_v28 = vld [vmem:[%s10055_s1 + $0x188] sm:$0xff]  ;;  %v7390_v25 = vld [vmem:[%s10055_s1 + $0x390] sm:$0xff] }
 0x141   :  { %v3598_v51 = vadd.f32 %v3576_v20, %v3554_v22  ;;  %v3599_v26 = vadd.f32 %v3577_v45, %v3555_v10  ;;  %v3620_v3 = vmul.f32 %v5073_v59, %v6981_v41  ;;  %v3621_v49 = vmul.f32 %v5074_v32, %v6981_v41  ;;  %v7376_v42 = vld [vmem:[%s10055_s1 + $0x180] sm:$0xff] }
 0x142   :  { %v3510_v43 = vadd.f32 %v3488_v5, %v3444_v53  ;;  %v3511_v56 = vadd.f32 %v3489_v60, %v3445_v2  ;;  %v3686_v47 = vmul.f32 %v5095_v54, %v6987_v44  ;;  %v3687_v34 = vmul.f32 %v5096_v15, %v6987_v44  ;;  %v7403_v15 = vld [vmem:[%s10055_s1 + $0x398] sm:$0xff] }
 0x143   :  { %v3642_v17 = vadd.f32 %v3620_v3, %v3598_v51  ;;  %v3643_v37 = vadd.f32 %v3621_v49, %v3599_v26  ;;  %v1980_v19 = vmul.f32 %v6671_v23, %v7311_v33  ;;  %v1981_v7 = vmul.f32 %v6671_v23, %v7316_v13  ;;  %4051 = vmatmul.mubr.f32.gmra.mrb[2].mxu1 %v3778_v61  ;;  %v7414_v61 = vld [vmem:[%s10055_s1 + $0x440] sm:$0xff] }
 0x144   :  { %v3532_v52 = vmax.f32 %v3312_v24, %v3510_v43  ;;  %v3533_v59 = vmax.f32 %v3313_v57, %v3511_v56  ;;  %v2026_v32 = vmul.f32 %v7326_v48, %v6688_v21  ;;  %v2027_v29 = vmul.f32 %v7331_v8, %v6688_v21  ;;  %4055 = vmatprep.mubr.f32.mxu1 %v3785_v27  ;;  %v7419_v27 = vld [vmem:[%s10055_s1 + $0x448] sm:$0xff]  ;;  %v7424_v43 = vld [vmem:[%s10055_s1 + $0x4f0] sm:$0xff]  ;;  %v7429_v56 = vld [vmem:[%s10055_s1 + $0x4f8] sm:$0xff] }
 0x145   :  { %v3708_v4 = vadd.f32 %v3686_v47, %v3642_v17  ;;  %v3709_v38 = vadd.f32 %v3687_v34, %v3643_v37  ;;  %v2094_v62 = vmul.f32 %v7341_v63, %v6691_v16  ;;  %v2095_v1 = vmul.f32 %v7346_v36, %v6691_v16 }
 0x146   :  { %v2048_v39 = vadd.f32 %v2026_v32, %v1980_v19  ;;  %v2049_v5 = vadd.f32 %v2027_v29, %v1981_v7  ;;  %v2162_v60 = vmul.f32 %v7359_v11, %v6701_v40  ;;  %v2163_v12 = vmul.f32 %v7371_v0, %v6701_v40 }
 0x147   :  { %v3730_v46 = vmax.f32 %v3532_v52, %v3708_v4  ;;  %v3731_v6 = vmax.f32 %v3533_v59, %v3709_v38  ;;  %v2206_v35 = vmul.f32 %v7326_v48, %v6671_v23  ;;  %v2207_v22 = vmul.f32 %v7331_v8, %v6671_v23  ;;  %4056 = vmatmul.mubr.f32.gmra.mrb[4].mxu1 %v3784_v14 }
 0x148   :  { %v2116_v10 = vadd.f32 %v2094_v62, %v2048_v39  ;;  %v2117_v20 = vadd.f32 %v2095_v1, %v2049_v5  ;;  %v2250_v45 = vmul.f32 %v7376_v42, %v6688_v21  ;;  %v2251_v54 = vmul.f32 %v7381_v28, %v6688_v21 }
 0x149   :  { %v5335_v24 = vpack.c.bf16 %v3731_v6, %v3730_v46  ;;  %v2294_v57 = vmul.f32 %v7359_v11, %v6691_v16  ;;  %v2295_v53 = vmul.f32 %v7371_v0, %v6691_v16  ;;  %v2360_v2 = vmul.f32 %v7390_v25, %v6701_v40  ;;  %v7461_v6 = vld [vmem:[%s10055_s1 + $0x5a0] sm:$0xff] }
 0x14a   :  { %v2184_v51 = vadd.f32 %v2162_v60, %v2116_v10  ;;  %v2185_v26 = vadd.f32 %v2163_v12, %v2117_v20  ;;  %v2272_v3 = vadd.f32 %v2250_v45, %v2206_v35  ;;  %v2273_v49 = vadd.f32 %v2251_v54, %v2207_v22  ;;  %v7466_v35 = vld [vmem:[%s10055_s1 + $0x5a8] sm:$0xff]  ;;  %v1053_v22 = vld [vmem:[%s10055_s1 + $0x50] sm:$0xff] }
 0x14b   :  { %5336 = vmatpush1.bf16.msra.mxu0 %v5335_v24  ;;  %v2361_v47 = vmul.f32 %v7403_v15, %v6701_v40  ;;  %v2426_v34 = vmul.f32 %v7341_v63, %v6671_v23  ;;  %v2427_v17 = vmul.f32 %v7346_v36, %v6671_v23  ;;  %v2448_v37 = vmul.f32 %v7359_v11, %v6688_v21  ;;  %v1054_v24 = vld [vmem:[%s10055_s1 + $0x58] sm:$0xff] }
 0x14c   :  { %v2316_v19 = vadd.f32 %v2294_v57, %v2272_v3  ;;  %v2317_v7 = vadd.f32 %v2295_v53, %v2273_v49  ;;  %v2449_v52 = vmul.f32 %v7371_v0, %v6688_v21  ;;  %v2514_v59 = vmul.f32 %v7414_v61, %v6691_v16  ;;  %5337 = vmatprep.subr.bf16.mxu0 %v5403_v30  ;;  %v4587_v49 = vld [vmem:[%s10055_s1 + $0x100] sm:$0xff] }
 0x14d   :  { %v2470_v32 = vadd.f32 %v2448_v37, %v2426_v34  ;;  %v2515_v29 = vmul.f32 %v7419_v27, %v6691_v16  ;;  %v2580_v14 = vmul.f32 %v7424_v43, %v6701_v40  ;;  %v2581_v4 = vmul.f32 %v7429_v56, %v6701_v40 }
 0x14e   :  { %v2382_v38 = vadd.f32 %v2360_v2, %v2316_v19  ;;  %v2383_v62 = vadd.f32 %v2361_v47, %v2317_v7  ;;  %v2471_v1 = vadd.f32 %v2449_v52, %v2427_v17  ;;  %v2646_v39 = vmul.f32 %v7359_v11, %v6671_v23  ;;  %v4611_v19 = vld [vmem:[%s10055_s1 + $0x268] sm:$0xff] }
 0x14f   :  { %v2536_v5 = vadd.f32 %v2514_v59, %v2470_v32  ;;  %v2647_v60 = vmul.f32 %v7371_v0, %v6671_v23  ;;  %v2668_v12 = vmul.f32 %v7390_v25, %v6688_v21  ;;  %v2669_v46 = vmul.f32 %v7403_v15, %v6688_v21 }
 0x150   :  { %v2404_v10 = vmax.f32 %v2184_v51, %v2382_v38  ;;  %v2405_v20 = vmax.f32 %v2185_v26, %v2383_v62  ;;  %v2537_v45 = vadd.f32 %v2515_v29, %v2471_v1  ;;  %v2712_v54 = vmul.f32 %v7424_v43, %v6691_v16  ;;  %v4588_v51 = vld [vmem:[%s10055_s1 + $0x108] sm:$0xff]  ;;  %v4610_v26 = vld [vmem:[%s10055_s1 + $0x260] sm:$0xff]  ;;  %v4633_v62 = vld [vmem:[%s10055_s1 + $0x310] sm:$0xff] }
 0x151   :  { %v2602_v57 = vadd.f32 %v2580_v14, %v2536_v5  ;;  %v2690_v53 = vadd.f32 %v2668_v12, %v2646_v39  ;;  %v2691_v2 = vadd.f32 %v2669_v46, %v2647_v60  ;;  %v2713_v3 = vmul.f32 %v7429_v56, %v6691_v16  ;;  %v4655_v1 = vld [vmem:[%s10055_s1 + $0x1b0] sm:$0xff]  ;;  %v4634_v12 = vld [vmem:[%s10055_s1 + $0x318] sm:$0xff] }
 0x152   :  { %v2603_v47 = vadd.f32 %v2581_v4, %v2537_v45  ;;  %v2778_v34 = vmul.f32 %v7461_v6, %v6701_v40  ;;  %v2779_v17 = vmul.f32 %v7466_v35, %v6701_v40  ;;  %v1076_v37 = vmul.f32 %v6191_v9, %v1053_v22  ;;  %v4656_v22 = vld [vmem:[%s10055_s1 + $0x1b8] sm:$0xff] }
 0x153   :  { %v2624_v7 = vmax.f32 %v2404_v10, %v2602_v57  ;;  %v2734_v52 = vadd.f32 %v2712_v54, %v2690_v53  ;;  %v2735_v59 = vadd.f32 %v2713_v3, %v2691_v2  ;;  %v1077_v32 = vmul.f32 %v6191_v9, %v1054_v24  ;;  %v4677_v24 = vld [vmem:[%s10055_s1 + $0x3c0] sm:$0xff] }
 0x154   :  { %v2625_v29 = vmax.f32 %v2405_v20, %v2603_v47  ;;  %v1122_v14 = vmul.f32 %v4587_v49, %v6198_v58  ;;  %v1123_v4 = vmul.f32 %v4588_v51, %v6198_v58  ;;  %v1190_v38 = vmul.f32 %v4610_v26, %v6205_v55  ;;  %v4678_v47 = vld [vmem:[%s10055_s1 + $0x3c8] sm:$0xff] }
 0x155   :  { %v2800_v39 = vadd.f32 %v2778_v34, %v2734_v52  ;;  %v2801_v5 = vadd.f32 %v2779_v17, %v2735_v59  ;;  %v1191_v60 = vmul.f32 %v4611_v19, %v6205_v55  ;;  %v1258_v46 = vmul.f32 %v4633_v62, %v6208_v18  ;;  %v4699_v52 = vld [vmem:[%s10055_s1 + $0x470] sm:$0xff] }
 0x156   :  { %v1144_v10 = vadd.f32 %v1122_v14, %v1076_v37  ;;  %v1145_v20 = vadd.f32 %v1123_v4, %v1077_v32  ;;  %v1259_v45 = vmul.f32 %v4634_v12, %v6208_v18  ;;  %v1302_v54 = vmul.f32 %v4587_v49, %v6191_v9  ;;  %v3791_v14 = vld [vmem:[%s10056_s2 + $0x98] sm:$0xff]  ;;  %v3790_v4 = vld [vmem:[%s10056_s2 + $0x90] sm:$0xff] }
 0x157   :  { %v2822_v57 = vmax.f32 %v2624_v7, %v2800_v39  ;;  %v2823_v53 = vmax.f32 %v2625_v29, %v2801_v5  ;;  %v1303_v2 = vmul.f32 %v4588_v51, %v6191_v9  ;;  %v1346_v3 = vmul.f32 %v4655_v1, %v6198_v58  ;;  %v4700_v29 = vld [vmem:[%s10055_s1 + $0x478] sm:$0xff]  ;;  %4060 = vmatprep.mubr.f32.mxu1 %v3791_v14 }
 0x158   :  { %v1212_v34 = vadd.f32 %v1190_v38, %v1144_v10  ;;  %v1213_v17 = vadd.f32 %v1191_v60, %v1145_v20  ;;  %v1347_v37 = vmul.f32 %v4656_v22, %v6198_v58  ;;  %v1390_v49 = vmul.f32 %v4633_v62, %v6205_v55  ;;  %v4721_v60 = vld [vmem:[%s10055_s1 + $0x520] sm:$0xff]  ;;  %v4722_v22 = vld [vmem:[%s10055_s1 + $0x528] sm:$0xff]  ;;  %4061 = vmatmul.mubr.f32.gmra.mrb[6].mxu1 %v3790_v4  ;;  %v4744_v14 = vld [vmem:[%s10055_s1 + $0x5d8] sm:$0xff] }
 0x159   :  { %v5296_v7 = vpack.c.bf16 %v2823_v53, %v2822_v57  ;;  %v1368_v59 = vadd.f32 %v1346_v3, %v1302_v54  ;;  %v1391_v51 = vmul.f32 %v4634_v12, %v6205_v55  ;;  %v1456_v32 = vmul.f32 %v4677_v24, %v6208_v18 }
 0x15a   :  { %v1280_v38 = vadd.f32 %v1258_v46, %v1212_v34  ;;  %v1281_v1 = vadd.f32 %v1259_v45, %v1213_v17  ;;  %v1369_v39 = vadd.f32 %v1347_v37, %v1303_v2  ;;  %v1457_v5 = vmul.f32 %v4678_v47, %v6208_v18 }
 0x15b   :  { %5297 = vmatprep.subr.bf16.mxu1 %v5296_v7  ;;  %v1412_v10 = vadd.f32 %v1390_v49, %v1368_v59  ;;  %v1522_v20 = vmul.f32 %v4610_v26, %v6191_v9  ;;  %v1523_v54 = vmul.f32 %v4611_v19, %v6191_v9  ;;  %v1544_v46 = vmul.f32 %v4633_v62, %v6198_v58  ;;  %v4743_v59 = vld [vmem:[%s10055_s1 + $0x5d0] sm:$0xff] }
 0x15c   :  { %v1413_v45 = vadd.f32 %v1391_v51, %v1369_v39  ;;  %v1545_v57 = vmul.f32 %v4634_v12, %v6198_v58  ;;  %v1610_v53 = vmul.f32 %v4699_v52, %v6205_v55  ;;  %v1611_v2 = vmul.f32 %v4700_v29, %v6205_v55 }
 0x15d   :  { %v1478_v3 = vadd.f32 %v1456_v32, %v1412_v10  ;;  %v1566_v34 = vadd.f32 %v1544_v46, %v1522_v20  ;;  %v1676_v17 = vmul.f32 %v4721_v60, %v6208_v18  ;;  %v1677_v37 = vmul.f32 %v4722_v22, %v6208_v18 }
 0x15e   :  { %v1479_v49 = vadd.f32 %v1457_v5, %v1413_v45  ;;  %v1567_v26 = vadd.f32 %v1545_v57, %v1523_v54  ;;  %v1742_v19 = vmul.f32 %v4633_v62, %v6191_v9  ;;  %v1743_v7 = vmul.f32 %v4634_v12, %v6191_v9 }
 0x15f   :  { %v1500_v52 = vmax.f32 %v1280_v38, %v1478_v3  ;;  %v1632_v51 = vadd.f32 %v1610_v53, %v1566_v34  ;;  %v1764_v29 = vmul.f32 %v4677_v24, %v6198_v58  ;;  %v1765_v32 = vmul.f32 %v4678_v47, %v6198_v58 }
 0x160   :  { %v1501_v4 = vmax.f32 %v1281_v1, %v1479_v49  ;;  %v1633_v39 = vadd.f32 %v1611_v2, %v1567_v26  ;;  %v1808_v62 = vmul.f32 %v4721_v60, %v6205_v55  ;;  %v1809_v12 = vmul.f32 %v4722_v22, %v6205_v55 }
 0x161   :  { %v1698_v5 = vadd.f32 %v1676_v17, %v1632_v51  ;;  %v1786_v10 = vadd.f32 %v1764_v29, %v1742_v19  ;;  %v1787_v20 = vadd.f32 %v1765_v32, %v1743_v7  ;;  %v1874_v38 = vmul.f32 %v4743_v59, %v6208_v18 }
 0x162   :  { %v1699_v54 = vadd.f32 %v1677_v37, %v1633_v39  ;;  %v1875_v24 = vmul.f32 %v4744_v14, %v6208_v18  ;;  %v2890_v47 = vmul.f32 %v6962_v50, %v7311_v33  ;;  %v2891_v46 = vmul.f32 %v6962_v50, %v7316_v13 }
 0x163   :  { %v1720_v1 = vmax.f32 %v1500_v52, %v1698_v5  ;;  %v1830_v45 = vadd.f32 %v1808_v62, %v1786_v10  ;;  %v1831_v57 = vadd.f32 %v1809_v12, %v1787_v20  ;;  %v2936_v60 = vmul.f32 %v7326_v48, %v6965_v31 }
 0x164   :  { %v1721_v22 = vmax.f32 %v1501_v4, %v1699_v54  ;;  %v2937_v53 = vmul.f32 %v7331_v8, %v6965_v31  ;;  %v3004_v2 = vmul.f32 %v7341_v63, %v6981_v41  ;;  %v3005_v3 = vmul.f32 %v7346_v36, %v6981_v41 }
 0x165   :  { %v1896_v33 = vadd.f32 %v1874_v38, %v1830_v45  ;;  %v1897_v34 = vadd.f32 %v1875_v24, %v1831_v57  ;;  %v2958_v17 = vadd.f32 %v2936_v60, %v2890_v47  ;;  %v3072_v13 = vmul.f32 %v7359_v11, %v6987_v44 }
 0x166   :  { %v2959_v37 = vadd.f32 %v2937_v53, %v2891_v46  ;;  %v3073_v49 = vmul.f32 %v7371_v0, %v6987_v44  ;;  %v3116_v26 = vmul.f32 %v7326_v48, %v6962_v50  ;;  %v3117_v19 = vmul.f32 %v7331_v8, %v6962_v50 }
 0x167   :  { %v1918_v7 = vmax.f32 %v1720_v1, %v1896_v33  ;;  %v1919_v59 = vmax.f32 %v1721_v22, %v1897_v34  ;;  %v3026_v52 = vadd.f32 %v3004_v2, %v2958_v17  ;;  %v3160_v51 = vmul.f32 %v7376_v42, %v6965_v31  ;;  %v7627_v34 = vld [vmem:[%s10055_s1 + $0x30] sm:$0xff] }
 0x168   :  { %v3027_v29 = vadd.f32 %v3005_v3, %v2959_v37  ;;  %v3161_v32 = vmul.f32 %v7381_v28, %v6965_v31  ;;  %v3204_v14 = vmul.f32 %v7359_v11, %v6981_v41  ;;  %v3205_v4 = vmul.f32 %v7371_v0, %v6981_v41 }
 0x169   :  { %v5298_v48 = vpack.c.bf16 %v1919_v59, %v1918_v7  ;;  %v3094_v39 = vadd.f32 %v3072_v13, %v3026_v52  ;;  %v3182_v62 = vadd.f32 %v3160_v51, %v3116_v26  ;;  %v3270_v8 = vmul.f32 %v7390_v25, %v6987_v44  ;;  %v7648_v7 = vld [vmem:[%s10055_s1 + $0xe8] sm:$0xff] }
 0x16a   :  { %v3095_v12 = vadd.f32 %v3073_v49, %v3027_v29  ;;  %v3183_v5 = vadd.f32 %v3161_v32, %v3117_v19  ;;  %v3271_v42 = vmul.f32 %v7403_v15, %v6987_v44  ;;  %v3336_v28 = vmul.f32 %v7341_v63, %v6962_v50 }
 0x16b   :  { %5299 = vmatpush3.bf16.msra.mxu1 %v5298_v48  ;;  %v3226_v10 = vadd.f32 %v3204_v14, %v3182_v62  ;;  %v3337_v20 = vmul.f32 %v7346_v36, %v6962_v50  ;;  %v3358_v38 = vmul.f32 %v7359_v11, %v6965_v31  ;;  %v3359_v54 = vmul.f32 %v7371_v0, %v6965_v31  ;;  %v7671_v48 = vld [vmem:[%s10055_s1 + $0x2f0] sm:$0xff] }
 0x16c   :  { %v3227_v24 = vadd.f32 %v3205_v4, %v3183_v5  ;;  %v3424_v47 = vmul.f32 %v7414_v61, %v6981_v41  ;;  %v3425_v46 = vmul.f32 %v7419_v27, %v6981_v41  ;;  %v3490_v63 = vmul.f32 %v7424_v43, %v6987_v44  ;;  %v7687_v5 = vld [vmem:[%s10055_s1 + $0x190] sm:$0xff] }
 0x16d   :  { %v3292_v1 = vadd.f32 %v3270_v8, %v3226_v10  ;;  %v3380_v45 = vadd.f32 %v3358_v38, %v3336_v28  ;;  %v3381_v57 = vadd.f32 %v3359_v54, %v3337_v20  ;;  %v3491_v36 = vmul.f32 %v7429_v56, %v6987_v44  ;;  %v7701_v54 = vld [vmem:[%s10055_s1 + $0x3a0] sm:$0xff] }
 0x16e   :  { %v3293_v60 = vadd.f32 %v3271_v42, %v3227_v24  ;;  %v3556_v22 = vmul.f32 %v7359_v11, %v6962_v50  ;;  %v3557_v53 = vmul.f32 %v7371_v0, %v6962_v50  ;;  %v3578_v61 = vmul.f32 %v7390_v25, %v6965_v31  ;;  %v7632_v11 = vld [vmem:[%s10055_s1 + $0x38] sm:$0xff] }
 0x16f   :  { %v3314_v27 = vmax.f32 %v3094_v39, %v3292_v1  ;;  %v3446_v2 = vadd.f32 %v3424_v47, %v3380_v45  ;;  %v3447_v3 = vadd.f32 %v3425_v46, %v3381_v57  ;;  %v3579_v33 = vmul.f32 %v7403_v15, %v6965_v31  ;;  %v7641_v15 = vld [vmem:[%s10055_s1 + $0xe0] sm:$0xff]  ;;  %v7692_v42 = vld [vmem:[%s10055_s1 + $0x198] sm:$0xff] }
 0x170   :  { %v3315_v0 = vmax.f32 %v3095_v12, %v3293_v60  ;;  %v3600_v17 = vadd.f32 %v3578_v61, %v3556_v22  ;;  %v3622_v25 = vmul.f32 %v7424_v43, %v6981_v41  ;;  %v3623_v13 = vmul.f32 %v7429_v56, %v6981_v41  ;;  %v7653_v43 = vld [vmem:[%s10055_s1 + $0x240] sm:$0xff]  ;;  %v7658_v56 = vld [vmem:[%s10055_s1 + $0x248] sm:$0xff]  ;;  %v7682_v12 = vld [vmem:[%s10055_s1 + $0x2f8] sm:$0xff] }
 0x171   :  { %v3512_v37 = vadd.f32 %v3490_v63, %v3446_v2  ;;  %v3513_v49 = vadd.f32 %v3491_v36, %v3447_v3  ;;  %v3601_v26 = vadd.f32 %v3579_v33, %v3557_v53  ;;  %v3688_v19 = vmul.f32 %v7461_v6, %v6987_v44  ;;  %v7714_v60 = vld [vmem:[%s10055_s1 + $0x3a8] sm:$0xff]  ;;  %v7725_v2 = vld [vmem:[%s10055_s1 + $0x450] sm:$0xff] }
 0x172   :  { %v3644_v59 = vadd.f32 %v3622_v25, %v3600_v17  ;;  %v3689_v52 = vmul.f32 %v7466_v35, %v6987_v44  ;;  %v1982_v6 = vmul.f32 %v6671_v23, %v7627_v34  ;;  %v1983_v51 = vmul.f32 %v6671_v23, %v7632_v11  ;;  %v7730_v25 = vld [vmem:[%s10055_s1 + $0x458] sm:$0xff] }
 0x173   :  { %v3534_v29 = vmax.f32 %v3314_v27, %v3512_v37  ;;  %v3535_v32 = vmax.f32 %v3315_v0, %v3513_v49  ;;  %v3645_v14 = vadd.f32 %v3623_v13, %v3601_v26  ;;  %v2028_v4 = vmul.f32 %v7641_v15, %v6688_v21  ;;  %v7735_v13 = vld [vmem:[%s10055_s1 + $0x500] sm:$0xff]  ;;  %v7740_v37 = vld [vmem:[%s10055_s1 + $0x508] sm:$0xff] }
 0x174   :  { %v3710_v39 = vadd.f32 %v3688_v19, %v3644_v59  ;;  %v2029_v35 = vmul.f32 %v7648_v7, %v6688_v21  ;;  %v2096_v62 = vmul.f32 %v7653_v43, %v6691_v16  ;;  %v2097_v8 = vmul.f32 %v7658_v56, %v6691_v16 }
 0x175   :  { %v3711_v28 = vadd.f32 %v3689_v52, %v3645_v14  ;;  %v2050_v10 = vadd.f32 %v2028_v4, %v1982_v6  ;;  %v2164_v20 = vmul.f32 %v7671_v48, %v6701_v40  ;;  %v2165_v38 = vmul.f32 %v7682_v12, %v6701_v40 }
 0x176   :  { %v3732_v24 = vmax.f32 %v3534_v29, %v3710_v39  ;;  %v2051_v47 = vadd.f32 %v2029_v35, %v1983_v51  ;;  %v2208_v46 = vmul.f32 %v7641_v15, %v6671_v23  ;;  %v2209_v63 = vmul.f32 %v7648_v7, %v6671_v23 }
 0x177   :  { %v3733_v1 = vmax.f32 %v3535_v32, %v3711_v28  ;;  %v2118_v45 = vadd.f32 %v2096_v62, %v2050_v10  ;;  %v2252_v57 = vmul.f32 %v7687_v5, %v6688_v21  ;;  %v2253_v36 = vmul.f32 %v7692_v42, %v6688_v21 }
 0x178   :  { %v2119_v22 = vadd.f32 %v2097_v8, %v2051_v47  ;;  %v2296_v53 = vmul.f32 %v7671_v48, %v6691_v16  ;;  %v2297_v61 = vmul.f32 %v7682_v12, %v6691_v16  ;;  %v2362_v27 = vmul.f32 %v7701_v54, %v6701_v40  ;;  %v7772_v47 = vld [vmem:[%s10055_s1 + $0x5b0] sm:$0xff] }
 0x179   :  { %v5338_v3 = vpack.c.bf16 %v3733_v1, %v3732_v24  ;;  %v2186_v33 = vadd.f32 %v2164_v20, %v2118_v45  ;;  %v2274_v0 = vadd.f32 %v2252_v57, %v2208_v46  ;;  %v2275_v17 = vadd.f32 %v2253_v36, %v2209_v63  ;;  %v7777_v46 = vld [vmem:[%s10055_s1 + $0x5b8] sm:$0xff]  ;;  %v1055_v36 = vld [vmem:[%s10055_s1 + $0x60] sm:$0xff] }
 0x17a   :  { %v2187_v49 = vadd.f32 %v2165_v38, %v2119_v22  ;;  %v2363_v26 = vmul.f32 %v7714_v60, %v6701_v40  ;;  %v2428_v19 = vmul.f32 %v7653_v43, %v6671_v23  ;;  %v2429_v59 = vmul.f32 %v7658_v56, %v6671_v23  ;;  %v1056_v22 = vld [vmem:[%s10055_s1 + $0x68] sm:$0xff] }
 0x17b   :  { %5339 = vmatpush1.bf16.msra.mxu0 %v5338_v3  ;;  %v2318_v52 = vadd.f32 %v2296_v53, %v2274_v0  ;;  %v2319_v6 = vadd.f32 %v2297_v61, %v2275_v17  ;;  %v2450_v51 = vmul.f32 %v7671_v48, %v6688_v21  ;;  %v2451_v29 = vmul.f32 %v7682_v12, %v6688_v21  ;;  %v4590_v0 = vld [vmem:[%s10055_s1 + $0x118] sm:$0xff] }
 0x17c   :  { %v2516_v32 = vmul.f32 %v7725_v2, %v6691_v16  ;;  %v2517_v14 = vmul.f32 %v7730_v25, %v6691_v16  ;;  %v2582_v4 = vmul.f32 %v7735_v13, %v6701_v40  ;;  %v2583_v39 = vmul.f32 %v7740_v37, %v6701_v40  ;;  %5340 = vmatprep.subr.bf16.mxu0 %v5403_v30 }
 0x17d   :  { %v2384_v35 = vadd.f32 %v2362_v27, %v2318_v52  ;;  %v2385_v62 = vadd.f32 %v2363_v26, %v2319_v6  ;;  %v2472_v8 = vadd.f32 %v2450_v51, %v2428_v19  ;;  %v2473_v28 = vadd.f32 %v2451_v29, %v2429_v59  ;;  %v4612_v59 = vld [vmem:[%s10055_s1 + $0x270] sm:$0xff]  ;;  %v4613_v52 = vld [vmem:[%s10055_s1 + $0x278] sm:$0xff] }
 0x17e   :  { %v2648_v10 = vmul.f32 %v7671_v48, %v6671_v23  ;;  %v2649_v20 = vmul.f32 %v7682_v12, %v6671_v23  ;;  %v2670_v38 = vmul.f32 %v7701_v54, %v6688_v21  ;;  %v2671_v24 = vmul.f32 %v7714_v60, %v6688_v21 }
 0x17f   :  { %v2406_v63 = vmax.f32 %v2186_v33, %v2384_v35  ;;  %v2407_v1 = vmax.f32 %v2187_v49, %v2385_v62  ;;  %v2538_v45 = vadd.f32 %v2516_v32, %v2472_v8  ;;  %v2539_v57 = vadd.f32 %v2517_v14, %v2473_v28  ;;  %v4589_v33 = vld [vmem:[%s10055_s1 + $0x110] sm:$0xff]  ;;  %v4635_v62 = vld [vmem:[%s10055_s1 + $0x320] sm:$0xff] }
 0x180   :  { %v2692_v53 = vadd.f32 %v2670_v38, %v2648_v10  ;;  %v2693_v61 = vadd.f32 %v2671_v24, %v2649_v20  ;;  %v2714_v27 = vmul.f32 %v7735_v13, %v6691_v16  ;;  %v2715_v3 = vmul.f32 %v7740_v37, %v6691_v16  ;;  %v4636_v38 = vld [vmem:[%s10055_s1 + $0x328] sm:$0xff]  ;;  %v4657_v24 = vld [vmem:[%s10055_s1 + $0x1c0] sm:$0xff] }
 0x181   :  { %v2604_v17 = vadd.f32 %v2582_v4, %v2538_v45  ;;  %v2605_v49 = vadd.f32 %v2583_v39, %v2539_v57  ;;  %v2780_v26 = vmul.f32 %v7772_v47, %v6701_v40  ;;  %v2781_v19 = vmul.f32 %v7777_v46, %v6701_v40 }
 0x182   :  { %v2736_v6 = vadd.f32 %v2714_v27, %v2692_v53  ;;  %v2737_v51 = vadd.f32 %v2715_v3, %v2693_v61  ;;  %v1078_v29 = vmul.f32 %v6191_v9, %v1055_v36  ;;  %v1079_v32 = vmul.f32 %v6191_v9, %v1056_v22  ;;  %v4679_v22 = vld [vmem:[%s10055_s1 + $0x3d0] sm:$0xff] }
 0x183   :  { %v2626_v14 = vmax.f32 %v2406_v63, %v2604_v17  ;;  %v2627_v4 = vmax.f32 %v2407_v1, %v2605_v49  ;;  %v1124_v39 = vmul.f32 %v4589_v33, %v6198_v58  ;;  %v1125_v35 = vmul.f32 %v4590_v0, %v6198_v58  ;;  %v4658_v63 = vld [vmem:[%s10055_s1 + $0x1c8] sm:$0xff] }
 0x184   :  { %v2802_v8 = vadd.f32 %v2780_v26, %v2736_v6  ;;  %v2803_v28 = vadd.f32 %v2781_v19, %v2737_v51  ;;  %v1192_v10 = vmul.f32 %v4612_v59, %v6205_v55  ;;  %v1193_v20 = vmul.f32 %v4613_v52, %v6205_v55  ;;  %v4680_v6 = vld [vmem:[%s10055_s1 + $0x3d8] sm:$0xff] }
 0x185   :  { %v1146_v1 = vadd.f32 %v1124_v39, %v1078_v29  ;;  %v1147_v45 = vadd.f32 %v1125_v35, %v1079_v32  ;;  %v1260_v57 = vmul.f32 %v4635_v62, %v6208_v18  ;;  %v1261_v36 = vmul.f32 %v4636_v38, %v6208_v18 }
 0x186   :  { %v2824_v53 = vmax.f32 %v2626_v14, %v2802_v8  ;;  %v2825_v61 = vmax.f32 %v2627_v4, %v2803_v28  ;;  %v1304_v27 = vmul.f32 %v4589_v33, %v6191_v9  ;;  %v1305_v3 = vmul.f32 %v4590_v0, %v6191_v9  ;;  %v4701_v33 = vld [vmem:[%s10055_s1 + $0x480] sm:$0xff]  ;;  %v3797_v0 = vld [vmem:[%s10056_s2 + $0xc8] sm:$0xff] }
 0x187   :  { %v1214_v17 = vadd.f32 %v1192_v10, %v1146_v1  ;;  %v1215_v49 = vadd.f32 %v1193_v20, %v1147_v45  ;;  %v1348_v26 = vmul.f32 %v4657_v24, %v6198_v58  ;;  %v1349_v19 = vmul.f32 %v4658_v63, %v6198_v58  ;;  %v3796_v4 = vld [vmem:[%s10056_s2 + $0xc0] sm:$0xff]  ;;  %v4702_v10 = vld [vmem:[%s10055_s1 + $0x488] sm:$0xff]  ;;  %v4723_v20 = vld [vmem:[%s10055_s1 + $0x530] sm:$0xff]  ;;  %4065 = vmatprep.mubr.f32.mxu1 %v3797_v0 }
 0x188   :  { %v5300_v51 = vpack.c.bf16 %v2825_v61, %v2824_v53  ;;  %v1392_v29 = vmul.f32 %v4635_v62, %v6205_v55  ;;  %v1393_v32 = vmul.f32 %v4636_v38, %v6205_v55  ;;  %v1458_v14 = vmul.f32 %v4679_v22, %v6208_v18  ;;  %v4724_v24 = vld [vmem:[%s10055_s1 + $0x538] sm:$0xff]  ;;  %4066 = vmatmul.mubr.f32.gmra.mrb[8].mxu1 %v3796_v4  ;;  %v4745_v4 = vld [vmem:[%s10055_s1 + $0x5e0] sm:$0xff] }
 0x189   :  { %v1282_v39 = vadd.f32 %v1260_v57, %v1214_v17  ;;  %v1283_v35 = vadd.f32 %v1261_v36, %v1215_v49  ;;  %v1370_v8 = vadd.f32 %v1348_v26, %v1304_v27  ;;  %v1371_v28 = vadd.f32 %v1349_v19, %v1305_v3 }
 0x18a   :  { %5301 = vmatprep.subr.bf16.mxu1 %v5300_v51  ;;  %v1459_v63 = vmul.f32 %v4680_v6, %v6208_v18  ;;  %v1524_v1 = vmul.f32 %v4612_v59, %v6191_v9  ;;  %v1525_v45 = vmul.f32 %v4613_v52, %v6191_v9  ;;  %v1546_v57 = vmul.f32 %v4635_v62, %v6198_v58 }
 0x18b   :  { %v1414_v36 = vadd.f32 %v1392_v29, %v1370_v8  ;;  %v1415_v53 = vadd.f32 %v1393_v32, %v1371_v28  ;;  %v1547_v61 = vmul.f32 %v4636_v38, %v6198_v58  ;;  %v1612_v27 = vmul.f32 %v4701_v33, %v6205_v55  ;;  %v4746_v8 = vld [vmem:[%s10055_s1 + $0x5e8] sm:$0xff] }
 0x18c   :  { %v1568_v3 = vadd.f32 %v1546_v57, %v1524_v1  ;;  %v1613_v17 = vmul.f32 %v4702_v10, %v6205_v55  ;;  %v1678_v49 = vmul.f32 %v4723_v20, %v6208_v18  ;;  %v1679_v26 = vmul.f32 %v4724_v24, %v6208_v18 }
 0x18d   :  { %v1480_v19 = vadd.f32 %v1458_v14, %v1414_v36  ;;  %v1481_v59 = vadd.f32 %v1459_v63, %v1415_v53  ;;  %v1569_v51 = vadd.f32 %v1547_v61, %v1525_v45  ;;  %v1744_v52 = vmul.f32 %v4635_v62, %v6191_v9 }
 0x18e   :  { %v1634_v0 = vadd.f32 %v1612_v27, %v1568_v3  ;;  %v1745_v29 = vmul.f32 %v4636_v38, %v6191_v9  ;;  %v1766_v32 = vmul.f32 %v4679_v22, %v6198_v58  ;;  %v1767_v33 = vmul.f32 %v4680_v6, %v6198_v58 }
 0x18f   :  { %v1502_v14 = vmax.f32 %v1282_v39, %v1480_v19  ;;  %v1503_v28 = vmax.f32 %v1283_v35, %v1481_v59  ;;  %v1635_v10 = vadd.f32 %v1613_v17, %v1569_v51  ;;  %v1810_v62 = vmul.f32 %v4723_v20, %v6205_v55 }
 0x190   :  { %v1700_v63 = vadd.f32 %v1678_v49, %v1634_v0  ;;  %v1788_v1 = vadd.f32 %v1766_v32, %v1744_v52  ;;  %v1789_v38 = vadd.f32 %v1767_v33, %v1745_v29  ;;  %v1811_v22 = vmul.f32 %v4724_v24, %v6205_v55 }
 0x191   :  { %v1701_v45 = vadd.f32 %v1679_v26, %v1635_v10  ;;  %v1876_v6 = vmul.f32 %v4745_v4, %v6208_v18  ;;  %v1877_v57 = vmul.f32 %v4746_v8, %v6208_v18  ;;  %v2892_v36 = vmul.f32 %v6962_v50, %v7627_v34 }
 0x192   :  { %v1722_v53 = vmax.f32 %v1502_v14, %v1700_v63  ;;  %v1832_v61 = vadd.f32 %v1810_v62, %v1788_v1  ;;  %v1833_v39 = vadd.f32 %v1811_v22, %v1789_v38  ;;  %v2893_v35 = vmul.f32 %v6962_v50, %v7632_v11 }
 0x193   :  { %v1723_v20 = vmax.f32 %v1503_v28, %v1701_v45  ;;  %v2938_v27 = vmul.f32 %v7641_v15, %v6965_v31  ;;  %v2939_v24 = vmul.f32 %v7648_v7, %v6965_v31  ;;  %v3006_v3 = vmul.f32 %v7653_v43, %v6981_v41 }
 0x194   :  { %v1898_v17 = vadd.f32 %v1876_v6, %v1832_v61  ;;  %v1899_v49 = vadd.f32 %v1877_v57, %v1833_v39  ;;  %v3007_v34 = vmul.f32 %v7658_v56, %v6981_v41  ;;  %v3074_v26 = vmul.f32 %v7671_v48, %v6987_v44 }
 0x195   :  { %v2960_v19 = vadd.f32 %v2938_v27, %v2892_v36  ;;  %v2961_v11 = vadd.f32 %v2939_v24, %v2893_v35  ;;  %v3075_v59 = vmul.f32 %v7682_v12, %v6987_v44  ;;  %v3118_v51 = vmul.f32 %v7641_v15, %v6962_v50 }
 0x196   :  { %v1920_v52 = vmax.f32 %v1722_v53, %v1898_v17  ;;  %v1921_v0 = vmax.f32 %v1723_v20, %v1899_v49  ;;  %v3119_v29 = vmul.f32 %v7648_v7, %v6962_v50  ;;  %v3162_v32 = vmul.f32 %v7687_v5, %v6965_v31  ;;  %v7938_v49 = vld [vmem:[%s10055_s1 + $0x40] sm:$0xff] }
 0x197   :  { %v3028_v33 = vadd.f32 %v3006_v3, %v2960_v19  ;;  %v3029_v4 = vadd.f32 %v3007_v34, %v2961_v11  ;;  %v3163_v8 = vmul.f32 %v7692_v42, %v6965_v31  ;;  %v3206_v14 = vmul.f32 %v7671_v48, %v6981_v41 }
 0x198   :  { %v5302_v28 = vpack.c.bf16 %v1921_v0, %v1920_v52  ;;  %v3184_v10 = vadd.f32 %v3162_v32, %v3118_v51  ;;  %v3207_v15 = vmul.f32 %v7682_v12, %v6981_v41  ;;  %v3272_v62 = vmul.f32 %v7701_v54, %v6987_v44  ;;  %v7959_v52 = vld [vmem:[%s10055_s1 + $0xf8] sm:$0xff] }
 0x199   :  { %v3096_v7 = vadd.f32 %v3074_v26, %v3028_v33  ;;  %v3097_v63 = vadd.f32 %v3075_v59, %v3029_v4  ;;  %v3185_v1 = vadd.f32 %v3163_v8, %v3119_v29  ;;  %v3273_v5 = vmul.f32 %v7714_v60, %v6987_v44 }
 0x19a   :  { %5303 = vmatpush3.bf16.msra.mxu1 %v5302_v28  ;;  %v3228_v38 = vadd.f32 %v3206_v14, %v3184_v10  ;;  %v3338_v42 = vmul.f32 %v7653_v43, %v6962_v50  ;;  %v3339_v22 = vmul.f32 %v7658_v56, %v6962_v50  ;;  %v3360_v45 = vmul.f32 %v7671_v48, %v6965_v31 }
 0x19b   :  { %v3229_v6 = vadd.f32 %v3207_v15, %v3185_v1  ;;  %v3361_v57 = vmul.f32 %v7682_v12, %v6965_v31  ;;  %v3426_v36 = vmul.f32 %v7725_v2, %v6981_v41  ;;  %v3427_v53 = vmul.f32 %v7730_v25, %v6981_v41 }
 0x19c   :  { %v3294_v61 = vadd.f32 %v3272_v62, %v3228_v38  ;;  %v3382_v39 = vadd.f32 %v3360_v45, %v3338_v42  ;;  %v3492_v43 = vmul.f32 %v7735_v13, %v6987_v44  ;;  %v3493_v56 = vmul.f32 %v7740_v37, %v6987_v44  ;;  %v7988_v62 = vld [vmem:[%s10055_s1 + $0x300] sm:$0xff]  ;;  %v7998_v38 = vld [vmem:[%s10055_s1 + $0x308] sm:$0xff] }
 0x19d   :  { %v3295_v35 = vadd.f32 %v3273_v5, %v3229_v6  ;;  %v3383_v20 = vadd.f32 %v3361_v57, %v3339_v22  ;;  %v3558_v27 = vmul.f32 %v7671_v48, %v6962_v50  ;;  %v3559_v24 = vmul.f32 %v7682_v12, %v6962_v50  ;;  %v7943_v48 = vld [vmem:[%s10055_s1 + $0x48] sm:$0xff] }
 0x19e   :  { %v3316_v2 = vmax.f32 %v3096_v7, %v3294_v61  ;;  %v3448_v3 = vadd.f32 %v3426_v36, %v3382_v39  ;;  %v3580_v25 = vmul.f32 %v7701_v54, %v6965_v31  ;;  %v3581_v17 = vmul.f32 %v7714_v60, %v6965_v31  ;;  %v7952_v60 = vld [vmem:[%s10055_s1 + $0xf0] sm:$0xff]  ;;  %v7993_v7 = vld [vmem:[%s10055_s1 + $0x1a0] sm:$0xff]  ;;  %v8005_v22 = vld [vmem:[%s10055_s1 + $0x1a8] sm:$0xff] }
 0x19f   :  { %v3317_v34 = vmax.f32 %v3097_v63, %v3295_v35  ;;  %v3449_v12 = vadd.f32 %v3427_v53, %v3383_v20  ;;  %v3624_v26 = vmul.f32 %v7735_v13, %v6981_v41  ;;  %v3625_v54 = vmul.f32 %v7740_v37, %v6981_v41  ;;  %v7964_v13 = vld [vmem:[%s10055_s1 + $0x250] sm:$0xff]  ;;  %v7969_v37 = vld [vmem:[%s10055_s1 + $0x258] sm:$0xff] }
 0x1a0   :  { %v3514_v19 = vadd.f32 %v3492_v43, %v3448_v3  ;;  %v3602_v11 = vadd.f32 %v3580_v25, %v3558_v27  ;;  %v3603_v59 = vadd.f32 %v3581_v17, %v3559_v24  ;;  %v3690_v51 = vmul.f32 %v7772_v47, %v6987_v44  ;;  %v8016_v53 = vld [vmem:[%s10055_s1 + $0x3b0] sm:$0xff]  ;;  %v8023_v35 = vld [vmem:[%s10055_s1 + $0x3b8] sm:$0xff] }
 0x1a1   :  { %v3515_v0 = vadd.f32 %v3493_v56, %v3449_v12  ;;  %v3691_v29 = vmul.f32 %v7777_v46, %v6987_v44  ;;  %v1984_v47 = vmul.f32 %v6671_v23, %v7938_v49  ;;  %v1985_v32 = vmul.f32 %v6671_v23, %v7943_v48  ;;  %v8036_v12 = vld [vmem:[%s10055_s1 + $0x460] sm:$0xff] }
 0x1a2   :  { %v3536_v33 = vmax.f32 %v3316_v2, %v3514_v19  ;;  %v3646_v4 = vadd.f32 %v3624_v26, %v3602_v11  ;;  %v3647_v8 = vadd.f32 %v3625_v54, %v3603_v59  ;;  %v2030_v14 = vmul.f32 %v7952_v60, %v6688_v21  ;;  %v8041_v26 = vld [vmem:[%s10055_s1 + $0x468] sm:$0xff]  ;;  %v8046_v54 = vld [vmem:[%s10055_s1 + $0x510] sm:$0xff] }
 0x1a3   :  { %v3537_v28 = vmax.f32 %v3317_v34, %v3515_v0  ;;  %v2031_v10 = vmul.f32 %v7959_v52, %v6688_v21  ;;  %v2098_v15 = vmul.f32 %v7964_v13, %v6691_v16  ;;  %v2099_v46 = vmul.f32 %v7969_v37, %v6691_v16  ;;  %v8055_v0 = vld [vmem:[%s10055_s1 + $0x518] sm:$0xff] }
 0x1a4   :  { %v3712_v63 = vadd.f32 %v3690_v51, %v3646_v4  ;;  %v3713_v1 = vadd.f32 %v3691_v29, %v3647_v8  ;;  %v2052_v5 = vadd.f32 %v2030_v14, %v1984_v47  ;;  %v2166_v42 = vmul.f32 %v7988_v62, %v6701_v40 }
 0x1a5   :  { %v2053_v45 = vadd.f32 %v2031_v10, %v1985_v32  ;;  %v2167_v6 = vmul.f32 %v7998_v38, %v6701_v40  ;;  %v2210_v57 = vmul.f32 %v7952_v60, %v6671_v23  ;;  %v2211_v36 = vmul.f32 %v7959_v52, %v6671_v23 }
 0x1a6   :  { %v3734_v61 = vmax.f32 %v3536_v33, %v3712_v63  ;;  %v3735_v39 = vmax.f32 %v3537_v28, %v3713_v1  ;;  %v2120_v43 = vadd.f32 %v2098_v15, %v2052_v5  ;;  %v2254_v56 = vmul.f32 %v7993_v7, %v6688_v21 }
 0x1a7   :  { %v2121_v20 = vadd.f32 %v2099_v46, %v2053_v45  ;;  %v2255_v27 = vmul.f32 %v8005_v22, %v6688_v21  ;;  %v2298_v24 = vmul.f32 %v7988_v62, %v6691_v16  ;;  %v2299_v2 = vmul.f32 %v7998_v38, %v6691_v16 }
 0x1a8   :  { %v5341_v3 = vpack.c.bf16 %v3735_v39, %v3734_v61  ;;  %v2188_v25 = vadd.f32 %v2166_v42, %v2120_v43  ;;  %v2276_v17 = vadd.f32 %v2254_v56, %v2210_v57  ;;  %v2364_v34 = vmul.f32 %v8016_v53, %v6701_v40  ;;  %v8088_v43 = vld [vmem:[%s10055_s1 + $0x5c8] sm:$0xff]  ;;  %v1057_v56 = vld [vmem:[%s10055_s1 + $0x70] sm:$0xff] }
 0x1a9   :  { %v2189_v19 = vadd.f32 %v2167_v6, %v2121_v20  ;;  %v2277_v11 = vadd.f32 %v2255_v27, %v2211_v36  ;;  %v2365_v59 = vmul.f32 %v8023_v35, %v6701_v40  ;;  %v2430_v51 = vmul.f32 %v7964_v13, %v6671_v23  ;;  %v8081_v6 = vld [vmem:[%s10055_s1 + $0x5c0] sm:$0xff]  ;;  %v1058_v20 = vld [vmem:[%s10055_s1 + $0x78] sm:$0xff] }
 0x1aa   :  { %5342 = vmatpush1.bf16.msra.mxu0 %v5341_v3  ;;  %v2320_v29 = vadd.f32 %v2298_v24, %v2276_v17  ;;  %v2431_v47 = vmul.f32 %v7969_v37, %v6671_v23  ;;  %v2452_v32 = vmul.f32 %v7988_v62, %v6688_v21  ;;  %v2453_v33 = vmul.f32 %v7998_v38, %v6688_v21 }
 0x1ab   :  { %v2321_v4 = vadd.f32 %v2299_v2, %v2277_v11  ;;  %v2518_v8 = vmul.f32 %v8036_v12, %v6691_v16  ;;  %v2519_v14 = vmul.f32 %v8041_v26, %v6691_v16  ;;  %v2584_v28 = vmul.f32 %v8046_v54, %v6701_v40  ;;  %5343 = vmatprep.subr.bf16.mxu0 %v5403_v30 }
 0x1ac   :  { %v2386_v10 = vadd.f32 %v2364_v34, %v2320_v29  ;;  %v2474_v15 = vadd.f32 %v2452_v32, %v2430_v51  ;;  %v2475_v46 = vadd.f32 %v2453_v33, %v2431_v47  ;;  %v2585_v63 = vmul.f32 %v8055_v0, %v6701_v40  ;;  %v4614_v51 = vld [vmem:[%s10055_s1 + $0x280] sm:$0xff]  ;;  %v4615_v29 = vld [vmem:[%s10055_s1 + $0x288] sm:$0xff] }
 0x1ad   :  { %v2387_v1 = vadd.f32 %v2365_v59, %v2321_v4  ;;  %v2650_v5 = vmul.f32 %v7988_v62, %v6671_v23  ;;  %v2651_v42 = vmul.f32 %v7998_v38, %v6671_v23  ;;  %v2672_v45 = vmul.f32 %v8016_v53, %v6688_v21 }
 0x1ae   :  { %v2408_v57 = vmax.f32 %v2188_v25, %v2386_v10  ;;  %v2540_v36 = vadd.f32 %v2518_v8, %v2474_v15  ;;  %v2541_v61 = vadd.f32 %v2519_v14, %v2475_v46  ;;  %v2673_v39 = vmul.f32 %v8023_v35, %v6688_v21  ;;  %v4591_v25 = vld [vmem:[%s10055_s1 + $0x120] sm:$0xff]  ;;  %v4637_v15 = vld [vmem:[%s10055_s1 + $0x330] sm:$0xff] }
 0x1af   :  { %v2409_v27 = vmax.f32 %v2189_v19, %v2387_v1  ;;  %v2694_v24 = vadd.f32 %v2672_v45, %v2650_v5  ;;  %v2716_v2 = vmul.f32 %v8046_v54, %v6691_v16  ;;  %v2717_v3 = vmul.f32 %v8055_v0, %v6691_v16  ;;  %v4592_v19 = vld [vmem:[%s10055_s1 + $0x128] sm:$0xff]  ;;  %v4659_v45 = vld [vmem:[%s10055_s1 + $0x1d0] sm:$0xff] }
 0x1b0   :  { %v2606_v17 = vadd.f32 %v2584_v28, %v2540_v36  ;;  %v2607_v34 = vadd.f32 %v2585_v63, %v2541_v61  ;;  %v2695_v11 = vadd.f32 %v2673_v39, %v2651_v42  ;;  %v2782_v59 = vmul.f32 %v8081_v6, %v6701_v40  ;;  %v4638_v42 = vld [vmem:[%s10055_s1 + $0x338] sm:$0xff] }
 0x1b1   :  { %v2738_v47 = vadd.f32 %v2716_v2, %v2694_v24  ;;  %v2783_v32 = vmul.f32 %v8088_v43, %v6701_v40  ;;  %v1080_v33 = vmul.f32 %v6191_v9, %v1057_v56  ;;  %v1081_v4 = vmul.f32 %v6191_v9, %v1058_v20  ;;  %v4681_v20 = vld [vmem:[%s10055_s1 + $0x3e0] sm:$0xff] }
 0x1b2   :  { %v2628_v8 = vmax.f32 %v2408_v57, %v2606_v17  ;;  %v2629_v14 = vmax.f32 %v2409_v27, %v2607_v34  ;;  %v2739_v28 = vadd.f32 %v2717_v3, %v2695_v11  ;;  %v1126_v10 = vmul.f32 %v4591_v25, %v6198_v58  ;;  %v4660_v57 = vld [vmem:[%s10055_s1 + $0x1d8] sm:$0xff] }
 0x1b3   :  { %v2804_v46 = vadd.f32 %v2782_v59, %v2738_v47  ;;  %v1127_v63 = vmul.f32 %v4592_v19, %v6198_v58  ;;  %v1194_v1 = vmul.f32 %v4614_v51, %v6205_v55  ;;  %v1195_v5 = vmul.f32 %v4615_v29, %v6205_v55  ;;  %v4682_v47 = vld [vmem:[%s10055_s1 + $0x3e8] sm:$0xff] }
 0x1b4   :  { %v2805_v36 = vadd.f32 %v2783_v32, %v2739_v28  ;;  %v1148_v61 = vadd.f32 %v1126_v10, %v1080_v33  ;;  %v1262_v39 = vmul.f32 %v4637_v15, %v6208_v18  ;;  %v1263_v56 = vmul.f32 %v4638_v42, %v6208_v18 }
 0x1b5   :  { %v2826_v27 = vmax.f32 %v2628_v8, %v2804_v46  ;;  %v1149_v24 = vadd.f32 %v1127_v63, %v1081_v4  ;;  %v1306_v2 = vmul.f32 %v4591_v25, %v6191_v9  ;;  %v1307_v3 = vmul.f32 %v4592_v19, %v6191_v9  ;;  %v4703_v25 = vld [vmem:[%s10055_s1 + $0x490] sm:$0xff]  ;;  %v4704_v19 = vld [vmem:[%s10055_s1 + $0x498] sm:$0xff] }
 0x1b6   :  { %v2827_v17 = vmax.f32 %v2629_v14, %v2805_v36  ;;  %v1216_v34 = vadd.f32 %v1194_v1, %v1148_v61  ;;  %v1350_v11 = vmul.f32 %v4659_v45, %v6198_v58  ;;  %v1351_v59 = vmul.f32 %v4660_v57, %v6198_v58  ;;  %v4725_v14 = vld [vmem:[%s10055_s1 + $0x540] sm:$0xff]  ;;  %v4726_v1 = vld [vmem:[%s10055_s1 + $0x548] sm:$0xff]  ;;  %v3802_v45 = vld [vmem:[%s10056_s2 + $0xf0] sm:$0xff] }
 0x1b7   :  { %v1217_v32 = vadd.f32 %v1195_v5, %v1149_v24  ;;  %v1394_v33 = vmul.f32 %v4637_v15, %v6205_v55  ;;  %v1395_v8 = vmul.f32 %v4638_v42, %v6205_v55  ;;  %v1460_v4 = vmul.f32 %v4681_v20, %v6208_v18  ;;  %v3803_v5 = vld [vmem:[%s10056_s2 + $0xf8] sm:$0xff] }
 0x1b8   :  { %v5304_v28 = vpack.c.bf16 %v2827_v17, %v2826_v27  ;;  %v1284_v10 = vadd.f32 %v1262_v39, %v1216_v34  ;;  %v1372_v46 = vadd.f32 %v1350_v11, %v1306_v2  ;;  %v1373_v63 = vadd.f32 %v1351_v59, %v1307_v3  ;;  %4070 = vmatprep.mubr.f32.mxu1 %v3803_v5 }
 0x1b9   :  { %v1285_v57 = vadd.f32 %v1263_v56, %v1217_v32  ;;  %v1461_v36 = vmul.f32 %v4682_v47, %v6208_v18  ;;  %v1526_v61 = vmul.f32 %v4614_v51, %v6191_v9  ;;  %v1527_v39 = vmul.f32 %v4615_v29, %v6191_v9  ;;  %4071 = vmatmul.mubr.f32.gmra.mrb[10].mxu1 %v3802_v45 }
 0x1ba   :  { %5305 = vmatprep.subr.bf16.mxu1 %v5304_v28  ;;  %v1416_v27 = vadd.f32 %v1394_v33, %v1372_v46  ;;  %v1417_v24 = vadd.f32 %v1395_v8, %v1373_v63  ;;  %v1548_v2 = vmul.f32 %v4637_v15, %v6198_v58  ;;  %v1549_v3 = vmul.f32 %v4638_v42, %v6198_v58 }
 0x1bb   :  { %v1614_v17 = vmul.f32 %v4703_v25, %v6205_v55  ;;  %v1615_v34 = vmul.f32 %v4704_v19, %v6205_v55  ;;  %v1680_v56 = vmul.f32 %v4725_v14, %v6208_v18  ;;  %v1681_v11 = vmul.f32 %v4726_v1, %v6208_v18  ;;  %v4747_v25 = vld [vmem:[%s10055_s1 + $0x5f0] sm:$0xff]  ;;  %v4748_v19 = vld [vmem:[%s10055_s1 + $0x5f8] sm:$0xff] }
 0x1bc   :  { %v1482_v51 = vadd.f32 %v1460_v4, %v1416_v27  ;;  %v1483_v59 = vadd.f32 %v1461_v36, %v1417_v24  ;;  %v1570_v29 = vadd.f32 %v1548_v2, %v1526_v61  ;;  %v1571_v32 = vadd.f32 %v1549_v3, %v1527_v39 }
 0x1bd   :  { %v1746_v33 = vmul.f32 %v4637_v15, %v6191_v9  ;;  %v1747_v8 = vmul.f32 %v4638_v42, %v6191_v9  ;;  %v1768_v28 = vmul.f32 %v4681_v20, %v6198_v58  ;;  %v1769_v46 = vmul.f32 %v4682_v47, %v6198_v58 }
 0x1be   :  { %v1504_v4 = vmax.f32 %v1284_v10, %v1482_v51  ;;  %v1505_v63 = vmax.f32 %v1285_v57, %v1483_v59  ;;  %v1636_v5 = vadd.f32 %v1614_v17, %v1570_v29  ;;  %v1637_v45 = vadd.f32 %v1615_v34, %v1571_v32 }
 0x1bf   :  { %v1790_v36 = vadd.f32 %v1768_v28, %v1746_v33  ;;  %v1791_v15 = vadd.f32 %v1769_v46, %v1747_v8  ;;  %v1812_v42 = vmul.f32 %v4725_v14, %v6205_v55  ;;  %v1813_v20 = vmul.f32 %v4726_v1, %v6205_v55 }
 0x1c0   :  { %v1702_v61 = vadd.f32 %v1680_v56, %v1636_v5  ;;  %v1703_v47 = vadd.f32 %v1681_v11, %v1637_v45  ;;  %v1878_v39 = vmul.f32 %v4747_v25, %v6208_v18  ;;  %v1879_v27 = vmul.f32 %v4748_v19, %v6208_v18 }
 0x1c1   :  { %v1834_v24 = vadd.f32 %v1812_v42, %v1790_v36  ;;  %v1835_v2 = vadd.f32 %v1813_v20, %v1791_v15  ;;  %v2894_v10 = vmul.f32 %v6962_v50, %v7938_v49  ;;  %v2895_v57 = vmul.f32 %v6962_v50, %v7943_v48 }
 0x1c2   :  { %v1724_v3 = vmax.f32 %v1504_v4, %v1702_v61  ;;  %v1725_v17 = vmax.f32 %v1505_v63, %v1703_v47  ;;  %v2940_v14 = vmul.f32 %v7952_v60, %v6965_v31  ;;  %v2941_v1 = vmul.f32 %v7959_v52, %v6965_v31 }
 0x1c3   :  { %v1900_v34 = vadd.f32 %v1878_v39, %v1834_v24  ;;  %v1901_v56 = vadd.f32 %v1879_v27, %v1835_v2  ;;  %v3008_v11 = vmul.f32 %v7964_v13, %v6981_v41  ;;  %v3009_v51 = vmul.f32 %v7969_v37, %v6981_v41 }
 0x1c4   :  { %v2962_v49 = vadd.f32 %v2940_v14, %v2894_v10  ;;  %v2963_v59 = vadd.f32 %v2941_v1, %v2895_v57  ;;  %v3076_v48 = vmul.f32 %v7988_v62, %v6987_v44  ;;  %v3077_v29 = vmul.f32 %v7998_v38, %v6987_v44 }
 0x1c5   :  { %v1922_v32 = vmax.f32 %v1724_v3, %v1900_v34  ;;  %v1923_v33 = vmax.f32 %v1725_v17, %v1901_v56  ;;  %v3120_v8 = vmul.f32 %v7952_v60, %v6962_v50  ;;  %v3121_v28 = vmul.f32 %v7959_v52, %v6962_v50  ;;  %v8249_v56 = vld [vmem:[%s10055_s1 + $0x50] sm:$0xff] }
 0x1c6   :  { %v3030_v46 = vadd.f32 %v3008_v11, %v2962_v49  ;;  %v3031_v25 = vadd.f32 %v3009_v51, %v2963_v59  ;;  %v3164_v19 = vmul.f32 %v7993_v7, %v6965_v31  ;;  %v3165_v4 = vmul.f32 %v8005_v22, %v6965_v31 }
 0x1c7   :  { %v5306_v63 = vpack.c.bf16 %v1923_v33, %v1922_v32  ;;  %v3208_v5 = vmul.f32 %v7988_v62, %v6981_v41  ;;  %v3209_v45 = vmul.f32 %v7998_v38, %v6981_v41  ;;  %v3274_v60 = vmul.f32 %v8016_v53, %v6987_v44  ;;  %v8273_v32 = vld [vmem:[%s10055_s1 + $0x260] sm:$0xff] }
 0x1c8   :  { %v3098_v36 = vadd.f32 %v3076_v48, %v3030_v46  ;;  %v3099_v52 = vadd.f32 %v3077_v29, %v3031_v25  ;;  %v3186_v15 = vadd.f32 %v3164_v19, %v3120_v8  ;;  %v3187_v42 = vadd.f32 %v3165_v4, %v3121_v28  ;;  %v8263_v29 = vld [vmem:[%s10055_s1 + $0x100] sm:$0xff]  ;;  %v8284_v46 = vld [vmem:[%s10055_s1 + $0x268] sm:$0xff] }
 0x1c9   :  { %5307 = vmatpush3.bf16.msra.mxu1 %v5306_v63  ;;  %v3275_v7 = vmul.f32 %v8023_v35, %v6987_v44  ;;  %v3340_v22 = vmul.f32 %v7964_v13, %v6962_v50  ;;  %v3341_v20 = vmul.f32 %v7969_v37, %v6962_v50  ;;  %v3362_v61 = vmul.f32 %v7988_v62, %v6965_v31 }
 0x1ca   :  { %v3230_v47 = vadd.f32 %v3208_v5, %v3186_v15  ;;  %v3231_v39 = vadd.f32 %v3209_v45, %v3187_v42  ;;  %v3363_v27 = vmul.f32 %v7998_v38, %v6965_v31  ;;  %v3428_v24 = vmul.f32 %v8036_v12, %v6981_v41 }
 0x1cb   :  { %v3384_v2 = vadd.f32 %v3362_v61, %v3340_v22  ;;  %v3429_v10 = vmul.f32 %v8041_v26, %v6981_v41  ;;  %v3494_v13 = vmul.f32 %v8046_v54, %v6987_v44  ;;  %v3495_v37 = vmul.f32 %v8055_v0, %v6987_v44 }
 0x1cc   :  { %v3296_v57 = vadd.f32 %v3274_v60, %v3230_v47  ;;  %v3297_v3 = vadd.f32 %v3275_v7, %v3231_v39  ;;  %v3385_v17 = vadd.f32 %v3363_v27, %v3341_v20  ;;  %v3560_v14 = vmul.f32 %v7988_v62, %v6962_v50  ;;  %v8297_v60 = vld [vmem:[%s10055_s1 + $0x310] sm:$0xff]  ;;  %v8309_v7 = vld [vmem:[%s10055_s1 + $0x318] sm:$0xff] }
 0x1cd   :  { %v3450_v1 = vadd.f32 %v3428_v24, %v3384_v2  ;;  %v3561_v12 = vmul.f32 %v7998_v38, %v6962_v50  ;;  %v3582_v34 = vmul.f32 %v8016_v53, %v6965_v31  ;;  %v3583_v26 = vmul.f32 %v8023_v35, %v6965_v31  ;;  %v8256_v38 = vld [vmem:[%s10055_s1 + $0x58] sm:$0xff]  ;;  %v8325_v24 = vld [vmem:[%s10055_s1 + $0x3c0] sm:$0xff] }
 0x1ce   :  { %v3318_v11 = vmax.f32 %v3098_v36, %v3296_v57  ;;  %v3319_v51 = vmax.f32 %v3099_v52, %v3297_v3  ;;  %v3451_v49 = vadd.f32 %v3429_v10, %v3385_v17  ;;  %v3626_v62 = vmul.f32 %v8046_v54, %v6981_v41  ;;  %v8268_v54 = vld [vmem:[%s10055_s1 + $0x108] sm:$0xff]  ;;  %v8302_v36 = vld [vmem:[%s10055_s1 + $0x1b0] sm:$0xff]  ;;  %v8316_v20 = vld [vmem:[%s10055_s1 + $0x1b8] sm:$0xff] }
 0x1cf   :  { %v3516_v53 = vadd.f32 %v3494_v13, %v3450_v1  ;;  %v3604_v59 = vadd.f32 %v3582_v34, %v3560_v14  ;;  %v3605_v48 = vadd.f32 %v3583_v26, %v3561_v12  ;;  %v3627_v35 = vmul.f32 %v8055_v0, %v6981_v41  ;;  %v8334_v57 = vld [vmem:[%s10055_s1 + $0x3c8] sm:$0xff] }
 0x1d0   :  { %v3517_v33 = vadd.f32 %v3495_v37, %v3451_v49  ;;  %v3692_v8 = vmul.f32 %v8081_v6, %v6987_v44  ;;  %v3693_v0 = vmul.f32 %v8088_v43, %v6987_v44  ;;  %v1986_v28 = vmul.f32 %v6671_v23, %v8249_v56  ;;  %v8352_v49 = vld [vmem:[%s10055_s1 + $0x478] sm:$0xff] }
 0x1d1   :  { %v3538_v25 = vmax.f32 %v3318_v11, %v3516_v53  ;;  %v3648_v19 = vadd.f32 %v3626_v62, %v3604_v59  ;;  %v3649_v4 = vadd.f32 %v3627_v35, %v3605_v48  ;;  %v1987_v63 = vmul.f32 %v6671_v23, %v8256_v38  ;;  %v8359_v35 = vld [vmem:[%s10055_s1 + $0x520] sm:$0xff] }
 0x1d2   :  { %v3539_v5 = vmax.f32 %v3319_v51, %v3517_v33  ;;  %v2032_v6 = vmul.f32 %v8263_v29, %v6688_v21  ;;  %v2033_v43 = vmul.f32 %v8268_v54, %v6688_v21  ;;  %v2100_v45 = vmul.f32 %v8273_v32, %v6691_v16  ;;  %v8347_v51 = vld [vmem:[%s10055_s1 + $0x470] sm:$0xff]  ;;  %v8364_v33 = vld [vmem:[%s10055_s1 + $0x528] sm:$0xff] }
 0x1d3   :  { %v3714_v52 = vadd.f32 %v3692_v8, %v3648_v19  ;;  %v3715_v15 = vadd.f32 %v3693_v0, %v3649_v4  ;;  %v2101_v42 = vmul.f32 %v8284_v46, %v6691_v16  ;;  %v2168_v22 = vmul.f32 %v8297_v60, %v6701_v40 }
 0x1d4   :  { %v2054_v61 = vadd.f32 %v2032_v6, %v1986_v28  ;;  %v2055_v47 = vadd.f32 %v2033_v43, %v1987_v63  ;;  %v2169_v39 = vmul.f32 %v8309_v7, %v6701_v40  ;;  %v2212_v27 = vmul.f32 %v8263_v29, %v6671_v23 }
 0x1d5   :  { %v3736_v2 = vmax.f32 %v3538_v25, %v3714_v52  ;;  %v3737_v10 = vmax.f32 %v3539_v5, %v3715_v15  ;;  %v2213_v13 = vmul.f32 %v8268_v54, %v6671_v23  ;;  %v2256_v37 = vmul.f32 %v8302_v36, %v6688_v21 }
 0x1d6   :  { %v2122_v3 = vadd.f32 %v2100_v45, %v2054_v61  ;;  %v2123_v17 = vadd.f32 %v2101_v42, %v2055_v47  ;;  %v2257_v14 = vmul.f32 %v8316_v20, %v6688_v21  ;;  %v2300_v1 = vmul.f32 %v8297_v60, %v6691_v16  ;;  %v8390_v47 = vld [vmem:[%s10055_s1 + $0x5d0] sm:$0xff] }
 0x1d7   :  { %v5344_v12 = vpack.c.bf16 %v3737_v10, %v3736_v2  ;;  %v2278_v34 = vadd.f32 %v2256_v37, %v2212_v27  ;;  %v2301_v26 = vmul.f32 %v8309_v7, %v6691_v16  ;;  %v2366_v11 = vmul.f32 %v8325_v24, %v6701_v40  ;;  %v1059_v37 = vld [vmem:[%s10055_s1 + $0x80] sm:$0xff] }
 0x1d8   :  { %v2190_v62 = vadd.f32 %v2168_v22, %v2122_v3  ;;  %v2191_v53 = vadd.f32 %v2169_v39, %v2123_v17  ;;  %v2279_v59 = vadd.f32 %v2257_v14, %v2213_v13  ;;  %v2367_v48 = vmul.f32 %v8334_v57, %v6701_v40  ;;  %v8399_v13 = vld [vmem:[%s10055_s1 + $0x5d8] sm:$0xff]  ;;  %v1060_v3 = vld [vmem:[%s10055_s1 + $0x88] sm:$0xff] }
 0x1d9   :  { %5345 = vmatpush1.bf16.msra.mxu0 %v5344_v12  ;;  %v2322_v8 = vadd.f32 %v2300_v1, %v2278_v34  ;;  %v2432_v0 = vmul.f32 %v8273_v32, %v6671_v23  ;;  %v2433_v28 = vmul.f32 %v8284_v46, %v6671_v23  ;;  %v2454_v25 = vmul.f32 %v8297_v60, %v6688_v21  ;;  %v4593_v34 = vld [vmem:[%s10055_s1 + $0x130] sm:$0xff] }
 0x1da   :  { %v2323_v19 = vadd.f32 %v2301_v26, %v2279_v59  ;;  %v2455_v4 = vmul.f32 %v8309_v7, %v6688_v21  ;;  %v2520_v63 = vmul.f32 %v8347_v51, %v6691_v16  ;;  %v2521_v5 = vmul.f32 %v8352_v49, %v6691_v16  ;;  %5346 = vmatprep.subr.bf16.mxu0 %v5403_v30 }
 0x1db   :  { %v2388_v6 = vadd.f32 %v2366_v11, %v2322_v8  ;;  %v2476_v43 = vadd.f32 %v2454_v25, %v2432_v0  ;;  %v2586_v45 = vmul.f32 %v8359_v35, %v6701_v40  ;;  %v2587_v52 = vmul.f32 %v8364_v33, %v6701_v40  ;;  %v4617_v8 = vld [vmem:[%s10055_s1 + $0x298] sm:$0xff] }
 0x1dc   :  { %v2389_v15 = vadd.f32 %v2367_v48, %v2323_v19  ;;  %v2477_v42 = vadd.f32 %v2455_v4, %v2433_v28  ;;  %v2652_v22 = vmul.f32 %v8297_v60, %v6671_v23  ;;  %v2653_v61 = vmul.f32 %v8309_v7, %v6671_v23  ;;  %v4616_v48 = vld [vmem:[%s10055_s1 + $0x290] sm:$0xff] }
 0x1dd   :  { %v2410_v39 = vmax.f32 %v2190_v62, %v2388_v6  ;;  %v2542_v27 = vadd.f32 %v2520_v63, %v2476_v43  ;;  %v2674_v2 = vmul.f32 %v8325_v24, %v6688_v21  ;;  %v2675_v10 = vmul.f32 %v8334_v57, %v6688_v21 }
 0x1de   :  { %v2411_v17 = vmax.f32 %v2191_v53, %v2389_v15  ;;  %v2543_v14 = vadd.f32 %v2521_v5, %v2477_v42  ;;  %v2718_v1 = vmul.f32 %v8359_v35, %v6691_v16  ;;  %v2719_v12 = vmul.f32 %v8364_v33, %v6691_v16  ;;  %v4594_v53 = vld [vmem:[%s10055_s1 + $0x138] sm:$0xff] }
 0x1df   :  { %v2608_v26 = vadd.f32 %v2586_v45, %v2542_v27  ;;  %v2696_v11 = vadd.f32 %v2674_v2, %v2652_v22  ;;  %v2697_v62 = vadd.f32 %v2675_v10, %v2653_v61  ;;  %v2784_v59 = vmul.f32 %v8390_v47, %v6701_v40  ;;  %v4661_v22 = vld [vmem:[%s10055_s1 + $0x1e0] sm:$0xff]  ;;  %v4640_v2 = vld [vmem:[%s10055_s1 + $0x348] sm:$0xff] }
 0x1e0   :  { %v2609_v0 = vadd.f32 %v2587_v52, %v2543_v14  ;;  %v2785_v28 = vmul.f32 %v8399_v13, %v6701_v40  ;;  %v1082_v25 = vmul.f32 %v6191_v9, %v1059_v37  ;;  %v1083_v19 = vmul.f32 %v6191_v9, %v1060_v3  ;;  %v4639_v52 = vld [vmem:[%s10055_s1 + $0x340] sm:$0xff]  ;;  %v4662_v37 = vld [vmem:[%s10055_s1 + $0x1e8] sm:$0xff] }
 0x1e1   :  { %v2630_v4 = vmax.f32 %v2410_v39, %v2608_v26  ;;  %v2740_v63 = vadd.f32 %v2718_v1, %v2696_v11  ;;  %v2741_v5 = vadd.f32 %v2719_v12, %v2697_v62  ;;  %v1128_v6 = vmul.f32 %v4593_v34, %v6198_v58  ;;  %v4683_v12 = vld [vmem:[%s10055_s1 + $0x3f0] sm:$0xff] }
 0x1e2   :  { %v2631_v43 = vmax.f32 %v2411_v17, %v2609_v0  ;;  %v1129_v45 = vmul.f32 %v4594_v53, %v6198_v58  ;;  %v1196_v15 = vmul.f32 %v4616_v48, %v6205_v55  ;;  %v1197_v42 = vmul.f32 %v4617_v8, %v6205_v55  ;;  %v4684_v0 = vld [vmem:[%s10055_s1 + $0x3f8] sm:$0xff] }
 0x1e3   :  { %v2806_v61 = vadd.f32 %v2784_v59, %v2740_v63  ;;  %v2807_v39 = vadd.f32 %v2785_v28, %v2741_v5  ;;  %v1150_v27 = vadd.f32 %v1128_v6, %v1082_v25  ;;  %v1264_v10 = vmul.f32 %v4639_v52, %v6208_v18 }
 0x1e4   :  { %v1151_v3 = vadd.f32 %v1129_v45, %v1083_v19  ;;  %v1265_v17 = vmul.f32 %v4640_v2, %v6208_v18  ;;  %v1308_v14 = vmul.f32 %v4593_v34, %v6191_v9  ;;  %v1309_v1 = vmul.f32 %v4594_v53, %v6191_v9  ;;  %v4705_v19 = vld [vmem:[%s10055_s1 + $0x4a0] sm:$0xff]  ;;  %v4727_v45 = vld [vmem:[%s10055_s1 + $0x550] sm:$0xff] }
 0x1e5   :  { %v2828_v26 = vmax.f32 %v2630_v4, %v2806_v61  ;;  %v2829_v11 = vmax.f32 %v2631_v43, %v2807_v39  ;;  %v1218_v62 = vadd.f32 %v1196_v15, %v1150_v27  ;;  %v1352_v59 = vmul.f32 %v4661_v22, %v6198_v58  ;;  %v4706_v4 = vld [vmem:[%s10055_s1 + $0x4a8] sm:$0xff] }
 0x1e6   :  { %v1219_v28 = vadd.f32 %v1197_v42, %v1151_v3  ;;  %v1353_v25 = vmul.f32 %v4662_v37, %v6198_v58  ;;  %v1396_v34 = vmul.f32 %v4639_v52, %v6205_v55  ;;  %v1397_v53 = vmul.f32 %v4640_v2, %v6205_v55  ;;  %v3809_v15 = vld [vmem:[%s10056_s2 + $0x128] sm:$0xff]  ;;  %v3808_v42 = vld [vmem:[%s10056_s2 + $0x120] sm:$0xff] }
 0x1e7   :  { %v5308_v63 = vpack.c.bf16 %v2829_v11, %v2828_v26  ;;  %v1286_v5 = vadd.f32 %v1264_v10, %v1218_v62  ;;  %v1374_v6 = vadd.f32 %v1352_v59, %v1308_v14  ;;  %v1462_v43 = vmul.f32 %v4683_v12, %v6208_v18  ;;  %v4728_v10 = vld [vmem:[%s10055_s1 + $0x558] sm:$0xff]  ;;  %4075 = vmatprep.mubr.f32.mxu1 %v3809_v15 }
 0x1e8   :  { %v1287_v22 = vadd.f32 %v1265_v17, %v1219_v28  ;;  %v1375_v61 = vadd.f32 %v1353_v25, %v1309_v1  ;;  %v1463_v39 = vmul.f32 %v4684_v0, %v6208_v18  ;;  %v1528_v27 = vmul.f32 %v4616_v48, %v6191_v9  ;;  %4076 = vmatmul.mubr.f32.gmra.mrb[12].mxu1 %v3808_v42  ;;  %v4750_v42 = vld [vmem:[%s10055_s1 + $0x608] sm:$0xff] }
 0x1e9   :  { %5309 = vmatprep.subr.bf16.mxu1 %v5308_v63  ;;  %v1418_v37 = vadd.f32 %v1396_v34, %v1374_v6  ;;  %v1529_v3 = vmul.f32 %v4617_v8, %v6191_v9  ;;  %v1550_v14 = vmul.f32 %v4639_v52, %v6198_v58  ;;  %v1551_v26 = vmul.f32 %v4640_v2, %v6198_v58 }
 0x1ea   :  { %v1419_v11 = vadd.f32 %v1397_v53, %v1375_v61  ;;  %v1616_v17 = vmul.f32 %v4705_v19, %v6205_v55  ;;  %v1617_v1 = vmul.f32 %v4706_v4, %v6205_v55  ;;  %v1682_v48 = vmul.f32 %v4727_v45, %v6208_v18  ;;  %v4749_v53 = vld [vmem:[%s10055_s1 + $0x600] sm:$0xff] }
 0x1eb   :  { %v1484_v62 = vadd.f32 %v1462_v43, %v1418_v37  ;;  %v1572_v59 = vadd.f32 %v1550_v14, %v1528_v27  ;;  %v1573_v28 = vadd.f32 %v1551_v26, %v1529_v3  ;;  %v1683_v25 = vmul.f32 %v4728_v10, %v6208_v18 }
 0x1ec   :  { %v1485_v34 = vadd.f32 %v1463_v39, %v1419_v11  ;;  %v1748_v8 = vmul.f32 %v4639_v52, %v6191_v9  ;;  %v1749_v63 = vmul.f32 %v4640_v2, %v6191_v9  ;;  %v1770_v6 = vmul.f32 %v4683_v12, %v6198_v58 }
 0x1ed   :  { %v1506_v19 = vmax.f32 %v1286_v5, %v1484_v62  ;;  %v1638_v4 = vadd.f32 %v1616_v17, %v1572_v59  ;;  %v1639_v15 = vadd.f32 %v1617_v1, %v1573_v28  ;;  %v1771_v43 = vmul.f32 %v4684_v0, %v6198_v58 }
 0x1ee   :  { %v1507_v61 = vmax.f32 %v1287_v22, %v1485_v34  ;;  %v1792_v39 = vadd.f32 %v1770_v6, %v1748_v8  ;;  %v1814_v52 = vmul.f32 %v4727_v45, %v6205_v55  ;;  %v1815_v2 = vmul.f32 %v4728_v10, %v6205_v55 }
 0x1ef   :  { %v1704_v12 = vadd.f32 %v1682_v48, %v1638_v4  ;;  %v1705_v27 = vadd.f32 %v1683_v25, %v1639_v15  ;;  %v1793_v37 = vadd.f32 %v1771_v43, %v1749_v63  ;;  %v1880_v3 = vmul.f32 %v4749_v53, %v6208_v18 }
 0x1f0   :  { %v1836_v5 = vadd.f32 %v1814_v52, %v1792_v39  ;;  %v1881_v14 = vmul.f32 %v4750_v42, %v6208_v18  ;;  %v2896_v0 = vmul.f32 %v6962_v50, %v8249_v56  ;;  %v2897_v26 = vmul.f32 %v6962_v50, %v8256_v38 }
 0x1f1   :  { %v1726_v22 = vmax.f32 %v1506_v19, %v1704_v12  ;;  %v1727_v11 = vmax.f32 %v1507_v61, %v1705_v27  ;;  %v1837_v17 = vadd.f32 %v1815_v2, %v1793_v37  ;;  %v2942_v45 = vmul.f32 %v8263_v29, %v6965_v31 }
 0x1f2   :  { %v1902_v10 = vadd.f32 %v1880_v3, %v1836_v5  ;;  %v2943_v1 = vmul.f32 %v8268_v54, %v6965_v31  ;;  %v3010_v48 = vmul.f32 %v8273_v32, %v6981_v41  ;;  %v3011_v62 = vmul.f32 %v8284_v46, %v6981_v41 }
 0x1f3   :  { %v1903_v56 = vadd.f32 %v1881_v14, %v1837_v17  ;;  %v2964_v59 = vadd.f32 %v2942_v45, %v2896_v0  ;;  %v3078_v38 = vmul.f32 %v8297_v60, %v6987_v44  ;;  %v3079_v28 = vmul.f32 %v8309_v7, %v6987_v44 }
 0x1f4   :  { %v1924_v25 = vmax.f32 %v1726_v22, %v1902_v10  ;;  %v2965_v34 = vadd.f32 %v2943_v1, %v2897_v26  ;;  %v3122_v8 = vmul.f32 %v8263_v29, %v6962_v50  ;;  %v3123_v63 = vmul.f32 %v8268_v54, %v6962_v50 }
 0x1f5   :  { %v1925_v6 = vmax.f32 %v1727_v11, %v1903_v56  ;;  %v3032_v53 = vadd.f32 %v3010_v48, %v2964_v59  ;;  %v3166_v19 = vmul.f32 %v8302_v36, %v6965_v31  ;;  %v3167_v4 = vmul.f32 %v8316_v20, %v6965_v31  ;;  %v8560_v59 = vld [vmem:[%s10055_s1 + $0x60] sm:$0xff] }
 0x1f6   :  { %v3033_v15 = vadd.f32 %v3011_v62, %v2965_v34  ;;  %v3210_v43 = vmul.f32 %v8297_v60, %v6981_v41  ;;  %v3211_v42 = vmul.f32 %v8309_v7, %v6981_v41  ;;  %v3276_v29 = vmul.f32 %v8325_v24, %v6987_v44 }
 0x1f7   :  { %v5310_v61 = vpack.c.bf16 %v1925_v6, %v1924_v25  ;;  %v3100_v54 = vadd.f32 %v3078_v38, %v3032_v53  ;;  %v3188_v39 = vadd.f32 %v3166_v19, %v3122_v8  ;;  %v3189_v52 = vadd.f32 %v3167_v4, %v3123_v63  ;;  %v8579_v25 = vld [vmem:[%s10055_s1 + $0x118] sm:$0xff] }
 0x1f8   :  { %v3101_v2 = vadd.f32 %v3079_v28, %v3033_v15  ;;  %v3277_v36 = vmul.f32 %v8334_v57, %v6987_v44  ;;  %v3342_v20 = vmul.f32 %v8273_v32, %v6962_v50  ;;  %v3343_v12 = vmul.f32 %v8284_v46, %v6962_v50  ;;  %v8574_v28 = vld [vmem:[%s10055_s1 + $0x110] sm:$0xff]  ;;  %v8593_v6 = vld [vmem:[%s10055_s1 + $0x278] sm:$0xff] }
 0x1f9   :  { %5311 = vmatpush3.bf16.msra.mxu1 %v5310_v61  ;;  %v3232_v27 = vadd.f32 %v3210_v43, %v3188_v39  ;;  %v3233_v37 = vadd.f32 %v3211_v42, %v3189_v52  ;;  %v3364_v3 = vmul.f32 %v8297_v60, %v6965_v31  ;;  %v3365_v5 = vmul.f32 %v8309_v7, %v6965_v31 }
 0x1fa   :  { %v3430_v14 = vmul.f32 %v8347_v51, %v6981_v41  ;;  %v3431_v0 = vmul.f32 %v8352_v49, %v6981_v41  ;;  %v3496_v32 = vmul.f32 %v8359_v35, %v6987_v44  ;;  %v3497_v46 = vmul.f32 %v8364_v33, %v6987_v44 }
 0x1fb   :  { %v3298_v26 = vadd.f32 %v3276_v29, %v3232_v27  ;;  %v3299_v22 = vadd.f32 %v3277_v36, %v3233_v37  ;;  %v3386_v11 = vadd.f32 %v3364_v3, %v3342_v20  ;;  %v3387_v17 = vadd.f32 %v3365_v5, %v3343_v12  ;;  %v8606_v29 = vld [vmem:[%s10055_s1 + $0x320] sm:$0xff]  ;;  %v8625_v20 = vld [vmem:[%s10055_s1 + $0x1c8] sm:$0xff]  ;;  %v8634_v5 = vld [vmem:[%s10055_s1 + $0x3d0] sm:$0xff] }
 0x1fc   :  { %v3562_v45 = vmul.f32 %v8297_v60, %v6962_v50  ;;  %v3563_v10 = vmul.f32 %v8309_v7, %v6962_v50  ;;  %v3584_v51 = vmul.f32 %v8325_v24, %v6965_v31  ;;  %v3585_v49 = vmul.f32 %v8334_v57, %v6965_v31  ;;  %v8565_v60 = vld [vmem:[%s10055_s1 + $0x68] sm:$0xff]  ;;  %v8620_v36 = vld [vmem:[%s10055_s1 + $0x1c0] sm:$0xff] }
 0x1fd   :  { %v3320_v1 = vmax.f32 %v3100_v54, %v3298_v26  ;;  %v3321_v48 = vmax.f32 %v3101_v2, %v3299_v22  ;;  %v3452_v62 = vadd.f32 %v3430_v14, %v3386_v11  ;;  %v3453_v56 = vadd.f32 %v3431_v0, %v3387_v17  ;;  %v8615_v2 = vld [vmem:[%s10055_s1 + $0x328] sm:$0xff] }
 0x1fe   :  { %v3606_v7 = vadd.f32 %v3584_v51, %v3562_v45  ;;  %v3607_v38 = vadd.f32 %v3585_v49, %v3563_v10  ;;  %v3628_v24 = vmul.f32 %v8359_v35, %v6981_v41  ;;  %v3629_v57 = vmul.f32 %v8364_v33, %v6981_v41  ;;  %v8588_v33 = vld [vmem:[%s10055_s1 + $0x270] sm:$0xff]  ;;  %v8647_v45 = vld [vmem:[%s10055_s1 + $0x3d8] sm:$0xff] }
 0x1ff   :  { %v3518_v34 = vadd.f32 %v3496_v32, %v3452_v62  ;;  %v3519_v8 = vadd.f32 %v3497_v46, %v3453_v56  ;;  %v3694_v63 = vmul.f32 %v8390_v47, %v6987_v44  ;;  %v3695_v35 = vmul.f32 %v8399_v13, %v6987_v44 }
 0x200   :  { %v3650_v53 = vadd.f32 %v3628_v24, %v3606_v7  ;;  %v3651_v19 = vadd.f32 %v3629_v57, %v3607_v38  ;;  %v1988_v4 = vmul.f32 %v6671_v23, %v8560_v59  ;;  %v1989_v47 = vmul.f32 %v6671_v23, %v8565_v60  ;;  %v8663_v24 = vld [vmem:[%s10055_s1 + $0x488] sm:$0xff]  ;;  %v8668_v57 = vld [vmem:[%s10055_s1 + $0x530] sm:$0xff] }
 0x201   :  { %v3540_v15 = vmax.f32 %v3320_v1, %v3518_v34  ;;  %v3541_v13 = vmax.f32 %v3321_v48, %v3519_v8  ;;  %v2034_v43 = vmul.f32 %v8574_v28, %v6688_v21  ;;  %v2035_v42 = vmul.f32 %v8579_v25, %v6688_v21  ;;  %v8658_v48 = vld [vmem:[%s10055_s1 + $0x480] sm:$0xff]  ;;  %v8673_v34 = vld [vmem:[%s10055_s1 + $0x538] sm:$0xff] }
 0x202   :  { %v3716_v61 = vadd.f32 %v3694_v63, %v3650_v53  ;;  %v3717_v54 = vadd.f32 %v3695_v35, %v3651_v19  ;;  %v2102_v39 = vmul.f32 %v8588_v33, %v6691_v16  ;;  %v2103_v52 = vmul.f32 %v8593_v6, %v6691_v16 }
 0x203   :  { %v2056_v12 = vadd.f32 %v2034_v43, %v1988_v4  ;;  %v2057_v27 = vadd.f32 %v2035_v42, %v1989_v47  ;;  %v2170_v37 = vmul.f32 %v8606_v29, %v6701_v40  ;;  %v2171_v3 = vmul.f32 %v8615_v2, %v6701_v40 }
 0x204   :  { %v3738_v14 = vmax.f32 %v3540_v15, %v3716_v61  ;;  %v3739_v0 = vmax.f32 %v3541_v13, %v3717_v54  ;;  %v2214_v32 = vmul.f32 %v8574_v28, %v6671_v23  ;;  %v2215_v46 = vmul.f32 %v8579_v25, %v6671_v23 }
 0x205   :  { %v2124_v26 = vadd.f32 %v2102_v39, %v2056_v12  ;;  %v2125_v22 = vadd.f32 %v2103_v52, %v2057_v27  ;;  %v2258_v11 = vmul.f32 %v8620_v36, %v6688_v21  ;;  %v2259_v17 = vmul.f32 %v8625_v20, %v6688_v21 }
 0x206   :  { %v5347_v10 = vpack.c.bf16 %v3739_v0, %v3738_v14  ;;  %v2302_v51 = vmul.f32 %v8606_v29, %v6691_v16  ;;  %v2303_v49 = vmul.f32 %v8615_v2, %v6691_v16  ;;  %v2368_v1 = vmul.f32 %v8634_v5, %v6701_v40  ;;  %v8705_v0 = vld [vmem:[%s10055_s1 + $0x5e0] sm:$0xff] }
 0x207   :  { %v2192_v62 = vadd.f32 %v2170_v37, %v2124_v26  ;;  %v2193_v56 = vadd.f32 %v2171_v3, %v2125_v22  ;;  %v2280_v7 = vadd.f32 %v2258_v11, %v2214_v32  ;;  %v2281_v38 = vadd.f32 %v2259_v17, %v2215_v46  ;;  %v8710_v32 = vld [vmem:[%s10055_s1 + $0x5e8] sm:$0xff]  ;;  %v1061_v46 = vld [vmem:[%s10055_s1 + $0x90] sm:$0xff] }
 0x208   :  { %5348 = vmatpush1.bf16.msra.mxu0 %v5347_v10  ;;  %v2369_v8 = vmul.f32 %v8647_v45, %v6701_v40  ;;  %v2434_v63 = vmul.f32 %v8588_v33, %v6671_v23  ;;  %v2435_v35 = vmul.f32 %v8593_v6, %v6671_v23  ;;  %v2456_v53 = vmul.f32 %v8606_v29, %v6688_v21  ;;  %v1062_v10 = vld [vmem:[%s10055_s1 + $0x98] sm:$0xff] }
 0x209   :  { %v2324_v19 = vadd.f32 %v2302_v51, %v2280_v7  ;;  %v2325_v4 = vadd.f32 %v2303_v49, %v2281_v38  ;;  %v2457_v47 = vmul.f32 %v8615_v2, %v6688_v21  ;;  %v2522_v15 = vmul.f32 %v8658_v48, %v6691_v16  ;;  %5349 = vmatprep.subr.bf16.mxu0 %v5403_v30  ;;  %v4595_v38 = vld [vmem:[%s10055_s1 + $0x140] sm:$0xff] }
 0x20a   :  { %v2478_v13 = vadd.f32 %v2456_v53, %v2434_v63  ;;  %v2523_v43 = vmul.f32 %v8663_v24, %v6691_v16  ;;  %v2588_v42 = vmul.f32 %v8668_v57, %v6701_v40  ;;  %v2589_v61 = vmul.f32 %v8673_v34, %v6701_v40 }
 0x20b   :  { %v2390_v54 = vadd.f32 %v2368_v1, %v2324_v19  ;;  %v2391_v39 = vadd.f32 %v2369_v8, %v2325_v4  ;;  %v2479_v52 = vadd.f32 %v2457_v47, %v2435_v35  ;;  %v2654_v12 = vmul.f32 %v8606_v29, %v6671_v23  ;;  %v4619_v19 = vld [vmem:[%s10055_s1 + $0x2a8] sm:$0xff] }
 0x20c   :  { %v2544_v27 = vadd.f32 %v2522_v15, %v2478_v13  ;;  %v2655_v37 = vmul.f32 %v8615_v2, %v6671_v23  ;;  %v2676_v3 = vmul.f32 %v8634_v5, %v6688_v21  ;;  %v2677_v14 = vmul.f32 %v8647_v45, %v6688_v21 }
 0x20d   :  { %v2412_v26 = vmax.f32 %v2192_v62, %v2390_v54  ;;  %v2413_v22 = vmax.f32 %v2193_v56, %v2391_v39  ;;  %v2545_v11 = vadd.f32 %v2523_v43, %v2479_v52  ;;  %v2720_v17 = vmul.f32 %v8668_v57, %v6691_v16  ;;  %v4596_v62 = vld [vmem:[%s10055_s1 + $0x148] sm:$0xff]  ;;  %v4618_v56 = vld [vmem:[%s10055_s1 + $0x2a0] sm:$0xff]  ;;  %v4641_v39 = vld [vmem:[%s10055_s1 + $0x350] sm:$0xff] }
 0x20e   :  { %v2610_v51 = vadd.f32 %v2588_v42, %v2544_v27  ;;  %v2698_v49 = vadd.f32 %v2676_v3, %v2654_v12  ;;  %v2699_v1 = vadd.f32 %v2677_v14, %v2655_v37  ;;  %v2721_v7 = vmul.f32 %v8673_v34, %v6691_v16  ;;  %v4663_v52 = vld [vmem:[%s10055_s1 + $0x1f0] sm:$0xff]  ;;  %v4642_v3 = vld [vmem:[%s10055_s1 + $0x358] sm:$0xff] }
 0x20f   :  { %v2611_v8 = vadd.f32 %v2589_v61, %v2545_v11  ;;  %v2786_v63 = vmul.f32 %v8705_v0, %v6701_v40  ;;  %v2787_v35 = vmul.f32 %v8710_v32, %v6701_v40  ;;  %v1084_v53 = vmul.f32 %v6191_v9, %v1061_v46  ;;  %v4664_v46 = vld [vmem:[%s10055_s1 + $0x1f8] sm:$0xff] }
 0x210   :  { %v2632_v4 = vmax.f32 %v2412_v26, %v2610_v51  ;;  %v2742_v47 = vadd.f32 %v2720_v17, %v2698_v49  ;;  %v2743_v15 = vadd.f32 %v2721_v7, %v2699_v1  ;;  %v1085_v13 = vmul.f32 %v6191_v9, %v1062_v10  ;;  %v4685_v10 = vld [vmem:[%s10055_s1 + $0x400] sm:$0xff] }
 0x211   :  { %v2633_v43 = vmax.f32 %v2413_v22, %v2611_v8  ;;  %v1130_v42 = vmul.f32 %v4595_v38, %v6198_v58  ;;  %v1131_v61 = vmul.f32 %v4596_v62, %v6198_v58  ;;  %v1198_v54 = vmul.f32 %v4618_v56, %v6205_v55  ;;  %v4686_v8 = vld [vmem:[%s10055_s1 + $0x408] sm:$0xff] }
 0x212   :  { %v2808_v12 = vadd.f32 %v2786_v63, %v2742_v47  ;;  %v2809_v27 = vadd.f32 %v2787_v35, %v2743_v15  ;;  %v1199_v37 = vmul.f32 %v4619_v19, %v6205_v55  ;;  %v1266_v14 = vmul.f32 %v4641_v39, %v6208_v18  ;;  %v4707_v47 = vld [vmem:[%s10055_s1 + $0x4b0] sm:$0xff] }
 0x213   :  { %v1152_v26 = vadd.f32 %v1130_v42, %v1084_v53  ;;  %v1153_v22 = vadd.f32 %v1131_v61, %v1085_v13  ;;  %v1267_v11 = vmul.f32 %v4642_v3, %v6208_v18  ;;  %v1310_v17 = vmul.f32 %v4595_v38, %v6191_v9  ;;  %v3815_v42 = vld [vmem:[%s10056_s2 + $0x158] sm:$0xff]  ;;  %v3814_v61 = vld [vmem:[%s10056_s2 + $0x150] sm:$0xff] }
 0x214   :  { %v2830_v51 = vmax.f32 %v2632_v4, %v2808_v12  ;;  %v2831_v49 = vmax.f32 %v2633_v43, %v2809_v27  ;;  %v1311_v1 = vmul.f32 %v4596_v62, %v6191_v9  ;;  %v1354_v7 = vmul.f32 %v4663_v52, %v6198_v58  ;;  %v4708_v43 = vld [vmem:[%s10055_s1 + $0x4b8] sm:$0xff]  ;;  %4080 = vmatprep.mubr.f32.mxu1 %v3815_v42 }
 0x215   :  { %v1220_v63 = vadd.f32 %v1198_v54, %v1152_v26  ;;  %v1221_v35 = vadd.f32 %v1199_v37, %v1153_v22  ;;  %v1355_v53 = vmul.f32 %v4664_v46, %v6198_v58  ;;  %v1398_v38 = vmul.f32 %v4641_v39, %v6205_v55  ;;  %v4729_v37 = vld [vmem:[%s10055_s1 + $0x560] sm:$0xff]  ;;  %v4730_v46 = vld [vmem:[%s10055_s1 + $0x568] sm:$0xff]  ;;  %4081 = vmatmul.mubr.f32.gmra.mrb[14].mxu1 %v3814_v61  ;;  %v4752_v42 = vld [vmem:[%s10055_s1 + $0x618] sm:$0xff] }
 0x216   :  { %v5312_v4 = vpack.c.bf16 %v2831_v49, %v2830_v51  ;;  %v1376_v15 = vadd.f32 %v1354_v7, %v1310_v17  ;;  %v1399_v62 = vmul.f32 %v4642_v3, %v6205_v55  ;;  %v1464_v13 = vmul.f32 %v4685_v10, %v6208_v18 }
 0x217   :  { %v1288_v54 = vadd.f32 %v1266_v14, %v1220_v63  ;;  %v1289_v52 = vadd.f32 %v1267_v11, %v1221_v35  ;;  %v1377_v12 = vadd.f32 %v1355_v53, %v1311_v1  ;;  %v1465_v27 = vmul.f32 %v4686_v8, %v6208_v18 }
 0x218   :  { %5313 = vmatprep.subr.bf16.mxu1 %v5312_v4  ;;  %v1420_v26 = vadd.f32 %v1398_v38, %v1376_v15  ;;  %v1530_v22 = vmul.f32 %v4618_v56, %v6191_v9  ;;  %v1531_v17 = vmul.f32 %v4619_v19, %v6191_v9  ;;  %v1552_v14 = vmul.f32 %v4641_v39, %v6198_v58  ;;  %v4751_v15 = vld [vmem:[%s10055_s1 + $0x610] sm:$0xff] }
 0x219   :  { %v1421_v11 = vadd.f32 %v1399_v62, %v1377_v12  ;;  %v1553_v51 = vmul.f32 %v4642_v3, %v6198_v58  ;;  %v1618_v49 = vmul.f32 %v4707_v47, %v6205_v55  ;;  %v1619_v1 = vmul.f32 %v4708_v43, %v6205_v55 }
 0x21a   :  { %v1486_v7 = vadd.f32 %v1464_v13, %v1420_v26  ;;  %v1574_v63 = vadd.f32 %v1552_v14, %v1530_v22  ;;  %v1684_v35 = vmul.f32 %v4729_v37, %v6208_v18  ;;  %v1685_v53 = vmul.f32 %v4730_v46, %v6208_v18 }
 0x21b   :  { %v1487_v38 = vadd.f32 %v1465_v27, %v1421_v11  ;;  %v1575_v56 = vadd.f32 %v1553_v51, %v1531_v17  ;;  %v1750_v19 = vmul.f32 %v4641_v39, %v6191_v9  ;;  %v1751_v4 = vmul.f32 %v4642_v3, %v6191_v9 }
 0x21c   :  { %v1508_v47 = vmax.f32 %v1288_v54, %v1486_v7  ;;  %v1640_v62 = vadd.f32 %v1618_v49, %v1574_v63  ;;  %v1772_v43 = vmul.f32 %v4685_v10, %v6198_v58  ;;  %v1773_v13 = vmul.f32 %v4686_v8, %v6198_v58 }
 0x21d   :  { %v1509_v61 = vmax.f32 %v1289_v52, %v1487_v38  ;;  %v1641_v12 = vadd.f32 %v1619_v1, %v1575_v56  ;;  %v1816_v39 = vmul.f32 %v4729_v37, %v6205_v55  ;;  %v1817_v3 = vmul.f32 %v4730_v46, %v6205_v55 }
 0x21e   :  { %v1706_v27 = vadd.f32 %v1684_v35, %v1640_v62  ;;  %v1794_v26 = vadd.f32 %v1772_v43, %v1750_v19  ;;  %v1795_v22 = vadd.f32 %v1773_v13, %v1751_v4  ;;  %v1882_v54 = vmul.f32 %v4751_v15, %v6208_v18 }
 0x21f   :  { %v1707_v17 = vadd.f32 %v1685_v53, %v1641_v12  ;;  %v1883_v10 = vmul.f32 %v4752_v42, %v6208_v18  ;;  %v2898_v8 = vmul.f32 %v6962_v50, %v8560_v59  ;;  %v2899_v14 = vmul.f32 %v6962_v50, %v8565_v60 }
 0x220   :  { %v1728_v52 = vmax.f32 %v1508_v47, %v1706_v27  ;;  %v1838_v11 = vadd.f32 %v1816_v39, %v1794_v26  ;;  %v1839_v51 = vadd.f32 %v1817_v3, %v1795_v22  ;;  %v2944_v37 = vmul.f32 %v8574_v28, %v6965_v31 }
 0x221   :  { %v1729_v46 = vmax.f32 %v1509_v61, %v1707_v17  ;;  %v2945_v49 = vmul.f32 %v8579_v25, %v6965_v31  ;;  %v3012_v1 = vmul.f32 %v8588_v33, %v6981_v41  ;;  %v3013_v7 = vmul.f32 %v8593_v6, %v6981_v41 }
 0x222   :  { %v1904_v59 = vadd.f32 %v1882_v54, %v1838_v11  ;;  %v1905_v63 = vadd.f32 %v1883_v10, %v1839_v51  ;;  %v2966_v35 = vadd.f32 %v2944_v37, %v2898_v8  ;;  %v3080_v60 = vmul.f32 %v8606_v29, %v6987_v44 }
 0x223   :  { %v2967_v53 = vadd.f32 %v2945_v49, %v2899_v14  ;;  %v3081_v38 = vmul.f32 %v8615_v2, %v6987_v44  ;;  %v3124_v56 = vmul.f32 %v8574_v28, %v6962_v50  ;;  %v3125_v19 = vmul.f32 %v8579_v25, %v6962_v50 }
 0x224   :  { %v1926_v4 = vmax.f32 %v1728_v52, %v1904_v59  ;;  %v1927_v15 = vmax.f32 %v1729_v46, %v1905_v63  ;;  %v3034_v47 = vadd.f32 %v3012_v1, %v2966_v35  ;;  %v3168_v62 = vmul.f32 %v8620_v36, %v6965_v31  ;;  %v8871_v63 = vld [vmem:[%s10055_s1 + $0x70] sm:$0xff] }
 0x225   :  { %v3035_v43 = vadd.f32 %v3013_v7, %v2967_v53  ;;  %v3169_v13 = vmul.f32 %v8625_v20, %v6965_v31  ;;  %v3212_v42 = vmul.f32 %v8606_v29, %v6981_v41  ;;  %v3213_v61 = vmul.f32 %v8615_v2, %v6981_v41 }
 0x226   :  { %v5314_v28 = vpack.c.bf16 %v1927_v15, %v1926_v4  ;;  %v3102_v12 = vadd.f32 %v3080_v60, %v3034_v47  ;;  %v3190_v39 = vadd.f32 %v3168_v62, %v3124_v56  ;;  %v3278_v25 = vmul.f32 %v8634_v5, %v6987_v44  ;;  %v8892_v4 = vld [vmem:[%s10055_s1 + $0x128] sm:$0xff] }
 0x227   :  { %v3103_v3 = vadd.f32 %v3081_v38, %v3035_v43  ;;  %v3191_v27 = vadd.f32 %v3169_v13, %v3125_v19  ;;  %v3279_v36 = vmul.f32 %v8647_v45, %v6987_v44  ;;  %v3344_v20 = vmul.f32 %v8588_v33, %v6962_v50 }
 0x228   :  { %5315 = vmatpush3.bf16.msra.mxu1 %v5314_v28  ;;  %v3234_v26 = vadd.f32 %v3212_v42, %v3190_v39  ;;  %v3345_v22 = vmul.f32 %v8593_v6, %v6962_v50  ;;  %v3366_v54 = vmul.f32 %v8606_v29, %v6965_v31  ;;  %v3367_v17 = vmul.f32 %v8615_v2, %v6965_v31  ;;  %v8915_v28 = vld [vmem:[%s10055_s1 + $0x330] sm:$0xff] }
 0x229   :  { %v3235_v10 = vadd.f32 %v3213_v61, %v3191_v27  ;;  %v3432_v8 = vmul.f32 %v8658_v48, %v6981_v41  ;;  %v3433_v14 = vmul.f32 %v8663_v24, %v6981_v41  ;;  %v3498_v33 = vmul.f32 %v8668_v57, %v6987_v44  ;;  %v8931_v27 = vld [vmem:[%s10055_s1 + $0x1d0] sm:$0xff] }
 0x22a   :  { %v3300_v52 = vadd.f32 %v3278_v25, %v3234_v26  ;;  %v3388_v11 = vadd.f32 %v3366_v54, %v3344_v20  ;;  %v3389_v51 = vadd.f32 %v3367_v17, %v3345_v22  ;;  %v3499_v6 = vmul.f32 %v8673_v34, %v6987_v44  ;;  %v8945_v17 = vld [vmem:[%s10055_s1 + $0x3e0] sm:$0xff] }
 0x22b   :  { %v3301_v37 = vadd.f32 %v3279_v36, %v3235_v10  ;;  %v3564_v46 = vmul.f32 %v8606_v29, %v6962_v50  ;;  %v3565_v49 = vmul.f32 %v8615_v2, %v6962_v50  ;;  %v3586_v48 = vmul.f32 %v8634_v5, %v6965_v31  ;;  %v8876_v29 = vld [vmem:[%s10055_s1 + $0x78] sm:$0xff] }
 0x22c   :  { %v3322_v24 = vmax.f32 %v3102_v12, %v3300_v52  ;;  %v3454_v1 = vadd.f32 %v3432_v8, %v3388_v11  ;;  %v3455_v7 = vadd.f32 %v3433_v14, %v3389_v51  ;;  %v3587_v59 = vmul.f32 %v8647_v45, %v6965_v31  ;;  %v8885_v45 = vld [vmem:[%s10055_s1 + $0x120] sm:$0xff]  ;;  %v8936_v36 = vld [vmem:[%s10055_s1 + $0x1d8] sm:$0xff] }
 0x22d   :  { %v3323_v2 = vmax.f32 %v3103_v3, %v3301_v37  ;;  %v3608_v35 = vadd.f32 %v3586_v48, %v3564_v46  ;;  %v3630_v5 = vmul.f32 %v8668_v57, %v6981_v41  ;;  %v3631_v60 = vmul.f32 %v8673_v34, %v6981_v41  ;;  %v8897_v57 = vld [vmem:[%s10055_s1 + $0x280] sm:$0xff]  ;;  %v8902_v34 = vld [vmem:[%s10055_s1 + $0x288] sm:$0xff]  ;;  %v8926_v3 = vld [vmem:[%s10055_s1 + $0x338] sm:$0xff] }
 0x22e   :  { %v3520_v53 = vadd.f32 %v3498_v33, %v3454_v1  ;;  %v3521_v38 = vadd.f32 %v3499_v6, %v3455_v7  ;;  %v3609_v56 = vadd.f32 %v3587_v59, %v3565_v49  ;;  %v3696_v19 = vmul.f32 %v8705_v0, %v6987_v44  ;;  %v8958_v37 = vld [vmem:[%s10055_s1 + $0x3e8] sm:$0xff]  ;;  %v8969_v1 = vld [vmem:[%s10055_s1 + $0x490] sm:$0xff] }
 0x22f   :  { %v3652_v15 = vadd.f32 %v3630_v5, %v3608_v35  ;;  %v3697_v47 = vmul.f32 %v8710_v32, %v6987_v44  ;;  %v1990_v0 = vmul.f32 %v6671_v23, %v8871_v63  ;;  %v1991_v62 = vmul.f32 %v6671_v23, %v8876_v29  ;;  %v8974_v5 = vld [vmem:[%s10055_s1 + $0x498] sm:$0xff] }
 0x230   :  { %v3542_v43 = vmax.f32 %v3322_v24, %v3520_v53  ;;  %v3543_v13 = vmax.f32 %v3323_v2, %v3521_v38  ;;  %v3653_v42 = vadd.f32 %v3631_v60, %v3609_v56  ;;  %v2036_v61 = vmul.f32 %v8885_v45, %v6688_v21  ;;  %v8979_v60 = vld [vmem:[%s10055_s1 + $0x540] sm:$0xff]  ;;  %v8984_v53 = vld [vmem:[%s10055_s1 + $0x548] sm:$0xff] }
 0x231   :  { %v3718_v12 = vadd.f32 %v3696_v19, %v3652_v15  ;;  %v2037_v32 = vmul.f32 %v8892_v4, %v6688_v21  ;;  %v2104_v39 = vmul.f32 %v8897_v57, %v6691_v16  ;;  %v2105_v25 = vmul.f32 %v8902_v34, %v6691_v16 }
 0x232   :  { %v3719_v20 = vadd.f32 %v3697_v47, %v3653_v42  ;;  %v2058_v26 = vadd.f32 %v2036_v61, %v1990_v0  ;;  %v2172_v22 = vmul.f32 %v8915_v28, %v6701_v40  ;;  %v2173_v54 = vmul.f32 %v8926_v3, %v6701_v40 }
 0x233   :  { %v3740_v10 = vmax.f32 %v3542_v43, %v3718_v12  ;;  %v2059_v8 = vadd.f32 %v2037_v32, %v1991_v62  ;;  %v2216_v14 = vmul.f32 %v8885_v45, %v6671_v23  ;;  %v2217_v33 = vmul.f32 %v8892_v4, %v6671_v23 }
 0x234   :  { %v3741_v52 = vmax.f32 %v3543_v13, %v3719_v20  ;;  %v2126_v11 = vadd.f32 %v2104_v39, %v2058_v26  ;;  %v2260_v51 = vmul.f32 %v8931_v27, %v6688_v21  ;;  %v2261_v6 = vmul.f32 %v8936_v36, %v6688_v21 }
 0x235   :  { %v2127_v46 = vadd.f32 %v2105_v25, %v2059_v8  ;;  %v2304_v49 = vmul.f32 %v8915_v28, %v6691_v16  ;;  %v2305_v48 = vmul.f32 %v8926_v3, %v6691_v16  ;;  %v2370_v24 = vmul.f32 %v8945_v17, %v6701_v40  ;;  %v9016_v8 = vld [vmem:[%s10055_s1 + $0x5f0] sm:$0xff] }
 0x236   :  { %v5350_v7 = vpack.c.bf16 %v3741_v52, %v3740_v10  ;;  %v2194_v59 = vadd.f32 %v2172_v22, %v2126_v11  ;;  %v2282_v2 = vadd.f32 %v2260_v51, %v2216_v14  ;;  %v2283_v35 = vadd.f32 %v2261_v6, %v2217_v33  ;;  %v9021_v14 = vld [vmem:[%s10055_s1 + $0x5f8] sm:$0xff]  ;;  %v1063_v6 = vld [vmem:[%s10055_s1 + $0xa0] sm:$0xff] }
 0x237   :  { %v2195_v38 = vadd.f32 %v2173_v54, %v2127_v46  ;;  %v2371_v56 = vmul.f32 %v8958_v37, %v6701_v40  ;;  %v2436_v19 = vmul.f32 %v8897_v57, %v6671_v23  ;;  %v2437_v15 = vmul.f32 %v8902_v34, %v6671_v23  ;;  %v1064_v46 = vld [vmem:[%s10055_s1 + $0xa8] sm:$0x1] }
 0x238   :  { %5351 = vmatpush1.bf16.msra.mxu0 %v5350_v7  ;;  %v2326_v47 = vadd.f32 %v2304_v49, %v2282_v2  ;;  %v2327_v0 = vadd.f32 %v2305_v48, %v2283_v35  ;;  %v2458_v62 = vmul.f32 %v8915_v28, %v6688_v21  ;;  %v2459_v43 = vmul.f32 %v8926_v3, %v6688_v21  ;;  %v4598_v2 = vld [vmem:[%s10055_s1 + $0x158] sm:$0x1] }
 0x239   :  { %v2524_v13 = vmul.f32 %v8969_v1, %v6691_v16  ;;  %v2525_v42 = vmul.f32 %v8974_v5, %v6691_v16  ;;  %v2590_v61 = vmul.f32 %v8979_v60, %v6701_v40  ;;  %v2591_v12 = vmul.f32 %v8984_v53, %v6701_v40  ;;  %5352 = vmatprep.subr.bf16.mxu0 %v5403_v30 }
 0x23a   :  { %v2392_v32 = vadd.f32 %v2370_v24, %v2326_v47  ;;  %v2393_v39 = vadd.f32 %v2371_v56, %v2327_v0  ;;  %v2480_v25 = vadd.f32 %v2458_v62, %v2436_v19  ;;  %v2481_v20 = vadd.f32 %v2459_v43, %v2437_v15  ;;  %v4620_v15 = vld [vmem:[%s10055_s1 + $0x2b0] sm:$0xff]  ;;  %v4621_v47 = vld [vmem:[%s10055_s1 + $0x2b8] sm:$0x1] }
 0x23b   :  { %v2656_v26 = vmul.f32 %v8915_v28, %v6671_v23  ;;  %v2657_v22 = vmul.f32 %v8926_v3, %v6671_v23  ;;  %v2678_v54 = vmul.f32 %v8945_v17, %v6688_v21  ;;  %v2679_v10 = vmul.f32 %v8958_v37, %v6688_v21 }
 0x23c   :  { %v2414_v33 = vmax.f32 %v2194_v59, %v2392_v32  ;;  %v2415_v52 = vmax.f32 %v2195_v38, %v2393_v39  ;;  %v2546_v11 = vadd.f32 %v2524_v13, %v2480_v25  ;;  %v2547_v51 = vadd.f32 %v2525_v42, %v2481_v20  ;;  %v4597_v59 = vld [vmem:[%s10055_s1 + $0x150] sm:$0xff]  ;;  %v4644_v39 = vld [vmem:[%s10055_s1 + $0x368] sm:$0x1] }
 0x23d   :  { %v2700_v49 = vadd.f32 %v2678_v54, %v2656_v26  ;;  %v2701_v48 = vadd.f32 %v2679_v10, %v2657_v22  ;;  %v2722_v24 = vmul.f32 %v8979_v60, %v6691_v16  ;;  %v2723_v7 = vmul.f32 %v8984_v53, %v6691_v16  ;;  %v4643_v54 = vld [vmem:[%s10055_s1 + $0x360] sm:$0xff] }
 0x23e   :  { %v2612_v35 = vadd.f32 %v2590_v61, %v2546_v11  ;;  %v2613_v38 = vadd.f32 %v2591_v12, %v2547_v51  ;;  %v2788_v56 = vmul.f32 %v9016_v8, %v6701_v40  ;;  %v2789_v19 = vmul.f32 %v9021_v14, %v6701_v40  ;;  %v4665_v10 = vld [vmem:[%s10055_s1 + $0x200] sm:$0xff] }
 0x23f   :  { %v2744_v0 = vadd.f32 %v2722_v24, %v2700_v49  ;;  %v2745_v62 = vadd.f32 %v2723_v7, %v2701_v48  ;;  %v1086_v43 = vmul.f32 %v6191_v9, %v1063_v6  ;;  %v1087_v13 = vmul.f32 %v6191_v9, %v1064_v46  ;;  %v4687_v46 = vld [vmem:[%s10055_s1 + $0x410] sm:$0xff] }
 0x240   :  { %v2634_v42 = vmax.f32 %v2414_v33, %v2612_v35  ;;  %v2635_v61 = vmax.f32 %v2415_v52, %v2613_v38  ;;  %v1132_v12 = vmul.f32 %v4597_v59, %v6198_v58  ;;  %v1133_v32 = vmul.f32 %v4598_v2, %v6198_v58  ;;  %v4666_v33 = vld [vmem:[%s10055_s1 + $0x208] sm:$0x1] }
 0x241   :  { %v2810_v25 = vadd.f32 %v2788_v56, %v2744_v0  ;;  %v2811_v20 = vadd.f32 %v2789_v19, %v2745_v62  ;;  %v1200_v26 = vmul.f32 %v4620_v15, %v6205_v55  ;;  %v1201_v22 = vmul.f32 %v4621_v47, %v6205_v55  ;;  %v4688_v0 = vld [vmem:[%s10055_s1 + $0x418] sm:$0x1] }
 0x242   :  { %v1154_v52 = vadd.f32 %v1132_v12, %v1086_v43  ;;  %v1155_v11 = vadd.f32 %v1133_v32, %v1087_v13  ;;  %v1268_v51 = vmul.f32 %v4643_v54, %v6208_v18  ;;  %v1269_v6 = vmul.f32 %v4644_v39, %v6208_v18 }
 0x243   :  { %v2832_v49 = vmax.f32 %v2634_v42, %v2810_v25  ;;  %v2833_v48 = vmax.f32 %v2635_v61, %v2811_v20  ;;  %v1312_v24 = vmul.f32 %v4597_v59, %v6191_v9  ;;  %v1313_v7 = vmul.f32 %v4598_v2, %v6191_v9  ;;  %v4709_v59 = vld [vmem:[%s10055_s1 + $0x4c0] sm:$0xff]  ;;  %v3775_v2 = vld [vmem:[%s10056_s2 + $0x18] sm:$0xff]  ;;  %v4710_v20 = vld [vmem:[%s10055_s1 + $0x4c8] sm:$0x1] }
 0x244   :  { %v1222_v35 = vadd.f32 %v1200_v26, %v1154_v52  ;;  %v1223_v38 = vadd.f32 %v1201_v22, %v1155_v11  ;;  %v1356_v56 = vmul.f32 %v4665_v10, %v6198_v58  ;;  %v1357_v19 = vmul.f32 %v4666_v33, %v6198_v58  ;;  %v4731_v26 = vld [vmem:[%s10055_s1 + $0x570] sm:$0xff]  ;;  %v4732_v22 = vld [vmem:[%s10055_s1 + $0x578] sm:$0x1]  ;;  %4150 = vmatprep.mubr.f32.mxu1 %v3775_v2 }
 0x245   :  { %v5316_v62 = vpack.c.bf16 %v2833_v48, %v2832_v49  ;;  %v1400_v43 = vmul.f32 %v4643_v54, %v6205_v55  ;;  %v1401_v13 = vmul.f32 %v4644_v39, %v6205_v55  ;;  %v1466_v42 = vmul.f32 %v4687_v46, %v6208_v18 }
 0x246   :  { %v1290_v61 = vadd.f32 %v1268_v51, %v1222_v35  ;;  %v1291_v12 = vadd.f32 %v1269_v6, %v1223_v38  ;;  %v1378_v32 = vadd.f32 %v1356_v56, %v1312_v24  ;;  %v1379_v25 = vadd.f32 %v1357_v19, %v1313_v7 }
 0x247   :  { %5317 = vmatprep.subr.bf16.mxu1 %v5316_v62  ;;  %v1467_v10 = vmul.f32 %v4688_v0, %v6208_v18  ;;  %v1532_v33 = vmul.f32 %v4620_v15, %v6191_v9  ;;  %v1533_v52 = vmul.f32 %v4621_v47, %v6191_v9  ;;  %v1554_v11 = vmul.f32 %v4643_v54, %v6198_v58 }
 0x248   :  { %v1422_v51 = vadd.f32 %v1400_v43, %v1378_v32  ;;  %v1423_v6 = vadd.f32 %v1401_v13, %v1379_v25  ;;  %v1555_v49 = vmul.f32 %v4644_v39, %v6198_v58  ;;  %v1620_v48 = vmul.f32 %v4709_v59, %v6205_v55  ;;  %v4753_v59 = vld [vmem:[%s10055_s1 + $0x620] sm:$0xff]  ;;  %v4754_v32 = vld [vmem:[%s10055_s1 + $0x628] sm:$0x1] }
 0x249   :  { %v1576_v24 = vadd.f32 %v1554_v11, %v1532_v33  ;;  %v1621_v7 = vmul.f32 %v4710_v20, %v6205_v55  ;;  %v1686_v35 = vmul.f32 %v4731_v26, %v6208_v18  ;;  %v1687_v38 = vmul.f32 %v4732_v22, %v6208_v18 }
 0x24a   :  { %v1488_v56 = vadd.f32 %v1466_v42, %v1422_v51  ;;  %v1489_v19 = vadd.f32 %v1467_v10, %v1423_v6  ;;  %v1577_v15 = vadd.f32 %v1555_v49, %v1533_v52  ;;  %v1752_v47 = vmul.f32 %v4643_v54, %v6191_v9 }
 0x24b   :  { %v1642_v62 = vadd.f32 %v1620_v48, %v1576_v24  ;;  %v1753_v43 = vmul.f32 %v4644_v39, %v6191_v9  ;;  %v1774_v13 = vmul.f32 %v4687_v46, %v6198_v58  ;;  %v1775_v2 = vmul.f32 %v4688_v0, %v6198_v58 }
 0x24c   :  { %v1510_v42 = vmax.f32 %v1290_v61, %v1488_v56  ;;  %v1511_v25 = vmax.f32 %v1291_v12, %v1489_v19  ;;  %v1643_v20 = vadd.f32 %v1621_v7, %v1577_v15  ;;  %v1818_v54 = vmul.f32 %v4731_v26, %v6205_v55 }
 0x24d   :  { %v1708_v10 = vadd.f32 %v1686_v35, %v1642_v62  ;;  %v1796_v33 = vadd.f32 %v1774_v13, %v1752_v47  ;;  %v1797_v9 = vadd.f32 %v1775_v2, %v1753_v43  ;;  %v1819_v39 = vmul.f32 %v4732_v22, %v6205_v55 }
 0x24e   :  { %v1709_v46 = vadd.f32 %v1687_v38, %v1643_v20  ;;  %v1884_v58 = vmul.f32 %v4753_v59, %v6208_v18  ;;  %v1885_v0 = vmul.f32 %v4754_v32, %v6208_v18  ;;  %v2900_v52 = vmul.f32 %v6962_v50, %v8871_v63 }
 0x24f   :  { %v1730_v11 = vmax.f32 %v1510_v42, %v1708_v10  ;;  %v1840_v51 = vadd.f32 %v1818_v54, %v1796_v33  ;;  %v1841_v61 = vadd.f32 %v1819_v39, %v1797_v9  ;;  %v2901_v12 = vmul.f32 %v6962_v50, %v8876_v29 }
 0x250   :  { %v1731_v26 = vmax.f32 %v1511_v25, %v1709_v46  ;;  %v2946_v6 = vmul.f32 %v8885_v45, %v6965_v31  ;;  %v2947_v55 = vmul.f32 %v8892_v4, %v6965_v31  ;;  %v3014_v22 = vmul.f32 %v8897_v57, %v6981_v41 }
 0x251   :  { %v1906_v18 = vadd.f32 %v1884_v58, %v1840_v51  ;;  %v1907_v49 = vadd.f32 %v1885_v0, %v1841_v61  ;;  %v3015_v63 = vmul.f32 %v8902_v34, %v6981_v41  ;;  %v3082_v48 = vmul.f32 %v8915_v28, %v6987_v44 }
 0x252   :  { %v2968_v24 = vadd.f32 %v2946_v6, %v2900_v52  ;;  %v2969_v29 = vadd.f32 %v2947_v55, %v2901_v12  ;;  %v3083_v7 = vmul.f32 %v8926_v3, %v6987_v44  ;;  %v3126_v35 = vmul.f32 %v8885_v45, %v6962_v50  ;;  %v9179_v6 = vld [vmem:[%s10055_s1 + $0x80] sm:$0xff] }
 0x253   :  { %v1928_v38 = vmax.f32 %v1730_v11, %v1906_v18  ;;  %v1929_v56 = vmax.f32 %v1731_v26, %v1907_v49  ;;  %v3127_v19 = vmul.f32 %v8892_v4, %v6962_v50  ;;  %v3170_v15 = vmul.f32 %v8931_v27, %v6965_v31  ;;  %v9188_v18 = vld [vmem:[%s10055_s1 + $0x88] sm:$0xff] }
 0x254   :  { %v3036_v47 = vadd.f32 %v3014_v22, %v2968_v24  ;;  %v3037_v62 = vadd.f32 %v3015_v63, %v2969_v29  ;;  %v3171_v43 = vmul.f32 %v8936_v36, %v6965_v31  ;;  %v3214_v13 = vmul.f32 %v8915_v28, %v6981_v41  ;;  %v9193_v24 = vld [vmem:[%s10055_s1 + $0x130] sm:$0xff] }
 0x255   :  { %1951 = vst [vmem:[#allocation2 + $0x158] sm:$0x1] %v1929_v56  ;;  %v3192_v2 = vadd.f32 %v3170_v15, %v3126_v35  ;;  %v3215_v45 = vmul.f32 %v8926_v3, %v6981_v41  ;;  %v3280_v59 = vmul.f32 %v8945_v17, %v6987_v44  ;;  %v3281_v4 = vmul.f32 %v8958_v37, %v6987_v44  ;;  %v9214_v56 = vld [vmem:[%s10055_s1 + $0x298] sm:$0xff] }
 0x256   :  { %v3104_v27 = vadd.f32 %v3082_v48, %v3036_v47  ;;  %v3105_v32 = vadd.f32 %v3083_v7, %v3037_v62  ;;  %v3193_v42 = vadd.f32 %v3171_v43, %v3127_v19  ;;  %v3346_v36 = vmul.f32 %v8897_v57, %v6962_v50 }
 0x257   :  { %v3236_v25 = vadd.f32 %v3214_v13, %v3192_v2  ;;  %v3347_v20 = vmul.f32 %v8902_v34, %v6962_v50  ;;  %v3368_v54 = vmul.f32 %v8915_v28, %v6965_v31  ;;  %v3369_v10 = vmul.f32 %v8926_v3, %v6965_v31 }
 0x258   :  { %v3237_v33 = vadd.f32 %v3215_v45, %v3193_v42  ;;  %v3434_v9 = vmul.f32 %v8969_v1, %v6981_v41  ;;  %v3435_v39 = vmul.f32 %v8974_v5, %v6981_v41  ;;  %v3500_v57 = vmul.f32 %v8979_v60, %v6987_v44  ;;  %v9232_v45 = vld [vmem:[%s10055_s1 + $0x348] sm:$0xff] }
 0x259   :  { %v3302_v46 = vadd.f32 %v3280_v59, %v3236_v25  ;;  %v3390_v58 = vadd.f32 %v3368_v54, %v3346_v36  ;;  %v3391_v0 = vadd.f32 %v3369_v10, %v3347_v20  ;;  %v3501_v34 = vmul.f32 %v8984_v53, %v6987_v44  ;;  %v9237_v59 = vld [vmem:[%s10055_s1 + $0x1e0] sm:$0xff] }
 0x25a   :  { %v3303_v52 = vadd.f32 %v3281_v4, %v3237_v33  ;;  %v3566_v11 = vmul.f32 %v8915_v28, %v6962_v50  ;;  %v3567_v51 = vmul.f32 %v8926_v3, %v6962_v50  ;;  %v3588_v1 = vmul.f32 %v8945_v17, %v6965_v31  ;;  %v9242_v4 = vld [vmem:[%s10055_s1 + $0x1e8] sm:$0xff]  ;;  %v9255_v33 = vld [vmem:[%s10055_s1 + $0x3f0] sm:$0xff] }
 0x25b   :  { %v3324_v5 = vmax.f32 %v3104_v27, %v3302_v46  ;;  %v3456_v61 = vadd.f32 %v3434_v9, %v3390_v58  ;;  %v3457_v12 = vadd.f32 %v3435_v39, %v3391_v0  ;;  %v3589_v26 = vmul.f32 %v8958_v37, %v6965_v31  ;;  %v9266_v58 = vld [vmem:[%s10055_s1 + $0x3f8] sm:$0xff] }
 0x25c   :  { %v3863_v55 = vld [vmem:[#allocation2 + $0x158] sm:$0xff]  ;;  %v3325_v22 = vmax.f32 %v3105_v32, %v3303_v52  ;;  %v3610_v28 = vadd.f32 %v3588_v1, %v3566_v11  ;;  %v3632_v3 = vmul.f32 %v8979_v60, %v6981_v41  ;;  %v3633_v17 = vmul.f32 %v8984_v53, %v6981_v41  ;;  %v9203_v53 = vld [vmem:[%s10055_s1 + $0x290] sm:$0xff] }
 0x25d   :  { %v5318_v37 = vpack.c.bf16 %v3863_v55, %v1928_v38  ;;  %v3522_v49 = vadd.f32 %v3500_v57, %v3456_v61  ;;  %v3523_v63 = vadd.f32 %v3501_v34, %v3457_v12  ;;  %v3611_v48 = vadd.f32 %v3589_v26, %v3567_v51  ;;  %v9198_v60 = vld [vmem:[%s10055_s1 + $0x138] sm:$0xff]  ;;  %v9277_v12 = vld [vmem:[%s10055_s1 + $0x4a0] sm:$0xff]  ;;  %v9282_v26 = vld [vmem:[%s10055_s1 + $0x4a8] sm:$0xff] }
 0x25e   :  { %v3654_v29 = vadd.f32 %v3632_v3, %v3610_v28  ;;  %v3698_v7 = vmul.f32 %v9016_v8, %v6987_v44  ;;  %v3699_v35 = vmul.f32 %v9021_v14, %v6987_v44  ;;  %v1992_v38 = vmul.f32 %v6671_v23, %v9179_v6  ;;  %v9221_v8 = vld [vmem:[%s10055_s1 + $0x340] sm:$0xff]  ;;  %v9287_v55 = vld [vmem:[%s10055_s1 + $0x550] sm:$0xff] }
 0x25f   :  { %5319 = vmatpush3.bf16.msra.mxu1 %v5318_v37  ;;  %v3544_v19 = vmax.f32 %v3324_v5, %v3522_v49  ;;  %v3545_v15 = vmax.f32 %v3325_v22, %v3523_v63  ;;  %v3655_v47 = vadd.f32 %v3633_v17, %v3611_v48  ;;  %v1993_v62 = vmul.f32 %v6671_v23, %v9188_v18  ;;  %v9296_v37 = vld [vmem:[%s10055_s1 + $0x558] sm:$0xff] }
 0x260   :  { %v3720_v14 = vadd.f32 %v3698_v7, %v3654_v29  ;;  %v2038_v43 = vmul.f32 %v9193_v24, %v6688_v21  ;;  %v2039_v13 = vmul.f32 %v9198_v60, %v6688_v21  ;;  %v2106_v2 = vmul.f32 %v9203_v53, %v6691_v16 }
 0x261   :  { %v3721_v27 = vadd.f32 %v3699_v35, %v3655_v47  ;;  %v2107_v32 = vmul.f32 %v9214_v56, %v6691_v16  ;;  %v2174_v42 = vmul.f32 %v9221_v8, %v6701_v40  ;;  %v2175_v36 = vmul.f32 %v9232_v45, %v6701_v40 }
 0x262   :  { %v3742_v25 = vmax.f32 %v3544_v19, %v3720_v14  ;;  %v2060_v20 = vadd.f32 %v2038_v43, %v1992_v38  ;;  %v2061_v54 = vadd.f32 %v2039_v13, %v1993_v62  ;;  %v2218_v10 = vmul.f32 %v9193_v24, %v6671_v23 }
 0x263   :  { %v3743_v9 = vmax.f32 %v3545_v15, %v3721_v27  ;;  %v2219_v39 = vmul.f32 %v9198_v60, %v6671_v23  ;;  %v2262_v57 = vmul.f32 %v9237_v59, %v6688_v21  ;;  %v2263_v46 = vmul.f32 %v9242_v4, %v6688_v21 }
 0x264   :  { %v2128_v0 = vadd.f32 %v2106_v2, %v2060_v20  ;;  %v2129_v34 = vadd.f32 %v2107_v32, %v2061_v54  ;;  %v2306_v52 = vmul.f32 %v9221_v8, %v6691_v16  ;;  %v2307_v11 = vmul.f32 %v9232_v45, %v6691_v16  ;;  %v9322_v32 = vld [vmem:[%s10055_s1 + $0x600] sm:$0xff] }
 0x265   :  { %v5353_v51 = vpack.c.bf16 %v3743_v9, %v3742_v25  ;;  %v2284_v1 = vadd.f32 %v2262_v57, %v2218_v10  ;;  %v2285_v5 = vadd.f32 %v2263_v46, %v2219_v39  ;;  %v2372_v61 = vmul.f32 %v9255_v33, %v6701_v40  ;;  %v1953_v10 = vld [vmem:[%s10055_s1] sm:$0xff]  ;;  %v1954_v9 = vld [vmem:[%s10055_s1 + $0x8] sm:$0xff] }
 0x266   :  { %v2196_v22 = vadd.f32 %v2174_v42, %v2128_v0  ;;  %v2197_v28 = vadd.f32 %v2175_v36, %v2129_v34  ;;  %v2373_v3 = vmul.f32 %v9266_v58, %v6701_v40  ;;  %v2438_v17 = vmul.f32 %v9203_v53, %v6671_v23  ;;  %v9327_v42 = vld [vmem:[%s10055_s1 + $0x608] sm:$0xff]  ;;  %v4757_v34 = vld [vmem:[%s10055_s1 + $0xb0] sm:$0xff] }
 0x267   :  { %5354 = vmatpush1.bf16.msra.mxu0 %v5353_v51  ;;  %v2328_v49 = vadd.f32 %v2306_v52, %v2284_v1  ;;  %v2329_v63 = vadd.f32 %v2307_v11, %v2285_v5  ;;  %v2439_v48 = vmul.f32 %v9214_v56, %v6671_v23  ;;  %v2460_v29 = vmul.f32 %v9221_v8, %v6688_v21  ;;  %v4758_v52 = vld [vmem:[%s10055_s1 + $0xb8] sm:$0xff] }
 0x268   :  { %v2461_v7 = vmul.f32 %v9232_v45, %v6688_v21  ;;  %v2526_v35 = vmul.f32 %v9277_v12, %v6691_v16  ;;  %v2527_v38 = vmul.f32 %v9282_v26, %v6691_v16  ;;  %v2592_v19 = vmul.f32 %v9287_v55, %v6701_v40  ;;  %5355 = vmatprep.subr.bf16.mxu0 %v5403_v30 }
 0x269   :  { %v2394_v15 = vadd.f32 %v2372_v61, %v2328_v49  ;;  %v2395_v47 = vadd.f32 %v2373_v3, %v2329_v63  ;;  %v2482_v62 = vadd.f32 %v2460_v29, %v2438_v17  ;;  %v2593_v14 = vmul.f32 %v9296_v37, %v6701_v40  ;;  %v4780_v61 = vld [vmem:[%s10055_s1 + $0x210] sm:$0xff] }
 0x26a   :  { %v2483_v43 = vadd.f32 %v2461_v7, %v2439_v48  ;;  %v2658_v13 = vmul.f32 %v9221_v8, %v6671_v23  ;;  %v2659_v2 = vmul.f32 %v9232_v45, %v6671_v23  ;;  %v2680_v27 = vmul.f32 %v9255_v33, %v6688_v21 }
 0x26b   :  { %v2416_v36 = vmax.f32 %v2196_v22, %v2394_v15  ;;  %v2417_v25 = vmax.f32 %v2197_v28, %v2395_v47  ;;  %v2548_v20 = vadd.f32 %v2526_v35, %v2482_v62  ;;  %v2681_v54 = vmul.f32 %v9266_v58, %v6688_v21  ;;  %v4781_v22 = vld [vmem:[%s10055_s1 + $0x218] sm:$0xff]  ;;  %v4803_v47 = vld [vmem:[%s10055_s1 + $0x2c0] sm:$0xff] }
 0x26c   :  { %v2549_v39 = vadd.f32 %v2527_v38, %v2483_v43  ;;  %v2702_v57 = vadd.f32 %v2680_v27, %v2658_v13  ;;  %v2724_v46 = vmul.f32 %v9287_v55, %v6691_v16  ;;  %v2725_v0 = vmul.f32 %v9296_v37, %v6691_v16  ;;  %v4825_v62 = vld [vmem:[%s10055_s1 + $0x160] sm:$0xff] }
 0x26d   :  { %v2614_v11 = vadd.f32 %v2592_v19, %v2548_v20  ;;  %v2703_v51 = vadd.f32 %v2681_v54, %v2659_v2  ;;  %v2790_v1 = vmul.f32 %v9322_v32, %v6701_v40  ;;  %v2791_v5 = vmul.f32 %v9327_v42, %v6701_v40  ;;  %v4804_v2 = vld [vmem:[%s10055_s1 + $0x2c8] sm:$0xff] }
 0x26e   :  { %v2615_v28 = vadd.f32 %v2593_v14, %v2549_v39  ;;  %v2746_v3 = vadd.f32 %v2724_v46, %v2702_v57  ;;  %v1976_v17 = vmul.f32 %v6671_v23, %v1953_v10  ;;  %v1977_v49 = vmul.f32 %v6671_v23, %v1954_v9 }
 0x26f   :  { %v2636_v63 = vmax.f32 %v2416_v36, %v2614_v11  ;;  %v2747_v48 = vadd.f32 %v2725_v0, %v2703_v51  ;;  %v2022_v29 = vmul.f32 %v4757_v34, %v6688_v21  ;;  %v2023_v7 = vmul.f32 %v4758_v52, %v6688_v21  ;;  %v4826_v36 = vld [vmem:[%s10055_s1 + $0x168] sm:$0xff]  ;;  %v4848_v11 = vld [vmem:[%s10055_s1 + $0x378] sm:$0xff] }
 0x270   :  { %v2637_v35 = vmax.f32 %v2417_v25, %v2615_v28  ;;  %v2812_v38 = vadd.f32 %v2790_v1, %v2746_v3  ;;  %v2090_v19 = vmul.f32 %v4780_v61, %v6691_v16  ;;  %v2091_v15 = vmul.f32 %v4781_v22, %v6691_v16  ;;  %v4847_v25 = vld [vmem:[%s10055_s1 + $0x370] sm:$0xff] }
 0x271   :  { %v2813_v14 = vadd.f32 %v2791_v5, %v2747_v48  ;;  %v2044_v43 = vadd.f32 %v2022_v29, %v1976_v17  ;;  %v2045_v13 = vadd.f32 %v2023_v7, %v1977_v49  ;;  %v2158_v27 = vmul.f32 %v4803_v47, %v6701_v40  ;;  %v4891_v48 = vld [vmem:[%s10055_s1 + $0x4d0] sm:$0xff]  ;;  %v4892_v29 = vld [vmem:[%s10055_s1 + $0x4d8] sm:$0xff] }
 0x272   :  { %v2834_v20 = vmax.f32 %v2636_v63, %v2812_v38  ;;  %v2159_v54 = vmul.f32 %v4804_v2, %v6701_v40  ;;  %v2202_v10 = vmul.f32 %v4757_v34, %v6671_v23  ;;  %v2203_v9 = vmul.f32 %v4758_v52, %v6671_v23  ;;  %v4869_v34 = vld [vmem:[%s10055_s1 + $0x420] sm:$0xff]  ;;  %v4870_v63 = vld [vmem:[%s10055_s1 + $0x428] sm:$0xff] }
 0x273   :  { %v2835_v39 = vmax.f32 %v2637_v35, %v2813_v14  ;;  %v2112_v57 = vadd.f32 %v2090_v19, %v2044_v43  ;;  %v2113_v46 = vadd.f32 %v2091_v15, %v2045_v13  ;;  %v2246_v0 = vmul.f32 %v4825_v62, %v6688_v21 }
 0x274   :  { %v2247_v51 = vmul.f32 %v4826_v36, %v6688_v21  ;;  %v2290_v1 = vmul.f32 %v4803_v47, %v6691_v16  ;;  %v2291_v5 = vmul.f32 %v4804_v2, %v6691_v16  ;;  %v2356_v28 = vmul.f32 %v4847_v25, %v6701_v40 }
 0x275   :  { %v5320_v52 = vpack.c.bf16 %v2835_v39, %v2834_v20  ;;  %v2180_v3 = vadd.f32 %v2158_v27, %v2112_v57  ;;  %v2181_v17 = vadd.f32 %v2159_v54, %v2113_v46  ;;  %v2268_v49 = vadd.f32 %v2246_v0, %v2202_v10  ;;  %v4913_v0 = vld [vmem:[%s10055_s1 + $0x580] sm:$0xff] }
 0x276   :  { %v2269_v7 = vadd.f32 %v2247_v51, %v2203_v9  ;;  %v2357_v35 = vmul.f32 %v4848_v11, %v6701_v40  ;;  %v2422_v38 = vmul.f32 %v4780_v61, %v6671_v23  ;;  %v2423_v19 = vmul.f32 %v4781_v22, %v6671_v23  ;;  %v4914_v51 = vld [vmem:[%s10055_s1 + $0x588] sm:$0xff] }
 0x277   :  { %5321 = vmatprep.subr.bf16.mxu1 %v5320_v52  ;;  %v2312_v15 = vadd.f32 %v2290_v1, %v2268_v49  ;;  %v2444_v62 = vmul.f32 %v4803_v47, %v6688_v21  ;;  %v2445_v14 = vmul.f32 %v4804_v2, %v6688_v21  ;;  %v2510_v43 = vmul.f32 %v4869_v34, %v6691_v16  ;;  %v9423_v49 = vpop.f32.mrb[0].mxu1 }
 0x278   :  { %v2313_v13 = vadd.f32 %v2291_v5, %v2269_v7  ;;  %v2511_v27 = vmul.f32 %v4870_v63, %v6691_v16  ;;  %v2576_v36 = vmul.f32 %v4891_v48, %v6701_v40  ;;  %v2577_v20 = vmul.f32 %v4892_v29, %v6701_v40 }
 0x279   :  { %v2378_v54 = vadd.f32 %v2356_v28, %v2312_v15  ;;  %v2466_v10 = vadd.f32 %v2444_v62, %v2422_v38  ;;  %v2467_v61 = vadd.f32 %v2445_v14, %v2423_v19  ;;  %v2642_v22 = vmul.f32 %v4803_v47, %v6671_v23  ;;  %v9427_v38 = vpop.f32.mrb[1].mxu1 }
 0x27a   :  { %v2379_v9 = vadd.f32 %v2357_v35, %v2313_v13  ;;  %v2643_v39 = vmul.f32 %v4804_v2, %v6671_v23  ;;  %v2664_v57 = vmul.f32 %v4847_v25, %v6688_v21  ;;  %v2665_v46 = vmul.f32 %v4848_v11, %v6688_v21 }
 0x27b   :  { %v2400_v1 = vmax.f32 %v2180_v3, %v2378_v54  ;;  %v2532_v5 = vadd.f32 %v2510_v43, %v2466_v10  ;;  %v2533_v28 = vadd.f32 %v2511_v27, %v2467_v61  ;;  %v2708_v47 = vmul.f32 %v4891_v48, %v6691_v16 }
 0x27c   :  { %v2401_v34 = vmax.f32 %v2181_v17, %v2379_v9  ;;  %v2686_v52 = vadd.f32 %v2664_v57, %v2642_v22  ;;  %v2687_v2 = vadd.f32 %v2665_v46, %v2643_v39  ;;  %v2709_v25 = vmul.f32 %v4892_v29, %v6691_v16 }
 0x27d   :  { %v2598_v11 = vadd.f32 %v2576_v36, %v2532_v5  ;;  %v2599_v63 = vadd.f32 %v2577_v20, %v2533_v28  ;;  %v2774_v7 = vmul.f32 %v4913_v0, %v6701_v40  ;;  %v2775_v35 = vmul.f32 %v4914_v51, %v6701_v40 }
 0x27e   :  { %v2730_v3 = vadd.f32 %v2708_v47, %v2686_v52  ;;  %v2731_v19 = vadd.f32 %v2709_v25, %v2687_v2  ;;  %v2902_v48 = vmul.f32 %v6962_v50, %v9179_v6  ;;  %v2903_v17 = vmul.f32 %v6962_v50, %v9188_v18 }
 0x27f   :  { %v2620_v15 = vmax.f32 %v2400_v1, %v2598_v11  ;;  %v2621_v29 = vmax.f32 %v2401_v34, %v2599_v63  ;;  %v2948_v62 = vmul.f32 %v9193_v24, %v6965_v31  ;;  %v2949_v14 = vmul.f32 %v9198_v60, %v6965_v31 }
 0x280   :  { %v2796_v43 = vadd.f32 %v2774_v7, %v2730_v3  ;;  %v2797_v13 = vadd.f32 %v2775_v35, %v2731_v19  ;;  %v3016_v27 = vmul.f32 %v9203_v53, %v6981_v41  ;;  %v3017_v36 = vmul.f32 %v9214_v56, %v6981_v41 }
 0x281   :  { %v2970_v6 = vadd.f32 %v2948_v62, %v2902_v48  ;;  %v2971_v20 = vadd.f32 %v2949_v14, %v2903_v17  ;;  %v3084_v18 = vmul.f32 %v9221_v8, %v6987_v44  ;;  %v3085_v54 = vmul.f32 %v9232_v45, %v6987_v44  ;;  %v9488_v14 = vld [vmem:[%s10055_s1 + $0x90] sm:$0xff] }
 0x282   :  { %v2818_v10 = vmax.f32 %v2620_v15, %v2796_v43  ;;  %v2819_v61 = vmax.f32 %v2621_v29, %v2797_v13  ;;  %v3128_v22 = vmul.f32 %v9193_v24, %v6962_v50  ;;  %v3129_v9 = vmul.f32 %v9198_v60, %v6962_v50 }
 0x283   :  { %v3038_v39 = vadd.f32 %v3016_v27, %v2970_v6  ;;  %v3039_v57 = vadd.f32 %v3017_v36, %v2971_v20  ;;  %v3172_v46 = vmul.f32 %v9237_v59, %v6965_v31  ;;  %v3173_v0 = vmul.f32 %v9242_v4, %v6965_v31  ;;  %v9502_v20 = vld [vmem:[%s10055_s1 + $0x140] sm:$0xff] }
 0x284   :  { %v5322_v51 = vpack.c.bf16 %v2819_v61, %v2818_v10  ;;  %v3216_v1 = vmul.f32 %v9221_v8, %v6981_v41  ;;  %v3217_v5 = vmul.f32 %v9232_v45, %v6981_v41  ;;  %v3282_v24 = vmul.f32 %v9255_v33, %v6987_v44 }
 0x285   :  { %v3106_v28 = vadd.f32 %v3084_v18, %v3038_v39  ;;  %v3107_v60 = vadd.f32 %v3085_v54, %v3039_v57  ;;  %v3194_v47 = vadd.f32 %v3172_v46, %v3128_v22  ;;  %v3195_v34 = vadd.f32 %v3173_v0, %v3129_v9  ;;  %v9512_v18 = vld [vmem:[%s10055_s1 + $0x2a0] sm:$0xff]  ;;  %v9523_v22 = vld [vmem:[%s10055_s1 + $0x2a8] sm:$0xff] }
 0x286   :  { %5323 = vmatpush3.bf16.msra.mxu1 %v5322_v51  ;;  %v3283_v59 = vmul.f32 %v9266_v58, %v6987_v44  ;;  %v3348_v4 = vmul.f32 %v9203_v53, %v6962_v50  ;;  %v3349_v52 = vmul.f32 %v9214_v56, %v6962_v50  ;;  %v3370_v2 = vmul.f32 %v9221_v8, %v6965_v31 }
 0x287   :  { %v3238_v25 = vadd.f32 %v3216_v1, %v3194_v47  ;;  %v3239_v11 = vadd.f32 %v3217_v5, %v3195_v34  ;;  %v3371_v63 = vmul.f32 %v9232_v45, %v6965_v31  ;;  %v3436_v7 = vmul.f32 %v9277_v12, %v6981_v41  ;;  %v9536_v1 = vld [vmem:[%s10055_s1 + $0x350] sm:$0xff]  ;;  %v9548_v47 = vld [vmem:[%s10055_s1 + $0x358] sm:$0xff] }
 0x288   :  { %v3392_v35 = vadd.f32 %v3370_v2, %v3348_v4  ;;  %v3437_v3 = vmul.f32 %v9282_v26, %v6981_v41  ;;  %v3502_v53 = vmul.f32 %v9287_v55, %v6987_v44  ;;  %v3503_v56 = vmul.f32 %v9296_v37, %v6987_v44  ;;  %v9541_v5 = vld [vmem:[%s10055_s1 + $0x1f0] sm:$0xff] }
 0x289   :  { %v3304_v19 = vadd.f32 %v3282_v24, %v3238_v25  ;;  %v3305_v48 = vadd.f32 %v3283_v59, %v3239_v11  ;;  %v3393_v17 = vadd.f32 %v3371_v63, %v3349_v52  ;;  %v3568_v15 = vmul.f32 %v9221_v8, %v6962_v50  ;;  %v9555_v59 = vld [vmem:[%s10055_s1 + $0x1f8] sm:$0xff]  ;;  %v9564_v11 = vld [vmem:[%s10055_s1 + $0x400] sm:$0xff] }
 0x28a   :  { %v3458_v29 = vadd.f32 %v3436_v7, %v3392_v35  ;;  %v3569_v12 = vmul.f32 %v9232_v45, %v6962_v50  ;;  %v3590_v62 = vmul.f32 %v9255_v33, %v6965_v31  ;;  %v3591_v26 = vmul.f32 %v9266_v58, %v6965_v31  ;;  %v9495_v45 = vld [vmem:[%s10055_s1 + $0x98] sm:$0xff] }
 0x28b   :  { %v3326_v43 = vmax.f32 %v3106_v28, %v3304_v19  ;;  %v3327_v13 = vmax.f32 %v3107_v60, %v3305_v48  ;;  %v3459_v27 = vadd.f32 %v3437_v3, %v3393_v17  ;;  %v3634_v8 = vmul.f32 %v9287_v55, %v6981_v41  ;;  %v9507_v55 = vld [vmem:[%s10055_s1 + $0x148] sm:$0xff] }
 0x28c   :  { %v3524_v33 = vadd.f32 %v3502_v53, %v3458_v29  ;;  %v3612_v36 = vadd.f32 %v3590_v62, %v3568_v15  ;;  %v3613_v6 = vadd.f32 %v3591_v26, %v3569_v12  ;;  %v3635_v58 = vmul.f32 %v9296_v37, %v6981_v41  ;;  %v9573_v53 = vld [vmem:[%s10055_s1 + $0x408] sm:$0xff]  ;;  %v9586_v26 = vld [vmem:[%s10055_s1 + $0x4b0] sm:$0xff] }
 0x28d   :  { %v3525_v54 = vadd.f32 %v3503_v56, %v3459_v27  ;;  %v3700_v10 = vmul.f32 %v9322_v32, %v6987_v44  ;;  %v3701_v37 = vmul.f32 %v9327_v42, %v6987_v44  ;;  %v1994_v61 = vmul.f32 %v6671_v23, %v9488_v14 }
 0x28e   :  { %v3546_v9 = vmax.f32 %v3326_v43, %v3524_v33  ;;  %v3656_v39 = vadd.f32 %v3634_v8, %v3612_v36  ;;  %v3657_v57 = vadd.f32 %v3635_v58, %v3613_v6  ;;  %v1995_v46 = vmul.f32 %v6671_v23, %v9495_v45  ;;  %v9591_v43 = vld [vmem:[%s10055_s1 + $0x4b8] sm:$0xff]  ;;  %v9598_v36 = vld [vmem:[%s10055_s1 + $0x560] sm:$0xff]  ;;  %v9603_v6 = vld [vmem:[%s10055_s1 + $0x568] sm:$0xff] }
 0x28f   :  { %v3547_v0 = vmax.f32 %v3327_v13, %v3525_v54  ;;  %v2040_v32 = vmul.f32 %v9502_v20, %v6688_v21  ;;  %v2041_v42 = vmul.f32 %v9507_v55, %v6688_v21  ;;  %v2108_v51 = vmul.f32 %v9512_v18, %v6691_v16 }
 0x290   :  { %v3722_v24 = vadd.f32 %v3700_v10, %v3656_v39  ;;  %v3723_v28 = vadd.f32 %v3701_v37, %v3657_v57  ;;  %v2109_v60 = vmul.f32 %v9523_v22, %v6691_v16  ;;  %v2176_v34 = vmul.f32 %v9536_v1, %v6701_v40 }
 0x291   :  { %v2062_v4 = vadd.f32 %v2040_v32, %v1994_v61  ;;  %v2063_v52 = vadd.f32 %v2041_v42, %v1995_v46  ;;  %v2177_v2 = vmul.f32 %v9548_v47, %v6701_v40  ;;  %v2220_v25 = vmul.f32 %v9502_v20, %v6671_v23 }
 0x292   :  { %v3744_v63 = vmax.f32 %v3546_v9, %v3722_v24  ;;  %v3745_v7 = vmax.f32 %v3547_v0, %v3723_v28  ;;  %v2221_v35 = vmul.f32 %v9507_v55, %v6671_v23  ;;  %v2264_v3 = vmul.f32 %v9541_v5, %v6688_v21 }
 0x293   :  { %v2130_v56 = vadd.f32 %v2108_v51, %v2062_v4  ;;  %v2131_v19 = vadd.f32 %v2109_v60, %v2063_v52  ;;  %v2265_v48 = vmul.f32 %v9555_v59, %v6688_v21  ;;  %v2308_v17 = vmul.f32 %v9536_v1, %v6691_v16 }
 0x294   :  { %v5356_v15 = vpack.c.bf16 %v3745_v7, %v3744_v63  ;;  %v2286_v29 = vadd.f32 %v2264_v3, %v2220_v25  ;;  %v2309_v12 = vmul.f32 %v9548_v47, %v6691_v16  ;;  %v2374_v62 = vmul.f32 %v9564_v11, %v6701_v40  ;;  %v9638_v63 = vld [vmem:[%s10055_s1 + $0x618] sm:$0xff]  ;;  %v1955_v7 = vld [vmem:[%s10055_s1 + $0x10] sm:$0xff] }
 0x295   :  { %v2198_v13 = vadd.f32 %v2176_v34, %v2130_v56  ;;  %v2199_v27 = vadd.f32 %v2177_v2, %v2131_v19  ;;  %v2287_v8 = vadd.f32 %v2265_v48, %v2221_v35  ;;  %v2375_v33 = vmul.f32 %v9573_v53, %v6701_v40  ;;  %v9629_v34 = vld [vmem:[%s10055_s1 + $0x610] sm:$0xff]  ;;  %v1956_v35 = vld [vmem:[%s10055_s1 + $0x18] sm:$0xff] }
 0x296   :  { %5357 = vmatpush1.bf16.msra.mxu0 %v5356_v15  ;;  %v2330_v58 = vadd.f32 %v2308_v17, %v2286_v29  ;;  %v2440_v54 = vmul.f32 %v9512_v18, %v6671_v23  ;;  %v2441_v10 = vmul.f32 %v9523_v22, %v6671_v23  ;;  %v2462_v37 = vmul.f32 %v9536_v1, %v6688_v21  ;;  %v4759_v17 = vld [vmem:[%s10055_s1 + $0xc0] sm:$0xff] }
 0x297   :  { %v2331_v61 = vadd.f32 %v2309_v12, %v2287_v8  ;;  %v2463_v9 = vmul.f32 %v9548_v47, %v6688_v21  ;;  %v2528_v39 = vmul.f32 %v9586_v26, %v6691_v16  ;;  %v2529_v57 = vmul.f32 %v9591_v43, %v6691_v16  ;;  %5358 = vmatprep.subr.bf16.mxu0 %v5403_v30  ;;  %v4783_v8 = vld [vmem:[%s10055_s1 + $0x228] sm:$0xff] }
 0x298   :  { %v2396_v46 = vadd.f32 %v2374_v62, %v2330_v58  ;;  %v2484_v0 = vadd.f32 %v2462_v37, %v2440_v54  ;;  %v2594_v32 = vmul.f32 %v9598_v36, %v6701_v40  ;;  %v2595_v42 = vmul.f32 %v9603_v6, %v6701_v40 }
 0x299   :  { %v2397_v51 = vadd.f32 %v2375_v33, %v2331_v61  ;;  %v2485_v24 = vadd.f32 %v2463_v9, %v2441_v10  ;;  %v2660_v28 = vmul.f32 %v9536_v1, %v6671_v23  ;;  %v2661_v60 = vmul.f32 %v9548_v47, %v6671_v23 }
 0x29a   :  { %v2418_v4 = vmax.f32 %v2198_v13, %v2396_v46  ;;  %v2550_v52 = vadd.f32 %v2528_v39, %v2484_v0  ;;  %v2682_v2 = vmul.f32 %v9564_v11, %v6688_v21  ;;  %v2683_v25 = vmul.f32 %v9573_v53, %v6688_v21  ;;  %v4760_v13 = vld [vmem:[%s10055_s1 + $0xc8] sm:$0xff] }
 0x29b   :  { %v2419_v3 = vmax.f32 %v2199_v27, %v2397_v51  ;;  %v2551_v56 = vadd.f32 %v2529_v57, %v2485_v24  ;;  %v2726_v19 = vmul.f32 %v9598_v36, %v6691_v16  ;;  %v2727_v48 = vmul.f32 %v9603_v6, %v6691_v16  ;;  %v4782_v27 = vld [vmem:[%s10055_s1 + $0x220] sm:$0xff]  ;;  %v4827_v51 = vld [vmem:[%s10055_s1 + $0x170] sm:$0xff] }
 0x29c   :  { %v2616_v15 = vadd.f32 %v2594_v32, %v2550_v52  ;;  %v2704_v29 = vadd.f32 %v2682_v2, %v2660_v28  ;;  %v2705_v12 = vadd.f32 %v2683_v25, %v2661_v60  ;;  %v2792_v62 = vmul.f32 %v9629_v34, %v6701_v40  ;;  %v4828_v2 = vld [vmem:[%s10055_s1 + $0x178] sm:$0xff] }
 0x29d   :  { %v2617_v33 = vadd.f32 %v2595_v42, %v2551_v56  ;;  %v2793_v58 = vmul.f32 %v9638_v63, %v6701_v40  ;;  %v1978_v54 = vmul.f32 %v6671_v23, %v1955_v7  ;;  %v1979_v10 = vmul.f32 %v6671_v23, %v1956_v35  ;;  %v4805_v42 = vld [vmem:[%s10055_s1 + $0x2d0] sm:$0xff]  ;;  %v4849_v56 = vld [vmem:[%s10055_s1 + $0x380] sm:$0xff] }
 0x29e   :  { %v2638_v37 = vmax.f32 %v2418_v4, %v2616_v15  ;;  %v2748_v61 = vadd.f32 %v2726_v19, %v2704_v29  ;;  %v2749_v9 = vadd.f32 %v2727_v48, %v2705_v12  ;;  %v2024_v39 = vmul.f32 %v4759_v17, %v6688_v21  ;;  %v4806_v4 = vld [vmem:[%s10055_s1 + $0x2d8] sm:$0xff]  ;;  %v4850_v12 = vld [vmem:[%s10055_s1 + $0x388] sm:$0xff] }
 0x29f   :  { %v2639_v57 = vmax.f32 %v2419_v3, %v2617_v33  ;;  %v2025_v46 = vmul.f32 %v4760_v13, %v6688_v21  ;;  %v2092_v0 = vmul.f32 %v4782_v27, %v6691_v16  ;;  %v2093_v32 = vmul.f32 %v4783_v8, %v6691_v16 }
 0x2a0   :  { %v2814_v24 = vadd.f32 %v2792_v62, %v2748_v61  ;;  %v2815_v28 = vadd.f32 %v2793_v58, %v2749_v9  ;;  %v2046_v60 = vadd.f32 %v2024_v39, %v1978_v54  ;;  %v2160_v52 = vmul.f32 %v4805_v42, %v6701_v40  ;;  %v4871_v61 = vld [vmem:[%s10055_s1 + $0x430] sm:$0xff]  ;;  %v4872_v9 = vld [vmem:[%s10055_s1 + $0x438] sm:$0xff]  ;;  %v4893_v39 = vld [vmem:[%s10055_s1 + $0x4e0] sm:$0xff] }
 0x2a1   :  { %v2047_v25 = vadd.f32 %v2025_v46, %v1979_v10  ;;  %v2161_v7 = vmul.f32 %v4806_v4, %v6701_v40  ;;  %v2204_v35 = vmul.f32 %v4759_v17, %v6671_v23  ;;  %v2205_v3 = vmul.f32 %v4760_v13, %v6671_v23 }
 0x2a2   :  { %v2836_v19 = vmax.f32 %v2638_v37, %v2814_v24  ;;  %v2837_v48 = vmax.f32 %v2639_v57, %v2815_v28  ;;  %v2114_v15 = vadd.f32 %v2092_v0, %v2046_v60  ;;  %v2248_v29 = vmul.f32 %v4827_v51, %v6688_v21  ;;  %v4894_v51 = vld [vmem:[%s10055_s1 + $0x4e8] sm:$0xff] }
 0x2a3   :  { %v2115_v62 = vadd.f32 %v2093_v32, %v2047_v25  ;;  %v2249_v33 = vmul.f32 %v4828_v2, %v6688_v21  ;;  %v2292_v17 = vmul.f32 %v4805_v42, %v6691_v16  ;;  %v2293_v13 = vmul.f32 %v4806_v4, %v6691_v16 }
 0x2a4   :  { %v5324_v58 = vpack.c.bf16 %v2837_v48, %v2836_v19  ;;  %v2182_v54 = vadd.f32 %v2160_v52, %v2114_v15  ;;  %v2270_v10 = vadd.f32 %v2248_v29, %v2204_v35  ;;  %v2358_v37 = vmul.f32 %v4849_v56, %v6701_v40 }
 0x2a5   :  { %v2183_v57 = vadd.f32 %v2161_v7, %v2115_v62  ;;  %v2271_v46 = vadd.f32 %v2249_v33, %v2205_v3  ;;  %v2359_v0 = vmul.f32 %v4850_v12, %v6701_v40  ;;  %v2424_v32 = vmul.f32 %v4782_v27, %v6671_v23  ;;  %v4915_v33 = vld [vmem:[%s10055_s1 + $0x590] sm:$0xff] }
 0x2a6   :  { %5325 = vmatprep.subr.bf16.mxu1 %v5324_v58  ;;  %v2314_v24 = vadd.f32 %v2292_v17, %v2270_v10  ;;  %v2425_v28 = vmul.f32 %v4783_v8, %v6671_v23  ;;  %v2446_v60 = vmul.f32 %v4805_v42, %v6688_v21  ;;  %v2447_v52 = vmul.f32 %v4806_v4, %v6688_v21 }
 0x2a7   :  { %v2315_v2 = vadd.f32 %v2293_v13, %v2271_v46  ;;  %v2512_v25 = vmul.f32 %v4871_v61, %v6691_v16  ;;  %v2513_v7 = vmul.f32 %v4872_v9, %v6691_v16  ;;  %v2578_v35 = vmul.f32 %v4893_v39, %v6701_v40 }
 0x2a8   :  { %v2380_v27 = vadd.f32 %v2358_v37, %v2314_v24  ;;  %v2468_v3 = vadd.f32 %v2446_v60, %v2424_v32  ;;  %v2469_v19 = vadd.f32 %v2447_v52, %v2425_v28  ;;  %v2579_v48 = vmul.f32 %v4894_v51, %v6701_v40  ;;  %v4916_v37 = vld [vmem:[%s10055_s1 + $0x598] sm:$0xff] }
 0x2a9   :  { %v2381_v15 = vadd.f32 %v2359_v0, %v2315_v2  ;;  %v2644_v29 = vmul.f32 %v4805_v42, %v6671_v23  ;;  %v2645_v8 = vmul.f32 %v4806_v4, %v6671_v23  ;;  %v2666_v62 = vmul.f32 %v4849_v56, %v6688_v21 }
 0x2aa   :  { %v2402_v17 = vmax.f32 %v2182_v54, %v2380_v27  ;;  %v2534_v13 = vadd.f32 %v2512_v25, %v2468_v3  ;;  %v2535_v58 = vadd.f32 %v2513_v7, %v2469_v19  ;;  %v2667_v10 = vmul.f32 %v4850_v12, %v6688_v21 }
 0x2ab   :  { %v2403_v61 = vmax.f32 %v2183_v57, %v2381_v15  ;;  %v2688_v9 = vadd.f32 %v2666_v62, %v2644_v29  ;;  %v2710_v42 = vmul.f32 %v4893_v39, %v6691_v16  ;;  %v2711_v23 = vmul.f32 %v4894_v51, %v6691_v16 }
 0x2ac   :  { %v2600_v4 = vadd.f32 %v2578_v35, %v2534_v13  ;;  %v2601_v56 = vadd.f32 %v2579_v48, %v2535_v58  ;;  %v2689_v46 = vadd.f32 %v2667_v10, %v2645_v8  ;;  %v2776_v0 = vmul.f32 %v4915_v33, %v6701_v40 }
 0x2ad   :  { %v2732_v54 = vadd.f32 %v2710_v42, %v2688_v9  ;;  %v2777_v32 = vmul.f32 %v4916_v37, %v6701_v40  ;;  %v2904_v21 = vmul.f32 %v6962_v50, %v9488_v14  ;;  %v2905_v12 = vmul.f32 %v6962_v50, %v9495_v45 }
 0x2ae   :  { %v2622_v57 = vmax.f32 %v2402_v17, %v2600_v4  ;;  %v2623_v24 = vmax.f32 %v2403_v61, %v2601_v56  ;;  %v2733_v28 = vadd.f32 %v2711_v23, %v2689_v46  ;;  %v2950_v16 = vmul.f32 %v9502_v20, %v6965_v31  ;;  %v3774_v23 = vld [vmem:[%s10056_s2 + $0x10] sm:$0xff]  ;;  %v3781_v46 = vld [vmem:[%s10056_s2 + $0x48] sm:$0xff] }
 0x2af   :  { %v2798_v39 = vadd.f32 %v2776_v0, %v2732_v54  ;;  %v2951_v51 = vmul.f32 %v9507_v55, %v6965_v31  ;;  %v3018_v60 = vmul.f32 %v9512_v18, %v6981_v41  ;;  %v3019_v40 = vmul.f32 %v9523_v22, %v6981_v41 }
 0x2b0   :  { %v2799_v14 = vadd.f32 %v2777_v32, %v2733_v28  ;;  %v2972_v52 = vadd.f32 %v2950_v16, %v2904_v21  ;;  %v3086_v45 = vmul.f32 %v9536_v1, %v6987_v44  ;;  %v3087_v2 = vmul.f32 %v9548_v47, %v6987_v44 }
 0x2b1   :  { %v2820_v25 = vmax.f32 %v2622_v57, %v2798_v39  ;;  %v2973_v7 = vadd.f32 %v2951_v51, %v2905_v12  ;;  %v3130_v35 = vmul.f32 %v9502_v20, %v6962_v50  ;;  %v3131_v27 = vmul.f32 %v9507_v55, %v6962_v50  ;;  %v2883_v51 = vld [vmem:[%s10055_s1 + $0xa0] sm:$0xff] }
 0x2b2   :  { %v2821_v3 = vmax.f32 %v2623_v24, %v2799_v14  ;;  %v3040_v19 = vadd.f32 %v3018_v60, %v2972_v52  ;;  %v3174_v48 = vmul.f32 %v9541_v5, %v6965_v31  ;;  %v3175_v15 = vmul.f32 %v9555_v59, %v6965_v31  ;;  %v4957_v14 = vld [vmem:[%s10055_s1 + $0x150] sm:$0xff]  ;;  %v4958_v52 = vld [vmem:[%s10055_s1 + $0x158] sm:$0x1] }
 0x2b3   :  { %v3041_v29 = vadd.f32 %v3019_v40, %v2973_v7  ;;  %v3218_v8 = vmul.f32 %v9536_v1, %v6981_v41  ;;  %v3219_v62 = vmul.f32 %v9548_v47, %v6981_v41  ;;  %v3284_v20 = vmul.f32 %v9564_v11, %v6987_v44  ;;  %v4980_v7 = vld [vmem:[%s10055_s1 + $0x2b0] sm:$0xff] }
 0x2b4   :  { %v5326_v33 = vpack.c.bf16 %v2821_v3, %v2820_v25  ;;  %v3108_v55 = vadd.f32 %v3086_v45, %v3040_v19  ;;  %v3196_v17 = vadd.f32 %v3174_v48, %v3130_v35  ;;  %v3197_v13 = vadd.f32 %v3175_v15, %v3131_v27  ;;  %v3787_v45 = vld [vmem:[%s10056_s2 + $0x78] sm:$0xff] }
 0x2b5   :  { %v3109_v58 = vadd.f32 %v3087_v2, %v3041_v29  ;;  %v3285_v5 = vmul.f32 %v9573_v53, %v6987_v44  ;;  %v3350_v59 = vmul.f32 %v9512_v18, %v6962_v50  ;;  %v3351_v10 = vmul.f32 %v9523_v22, %v6962_v50  ;;  %v4981_v35 = vld [vmem:[%s10055_s1 + $0x2b8] sm:$0x1] }
 0x2b6   :  { %5327 = vmatpush3.bf16.msra.mxu1 %v5326_v33  ;;  %v3240_v37 = vadd.f32 %v3218_v8, %v3196_v17  ;;  %v3241_v61 = vadd.f32 %v3219_v62, %v3197_v13  ;;  %v3372_v9 = vmul.f32 %v9536_v1, %v6965_v31  ;;  %v3373_v42 = vmul.f32 %v9548_v47, %v6965_v31  ;;  %v9835_v8 = vld [vmem:[%s10055_s1 + $0x368] sm:$0x1] }
 0x2b7   :  { %v3438_v4 = vmul.f32 %v9586_v26, %v6981_v41  ;;  %v3439_v18 = vmul.f32 %v9591_v43, %v6981_v41  ;;  %v3504_v22 = vmul.f32 %v9598_v36, %v6987_v44  ;;  %v3505_v56 = vmul.f32 %v9603_v6, %v6987_v44  ;;  %v5026_v62 = vld [vmem:[%s10055_s1 + $0x208] sm:$0x1] }
 0x2b8   :  { %v3306_v0 = vadd.f32 %v3284_v20, %v3240_v37  ;;  %v3307_v54 = vadd.f32 %v3285_v5, %v3241_v61  ;;  %v3394_v32 = vadd.f32 %v3372_v9, %v3350_v59  ;;  %v3395_v21 = vadd.f32 %v3373_v42, %v3351_v10  ;;  %v3786_v20 = vld [vmem:[%s10056_s2 + $0x70] sm:$0xff]  ;;  %v5025_v5 = vld [vmem:[%s10055_s1 + $0x200] sm:$0xff]  ;;  %v3793_v59 = vld [vmem:[%s10056_s2 + $0xa8] sm:$0xff] }
 0x2b9   :  { %v3570_v26 = vmul.f32 %v9536_v1, %v6962_v50  ;;  %v3571_v43 = vmul.f32 %v9548_v47, %v6962_v50  ;;  %v3592_v12 = vmul.f32 %v9564_v11, %v6965_v31  ;;  %v3593_v57 = vmul.f32 %v9573_v53, %v6965_v31  ;;  %4151 = vmatmul.mubr.f32.vlgmr.msra.gmra.mrb[16].mxu1 %v3774_v23  ;;  %v2884_v1 = vld [vmem:[%s10055_s1 + $0xa8] sm:$0x1]  ;;  %v3780_v47 = vld [vmem:[%s10056_s2 + $0x40] sm:$0xff]  ;;  %v5047_v42 = vld [vmem:[%s10055_s1 + $0x410] sm:$0xff] }
 0x2ba   :  { %v3328_v24 = vmax.f32 %v3108_v55, %v3306_v0  ;;  %v3329_v28 = vmax.f32 %v3109_v58, %v3307_v54  ;;  %v3460_v16 = vadd.f32 %v3438_v4, %v3394_v32  ;;  %v3461_v39 = vadd.f32 %v3439_v18, %v3395_v21  ;;  %4155 = vmatprep.mubr.f32.mxu1 %v3781_v46  ;;  %v5003_v58 = vld [vmem:[%s10055_s1 + $0x360] sm:$0xff]  ;;  %v5048_v32 = vld [vmem:[%s10055_s1 + $0x418] sm:$0x1] }
 0x2bb   :  { %v3614_v11 = vadd.f32 %v3592_v12, %v3570_v26  ;;  %v3615_v53 = vadd.f32 %v3593_v57, %v3571_v43  ;;  %v3636_v60 = vmul.f32 %v9598_v36, %v6981_v41  ;;  %v3637_v40 = vmul.f32 %v9603_v6, %v6981_v41  ;;  %v5069_v57 = vld [vmem:[%s10055_s1 + $0x4c0] sm:$0xff] }
 0x2bc   :  { %v3526_v2 = vadd.f32 %v3504_v22, %v3460_v16  ;;  %v3527_v25 = vadd.f32 %v3505_v56, %v3461_v39  ;;  %v3702_v36 = vmul.f32 %v9629_v34, %v6987_v44  ;;  %v3703_v6 = vmul.f32 %v9638_v63, %v6987_v44 }
 0x2bd   :  { %v3658_v27 = vadd.f32 %v3636_v60, %v3614_v11  ;;  %v3659_v3 = vadd.f32 %v3637_v40, %v3615_v53  ;;  %v2906_v19 = vmul.f32 %v6962_v50, %v2883_v51  ;;  %v2907_v48 = vmul.f32 %v6962_v50, %v2884_v1  ;;  %4156 = vmatmul.mubr.f32.gmra.mrb[18].mxu1 %v3780_v47  ;;  %v5091_v1 = vld [vmem:[%s10055_s1 + $0x570] sm:$0xff]  ;;  %v5092_v47 = vld [vmem:[%s10055_s1 + $0x578] sm:$0x1]  ;;  %v3792_v11 = vld [vmem:[%s10056_s2 + $0xa0] sm:$0xff] }
 0x2be   :  { %v3548_v15 = vmax.f32 %v3328_v24, %v3526_v2  ;;  %v3549_v34 = vmax.f32 %v3329_v28, %v3527_v25  ;;  %v2952_v29 = vmul.f32 %v4957_v14, %v6965_v31  ;;  %v2953_v63 = vmul.f32 %v4958_v52, %v6965_v31  ;;  %4160 = vmatprep.mubr.f32.mxu1 %v3787_v45  ;;  %v5070_v24 = vld [vmem:[%s10055_s1 + $0x4c8] sm:$0x1] }
 0x2bf   :  { %v3724_v33 = vadd.f32 %v3702_v36, %v3658_v27  ;;  %v3725_v55 = vadd.f32 %v3703_v6, %v3659_v3  ;;  %v3020_v17 = vmul.f32 %v4980_v7, %v6981_v41  ;;  %v3021_v13 = vmul.f32 %v4981_v35, %v6981_v41 }
 0x2c0   :  { %v2974_v10 = vadd.f32 %v2952_v29, %v2906_v19  ;;  %v2975_v37 = vadd.f32 %v2953_v63, %v2907_v48  ;;  %v3088_v61 = vmul.f32 %v5003_v58, %v6987_v44  ;;  %v3089_v9 = vmul.f32 %v9835_v8, %v6987_v44 }
 0x2c1   :  { %v3746_v23 = vmax.f32 %v3548_v15, %v3724_v33  ;;  %v3747_v4 = vmax.f32 %v3549_v34, %v3725_v55  ;;  %v3132_v18 = vmul.f32 %v4957_v14, %v6962_v50  ;;  %v3133_v22 = vmul.f32 %v4958_v52, %v6962_v50  ;;  %4161 = vmatmul.mubr.f32.gmra.mrb[20].mxu1 %v3786_v20  ;;  %v3799_v52 = vld [vmem:[%s10056_s2 + $0xd8] sm:$0xff]  ;;  %v3798_v34 = vld [vmem:[%s10056_s2 + $0xd0] sm:$0xff]  ;;  %v5113_v33 = vld [vmem:[%s10055_s1 + $0x620] sm:$0xff] }
 0x2c2   :  { %v3042_v56 = vadd.f32 %v3020_v17, %v2974_v10  ;;  %v3043_v46 = vadd.f32 %v3021_v13, %v2975_v37  ;;  %v3176_v0 = vmul.f32 %v5025_v5, %v6965_v31  ;;  %v3177_v54 = vmul.f32 %v5026_v62, %v6965_v31  ;;  %4165 = vmatprep.mubr.f32.mxu1 %v3793_v59  ;;  %v5114_v55 = vld [vmem:[%s10055_s1 + $0x628] sm:$0x1] }
 0x2c3   :  { %v5359_v21 = vpack.c.bf16 %v3747_v4, %v3746_v23  ;;  %v3220_v26 = vmul.f32 %v5003_v58, %v6981_v41  ;;  %v3221_v43 = vmul.f32 %v9835_v8, %v6981_v41  ;;  %v3286_v12 = vmul.f32 %v5047_v42, %v6987_v44  ;;  %v3805_v17 = vld [vmem:[%s10056_s2 + $0x108] sm:$0xff]  ;;  %v3804_v23 = vld [vmem:[%s10056_s2 + $0x100] sm:$0xff] }
 0x2c4   :  { %v3110_v28 = vadd.f32 %v3088_v61, %v3042_v56  ;;  %v3111_v16 = vadd.f32 %v3089_v9, %v3043_v46  ;;  %v3198_v39 = vadd.f32 %v3176_v0, %v3132_v18  ;;  %v3199_v51 = vadd.f32 %v3177_v54, %v3133_v22  ;;  %v3908_v4 = vld [vmem:[%s10057_s3] sm:$0xff] }
 0x2c5   :  { %5360 = vmatpush1.bf16.msra.mxu0 %v5359_v21  ;;  %v3287_v53 = vmul.f32 %v5048_v32, %v6987_v44  ;;  %v3352_v60 = vmul.f32 %v4980_v7, %v6962_v50  ;;  %v3353_v40 = vmul.f32 %v4981_v35, %v6962_v50  ;;  %v3374_v14 = vmul.f32 %v5003_v58, %v6965_v31 }
 0x2c6   :  { %5361 = vmatprep.subr.bf16.mxu0 %v5403_v30  ;;  %v3242_v45 = vadd.f32 %v3220_v26, %v3198_v39  ;;  %v3243_v2 = vadd.f32 %v3221_v43, %v3199_v51  ;;  %v3375_v25 = vmul.f32 %v9835_v8, %v6965_v31  ;;  %v3440_v36 = vmul.f32 %v5069_v57, %v6981_v41  ;;  %v5159_v26 = vpop.f32.mrb[2].mxu1  ;;  %v3810_v43 = vld [vmem:[%s10056_s2 + $0x130] sm:$0xff]  ;;  %v3816_v51 = vld [vmem:[%s10056_s2 + $0x160] sm:$0xff] }
 0x2c7   :  { %v3396_v6 = vadd.f32 %v3374_v14, %v3352_v60  ;;  %v3441_v7 = vmul.f32 %v5070_v24, %v6981_v41  ;;  %v3506_v35 = vmul.f32 %v5091_v1, %v6987_v44  ;;  %v3507_v27 = vmul.f32 %v5092_v47, %v6987_v44  ;;  %4166 = vmatmul.mubr.f32.gmra.mrb[22].mxu1 %v3792_v11  ;;  %v5160_v57 = vpop.f32.mrb[3].mxu1  ;;  %v3913_v11 = vld [vmem:[%s10057_s3 + $0x28] sm:$0xff] }
 0x2c8   :  { %v3308_v3 = vadd.f32 %v3286_v12, %v3242_v45  ;;  %v3309_v19 = vadd.f32 %v3287_v53, %v3243_v2  ;;  %v3397_v48 = vadd.f32 %v3375_v25, %v3353_v40  ;;  %v3572_v15 = vmul.f32 %v5003_v58, %v6962_v50  ;;  %4170 = vmatprep.mubr.f32.mxu1 %v3799_v52  ;;  %v3909_v12 = vld [vmem:[%s10057_s3 + $0x8] sm:$0xff]  ;;  %v5162_v39 = vpop.f32.mrb[4].mxu1  ;;  %v3914_v45 = vld [vmem:[%s10057_s3 + $0x30] sm:$0xff]  ;;  %v3915_v25 = vld [vmem:[%s10057_s3 + $0x38] sm:$0xff] }
 0x2c9   :  { %v3462_v29 = vadd.f32 %v3440_v36, %v3396_v6  ;;  %v3573_v63 = vmul.f32 %v9835_v8, %v6962_v50  ;;  %v3594_v62 = vmul.f32 %v5047_v42, %v6965_v31  ;;  %v3595_v20 = vmul.f32 %v5048_v32, %v6965_v31  ;;  %v3777_v31 = vld [vmem:[%s10056_s2 + $0x28] sm:$0xff] }
 0x2ca   :  { %v3330_v13 = vmax.f32 %v3110_v28, %v3308_v3  ;;  %v3331_v58 = vmax.f32 %v3111_v16, %v3309_v19  ;;  %v3463_v5 = vadd.f32 %v3441_v7, %v3397_v48  ;;  %v3638_v50 = vmul.f32 %v5091_v1, %v6981_v41  ;;  %5115 = vmatprep.mubr.msk.f32.mxu0 %vm3956_vm0, %v3777_v31  ;;  %v3912_v1 = vld [vmem:[%s10057_s3 + $0x20] sm:$0xff]  ;;  %v3807_v31 = vld [vmem:[%s10056_s2 + $0x118] sm:$0xff] }
 0x2cb   :  { %v3528_v8 = vadd.f32 %v3506_v35, %v3462_v29  ;;  %v3616_v59 = vadd.f32 %v3594_v62, %v3572_v15  ;;  %v3617_v10 = vadd.f32 %v3595_v20, %v3573_v63  ;;  %v3639_v37 = vmul.f32 %v5092_v47, %v6981_v41  ;;  %4171 = vmatmul.mubr.f32.gmra.mrb[24].mxu1 %v3798_v34  ;;  %v3811_v41 = vld [vmem:[%s10056_s2 + $0x138] sm:$0xff]  ;;  %v5163_v47 = vpop.f32.mrb[5].mxu1  ;;  %v4305_v48 = vld [vmem:[%s10059_s5] sm:$0x7]  ;;  %v3782_v62 = vld [vmem:[%s10056_s2 + $0x50] sm:$0xff] }
 0x2cc   :  { %v3529_v61 = vadd.f32 %v3507_v27, %v3463_v5  ;;  %v3704_v9 = vmul.f32 %v5113_v33, %v6987_v44  ;;  %v3705_v42 = vmul.f32 %v5114_v55, %v6987_v44  ;;  %4175 = vmatprep.mubr.f32.mxu1 %v3805_v17  ;;  %v3910_v44 = vld [vmem:[%s10057_s3 + $0x10] sm:$0xff]  ;;  %v5404_v0 = vmov 0   ;;  %v5165_v60 = vpop.f32.mrb[6].mxu1  ;;  %v3776_v34 = vld [vmem:[%s10056_s2 + $0x20] sm:$0xff]  ;;  %v3783_v63 = vld [vmem:[%s10056_s2 + $0x58] sm:$0xff] }
 0x2cd   :  { %v3550_v18 = vmax.f32 %v3330_v13, %v3528_v8  ;;  %v3660_v22 = vadd.f32 %v3638_v50, %v3616_v59  ;;  %v3661_v56 = vadd.f32 %v3639_v37, %v3617_v10  ;;  %5381 = vset.pattern.permute.xlu0 %v5404_v0  ;;  %5382 = vset.pattern.permute.xlu1 %v5404_v0  ;;  %v5166_v40 = vpop.f32.mrb[7].mxu1  ;;  %v3789_v20 = vld [vmem:[%s10056_s2 + $0x88] sm:$0xff]  ;;  %v3788_v33 = vld [vmem:[%s10056_s2 + $0x80] sm:$0xff]  ;;  %v3795_v55 = vld [vmem:[%s10056_s2 + $0xb8] sm:$0xff] }
 0x2ce   :  { %v3551_v46 = vmax.f32 %v3331_v58, %v3529_v61  ;;  %v9939_v54 = vadd.f32 %v9427_v38, %v9423_v49  ;;  %3918 = vperm.xlu0 %5381, %v3908_v4   ;;  %3928 = vperm.xlu1 %5382, %v3910_v44   ;;  %v3817_v49 = vld [vmem:[%s10056_s2 + $0x168] sm:$0xff]  ;;  %v3911_v38 = vld [vmem:[%s10057_s3 + $0x18] sm:$0xff]  ;;  %v9953_v16 = vadd.f32 %v5160_v57, %v5159_v26  ;;  %v5168_v52 = vpop.f32.mrb[8].mxu1  ;;  %v3794_v17 = vld [vmem:[%s10056_s2 + $0xb0] sm:$0xff] }
 0x2cf   :  { %v3726_v32 = vadd.f32 %v3704_v9, %v3660_v22  ;;  %v3727_v21 = vadd.f32 %v3705_v42, %v3661_v56  ;;  %4176 = vmatmul.mubr.f32.gmra.mrb[26].mxu1 %v3804_v23  ;;  %v9964_v53 = vadd.f32 %v5163_v47, %v5162_v39  ;;  %v9966_v14 = vadd.f32 %v5166_v40, %v5165_v60  ;;  %v5169_v2 = vpop.f32.mrb[9].mxu1  ;;  %v3801_v13 = vld [vmem:[%s10056_s2 + $0xe8] sm:$0xff]  ;;  %v3800_v5 = vld [vmem:[%s10056_s2 + $0xe0] sm:$0xff]  ;;  %v3806_v59 = vld [vmem:[%s10056_s2 + $0x110] sm:$0xff] }
 0x2d0   :  { %4180 = vmatprep.mubr.f32.mxu1 %v3811_v41  ;;  %v9974_v36 = vadd.f32 %v5169_v2, %v5168_v52  ;;  %v5171_v6 = vpop.f32.mrb[10].mxu1  ;;  %v3813_v10 = vld [vmem:[%s10056_s2 + $0x148] sm:$0xff]  ;;  %v3812_v37 = vld [vmem:[%s10056_s2 + $0x140] sm:$0xff]  ;;  %v3819_v61 = vld [vmem:[%s10056_s2 + $0x178] sm:$0xff]  ;;  %v10130_v42 = vmov 0.0  }
 0x2d1   :  { %v3748_v24 = vmax.f32 %v3550_v18, %v3726_v32  ;;  %v3749_v28 = vmax.f32 %v3551_v46, %v3727_v21  ;;  %v5172_v35 = vpop.f32.mrb[11].mxu1  ;;  %v3818_v9 = vld [vmem:[%s10056_s2 + $0x170] sm:$0xff] }
 0x2d2   :  { %3923 = vperm.xlu0 %5381, %v3909_v12   ;;  %3933 = vperm.xlu1 %5382, %v3911_v38   ;;  %v9976_v3 = vadd.f32 %v5172_v35, %v5171_v6  ;;  %v5174_v19 = vpop.f32.mrb[12].mxu1 }
 0x2d3   :  { %3771 = vst [vmem:[#allocation2 + $0x2b8] sm:$0x1] %v3749_v28  ;;  %4181 = vmatmul.mubr.f32.gmra.mrb[28].mxu1 %v3810_v43  ;;  %v5175_v15 = vpop.f32.mrb[13].mxu1 }
 0x2d4   :  { %4185 = vmatprep.mubr.f32.mxu1 %v3817_v49  ;;  %v9984_v29 = vadd.f32 %v5175_v15, %v5174_v19 }
 0x2d6   :  { %3938 = vperm.xlu0 %5381, %v3912_v1   ;;  %3943 = vperm.xlu1 %5382, %v3913_v11  }
 0x2d7   :  { %4186 = vmatmul.mubr.f32.gmra.mrb[30].mxu1 %v3816_v51 }
 0x2da   :  { %v3907_v7 = vld [vmem:[#allocation2 + $0x2b8] sm:$0xff]  ;;  %3948 = vperm.xlu0 %5381, %v3914_v45   ;;  %3953 = vperm.xlu1 %5382, %v3915_v25  }
 0x2db   :  { %v5362_v27 = vpack.c.bf16 %v3907_v7, %v3748_v24 }
 0x2dd   :  { %5363 = vmatpush1.bf16.msra.mxu0 %v5362_v27 }
 0x2de   :  { %5364 = vmatprep.subr.bf16.mxu0 %v5403_v30  ;;  %4308 = vperm.xlu0 %5381, %v4305_v48  }
 0x2e0   :  { %4256 = vmatmul.mubr.f32.vlgmr.msra.gmra.mrb[0].mxu0 %v3776_v34 }
 0x2e1   :  { %5116 = vmatprep.mubr.msk.f32.mxu0 %vm3956_vm0, %v3783_v63 }
 0x2e4   :  { %4261 = vmatmul.mubr.f32.gmra.mrb[2].mxu0 %v3782_v62 }
 0x2e5   :  { %5117 = vmatprep.mubr.msk.f32.mxu0 %vm3956_vm0, %v3789_v20 }
 0x2e8   :  { %4266 = vmatmul.mubr.f32.gmra.mrb[4].mxu0 %v3788_v33  ;;  %v5177_v58 = vpop.f32.mrb[14].mxu1 }
 0x2e9   :  { %5118 = vmatprep.mubr.msk.f32.mxu0 %vm3956_vm0, %v3795_v55  ;;  %v5178_v50 = vpop.f32.mrb[15].mxu1 }
 0x2ea   :  { %v5179_v8 = vadd.f32 %v5178_v50, %v5177_v58 }
 0x2ec   :  { %4271 = vmatmul.mubr.f32.gmra.mrb[6].mxu0 %v3794_v17 }
 0x2ed   :  { %5119 = vmatprep.mubr.msk.f32.mxu0 %vm3956_vm0, %v3801_v13 }
 0x2f0   :  { %4276 = vmatmul.mubr.f32.gmra.mrb[8].mxu0 %v3800_v5 }
 0x2f1   :  { %5120 = vmatprep.mubr.msk.f32.mxu0 %vm3956_vm0, %v3807_v31 }
 0x2f4   :  { %4281 = vmatmul.mubr.f32.gmra.mrb[10].mxu0 %v3806_v59 }
 0x2f5   :  { %5121 = vmatprep.mubr.msk.f32.mxu0 %vm3956_vm0, %v3813_v10 }
 0x2f8   :  { %4286 = vmatmul.mubr.f32.gmra.mrb[12].mxu0 %v3812_v37 }
 0x2f9   :  { %5122 = vmatprep.mubr.msk.f32.mxu0 %vm3956_vm0, %v3819_v61 }
 0x2fc   :  { %4291 = vmatmul.mubr.f32.gmra.mrb[14].mxu0 %v3818_v9 }
 0x2fd   :  { %5261 = vmatprep.mubr.msk.f32.mxu0 %vm5405_vm1, %v10130_v42 }
 0x34d   :  { %v3919_v23 = vpop.permute.xlu0 %3918  ;;  %v3929_v26 = vpop.permute.xlu1 %3928 }
 0x34e   :  { %v4048_v22 = vadd.f32 %v9939_v54, %v3919_v23  ;;  %v4058_v24 = vadd.f32 %v9964_v53, %v3929_v26 }
 0x351   :  { %v3924_v41 = vpop.permute.xlu0 %3923  ;;  %v3934_v38 = vpop.permute.xlu1 %3933 }
 0x352   :  { %v4053_v32 = vadd.f32 %v9953_v16, %v3924_v41  ;;  %v4063_v54 = vadd.f32 %v9966_v14, %v3934_v38 }
 0x355   :  { %v3939_v47 = vpop.permute.xlu0 %3938  ;;  %v3944_v45 = vpop.permute.xlu1 %3943 }
 0x356   :  { %v4068_v16 = vadd.f32 %v9974_v36, %v3939_v47  ;;  %v4073_v53 = vadd.f32 %v9976_v3, %v3944_v45 }
 0x359   :  { %v3949_v35 = vpop.permute.xlu0 %3948  ;;  %v3954_v34 = vpop.permute.xlu1 %3953 }
 0x35a   :  { %v4078_v14 = vadd.f32 %v9984_v29, %v3949_v35  ;;  %v4083_v36 = vadd.f32 %v5179_v8, %v3954_v34 }
 0x38c   :  { %v5212_v4 = vpop.f32.mrb[16].mxu1 }
 0x38d   :  { %v5213_v18 = vpop.f32.mrb[17].mxu1 }
 0x38e   :  { %v5214_v56 = vadd.f32 %v5213_v18, %v5212_v4 }
 0x390   :  { %v5215_v44 = vpop.f32.mrb[18].mxu1  ;;  %v4153_v46 = vadd.f32 %v5214_v56, %v4048_v22 }
 0x391   :  { %v5216_v0 = vpop.f32.mrb[19].mxu1 }
 0x392   :  { %v5217_v21 = vadd.f32 %v5216_v0, %v5215_v44 }
 0x394   :  { %v5218_v43 = vpop.f32.mrb[20].mxu1  ;;  %v4158_v12 = vadd.f32 %v5217_v21, %v4053_v32 }
 0x395   :  { %v5219_v57 = vpop.f32.mrb[21].mxu1 }
 0x396   :  { %v5220_v28 = vadd.f32 %v5219_v57, %v5218_v43 }
 0x398   :  { %v4163_v49 = vadd.f32 %v5220_v28, %v4058_v24 }
 0x39a   :  { %v5221_v39 = vpop.f32.mrb[22].mxu1 }
 0x39b   :  { %v5222_v51 = vpop.f32.mrb[23].mxu1 }
 0x39c   :  { %v5223_v1 = vadd.f32 %v5222_v51, %v5221_v39 }
 0x39e   :  { %v5224_v11 = vpop.f32.mrb[24].mxu1  ;;  %v4168_v60 = vadd.f32 %v5223_v1, %v4063_v54  ;;  %v4304_v54 = vld [vmem:[%s10058_s4] sm:$0x7]  ;;  %v4309_v1 = vpop.permute.xlu0 %4308 }
 0x39f   :  { %v5225_v40 = vpop.f32.mrb[25].mxu1 }
 0x3a0   :  { %v5226_v52 = vadd.f32 %v5225_v40, %v5224_v11 }
 0x3a2   :  { %v5227_v2 = vpop.f32.mrb[26].mxu1  ;;  %v4173_v25 = vadd.f32 %v5226_v52, %v4068_v16 }
 0x3a3   :  { %v5228_v6 = vpop.f32.mrb[27].mxu1 }
 0x3a4   :  { %v5229_v7 = vadd.f32 %v5228_v6, %v5227_v2 }
 0x3a6   :  { %v5230_v27 = vpop.f32.mrb[28].mxu1  ;;  %v4178_v19 = vadd.f32 %v5229_v7, %v4073_v53 }
 0x3a7   :  { %v5231_v48 = vpop.f32.mrb[29].mxu1 }
 0x3a8   :  { %v5232_v15 = vadd.f32 %v5231_v48, %v5230_v27 }
 0x3aa   :  { %v5233_v63 = vpop.f32.mrb[30].mxu1  ;;  %v4183_v62 = vadd.f32 %v5232_v15, %v4078_v14 }
 0x3ab   :  { %v5234_v20 = vpop.f32.mrb[31].mxu1 }
 0x3ac   :  { %v5235_v33 = vadd.f32 %v5234_v20, %v5233_v63 }
 0x3ae   :  { %v4188_v55 = vadd.f32 %v5235_v33, %v4083_v36 }
 0x3b3   :  { %v4257_v17 = vpop.f32.mrb[0].mxu0 }
 0x3b4   :  { %v4258_v13 = vadd.f32 %v4257_v17, %v4153_v46  ;;  %v4259_v58 = vpop.f32.mrb[1].mxu0 }
 0x3b6   :  { %v4296_v31 = vmax.f32 %v4258_v13, 0.0 }
 0x3b7   :  { %v4262_v5 = vpop.f32.mrb[2].mxu0 }
 0x3b8   :  { %v4263_v3 = vadd.f32 %v4262_v5, %v4158_v12  ;;  %v4264_v50 = vpop.f32.mrb[3].mxu0 }
 0x3ba   :  { %v4297_v59 = vmax.f32 %v4263_v3, 0.0 }
 0x3bb   :  { %v4267_v10 = vpop.f32.mrb[4].mxu0 }
 0x3bc   :  { %v5365_v37 = vpack.c.bf16 %v4297_v59, %v4296_v31  ;;  %v4268_v61 = vadd.f32 %v4267_v10, %v4163_v49  ;;  %v4269_v29 = vpop.f32.mrb[5].mxu0 }
 0x3be   :  { %5366 = vmatpush3.bf16.msra.mxu0 %v5365_v37  ;;  %v4298_v23 = vmax.f32 %v4268_v61, 0.0 }
 0x3bf   :  { %v4272_v9 = vpop.f32.mrb[6].mxu0  ;;  %5367 = vmatprep.subr.bf16.mxu0 %v5403_v30 }
 0x3c0   :  { %v4273_v42 = vadd.f32 %v4272_v9, %v4168_v60  ;;  %v4274_v8 = vpop.f32.mrb[7].mxu0 }
 0x3c2   :  { %v4299_v4 = vmax.f32 %v4273_v42, 0.0 }
 0x3c3   :  { %v4277_v18 = vpop.f32.mrb[8].mxu0 }
 0x3c4   :  { %v5368_v22 = vpack.c.bf16 %v4299_v4, %v4298_v23  ;;  %v4278_v56 = vadd.f32 %v4277_v18, %v4173_v25  ;;  %v4279_v41 = vpop.f32.mrb[9].mxu0 }
 0x3c6   :  { %5369 = vmatpush3.bf16.msra.mxu0 %v5368_v22  ;;  %v4300_v32 = vmax.f32 %v4278_v56, 0.0 }
 0x3c7   :  { %v4282_v44 = vpop.f32.mrb[10].mxu0  ;;  %5370 = vmatprep.subr.bf16.mxu0 %v5403_v30 }
 0x3c8   :  { %v4283_v46 = vadd.f32 %v4282_v44, %v4178_v19  ;;  %v4284_v0 = vpop.f32.mrb[11].mxu0 }
 0x3ca   :  { %v4301_v21 = vmax.f32 %v4283_v46, 0.0 }
 0x3cb   :  { %v4287_v26 = vpop.f32.mrb[12].mxu0 }
 0x3cc   :  { %v5371_v43 = vpack.c.bf16 %v4301_v21, %v4300_v32  ;;  %v4288_v12 = vadd.f32 %v4287_v26, %v4183_v62  ;;  %v4289_v57 = vpop.f32.mrb[13].mxu0 }
 0x3ce   :  { %5372 = vmatpush3.bf16.msra.mxu0 %v5371_v43  ;;  %v4302_v38 = vmax.f32 %v4288_v12, 0.0 }
 0x3cf   :  { %v4292_v24 = vpop.f32.mrb[14].mxu0  ;;  %5373 = vmatprep.subr.bf16.mxu0 %v5403_v30 }
 0x3d0   :  { %v4293_v28 = vadd.f32 %v4292_v24, %v4188_v55  ;;  %v4294_v49 = vpop.f32.mrb[15].mxu0 }
 0x3d2   :  { %v4303_v39 = vmax.f32 %v4293_v28, 0.0 }
 0x3d4   :  { %v5374_v51 = vpack.c.bf16 %v4303_v39, %v4302_v38 }
 0x3d6   :  { %5375 = vmatpush3.bf16.msra.mxu0 %v5374_v51 }
 0x3d9   :  { %5262 = vmatmul.mubr.msk.f32.vlgmr.msra.gmra.mrb[16].mxu0 %vm3956_vm0, %v4304_v54 }
 0x4ac   :  { %v4380_v47 = vpop.f32.mrb[16].mxu0 }
 0x4ad   :  { %v4381_v11 = vadd.f32 %v4380_v47, %v4309_v1  ;;  %v5263_v60 = vpop.f32.mrb[17].mxu0 }
 0x4af   :  { %v4384_v40 = vsub.f32 0.0, %v4381_v11 }
 0x4b1   :  { %v4385_v16 = vmul.f32 1.442695, %v4384_v40 }
 0x4b3   :  { %5383 = vpow2.f32 %v4385_v16 }
 0x4bd   :  { %v5384_v30 = vpop.eup %5383 }
 0x4be   :  { %v4387_v52 = vadd.f32 1.0, %v5384_v30 }
 0x4c0   :  { %5385 = vrcp.f32 %v4387_v52 }
 0x4ca   :  { %v5386_v45 = vpop.eup %5385 }
 0x4cb   :  { %4390 = vst [vmem:[%s10060_s6] sm:$0x7] %v5386_v45 }
 0x4cc   :  { %4395 = vsyncpa [#allocation4], 1 }

</bundles_post_ra>
